<compile_context>
chip_gen: v7x
topology: tpu7x:2x2x1
jax: 0.10.0
libtpu: 0.0.40
codegen_flags: <defaults>
</compile_context>

<pallas_src>
import math
import functools

import numpy as np
import jax
import jax.numpy as jnp
from jax.experimental import pallas as pl
from jax.experimental.pallas import tpu as pltpu

LN_EPS = 1e-6
NEG_INF = -1e18
LANE = 128


# ---------------------------------------------------------------------------
# Chip-generation aware budgets
# ---------------------------------------------------------------------------
def _tpu_generation():
    try:
        kind = jax.devices()[0].device_kind.lower()
    except Exception:
        return 0
    for g in (7, 6, 5, 4):
        if ("v%d" % g) in kind:
            return g
    return 0


def _vmem_limit_bytes(gen):
    # v4/v5e/v6e have 128 MiB physical VMEM -> use most of it; v7x only has
    # 64 MiB per TensorCore -> leave ~8 MiB headroom for compiler scratch.
    if gen in (4, 5, 6):
        return 100 * 1024 * 1024
    return 56 * 1024 * 1024


def _target_rows(gen):
    # MXU row target per grid step (v5e MXU is 128-row, v6e/v7x 256-row; v6e has
    # the VMEM to go deeper).
    return {5: 256, 6: 512, 7: 256}.get(gen, 256)


def _layer_norm(x, gamma, beta):
    mu = jnp.mean(x, axis=-1, keepdims=True)
    var = jnp.mean((x - mu) ** 2, axis=-1, keepdims=True)
    return (x - mu) * jax.lax.rsqrt(var + LN_EPS) * gamma + beta


def _pick_block_batch(B, S, target_rows=256, min_steps=2, sublane=False):
    """Divisor Bt of B: prefer >=min_steps grid steps, then Bt*S >= target_rows."""
    divs = [d for d in range(1, B + 1) if B % d == 0]
    if sublane:  # Bt is a sublane dim of a 2-D output block
        divs = [d for d in divs if d % 8 == 0 or d == B]
    allowed = [d for d in divs if B // d >= min_steps] or divs
    for d in allowed:
        if d * S >= target_rows:
            return d
    return allowed[-1]


def _pick_block_y(Y, max_lanes=2048):
    """Label-tile width: full Y if small, else the largest 128-multiple divisor."""
    if Y <= max_lanes:
        return Y
    best = None
    for ty in range(128, max_lanes + 1, 128):
        if Y % ty == 0:
            best = ty
    return best if best is not None else Y


# ---------------------------------------------------------------------------
# Kernel 1: one transformer encoder layer (pre-LN MHA + position-wise FFN),
# processed on a block of Bt batch elements per grid step.  The final encoder
# LayerNorm is fused into the last layer.
# ---------------------------------------------------------------------------
def encoder_layer_kernel(x_ref, mask_ref,
                         ln1_g_ref, ln1_b_ref,
                         wq_ref, bq_ref, wk_ref, bk_ref, wv_ref, bv_ref,
                         wo_ref, bo_ref,
                         ln2_g_ref, ln2_b_ref,
                         w1_ref, b1_ref, w2_ref, b2_ref,
                         lnf_g_ref, lnf_b_ref,
                         out_ref, ctx_ref, *, num_heads, apply_final_ln):
    Bt, S, D = x_ref.shape
    N = Bt * S
    dh = D // num_heads

    x = x_ref[...].reshape(N, D)                                   # (N, D) f32
    # additive mask: 0 for real tokens, -1e18 for padding keys
    neg = jnp.where(mask_ref[...] > 0.5, NEG_INF, 0.0)             # (Bt, 1, S)

    xn = _layer_norm(x, ln1_g_ref[...], ln1_b_ref[...])
    xn_b = xn.astype(jnp.bfloat16)                                 # MXU operand

    # weight-stationary matmuls at full (Bt*S) row count, bf16 in / f32 acc.
    # 1/sqrt(dh) is already folded into wq/bq at parameter-prep time.
    q = jnp.dot(xn_b, wq_ref[...], preferred_element_type=jnp.float32) + bq_ref[...]
    k = jnp.dot(xn_b, wk_ref[...], preferred_element_type=jnp.float32) + bk_ref[...]
    v = jnp.dot(xn_b, wv_ref[...], preferred_element_type=jnp.float32) + bv_ref[...]

    q3 = q.reshape(Bt, S, D)
    k3 = k.reshape(Bt, S, D)
    v3 = v.reshape(Bt, S, D)

    # per-head attention, batched over the Bt batch rows; each head's context is
    # staged into a bf16 VMEM scratch so the output projection is ONE (N,D)@(D,D).
    for h in range(num_heads):
        lo = h * dh
        qh = q3[:, :, lo:lo + dh].astype(jnp.bfloat16)             # (Bt, S, dh)
        kh = k3[:, :, lo:lo + dh].astype(jnp.bfloat16)
        vh = v3[:, :, lo:lo + dh].astype(jnp.bfloat16)
        s = jnp.einsum('bqd,bkd->bqk', qh, kh,
                       preferred_element_type=jnp.float32)          # (Bt, S, S)
        s = s + neg                                                 # mask padding keys
        s = s - jnp.max(s, axis=-1, keepdims=True)
        p = jnp.exp(s)
        p = p * pl.reciprocal(jnp.sum(p, axis=-1, keepdims=True), approx=True)
        ctx_h = jnp.einsum('bqk,bkd->bqd', p.astype(jnp.bfloat16), vh,
                           preferred_element_type=jnp.float32)      # (Bt, S, dh)
        ctx_ref[:, lo:lo + dh] = ctx_h.reshape(N, dh).astype(jnp.bfloat16)

    attn_out = jnp.dot(ctx_ref[...], wo_ref[...],
                       preferred_element_type=jnp.float32) + bo_ref[...]
    res1 = attn_out + x                                             # dropout(ctx) + inputs (eval)

    # TODO(synk): StackedConvolutions is not defined in the reference source; a
    # standard position-wise feed-forward (LN -> W1 -> ReLU -> W2 -> +residual) is used.
    rn = _layer_norm(res1, ln2_g_ref[...], ln2_b_ref[...])
    h1 = jnp.maximum(
        jnp.dot(rn.astype(jnp.bfloat16), w1_ref[...],
                preferred_element_type=jnp.float32) + b1_ref[...], 0.0)
    h2 = jnp.dot(h1.astype(jnp.bfloat16), w2_ref[...],
                 preferred_element_type=jnp.float32) + b2_ref[...]
    out = h2 + res1
    if apply_final_ln:   # fused final encoder LayerNorm (static flag)
        out = _layer_norm(out, lnf_g_ref[...], lnf_b_ref[...])
    out_ref[...] = out.reshape(Bt, S, D).astype(out_ref.dtype)


def run_encoder_layer(x, mask, p, lnf_g, lnf_b, *, num_heads, apply_final_ln,
                      target_rows, vmem_limit):
    B, S, D = x.shape
    Fd = p["w1"].shape[1]
    Bt = _pick_block_batch(B, S, target_rows=target_rows)

    def const2d(shape):  # weights/biases: constant index map -> single-buffer
        return pl.BlockSpec(shape, lambda b: (0, 0), pipeline_mode=pl.Buffered(1))

    kernel = functools.partial(encoder_layer_kernel, num_heads=num_heads,
                               apply_final_ln=apply_final_ln)
    return pl.pallas_call(
        kernel,
        out_shape=jax.ShapeDtypeStruct((B, S, D), jnp.float32),
        grid=(B // Bt,),
        in_specs=[
            pl.BlockSpec((Bt, S, D), lambda b: (b, 0, 0)),   # x
            pl.BlockSpec((Bt, 1, S), lambda b: (b, 0, 0)),   # padding mask
            const2d((1, D)), const2d((1, D)),                # ln1 gamma/beta
            const2d((D, D)), const2d((1, D)),                # Wq, bq
            const2d((D, D)), const2d((1, D)),                # Wk, bk
            const2d((D, D)), const2d((1, D)),                # Wv, bv
            const2d((D, D)), const2d((1, D)),                # Wo, bo
            const2d((1, D)), const2d((1, D)),                # ln2 gamma/beta
            const2d((D, Fd)), const2d((1, Fd)),              # W1, b1
            const2d((Fd, D)), const2d((1, D)),               # W2, b2
            const2d((1, D)), const2d((1, D)),                # final LN gamma/beta
        ],
        out_specs=pl.BlockSpec((Bt, S, D), lambda b: (b, 0, 0)),
        scratch_shapes=[pltpu.VMEM((Bt * S, D), jnp.bfloat16)],   # concat(heads) staging
        compiler_params=pltpu.CompilerParams(
            dimension_semantics=("parallel",),
            vmem_limit_bytes=vmem_limit),
    )(x, mask,
      p["ln1_g"], p["ln1_b"],
      p["wq"], p["bq"], p["wk"], p["bk"], p["wv"], p["bv"],
      p["wo"], p["bo"],
      p["ln2_g"], p["ln2_b"],
      p["w1"], p["b1"], p["w2"], p["b2"],
      lnf_g, lnf_b)


# ---------------------------------------------------------------------------
# Kernel 2: per-label attention head, lane-dense and fully batched:
#   scores = xn @ U^T          (N, Ty)
#   alpha  = softmax_S(scores) (exact, f32)
#   proj   = xn @ final.W^T    (N, Ty)
#   yhat   = sum_S(alpha * proj) + bias
# alpha is emitted as (B, S, Y) and transposed to (B, Y, S) outside the kernel.
# ---------------------------------------------------------------------------
def label_attn_kernel(x_ref, u_ref, fw_ref, fb_ref, yhat_ref, alpha_ref, *, s_valid):
    Bt, S, D = x_ref.shape
    Ty = u_ref.shape[1]
    xb = x_ref[...].reshape(Bt * S, D).astype(jnp.bfloat16)

    scores = jnp.dot(xb, u_ref[...],
                     preferred_element_type=jnp.float32).reshape(Bt, S, Ty)
    if s_valid < S:  # mask only the artificially padded positions (static)
        pos = jax.lax.broadcasted_iota(jnp.int32, (S, Ty), 0)
        kmask = jnp.where(pos >= s_valid, NEG_INF, 0.0).astype(jnp.float32)
        scores = scores + kmask[None, :, :]

    m = jnp.max(scores, axis=1, keepdims=True)
    e = jnp.exp(scores - m)
    alpha = e / jnp.sum(e, axis=1, keepdims=True)                     # exact (output)

    proj = jnp.dot(xb, fw_ref[...],
                   preferred_element_type=jnp.float32).reshape(Bt, S, Ty)
    yhat_ref[...] = jnp.sum(alpha * proj, axis=1) + fb_ref[...]       # (Bt, Ty)
    alpha_ref[...] = alpha


def run_label_attn(x, u_t, fw_t, final_b, *, s_valid, target_rows, vmem_limit):
    B, S, D = x.shape
    Y = u_t.shape[1]
    Bt = _pick_block_batch(B, S, target_rows=target_rows, sublane=True)
    Ty = _pick_block_y(Y)
    kernel = functools.partial(label_attn_kernel, s_valid=s_valid)
    yhat, alpha_sy = pl.pallas_call(
        kernel,
        out_shape=(jax.ShapeDtypeStruct((B, Y), jnp.float32),
                   jax.ShapeDtypeStruct((B, S, Y), jnp.float32)),
        grid=(B // Bt, Y // Ty),
        in_specs=[
            pl.BlockSpec((Bt, S, D), lambda b, y: (b, 0, 0)),   # encoder output
            pl.BlockSpec((D, Ty), lambda b, y: (0, y)),         # U^T
            pl.BlockSpec((D, Ty), lambda b, y: (0, y)),         # final.W^T
            pl.BlockSpec((1, Ty), lambda b, y: (0, y)),         # final.bias
        ],
        out_specs=(pl.BlockSpec((Bt, Ty), lambda b, y: (b, y)),
                   pl.BlockSpec((Bt, S, Ty), lambda b, y: (b, 0, y))),
        compiler_params=pltpu.CompilerParams(
            dimension_semantics=("parallel", "parallel"),
            vmem_limit_bytes=vmem_limit),
    )(x, u_t, fw_t, final_b)
    return yhat, alpha_sy


# ---------------------------------------------------------------------------
# Glue: embedding lookup, sinusoidal positional encoding, BCE-with-logits loss
# ---------------------------------------------------------------------------
def sinusoidal_pe(S, D):
    pos = np.arange(S, dtype=np.float32)[:, None]
    div = np.exp(np.arange(0, D, 2, dtype=np.float32) * -(math.log(10000.0) / D))
    pe = np.zeros((S, D), np.float32)
    pe[:, 0::2] = np.sin(pos * div)
    pe[:, 1::2] = np.cos(pos * div)
    return jnp.asarray(pe)


def bce_with_logits(logits, targets):
    return jnp.mean(jnp.maximum(logits, 0.0) - logits * targets
                    + jnp.log1p(jnp.exp(-jnp.abs(logits))))


def transformer_attn_forward(params, src, target, *, num_heads):
    D = params["embed"].shape[1]
    B, S0 = src.shape
    gen = _tpu_generation()
    vmem_limit = _vmem_limit_bytes(gen)
    target_rows = _target_rows(gen)

    # pad the sequence axis to a multiple of 128 (lane-dense scores / alpha);
    # padded tokens use padding_idx=0 -> masked in the encoder, and the label
    # softmax masks them explicitly, so numerics match the unpadded model.
    S_pad = ((S0 + LANE - 1) // LANE) * LANE
    src_p = jnp.pad(src, ((0, 0), (0, S_pad - S0))) if S_pad != S0 else src

    emb = jnp.take(params["embed"], src_p, axis=0)          # (B, S_pad, D)
    x = emb * math.sqrt(D) + sinusoidal_pe(S_pad, D)[None]  # PositionalEncoding (dropout=0)
    mask = (src_p == 0).astype(jnp.float32)[:, None, :]     # (B, 1, S_pad)

    nl = len(params["layers"])
    for i, lp in enumerate(params["layers"]):
        x = run_encoder_layer(x, mask, lp, params["lnf_g"], params["lnf_b"],
                              num_heads=num_heads, apply_final_ln=(i == nl - 1),
                              target_rows=target_rows, vmem_limit=vmem_limit)

    yhat, alpha_sy = run_label_attn(x, params["u_t"], params["fw_t"], params["final_b"],
                                    s_valid=S0, target_rows=target_rows,
                                    vmem_limit=vmem_limit)
    alpha = jnp.transpose(alpha_sy, (0, 2, 1))[:, :, :S0]    # (B, Y, S)
    loss = bce_with_logits(yhat, target)
    return yhat, loss, alpha


# ---------------------------------------------------------------------------
# Parameters: deterministic synthetic init + one-time prep (bf16 weights,
# folded q scale, pre-transposed label weights).
# ---------------------------------------------------------------------------
def init_params(key, vocab, D, d_ff, num_layers, Y):
    keys = jax.random.split(key, 8 * num_layers + 8)
    ki = iter(keys)

    def dense(k, fan_in, fan_out):
        bound = 1.0 / math.sqrt(fan_in)
        return jax.random.uniform(k, (fan_in, fan_out), jnp.float32, -bound, bound)

    def xavier(k, out_f, in_f):
        bound = math.sqrt(6.0 / (in_f + out_f))
        return jax.random.uniform(k, (out_f, in_f), jnp.float32, -bound, bound)

    embed = jax.random.normal(next(ki), (vocab + 2, D), jnp.float32) * 0.1
    embed = embed.at[0].set(0.0)                          # padding_idx = 0

    layers = []
    for _ in range(num_layers):
        layers.append(dict(
            ln1_g=jnp.ones((1, D), jnp.float32), ln1_b=jnp.zeros((1, D), jnp.float32),
            wq=dense(next(ki), D, D), bq=jnp.zeros((1, D), jnp.float32),
            wk=dense(next(ki), D, D), bk=jnp.zeros((1, D), jnp.float32),
            wv=dense(next(ki), D, D), bv=jnp.zeros((1, D), jnp.float32),
            wo=dense(next(ki), D, D), bo=jnp.zeros((1, D), jnp.float32),
            ln2_g=jnp.ones((1, D), jnp.float32), ln2_b=jnp.zeros((1, D), jnp.float32),
            w1=dense(next(ki), D, d_ff), b1=jnp.zeros((1, d_ff), jnp.float32),
            w2=dense(next(ki), d_ff, D), b2=jnp.zeros((1, D), jnp.float32),
        ))

    return dict(
        embed=embed, layers=layers,
        lnf_g=jnp.ones((1, D), jnp.float32), lnf_b=jnp.zeros((1, D), jnp.float32),
        u_w=xavier(next(ki), Y, D),              # self.U.weight (Y, D)
        final_w=xavier(next(ki), Y, D),          # self.final.weight (Y, D)
        final_b=jnp.zeros((1, Y), jnp.float32),  # self.final.bias (lane-dense)
    )


def prepare_params(params, num_heads):
    """One-time prep: bf16 matmul weights, fold 1/sqrt(dh) into Wq/bq,
    pre-transpose label weights to (D, Y)."""
    D = params["embed"].shape[1]
    scale = 1.0 / math.sqrt(D // num_heads)
    out = dict(params)
    layers = []
    for lp in params["layers"]:
        q = dict(lp)
        q["wq"] = (lp["wq"] * scale).astype(jnp.bfloat16)
        q["bq"] = lp["bq"] * scale
        for name in ("wk", "wv", "wo", "w1", "w2"):
            q[name] = lp[name].astype(jnp.bfloat16)
        layers.append(q)
    out["layers"] = layers
    out["u_t"] = params["u_w"].T.astype(jnp.bfloat16)       # (D, Y)
    out["fw_t"] = params["final_w"].T.astype(jnp.bfloat16)  # (D, Y)
    out.pop("u_w", None)
    out.pop("final_w", None)
    return out


if __name__ == "__main__":
    B, S, D = 2, 16, 32
    heads, d_ff, num_layers, Y = 4, 64, 2, 8
    vocab = 50

    key = jax.random.PRNGKey(0)
    k_tok, k_tgt, k_par = jax.random.split(key, 3)
    src = jax.random.randint(k_tok, (B, S), 1, vocab + 1, dtype=jnp.int32)
    src = src.at[1, S - 3:].set(0)   # a little padding to exercise the attention mask
    target = (jax.random.uniform(k_tgt, (B, Y)) > 0.5).astype(jnp.float32)

    params = prepare_params(init_params(k_par, vocab, D, d_ff, num_layers, Y), heads)

    fwd = jax.jit(functools.partial(transformer_attn_forward, num_heads=heads))
    yhat, loss, alpha = fwd(params, src, target)
    jax.block_until_ready((yhat, loss, alpha))

    assert yhat.shape == (B, Y)
    assert alpha.shape == (B, Y, S)
    assert loss.shape == ()
    assert bool(jnp.all(jnp.isfinite(yhat))) and bool(jnp.isfinite(loss))
    # attention rows must sum to 1 (padded positions get exactly zero weight)
    assert bool(jnp.allclose(jnp.sum(alpha, axis=-1), 1.0, atol=1e-4))
    print("KERNEL_OK")
</pallas_src>

<mosaic_0001>
module attributes {stable_mosaic.version = 11 : i64} {
  func.func @encoder_layer_kernel(%arg0: i32, %arg1: memref<1x128x32xf32, #tpu.memory_space<vmem>>, %arg2: memref<1x1x128xf32, #tpu.memory_space<vmem>>, %arg3: memref<1x32xf32, #tpu.memory_space<vmem>>, %arg4: memref<1x32xf32, #tpu.memory_space<vmem>>, %arg5: memref<32x32xbf16, #tpu.memory_space<vmem>>, %arg6: memref<1x32xf32, #tpu.memory_space<vmem>>, %arg7: memref<32x32xbf16, #tpu.memory_space<vmem>>, %arg8: memref<1x32xf32, #tpu.memory_space<vmem>>, %arg9: memref<32x32xbf16, #tpu.memory_space<vmem>>, %arg10: memref<1x32xf32, #tpu.memory_space<vmem>>, %arg11: memref<32x32xbf16, #tpu.memory_space<vmem>>, %arg12: memref<1x32xf32, #tpu.memory_space<vmem>>, %arg13: memref<1x32xf32, #tpu.memory_space<vmem>>, %arg14: memref<1x32xf32, #tpu.memory_space<vmem>>, %arg15: memref<32x64xbf16, #tpu.memory_space<vmem>>, %arg16: memref<1x64xf32, #tpu.memory_space<vmem>>, %arg17: memref<64x32xbf16, #tpu.memory_space<vmem>>, %arg18: memref<1x32xf32, #tpu.memory_space<vmem>>, %arg19: memref<1x32xf32, #tpu.memory_space<vmem>>, %arg20: memref<1x32xf32, #tpu.memory_space<vmem>>, %arg21: memref<1x128x32xf32, #tpu.memory_space<vmem>>, %arg22: memref<128x32xbf16, #tpu.memory_space<vmem>>) attributes {dimension_semantics = [#tpu.dimension_semantics<parallel>], iteration_bounds = array<i64: 2>, scalar_prefetch = 0 : i64, scratch_operands = 1 : i64, tpu.core_type = #tpu.core_type<tc>, window_params = [{transform_indices = @transform_0, window_bounds = array<i64: 1, 128, 32>}, {transform_indices = @transform_1, window_bounds = array<i64: 1, 1, 128>}, {pipeline_mode = #tpu.pipeline_mode<synchronous>, transform_indices = @transform_2, window_bounds = array<i64: 1, 32>}, {pipeline_mode = #tpu.pipeline_mode<synchronous>, transform_indices = @transform_3, window_bounds = array<i64: 1, 32>}, {pipeline_mode = #tpu.pipeline_mode<synchronous>, transform_indices = @transform_4, window_bounds = array<i64: 32, 32>}, {pipeline_mode = #tpu.pipeline_mode<synchronous>, transform_indices = @transform_5, window_bounds = array<i64: 1, 32>}, {pipeline_mode = #tpu.pipeline_mode<synchronous>, transform_indices = @transform_6, window_bounds = array<i64: 32, 32>}, {pipeline_mode = #tpu.pipeline_mode<synchronous>, transform_indices = @transform_7, window_bounds = array<i64: 1, 32>}, {pipeline_mode = #tpu.pipeline_mode<synchronous>, transform_indices = @transform_8, window_bounds = array<i64: 32, 32>}, {pipeline_mode = #tpu.pipeline_mode<synchronous>, transform_indices = @transform_9, window_bounds = array<i64: 1, 32>}, {pipeline_mode = #tpu.pipeline_mode<synchronous>, transform_indices = @transform_10, window_bounds = array<i64: 32, 32>}, {pipeline_mode = #tpu.pipeline_mode<synchronous>, transform_indices = @transform_11, window_bounds = array<i64: 1, 32>}, {pipeline_mode = #tpu.pipeline_mode<synchronous>, transform_indices = @transform_12, window_bounds = array<i64: 1, 32>}, {pipeline_mode = #tpu.pipeline_mode<synchronous>, transform_indices = @transform_13, window_bounds = array<i64: 1, 32>}, {pipeline_mode = #tpu.pipeline_mode<synchronous>, transform_indices = @transform_14, window_bounds = array<i64: 32, 64>}, {pipeline_mode = #tpu.pipeline_mode<synchronous>, transform_indices = @transform_15, window_bounds = array<i64: 1, 64>}, {pipeline_mode = #tpu.pipeline_mode<synchronous>, transform_indices = @transform_16, window_bounds = array<i64: 64, 32>}, {pipeline_mode = #tpu.pipeline_mode<synchronous>, transform_indices = @transform_17, window_bounds = array<i64: 1, 32>}, {pipeline_mode = #tpu.pipeline_mode<synchronous>, transform_indices = @transform_18, window_bounds = array<i64: 1, 32>}, {pipeline_mode = #tpu.pipeline_mode<synchronous>, transform_indices = @transform_19, window_bounds = array<i64: 1, 32>}, {transform_indices = @transform_20, window_bounds = array<i64: 1, 128, 32>}]} {
    %c0 = arith.constant 0 : index
    %c0_0 = arith.constant 0 : index
    %c0_1 = arith.constant 0 : index
    %0 = vector.load %arg1[%c0, %c0_0, %c0_1] : memref<1x128x32xf32, #tpu.memory_space<vmem>>, vector<1x128x32xf32>
    %1 = vector.shape_cast %0 : vector<1x128x32xf32> to vector<128x32xf32>
    %c0_2 = arith.constant 0 : index
    %c0_3 = arith.constant 0 : index
    %c0_4 = arith.constant 0 : index
    %2 = vector.load %arg2[%c0_2, %c0_3, %c0_4] : memref<1x1x128xf32, #tpu.memory_space<vmem>>, vector<1x1x128xf32>
    %cst = arith.constant 5.000000e-01 : f32
    %3 = vector.broadcast %cst : f32 to vector<1x1x128xf32>
    %4 = arith.cmpf ogt, %2, %3 : vector<1x1x128xf32>
    %cst_5 = arith.constant -9.99999984E+17 : f32
    %cst_6 = arith.constant 0.000000e+00 : f32
    %5 = vector.broadcast %cst_5 : f32 to vector<1x1x128xf32>
    %6 = vector.broadcast %cst_6 : f32 to vector<1x1x128xf32>
    %7 = arith.select %4, %5, %6 : vector<1x1x128xi1>, vector<1x1x128xf32>
    %c0_7 = arith.constant 0 : index
    %c0_8 = arith.constant 0 : index
    %8 = vector.load %arg3[%c0_7, %c0_8] : memref<1x32xf32, #tpu.memory_space<vmem>>, vector<1x32xf32>
    %c0_9 = arith.constant 0 : index
    %c0_10 = arith.constant 0 : index
    %9 = vector.load %arg4[%c0_9, %c0_10] : memref<1x32xf32, #tpu.memory_space<vmem>>, vector<1x32xf32>
    %cst_11 = arith.constant dense<0.000000e+00> : vector<128xf32>
    %10 = vector.multi_reduction <add>, %1, %cst_11 [1] : vector<128x32xf32> to vector<128xf32>
    %11 = vector.shape_cast %10 : vector<128xf32> to vector<128x1xf32>
    %cst_12 = arith.constant 3.200000e+01 : f32
    %12 = vector.broadcast %cst_12 : f32 to vector<128x1xf32>
    %13 = arith.divf %11, %12 : vector<128x1xf32>
    %14 = vector.broadcast %13 : vector<128x1xf32> to vector<128x32xf32>
    %15 = arith.subf %1, %14 : vector<128x32xf32>
    %16 = arith.mulf %15, %15 : vector<128x32xf32>
    %cst_13 = arith.constant dense<0.000000e+00> : vector<128xf32>
    %17 = vector.multi_reduction <add>, %16, %cst_13 [1] : vector<128x32xf32> to vector<128xf32>
    %18 = vector.shape_cast %17 : vector<128xf32> to vector<128x1xf32>
    %cst_14 = arith.constant 3.200000e+01 : f32
    %19 = vector.broadcast %cst_14 : f32 to vector<128x1xf32>
    %20 = arith.divf %18, %19 : vector<128x1xf32>
    %21 = vector.broadcast %13 : vector<128x1xf32> to vector<128x32xf32>
    %22 = arith.subf %1, %21 : vector<128x32xf32>
    %cst_15 = arith.constant 9.99999997E-7 : f32
    %23 = vector.broadcast %cst_15 : f32 to vector<128x1xf32>
    %24 = arith.addf %20, %23 : vector<128x1xf32>
    %25 = math.rsqrt %24 : vector<128x1xf32>
    %26 = vector.broadcast %25 : vector<128x1xf32> to vector<128x32xf32>
    %27 = arith.mulf %22, %26 : vector<128x32xf32>
    %28 = vector.broadcast %8 : vector<1x32xf32> to vector<128x32xf32>
    %29 = arith.mulf %27, %28 : vector<128x32xf32>
    %30 = vector.broadcast %9 : vector<1x32xf32> to vector<128x32xf32>
    %31 = arith.addf %29, %30 : vector<128x32xf32>
    %32 = arith.truncf %31 : vector<128x32xf32> to vector<128x32xbf16>
    %c0_16 = arith.constant 0 : index
    %c0_17 = arith.constant 0 : index
    %33 = vector.load %arg5[%c0_16, %c0_17] : memref<32x32xbf16, #tpu.memory_space<vmem>>, vector<32x32xbf16>
    %cst_18 = arith.constant dense<0.000000e+00> : vector<128x32xf32>
    %34 = tpu.matmul %32, %33, %cst_18 {dimension_numbers = #tpu.dot_dimension_numbers<[1], [0], [0], [1], [0, 0, 1, 1], [], []>} : vector<128x32xbf16>, vector<32x32xbf16>, vector<128x32xf32> -> vector<128x32xf32>
    %c0_19 = arith.constant 0 : index
    %c0_20 = arith.constant 0 : index
    %35 = vector.load %arg6[%c0_19, %c0_20] : memref<1x32xf32, #tpu.memory_space<vmem>>, vector<1x32xf32>
    %36 = vector.broadcast %35 : vector<1x32xf32> to vector<128x32xf32>
    %37 = arith.addf %34, %36 : vector<128x32xf32>
    %c0_21 = arith.constant 0 : index
    %c0_22 = arith.constant 0 : index
    %38 = vector.load %arg7[%c0_21, %c0_22] : memref<32x32xbf16, #tpu.memory_space<vmem>>, vector<32x32xbf16>
    %cst_23 = arith.constant dense<0.000000e+00> : vector<128x32xf32>
    %39 = tpu.matmul %32, %38, %cst_23 {dimension_numbers = #tpu.dot_dimension_numbers<[1], [0], [0], [1], [0, 0, 1, 1], [], []>} : vector<128x32xbf16>, vector<32x32xbf16>, vector<128x32xf32> -> vector<128x32xf32>
    %c0_24 = arith.constant 0 : index
    %c0_25 = arith.constant 0 : index
    %40 = vector.load %arg8[%c0_24, %c0_25] : memref<1x32xf32, #tpu.memory_space<vmem>>, vector<1x32xf32>
    %41 = vector.broadcast %40 : vector<1x32xf32> to vector<128x32xf32>
    %42 = arith.addf %39, %41 : vector<128x32xf32>
    %c0_26 = arith.constant 0 : index
    %c0_27 = arith.constant 0 : index
    %43 = vector.load %arg9[%c0_26, %c0_27] : memref<32x32xbf16, #tpu.memory_space<vmem>>, vector<32x32xbf16>
    %cst_28 = arith.constant dense<0.000000e+00> : vector<128x32xf32>
    %44 = tpu.matmul %32, %43, %cst_28 {dimension_numbers = #tpu.dot_dimension_numbers<[1], [0], [0], [1], [0, 0, 1, 1], [], []>} : vector<128x32xbf16>, vector<32x32xbf16>, vector<128x32xf32> -> vector<128x32xf32>
    %c0_29 = arith.constant 0 : index
    %c0_30 = arith.constant 0 : index
    %45 = vector.load %arg10[%c0_29, %c0_30] : memref<1x32xf32, #tpu.memory_space<vmem>>, vector<1x32xf32>
    %46 = vector.broadcast %45 : vector<1x32xf32> to vector<128x32xf32>
    %47 = arith.addf %44, %46 : vector<128x32xf32>
    %48 = vector.shape_cast %37 : vector<128x32xf32> to vector<1x128x32xf32>
    %49 = vector.shape_cast %42 : vector<128x32xf32> to vector<1x128x32xf32>
    %50 = vector.shape_cast %47 : vector<128x32xf32> to vector<1x128x32xf32>
    %51 = vector.extract_strided_slice %48 {offsets = [0, 0, 0], sizes = [1, 128, 8], strides = [1, 1, 1]} : vector<1x128x32xf32> to vector<1x128x8xf32>
    %52 = arith.truncf %51 : vector<1x128x8xf32> to vector<1x128x8xbf16>
    %53 = vector.extract_strided_slice %49 {offsets = [0, 0, 0], sizes = [1, 128, 8], strides = [1, 1, 1]} : vector<1x128x32xf32> to vector<1x128x8xf32>
    %54 = arith.truncf %53 : vector<1x128x8xf32> to vector<1x128x8xbf16>
    %55 = vector.extract_strided_slice %50 {offsets = [0, 0, 0], sizes = [1, 128, 8], strides = [1, 1, 1]} : vector<1x128x32xf32> to vector<1x128x8xf32>
    %56 = arith.truncf %55 : vector<1x128x8xf32> to vector<1x128x8xbf16>
    "tpu.trace_start"() <{level = 10 : i32, message = "bqd,bkd->bqk"}> : () -> ()
    %cst_31 = arith.constant dense<0.000000e+00> : vector<1x128x128xf32>
    %57 = tpu.matmul %52, %54, %cst_31 {dimension_numbers = #tpu.dot_dimension_numbers<[2], [2], [1], [1], [0, 0, 0, 1, 1, 1], [0], [0]>} : vector<1x128x8xbf16>, vector<1x128x8xbf16>, vector<1x128x128xf32> -> vector<1x128x128xf32>
    "tpu.trace_stop"() : () -> ()
    %58 = vector.broadcast %7 : vector<1x1x128xf32> to vector<1x128x128xf32>
    %59 = arith.addf %57, %58 : vector<1x128x128xf32>
    %cst_32 = arith.constant dense<0xFF800000> : vector<1x128xf32>
    %60 = vector.multi_reduction <maximumf>, %59, %cst_32 [2] : vector<1x128x128xf32> to vector<1x128xf32>
    %61 = vector.shape_cast %60 : vector<1x128xf32> to vector<1x128x1xf32>
    %62 = vector.broadcast %61 : vector<1x128x1xf32> to vector<1x128x128xf32>
    %63 = arith.subf %59, %62 : vector<1x128x128xf32>
    %64 = math.exp %63 : vector<1x128x128xf32>
    %cst_33 = arith.constant dense<0.000000e+00> : vector<1x128xf32>
    %65 = vector.multi_reduction <add>, %64, %cst_33 [2] : vector<1x128x128xf32> to vector<1x128xf32>
    %66 = vector.shape_cast %65 : vector<1x128xf32> to vector<1x128x1xf32>
    %67 = tpu.reciprocal %66 {approx = true} : vector<1x128x1xf32> -> vector<1x128x1xf32>
    %68 = vector.broadcast %67 : vector<1x128x1xf32> to vector<1x128x128xf32>
    %69 = arith.mulf %64, %68 : vector<1x128x128xf32>
    %70 = arith.truncf %69 : vector<1x128x128xf32> to vector<1x128x128xbf16>
    "tpu.trace_start"() <{level = 10 : i32, message = "bqk,bkd->bqd"}> : () -> ()
    %cst_34 = arith.constant dense<0.000000e+00> : vector<1x128x8xf32>
    %71 = tpu.matmul %70, %56, %cst_34 {dimension_numbers = #tpu.dot_dimension_numbers<[2], [1], [1], [2], [0, 0, 0, 1, 1, 2], [0], [0]>} : vector<1x128x128xbf16>, vector<1x128x8xbf16>, vector<1x128x8xf32> -> vector<1x128x8xf32>
    "tpu.trace_stop"() : () -> ()
    %72 = vector.shape_cast %71 : vector<1x128x8xf32> to vector<128x8xf32>
    %73 = arith.truncf %72 : vector<128x8xf32> to vector<128x8xbf16>
    %c0_35 = arith.constant 0 : index
    %c0_36 = arith.constant 0 : index
    %74 = vector.load %arg22[%c0_35, %c0_36] : memref<128x32xbf16, #tpu.memory_space<vmem>>, vector<128x8xbf16>
    tpu.vector_store %arg22[%c0_35, %c0_36], %73 {strides = array<i32>} : memref<128x32xbf16, #tpu.memory_space<vmem>>, vector<128x8xbf16>,
    %75 = vector.extract_strided_slice %48 {offsets = [0, 0, 8], sizes = [1, 128, 8], strides = [1, 1, 1]} : vector<1x128x32xf32> to vector<1x128x8xf32>
    %76 = arith.truncf %75 : vector<1x128x8xf32> to vector<1x128x8xbf16>
    %77 = vector.extract_strided_slice %49 {offsets = [0, 0, 8], sizes = [1, 128, 8], strides = [1, 1, 1]} : vector<1x128x32xf32> to vector<1x128x8xf32>
    %78 = arith.truncf %77 : vector<1x128x8xf32> to vector<1x128x8xbf16>
    %79 = vector.extract_strided_slice %50 {offsets = [0, 0, 8], sizes = [1, 128, 8], strides = [1, 1, 1]} : vector<1x128x32xf32> to vector<1x128x8xf32>
    %80 = arith.truncf %79 : vector<1x128x8xf32> to vector<1x128x8xbf16>
    "tpu.trace_start"() <{level = 10 : i32, message = "bqd,bkd->bqk"}> : () -> ()
    %cst_37 = arith.constant dense<0.000000e+00> : vector<1x128x128xf32>
    %81 = tpu.matmul %76, %78, %cst_37 {dimension_numbers = #tpu.dot_dimension_numbers<[2], [2], [1], [1], [0, 0, 0, 1, 1, 1], [0], [0]>} : vector<1x128x8xbf16>, vector<1x128x8xbf16>, vector<1x128x128xf32> -> vector<1x128x128xf32>
    "tpu.trace_stop"() : () -> ()
    %82 = vector.broadcast %7 : vector<1x1x128xf32> to vector<1x128x128xf32>
    %83 = arith.addf %81, %82 : vector<1x128x128xf32>
    %cst_38 = arith.constant dense<0xFF800000> : vector<1x128xf32>
    %84 = vector.multi_reduction <maximumf>, %83, %cst_38 [2] : vector<1x128x128xf32> to vector<1x128xf32>
    %85 = vector.shape_cast %84 : vector<1x128xf32> to vector<1x128x1xf32>
    %86 = vector.broadcast %85 : vector<1x128x1xf32> to vector<1x128x128xf32>
    %87 = arith.subf %83, %86 : vector<1x128x128xf32>
    %88 = math.exp %87 : vector<1x128x128xf32>
    %cst_39 = arith.constant dense<0.000000e+00> : vector<1x128xf32>
    %89 = vector.multi_reduction <add>, %88, %cst_39 [2] : vector<1x128x128xf32> to vector<1x128xf32>
    %90 = vector.shape_cast %89 : vector<1x128xf32> to vector<1x128x1xf32>
    %91 = tpu.reciprocal %90 {approx = true} : vector<1x128x1xf32> -> vector<1x128x1xf32>
    %92 = vector.broadcast %91 : vector<1x128x1xf32> to vector<1x128x128xf32>
    %93 = arith.mulf %88, %92 : vector<1x128x128xf32>
    %94 = arith.truncf %93 : vector<1x128x128xf32> to vector<1x128x128xbf16>
    "tpu.trace_start"() <{level = 10 : i32, message = "bqk,bkd->bqd"}> : () -> ()
    %cst_40 = arith.constant dense<0.000000e+00> : vector<1x128x8xf32>
    %95 = tpu.matmul %94, %80, %cst_40 {dimension_numbers = #tpu.dot_dimension_numbers<[2], [1], [1], [2], [0, 0, 0, 1, 1, 2], [0], [0]>} : vector<1x128x128xbf16>, vector<1x128x8xbf16>, vector<1x128x8xf32> -> vector<1x128x8xf32>
    "tpu.trace_stop"() : () -> ()
    %96 = vector.shape_cast %95 : vector<1x128x8xf32> to vector<128x8xf32>
    %97 = arith.truncf %96 : vector<128x8xf32> to vector<128x8xbf16>
    %c0_41 = arith.constant 0 : index
    %c8 = arith.constant 8 : index
    %98 = vector.load %arg22[%c0_41, %c8] : memref<128x32xbf16, #tpu.memory_space<vmem>>, vector<128x8xbf16>
    tpu.vector_store %arg22[%c0_41, %c8], %97 {strides = array<i32>} : memref<128x32xbf16, #tpu.memory_space<vmem>>, vector<128x8xbf16>,
    %99 = vector.extract_strided_slice %48 {offsets = [0, 0, 16], sizes = [1, 128, 8], strides = [1, 1, 1]} : vector<1x128x32xf32> to vector<1x128x8xf32>
    %100 = arith.truncf %99 : vector<1x128x8xf32> to vector<1x128x8xbf16>
    %101 = vector.extract_strided_slice %49 {offsets = [0, 0, 16], sizes = [1, 128, 8], strides = [1, 1, 1]} : vector<1x128x32xf32> to vector<1x128x8xf32>
    %102 = arith.truncf %101 : vector<1x128x8xf32> to vector<1x128x8xbf16>
    %103 = vector.extract_strided_slice %50 {offsets = [0, 0, 16], sizes = [1, 128, 8], strides = [1, 1, 1]} : vector<1x128x32xf32> to vector<1x128x8xf32>
    %104 = arith.truncf %103 : vector<1x128x8xf32> to vector<1x128x8xbf16>
    "tpu.trace_start"() <{level = 10 : i32, message = "bqd,bkd->bqk"}> : () -> ()
    %cst_42 = arith.constant dense<0.000000e+00> : vector<1x128x128xf32>
    %105 = tpu.matmul %100, %102, %cst_42 {dimension_numbers = #tpu.dot_dimension_numbers<[2], [2], [1], [1], [0, 0, 0, 1, 1, 1], [0], [0]>} : vector<1x128x8xbf16>, vector<1x128x8xbf16>, vector<1x128x128xf32> -> vector<1x128x128xf32>
    "tpu.trace_stop"() : () -> ()
    %106 = vector.broadcast %7 : vector<1x1x128xf32> to vector<1x128x128xf32>
    %107 = arith.addf %105, %106 : vector<1x128x128xf32>
    %cst_43 = arith.constant dense<0xFF800000> : vector<1x128xf32>
    %108 = vector.multi_reduction <maximumf>, %107, %cst_43 [2] : vector<1x128x128xf32> to vector<1x128xf32>
    %109 = vector.shape_cast %108 : vector<1x128xf32> to vector<1x128x1xf32>
    %110 = vector.broadcast %109 : vector<1x128x1xf32> to vector<1x128x128xf32>
    %111 = arith.subf %107, %110 : vector<1x128x128xf32>
    %112 = math.exp %111 : vector<1x128x128xf32>
    %cst_44 = arith.constant dense<0.000000e+00> : vector<1x128xf32>
    %113 = vector.multi_reduction <add>, %112, %cst_44 [2] : vector<1x128x128xf32> to vector<1x128xf32>
    %114 = vector.shape_cast %113 : vector<1x128xf32> to vector<1x128x1xf32>
    %115 = tpu.reciprocal %114 {approx = true} : vector<1x128x1xf32> -> vector<1x128x1xf32>
    %116 = vector.broadcast %115 : vector<1x128x1xf32> to vector<1x128x128xf32>
    %117 = arith.mulf %112, %116 : vector<1x128x128xf32>
    %118 = arith.truncf %117 : vector<1x128x128xf32> to vector<1x128x128xbf16>
    "tpu.trace_start"() <{level = 10 : i32, message = "bqk,bkd->bqd"}> : () -> ()
    %cst_45 = arith.constant dense<0.000000e+00> : vector<1x128x8xf32>
    %119 = tpu.matmul %118, %104, %cst_45 {dimension_numbers = #tpu.dot_dimension_numbers<[2], [1], [1], [2], [0, 0, 0, 1, 1, 2], [0], [0]>} : vector<1x128x128xbf16>, vector<1x128x8xbf16>, vector<1x128x8xf32> -> vector<1x128x8xf32>
    "tpu.trace_stop"() : () -> ()
    %120 = vector.shape_cast %119 : vector<1x128x8xf32> to vector<128x8xf32>
    %121 = arith.truncf %120 : vector<128x8xf32> to vector<128x8xbf16>
    %c0_46 = arith.constant 0 : index
    %c16 = arith.constant 16 : index
    %122 = vector.load %arg22[%c0_46, %c16] : memref<128x32xbf16, #tpu.memory_space<vmem>>, vector<128x8xbf16>
    tpu.vector_store %arg22[%c0_46, %c16], %121 {strides = array<i32>} : memref<128x32xbf16, #tpu.memory_space<vmem>>, vector<128x8xbf16>,
    %123 = vector.extract_strided_slice %48 {offsets = [0, 0, 24], sizes = [1, 128, 8], strides = [1, 1, 1]} : vector<1x128x32xf32> to vector<1x128x8xf32>
    %124 = arith.truncf %123 : vector<1x128x8xf32> to vector<1x128x8xbf16>
    %125 = vector.extract_strided_slice %49 {offsets = [0, 0, 24], sizes = [1, 128, 8], strides = [1, 1, 1]} : vector<1x128x32xf32> to vector<1x128x8xf32>
    %126 = arith.truncf %125 : vector<1x128x8xf32> to vector<1x128x8xbf16>
    %127 = vector.extract_strided_slice %50 {offsets = [0, 0, 24], sizes = [1, 128, 8], strides = [1, 1, 1]} : vector<1x128x32xf32> to vector<1x128x8xf32>
    %128 = arith.truncf %127 : vector<1x128x8xf32> to vector<1x128x8xbf16>
    "tpu.trace_start"() <{level = 10 : i32, message = "bqd,bkd->bqk"}> : () -> ()
    %cst_47 = arith.constant dense<0.000000e+00> : vector<1x128x128xf32>
    %129 = tpu.matmul %124, %126, %cst_47 {dimension_numbers = #tpu.dot_dimension_numbers<[2], [2], [1], [1], [0, 0, 0, 1, 1, 1], [0], [0]>} : vector<1x128x8xbf16>, vector<1x128x8xbf16>, vector<1x128x128xf32> -> vector<1x128x128xf32>
    "tpu.trace_stop"() : () -> ()
    %130 = vector.broadcast %7 : vector<1x1x128xf32> to vector<1x128x128xf32>
    %131 = arith.addf %129, %130 : vector<1x128x128xf32>
    %cst_48 = arith.constant dense<0xFF800000> : vector<1x128xf32>
    %132 = vector.multi_reduction <maximumf>, %131, %cst_48 [2] : vector<1x128x128xf32> to vector<1x128xf32>
    %133 = vector.shape_cast %132 : vector<1x128xf32> to vector<1x128x1xf32>
    %134 = vector.broadcast %133 : vector<1x128x1xf32> to vector<1x128x128xf32>
    %135 = arith.subf %131, %134 : vector<1x128x128xf32>
    %136 = math.exp %135 : vector<1x128x128xf32>
    %cst_49 = arith.constant dense<0.000000e+00> : vector<1x128xf32>
    %137 = vector.multi_reduction <add>, %136, %cst_49 [2] : vector<1x128x128xf32> to vector<1x128xf32>
    %138 = vector.shape_cast %137 : vector<1x128xf32> to vector<1x128x1xf32>
    %139 = tpu.reciprocal %138 {approx = true} : vector<1x128x1xf32> -> vector<1x128x1xf32>
    %140 = vector.broadcast %139 : vector<1x128x1xf32> to vector<1x128x128xf32>
    %141 = arith.mulf %136, %140 : vector<1x128x128xf32>
    %142 = arith.truncf %141 : vector<1x128x128xf32> to vector<1x128x128xbf16>
    "tpu.trace_start"() <{level = 10 : i32, message = "bqk,bkd->bqd"}> : () -> ()
    %cst_50 = arith.constant dense<0.000000e+00> : vector<1x128x8xf32>
    %143 = tpu.matmul %142, %128, %cst_50 {dimension_numbers = #tpu.dot_dimension_numbers<[2], [1], [1], [2], [0, 0, 0, 1, 1, 2], [0], [0]>} : vector<1x128x128xbf16>, vector<1x128x8xbf16>, vector<1x128x8xf32> -> vector<1x128x8xf32>
    "tpu.trace_stop"() : () -> ()
    %144 = vector.shape_cast %143 : vector<1x128x8xf32> to vector<128x8xf32>
    %145 = arith.truncf %144 : vector<128x8xf32> to vector<128x8xbf16>
    %c0_51 = arith.constant 0 : index
    %c24 = arith.constant 24 : index
    %146 = vector.load %arg22[%c0_51, %c24] : memref<128x32xbf16, #tpu.memory_space<vmem>>, vector<128x8xbf16>
    tpu.vector_store %arg22[%c0_51, %c24], %145 {strides = array<i32>} : memref<128x32xbf16, #tpu.memory_space<vmem>>, vector<128x8xbf16>,
    %c0_52 = arith.constant 0 : index
    %c0_53 = arith.constant 0 : index
    %147 = vector.load %arg22[%c0_52, %c0_53] : memref<128x32xbf16, #tpu.memory_space<vmem>>, vector<128x32xbf16>
    %c0_54 = arith.constant 0 : index
    %c0_55 = arith.constant 0 : index
    %148 = vector.load %arg11[%c0_54, %c0_55] : memref<32x32xbf16, #tpu.memory_space<vmem>>, vector<32x32xbf16>
    %cst_56 = arith.constant dense<0.000000e+00> : vector<128x32xf32>
    %149 = tpu.matmul %147, %148, %cst_56 {dimension_numbers = #tpu.dot_dimension_numbers<[1], [0], [0], [1], [0, 0, 1, 1], [], []>} : vector<128x32xbf16>, vector<32x32xbf16>, vector<128x32xf32> -> vector<128x32xf32>
    %c0_57 = arith.constant 0 : index
    %c0_58 = arith.constant 0 : index
    %150 = vector.load %arg12[%c0_57, %c0_58] : memref<1x32xf32, #tpu.memory_space<vmem>>, vector<1x32xf32>
    %151 = vector.broadcast %150 : vector<1x32xf32> to vector<128x32xf32>
    %152 = arith.addf %149, %151 : vector<128x32xf32>
    %153 = arith.addf %152, %1 : vector<128x32xf32>
    %c0_59 = arith.constant 0 : index
    %c0_60 = arith.constant 0 : index
    %154 = vector.load %arg13[%c0_59, %c0_60] : memref<1x32xf32, #tpu.memory_space<vmem>>, vector<1x32xf32>
    %c0_61 = arith.constant 0 : index
    %c0_62 = arith.constant 0 : index
    %155 = vector.load %arg14[%c0_61, %c0_62] : memref<1x32xf32, #tpu.memory_space<vmem>>, vector<1x32xf32>
    %cst_63 = arith.constant dense<0.000000e+00> : vector<128xf32>
    %156 = vector.multi_reduction <add>, %153, %cst_63 [1] : vector<128x32xf32> to vector<128xf32>
    %157 = vector.shape_cast %156 : vector<128xf32> to vector<128x1xf32>
    %cst_64 = arith.constant 3.200000e+01 : f32
    %158 = vector.broadcast %cst_64 : f32 to vector<128x1xf32>
    %159 = arith.divf %157, %158 : vector<128x1xf32>
    %160 = vector.broadcast %159 : vector<128x1xf32> to vector<128x32xf32>
    %161 = arith.subf %153, %160 : vector<128x32xf32>
    %162 = arith.mulf %161, %161 : vector<128x32xf32>
    %cst_65 = arith.constant dense<0.000000e+00> : vector<128xf32>
    %163 = vector.multi_reduction <add>, %162, %cst_65 [1] : vector<128x32xf32> to vector<128xf32>
    %164 = vector.shape_cast %163 : vector<128xf32> to vector<128x1xf32>
    %cst_66 = arith.constant 3.200000e+01 : f32
    %165 = vector.broadcast %cst_66 : f32 to vector<128x1xf32>
    %166 = arith.divf %164, %165 : vector<128x1xf32>
    %167 = vector.broadcast %159 : vector<128x1xf32> to vector<128x32xf32>
    %168 = arith.subf %153, %167 : vector<128x32xf32>
    %cst_67 = arith.constant 9.99999997E-7 : f32
    %169 = vector.broadcast %cst_67 : f32 to vector<128x1xf32>
    %170 = arith.addf %166, %169 : vector<128x1xf32>
    %171 = math.rsqrt %170 : vector<128x1xf32>
    %172 = vector.broadcast %171 : vector<128x1xf32> to vector<128x32xf32>
    %173 = arith.mulf %168, %172 : vector<128x32xf32>
    %174 = vector.broadcast %154 : vector<1x32xf32> to vector<128x32xf32>
    %175 = arith.mulf %173, %174 : vector<128x32xf32>
    %176 = vector.broadcast %155 : vector<1x32xf32> to vector<128x32xf32>
    %177 = arith.addf %175, %176 : vector<128x32xf32>
    %178 = arith.truncf %177 : vector<128x32xf32> to vector<128x32xbf16>
    %c0_68 = arith.constant 0 : index
    %c0_69 = arith.constant 0 : index
    %179 = vector.load %arg15[%c0_68, %c0_69] : memref<32x64xbf16, #tpu.memory_space<vmem>>, vector<32x64xbf16>
    %cst_70 = arith.constant dense<0.000000e+00> : vector<128x64xf32>
    %180 = tpu.matmul %178, %179, %cst_70 {dimension_numbers = #tpu.dot_dimension_numbers<[1], [0], [0], [1], [0, 0, 1, 1], [], []>} : vector<128x32xbf16>, vector<32x64xbf16>, vector<128x64xf32> -> vector<128x64xf32>
    %c0_71 = arith.constant 0 : index
    %c0_72 = arith.constant 0 : index
    %181 = vector.load %arg16[%c0_71, %c0_72] : memref<1x64xf32, #tpu.memory_space<vmem>>, vector<1x64xf32>
    %182 = vector.broadcast %181 : vector<1x64xf32> to vector<128x64xf32>
    %183 = arith.addf %180, %182 : vector<128x64xf32>
    %cst_73 = arith.constant 0.000000e+00 : f32
    %184 = vector.broadcast %cst_73 : f32 to vector<128x64xf32>
    %185 = arith.maximumf %183, %184 : vector<128x64xf32>
    %186 = arith.truncf %185 : vector<128x64xf32> to vector<128x64xbf16>
    %c0_74 = arith.constant 0 : index
    %c0_75 = arith.constant 0 : index
    %187 = vector.load %arg17[%c0_74, %c0_75] : memref<64x32xbf16, #tpu.memory_space<vmem>>, vector<64x32xbf16>
    %cst_76 = arith.constant dense<0.000000e+00> : vector<128x32xf32>
    %188 = tpu.matmul %186, %187, %cst_76 {dimension_numbers = #tpu.dot_dimension_numbers<[1], [0], [0], [1], [0, 0, 1, 1], [], []>} : vector<128x64xbf16>, vector<64x32xbf16>, vector<128x32xf32> -> vector<128x32xf32>
    %c0_77 = arith.constant 0 : index
    %c0_78 = arith.constant 0 : index
    %189 = vector.load %arg18[%c0_77, %c0_78] : memref<1x32xf32, #tpu.memory_space<vmem>>, vector<1x32xf32>
    %190 = vector.broadcast %189 : vector<1x32xf32> to vector<128x32xf32>
    %191 = arith.addf %188, %190 : vector<128x32xf32>
    %192 = arith.addf %191, %153 : vector<128x32xf32>
    %193 = vector.shape_cast %192 : vector<128x32xf32> to vector<1x128x32xf32>
    %c0_79 = arith.constant 0 : index
    %c0_80 = arith.constant 0 : index
    %c0_81 = arith.constant 0 : index
    %194 = vector.load %arg21[%c0_79, %c0_80, %c0_81] : memref<1x128x32xf32, #tpu.memory_space<vmem>>, vector<1x128x32xf32>
    tpu.vector_store %arg21[%c0_79, %c0_80, %c0_81], %193 {strides = array<i32>} : memref<1x128x32xf32, #tpu.memory_space<vmem>>, vector<1x128x32xf32>,
    return
  }
  func.func @transform_0(%arg0: i32) -> (i32, i32, i32) {
    %c0_i32 = arith.constant 0 : i32
    %c0_i32_0 = arith.constant 0 : i32
    %c0_i32_1 = arith.constant 0 : i32
    return %arg0, %c0_i32, %c0_i32_0 : i32, i32, i32
  }
  func.func @transform_1(%arg0: i32) -> (i32, i32, i32) {
    %c0_i32 = arith.constant 0 : i32
    %c0_i32_0 = arith.constant 0 : i32
    %c0_i32_1 = arith.constant 0 : i32
    return %arg0, %c0_i32, %c0_i32_0 : i32, i32, i32
  }
  func.func @transform_2(%arg0: i32) -> (i32, i32) {
    %c0_i32 = arith.constant 0 : i32
    %c0_i32_0 = arith.constant 0 : i32
    %c0_i32_1 = arith.constant 0 : i32
    return %c0_i32, %c0_i32_0 : i32, i32
  }
  func.func @transform_3(%arg0: i32) -> (i32, i32) {
    %c0_i32 = arith.constant 0 : i32
    %c0_i32_0 = arith.constant 0 : i32
    %c0_i32_1 = arith.constant 0 : i32
    return %c0_i32, %c0_i32_0 : i32, i32
  }
  func.func @transform_4(%arg0: i32) -> (i32, i32) {
    %c0_i32 = arith.constant 0 : i32
    %c0_i32_0 = arith.constant 0 : i32
    %c0_i32_1 = arith.constant 0 : i32
    return %c0_i32, %c0_i32_0 : i32, i32
  }
  func.func @transform_5(%arg0: i32) -> (i32, i32) {
    %c0_i32 = arith.constant 0 : i32
    %c0_i32_0 = arith.constant 0 : i32
    %c0_i32_1 = arith.constant 0 : i32
    return %c0_i32, %c0_i32_0 : i32, i32
  }
  func.func @transform_6(%arg0: i32) -> (i32, i32) {
    %c0_i32 = arith.constant 0 : i32
    %c0_i32_0 = arith.constant 0 : i32
    %c0_i32_1 = arith.constant 0 : i32
    return %c0_i32, %c0_i32_0 : i32, i32
  }
  func.func @transform_7(%arg0: i32) -> (i32, i32) {
    %c0_i32 = arith.constant 0 : i32
    %c0_i32_0 = arith.constant 0 : i32
    %c0_i32_1 = arith.constant 0 : i32
    return %c0_i32, %c0_i32_0 : i32, i32
  }
  func.func @transform_8(%arg0: i32) -> (i32, i32) {
    %c0_i32 = arith.constant 0 : i32
    %c0_i32_0 = arith.constant 0 : i32
    %c0_i32_1 = arith.constant 0 : i32
    return %c0_i32, %c0_i32_0 : i32, i32
  }
  func.func @transform_9(%arg0: i32) -> (i32, i32) {
    %c0_i32 = arith.constant 0 : i32
    %c0_i32_0 = arith.constant 0 : i32
    %c0_i32_1 = arith.constant 0 : i32
    return %c0_i32, %c0_i32_0 : i32, i32
  }
  func.func @transform_10(%arg0: i32) -> (i32, i32) {
    %c0_i32 = arith.constant 0 : i32
    %c0_i32_0 = arith.constant 0 : i32
    %c0_i32_1 = arith.constant 0 : i32
    return %c0_i32, %c0_i32_0 : i32, i32
  }
  func.func @transform_11(%arg0: i32) -> (i32, i32) {
    %c0_i32 = arith.constant 0 : i32
    %c0_i32_0 = arith.constant 0 : i32
    %c0_i32_1 = arith.constant 0 : i32
    return %c0_i32, %c0_i32_0 : i32, i32
  }
  func.func @transform_12(%arg0: i32) -> (i32, i32) {
    %c0_i32 = arith.constant 0 : i32
    %c0_i32_0 = arith.constant 0 : i32
    %c0_i32_1 = arith.constant 0 : i32
    return %c0_i32, %c0_i32_0 : i32, i32
  }
  func.func @transform_13(%arg0: i32) -> (i32, i32) {
    %c0_i32 = arith.constant 0 : i32
    %c0_i32_0 = arith.constant 0 : i32
    %c0_i32_1 = arith.constant 0 : i32
    return %c0_i32, %c0_i32_0 : i32, i32
  }
  func.func @transform_14(%arg0: i32) -> (i32, i32) {
    %c0_i32 = arith.constant 0 : i32
    %c0_i32_0 = arith.constant 0 : i32
    %c0_i32_1 = arith.constant 0 : i32
    return %c0_i32, %c0_i32_0 : i32, i32
  }
  func.func @transform_15(%arg0: i32) -> (i32, i32) {
    %c0_i32 = arith.constant 0 : i32
    %c0_i32_0 = arith.constant 0 : i32
    %c0_i32_1 = arith.constant 0 : i32
    return %c0_i32, %c0_i32_0 : i32, i32
  }
  func.func @transform_16(%arg0: i32) -> (i32, i32) {
    %c0_i32 = arith.constant 0 : i32
    %c0_i32_0 = arith.constant 0 : i32
    %c0_i32_1 = arith.constant 0 : i32
    return %c0_i32, %c0_i32_0 : i32, i32
  }
  func.func @transform_17(%arg0: i32) -> (i32, i32) {
    %c0_i32 = arith.constant 0 : i32
    %c0_i32_0 = arith.constant 0 : i32
    %c0_i32_1 = arith.constant 0 : i32
    return %c0_i32, %c0_i32_0 : i32, i32
  }
  func.func @transform_18(%arg0: i32) -> (i32, i32) {
    %c0_i32 = arith.constant 0 : i32
    %c0_i32_0 = arith.constant 0 : i32
    %c0_i32_1 = arith.constant 0 : i32
    return %c0_i32, %c0_i32_0 : i32, i32
  }
  func.func @transform_19(%arg0: i32) -> (i32, i32) {
    %c0_i32 = arith.constant 0 : i32
    %c0_i32_0 = arith.constant 0 : i32
    %c0_i32_1 = arith.constant 0 : i32
    return %c0_i32, %c0_i32_0 : i32, i32
  }
  func.func @transform_20(%arg0: i32) -> (i32, i32, i32) {
    %c0_i32 = arith.constant 0 : i32
    %c0_i32_0 = arith.constant 0 : i32
    %c0_i32_1 = arith.constant 0 : i32
    return %arg0, %c0_i32, %c0_i32_0 : i32, i32, i32
  }
}

module attributes {stable_mosaic.version = 11 : i64} {
  func.func @encoder_layer_kernel(%arg0: i32, %arg1: memref<1x128x32xf32, #tpu.memory_space<vmem>>, %arg2: memref<1x1x128xf32, #tpu.memory_space<vmem>>, %arg3: memref<1x32xf32, #tpu.memory_space<vmem>>, %arg4: memref<1x32xf32, #tpu.memory_space<vmem>>, %arg5: memref<32x32xbf16, #tpu.memory_space<vmem>>, %arg6: memref<1x32xf32, #tpu.memory_space<vmem>>, %arg7: memref<32x32xbf16, #tpu.memory_space<vmem>>, %arg8: memref<1x32xf32, #tpu.memory_space<vmem>>, %arg9: memref<32x32xbf16, #tpu.memory_space<vmem>>, %arg10: memref<1x32xf32, #tpu.memory_space<vmem>>, %arg11: memref<32x32xbf16, #tpu.memory_space<vmem>>, %arg12: memref<1x32xf32, #tpu.memory_space<vmem>>, %arg13: memref<1x32xf32, #tpu.memory_space<vmem>>, %arg14: memref<1x32xf32, #tpu.memory_space<vmem>>, %arg15: memref<32x64xbf16, #tpu.memory_space<vmem>>, %arg16: memref<1x64xf32, #tpu.memory_space<vmem>>, %arg17: memref<64x32xbf16, #tpu.memory_space<vmem>>, %arg18: memref<1x32xf32, #tpu.memory_space<vmem>>, %arg19: memref<1x32xf32, #tpu.memory_space<vmem>>, %arg20: memref<1x32xf32, #tpu.memory_space<vmem>>, %arg21: memref<1x128x32xf32, #tpu.memory_space<vmem>>, %arg22: memref<128x32xbf16, #tpu.memory_space<vmem>>) attributes {dimension_semantics = [#tpu.dimension_semantics<parallel>], iteration_bounds = array<i64: 2>, scalar_prefetch = 0 : i64, scratch_operands = 1 : i64, tpu.core_type = #tpu.core_type<tc>, window_params = [{transform_indices = @transform_0, window_bounds = array<i64: 1, 128, 32>}, {transform_indices = @transform_1, window_bounds = array<i64: 1, 1, 128>}, {pipeline_mode = #tpu.pipeline_mode<synchronous>, transform_indices = @transform_2, window_bounds = array<i64: 1, 32>}, {pipeline_mode = #tpu.pipeline_mode<synchronous>, transform_indices = @transform_3, window_bounds = array<i64: 1, 32>}, {pipeline_mode = #tpu.pipeline_mode<synchronous>, transform_indices = @transform_4, window_bounds = array<i64: 32, 32>}, {pipeline_mode = #tpu.pipeline_mode<synchronous>, transform_indices = @transform_5, window_bounds = array<i64: 1, 32>}, {pipeline_mode = #tpu.pipeline_mode<synchronous>, transform_indices = @transform_6, window_bounds = array<i64: 32, 32>}, {pipeline_mode = #tpu.pipeline_mode<synchronous>, transform_indices = @transform_7, window_bounds = array<i64: 1, 32>}, {pipeline_mode = #tpu.pipeline_mode<synchronous>, transform_indices = @transform_8, window_bounds = array<i64: 32, 32>}, {pipeline_mode = #tpu.pipeline_mode<synchronous>, transform_indices = @transform_9, window_bounds = array<i64: 1, 32>}, {pipeline_mode = #tpu.pipeline_mode<synchronous>, transform_indices = @transform_10, window_bounds = array<i64: 32, 32>}, {pipeline_mode = #tpu.pipeline_mode<synchronous>, transform_indices = @transform_11, window_bounds = array<i64: 1, 32>}, {pipeline_mode = #tpu.pipeline_mode<synchronous>, transform_indices = @transform_12, window_bounds = array<i64: 1, 32>}, {pipeline_mode = #tpu.pipeline_mode<synchronous>, transform_indices = @transform_13, window_bounds = array<i64: 1, 32>}, {pipeline_mode = #tpu.pipeline_mode<synchronous>, transform_indices = @transform_14, window_bounds = array<i64: 32, 64>}, {pipeline_mode = #tpu.pipeline_mode<synchronous>, transform_indices = @transform_15, window_bounds = array<i64: 1, 64>}, {pipeline_mode = #tpu.pipeline_mode<synchronous>, transform_indices = @transform_16, window_bounds = array<i64: 64, 32>}, {pipeline_mode = #tpu.pipeline_mode<synchronous>, transform_indices = @transform_17, window_bounds = array<i64: 1, 32>}, {pipeline_mode = #tpu.pipeline_mode<synchronous>, transform_indices = @transform_18, window_bounds = array<i64: 1, 32>}, {pipeline_mode = #tpu.pipeline_mode<synchronous>, transform_indices = @transform_19, window_bounds = array<i64: 1, 32>}, {transform_indices = @transform_20, window_bounds = array<i64: 1, 128, 32>}]} {
    %c0 = arith.constant 0 : index
    %c0_0 = arith.constant 0 : index
    %c0_1 = arith.constant 0 : index
    %0 = vector.load %arg1[%c0, %c0_0, %c0_1] : memref<1x128x32xf32, #tpu.memory_space<vmem>>, vector<1x128x32xf32>
    %1 = vector.shape_cast %0 : vector<1x128x32xf32> to vector<128x32xf32>
    %c0_2 = arith.constant 0 : index
    %c0_3 = arith.constant 0 : index
    %c0_4 = arith.constant 0 : index
    %2 = vector.load %arg2[%c0_2, %c0_3, %c0_4] : memref<1x1x128xf32, #tpu.memory_space<vmem>>, vector<1x1x128xf32>
    %cst = arith.constant 5.000000e-01 : f32
    %3 = vector.broadcast %cst : f32 to vector<1x1x128xf32>
    %4 = arith.cmpf ogt, %2, %3 : vector<1x1x128xf32>
    %cst_5 = arith.constant -9.99999984E+17 : f32
    %cst_6 = arith.constant 0.000000e+00 : f32
    %5 = vector.broadcast %cst_5 : f32 to vector<1x1x128xf32>
    %6 = vector.broadcast %cst_6 : f32 to vector<1x1x128xf32>
    %7 = arith.select %4, %5, %6 : vector<1x1x128xi1>, vector<1x1x128xf32>
    %c0_7 = arith.constant 0 : index
    %c0_8 = arith.constant 0 : index
    %8 = vector.load %arg3[%c0_7, %c0_8] : memref<1x32xf32, #tpu.memory_space<vmem>>, vector<1x32xf32>
    %c0_9 = arith.constant 0 : index
    %c0_10 = arith.constant 0 : index
    %9 = vector.load %arg4[%c0_9, %c0_10] : memref<1x32xf32, #tpu.memory_space<vmem>>, vector<1x32xf32>
    %cst_11 = arith.constant dense<0.000000e+00> : vector<128xf32>
    %10 = vector.multi_reduction <add>, %1, %cst_11 [1] : vector<128x32xf32> to vector<128xf32>
    %11 = vector.shape_cast %10 : vector<128xf32> to vector<128x1xf32>
    %cst_12 = arith.constant 3.200000e+01 : f32
    %12 = vector.broadcast %cst_12 : f32 to vector<128x1xf32>
    %13 = arith.divf %11, %12 : vector<128x1xf32>
    %14 = vector.broadcast %13 : vector<128x1xf32> to vector<128x32xf32>
    %15 = arith.subf %1, %14 : vector<128x32xf32>
    %16 = arith.mulf %15, %15 : vector<128x32xf32>
    %cst_13 = arith.constant dense<0.000000e+00> : vector<128xf32>
    %17 = vector.multi_reduction <add>, %16, %cst_13 [1] : vector<128x32xf32> to vector<128xf32>
    %18 = vector.shape_cast %17 : vector<128xf32> to vector<128x1xf32>
    %cst_14 = arith.constant 3.200000e+01 : f32
    %19 = vector.broadcast %cst_14 : f32 to vector<128x1xf32>
    %20 = arith.divf %18, %19 : vector<128x1xf32>
    %21 = vector.broadcast %13 : vector<128x1xf32> to vector<128x32xf32>
    %22 = arith.subf %1, %21 : vector<128x32xf32>
    %cst_15 = arith.constant 9.99999997E-7 : f32
    %23 = vector.broadcast %cst_15 : f32 to vector<128x1xf32>
    %24 = arith.addf %20, %23 : vector<128x1xf32>
    %25 = math.rsqrt %24 : vector<128x1xf32>
    %26 = vector.broadcast %25 : vector<128x1xf32> to vector<128x32xf32>
    %27 = arith.mulf %22, %26 : vector<128x32xf32>
    %28 = vector.broadcast %8 : vector<1x32xf32> to vector<128x32xf32>
    %29 = arith.mulf %27, %28 : vector<128x32xf32>
    %30 = vector.broadcast %9 : vector<1x32xf32> to vector<128x32xf32>
    %31 = arith.addf %29, %30 : vector<128x32xf32>
    %32 = arith.truncf %31 : vector<128x32xf32> to vector<128x32xbf16>
    %c0_16 = arith.constant 0 : index
    %c0_17 = arith.constant 0 : index
    %33 = vector.load %arg5[%c0_16, %c0_17] : memref<32x32xbf16, #tpu.memory_space<vmem>>, vector<32x32xbf16>
    %cst_18 = arith.constant dense<0.000000e+00> : vector<128x32xf32>
    %34 = tpu.matmul %32, %33, %cst_18 {dimension_numbers = #tpu.dot_dimension_numbers<[1], [0], [0], [1], [0, 0, 1, 1], [], []>} : vector<128x32xbf16>, vector<32x32xbf16>, vector<128x32xf32> -> vector<128x32xf32>
    %c0_19 = arith.constant 0 : index
    %c0_20 = arith.constant 0 : index
    %35 = vector.load %arg6[%c0_19, %c0_20] : memref<1x32xf32, #tpu.memory_space<vmem>>, vector<1x32xf32>
    %36 = vector.broadcast %35 : vector<1x32xf32> to vector<128x32xf32>
    %37 = arith.addf %34, %36 : vector<128x32xf32>
    %c0_21 = arith.constant 0 : index
    %c0_22 = arith.constant 0 : index
    %38 = vector.load %arg7[%c0_21, %c0_22] : memref<32x32xbf16, #tpu.memory_space<vmem>>, vector<32x32xbf16>
    %cst_23 = arith.constant dense<0.000000e+00> : vector<128x32xf32>
    %39 = tpu.matmul %32, %38, %cst_23 {dimension_numbers = #tpu.dot_dimension_numbers<[1], [0], [0], [1], [0, 0, 1, 1], [], []>} : vector<128x32xbf16>, vector<32x32xbf16>, vector<128x32xf32> -> vector<128x32xf32>
    %c0_24 = arith.constant 0 : index
    %c0_25 = arith.constant 0 : index
    %40 = vector.load %arg8[%c0_24, %c0_25] : memref<1x32xf32, #tpu.memory_space<vmem>>, vector<1x32xf32>
    %41 = vector.broadcast %40 : vector<1x32xf32> to vector<128x32xf32>
    %42 = arith.addf %39, %41 : vector<128x32xf32>
    %c0_26 = arith.constant 0 : index
    %c0_27 = arith.constant 0 : index
    %43 = vector.load %arg9[%c0_26, %c0_27] : memref<32x32xbf16, #tpu.memory_space<vmem>>, vector<32x32xbf16>
    %cst_28 = arith.constant dense<0.000000e+00> : vector<128x32xf32>
    %44 = tpu.matmul %32, %43, %cst_28 {dimension_numbers = #tpu.dot_dimension_numbers<[1], [0], [0], [1], [0, 0, 1, 1], [], []>} : vector<128x32xbf16>, vector<32x32xbf16>, vector<128x32xf32> -> vector<128x32xf32>
    %c0_29 = arith.constant 0 : index
    %c0_30 = arith.constant 0 : index
    %45 = vector.load %arg10[%c0_29, %c0_30] : memref<1x32xf32, #tpu.memory_space<vmem>>, vector<1x32xf32>
    %46 = vector.broadcast %45 : vector<1x32xf32> to vector<128x32xf32>
    %47 = arith.addf %44, %46 : vector<128x32xf32>
    %48 = vector.shape_cast %37 : vector<128x32xf32> to vector<1x128x32xf32>
    %49 = vector.shape_cast %42 : vector<128x32xf32> to vector<1x128x32xf32>
    %50 = vector.shape_cast %47 : vector<128x32xf32> to vector<1x128x32xf32>
    %51 = vector.extract_strided_slice %48 {offsets = [0, 0, 0], sizes = [1, 128, 8], strides = [1, 1, 1]} : vector<1x128x32xf32> to vector<1x128x8xf32>
    %52 = arith.truncf %51 : vector<1x128x8xf32> to vector<1x128x8xbf16>
    %53 = vector.extract_strided_slice %49 {offsets = [0, 0, 0], sizes = [1, 128, 8], strides = [1, 1, 1]} : vector<1x128x32xf32> to vector<1x128x8xf32>
    %54 = arith.truncf %53 : vector<1x128x8xf32> to vector<1x128x8xbf16>
    %55 = vector.extract_strided_slice %50 {offsets = [0, 0, 0], sizes = [1, 128, 8], strides = [1, 1, 1]} : vector<1x128x32xf32> to vector<1x128x8xf32>
    %56 = arith.truncf %55 : vector<1x128x8xf32> to vector<1x128x8xbf16>
    "tpu.trace_start"() <{level = 10 : i32, message = "bqd,bkd->bqk"}> : () -> ()
    %cst_31 = arith.constant dense<0.000000e+00> : vector<1x128x128xf32>
    %57 = tpu.matmul %52, %54, %cst_31 {dimension_numbers = #tpu.dot_dimension_numbers<[2], [2], [1], [1], [0, 0, 0, 1, 1, 1], [0], [0]>} : vector<1x128x8xbf16>, vector<1x128x8xbf16>, vector<1x128x128xf32> -> vector<1x128x128xf32>
    "tpu.trace_stop"() : () -> ()
    %58 = vector.broadcast %7 : vector<1x1x128xf32> to vector<1x128x128xf32>
    %59 = arith.addf %57, %58 : vector<1x128x128xf32>
    %cst_32 = arith.constant dense<0xFF800000> : vector<1x128xf32>
    %60 = vector.multi_reduction <maximumf>, %59, %cst_32 [2] : vector<1x128x128xf32> to vector<1x128xf32>
    %61 = vector.shape_cast %60 : vector<1x128xf32> to vector<1x128x1xf32>
    %62 = vector.broadcast %61 : vector<1x128x1xf32> to vector<1x128x128xf32>
    %63 = arith.subf %59, %62 : vector<1x128x128xf32>
    %64 = math.exp %63 : vector<1x128x128xf32>
    %cst_33 = arith.constant dense<0.000000e+00> : vector<1x128xf32>
    %65 = vector.multi_reduction <add>, %64, %cst_33 [2] : vector<1x128x128xf32> to vector<1x128xf32>
    %66 = vector.shape_cast %65 : vector<1x128xf32> to vector<1x128x1xf32>
    %67 = tpu.reciprocal %66 {approx = true} : vector<1x128x1xf32> -> vector<1x128x1xf32>
    %68 = vector.broadcast %67 : vector<1x128x1xf32> to vector<1x128x128xf32>
    %69 = arith.mulf %64, %68 : vector<1x128x128xf32>
    %70 = arith.truncf %69 : vector<1x128x128xf32> to vector<1x128x128xbf16>
    "tpu.trace_start"() <{level = 10 : i32, message = "bqk,bkd->bqd"}> : () -> ()
    %cst_34 = arith.constant dense<0.000000e+00> : vector<1x128x8xf32>
    %71 = tpu.matmul %70, %56, %cst_34 {dimension_numbers = #tpu.dot_dimension_numbers<[2], [1], [1], [2], [0, 0, 0, 1, 1, 2], [0], [0]>} : vector<1x128x128xbf16>, vector<1x128x8xbf16>, vector<1x128x8xf32> -> vector<1x128x8xf32>
    "tpu.trace_stop"() : () -> ()
    %72 = vector.shape_cast %71 : vector<1x128x8xf32> to vector<128x8xf32>
    %73 = arith.truncf %72 : vector<128x8xf32> to vector<128x8xbf16>
    %c0_35 = arith.constant 0 : index
    %c0_36 = arith.constant 0 : index
    %74 = vector.load %arg22[%c0_35, %c0_36] : memref<128x32xbf16, #tpu.memory_space<vmem>>, vector<128x8xbf16>
    tpu.vector_store %arg22[%c0_35, %c0_36], %73 {strides = array<i32>} : memref<128x32xbf16, #tpu.memory_space<vmem>>, vector<128x8xbf16>,
    %75 = vector.extract_strided_slice %48 {offsets = [0, 0, 8], sizes = [1, 128, 8], strides = [1, 1, 1]} : vector<1x128x32xf32> to vector<1x128x8xf32>
    %76 = arith.truncf %75 : vector<1x128x8xf32> to vector<1x128x8xbf16>
    %77 = vector.extract_strided_slice %49 {offsets = [0, 0, 8], sizes = [1, 128, 8], strides = [1, 1, 1]} : vector<1x128x32xf32> to vector<1x128x8xf32>
    %78 = arith.truncf %77 : vector<1x128x8xf32> to vector<1x128x8xbf16>
    %79 = vector.extract_strided_slice %50 {offsets = [0, 0, 8], sizes = [1, 128, 8], strides = [1, 1, 1]} : vector<1x128x32xf32> to vector<1x128x8xf32>
    %80 = arith.truncf %79 : vector<1x128x8xf32> to vector<1x128x8xbf16>
    "tpu.trace_start"() <{level = 10 : i32, message = "bqd,bkd->bqk"}> : () -> ()
    %cst_37 = arith.constant dense<0.000000e+00> : vector<1x128x128xf32>
    %81 = tpu.matmul %76, %78, %cst_37 {dimension_numbers = #tpu.dot_dimension_numbers<[2], [2], [1], [1], [0, 0, 0, 1, 1, 1], [0], [0]>} : vector<1x128x8xbf16>, vector<1x128x8xbf16>, vector<1x128x128xf32> -> vector<1x128x128xf32>
    "tpu.trace_stop"() : () -> ()
    %82 = vector.broadcast %7 : vector<1x1x128xf32> to vector<1x128x128xf32>
    %83 = arith.addf %81, %82 : vector<1x128x128xf32>
    %cst_38 = arith.constant dense<0xFF800000> : vector<1x128xf32>
    %84 = vector.multi_reduction <maximumf>, %83, %cst_38 [2] : vector<1x128x128xf32> to vector<1x128xf32>
    %85 = vector.shape_cast %84 : vector<1x128xf32> to vector<1x128x1xf32>
    %86 = vector.broadcast %85 : vector<1x128x1xf32> to vector<1x128x128xf32>
    %87 = arith.subf %83, %86 : vector<1x128x128xf32>
    %88 = math.exp %87 : vector<1x128x128xf32>
    %cst_39 = arith.constant dense<0.000000e+00> : vector<1x128xf32>
    %89 = vector.multi_reduction <add>, %88, %cst_39 [2] : vector<1x128x128xf32> to vector<1x128xf32>
    %90 = vector.shape_cast %89 : vector<1x128xf32> to vector<1x128x1xf32>
    %91 = tpu.reciprocal %90 {approx = true} : vector<1x128x1xf32> -> vector<1x128x1xf32>
    %92 = vector.broadcast %91 : vector<1x128x1xf32> to vector<1x128x128xf32>
    %93 = arith.mulf %88, %92 : vector<1x128x128xf32>
    %94 = arith.truncf %93 : vector<1x128x128xf32> to vector<1x128x128xbf16>
    "tpu.trace_start"() <{level = 10 : i32, message = "bqk,bkd->bqd"}> : () -> ()
    %cst_40 = arith.constant dense<0.000000e+00> : vector<1x128x8xf32>
    %95 = tpu.matmul %94, %80, %cst_40 {dimension_numbers = #tpu.dot_dimension_numbers<[2], [1], [1], [2], [0, 0, 0, 1, 1, 2], [0], [0]>} : vector<1x128x128xbf16>, vector<1x128x8xbf16>, vector<1x128x8xf32> -> vector<1x128x8xf32>
    "tpu.trace_stop"() : () -> ()
    %96 = vector.shape_cast %95 : vector<1x128x8xf32> to vector<128x8xf32>
    %97 = arith.truncf %96 : vector<128x8xf32> to vector<128x8xbf16>
    %c0_41 = arith.constant 0 : index
    %c8 = arith.constant 8 : index
    %98 = vector.load %arg22[%c0_41, %c8] : memref<128x32xbf16, #tpu.memory_space<vmem>>, vector<128x8xbf16>
    tpu.vector_store %arg22[%c0_41, %c8], %97 {strides = array<i32>} : memref<128x32xbf16, #tpu.memory_space<vmem>>, vector<128x8xbf16>,
    %99 = vector.extract_strided_slice %48 {offsets = [0, 0, 16], sizes = [1, 128, 8], strides = [1, 1, 1]} : vector<1x128x32xf32> to vector<1x128x8xf32>
    %100 = arith.truncf %99 : vector<1x128x8xf32> to vector<1x128x8xbf16>
    %101 = vector.extract_strided_slice %49 {offsets = [0, 0, 16], sizes = [1, 128, 8], strides = [1, 1, 1]} : vector<1x128x32xf32> to vector<1x128x8xf32>
    %102 = arith.truncf %101 : vector<1x128x8xf32> to vector<1x128x8xbf16>
    %103 = vector.extract_strided_slice %50 {offsets = [0, 0, 16], sizes = [1, 128, 8], strides = [1, 1, 1]} : vector<1x128x32xf32> to vector<1x128x8xf32>
    %104 = arith.truncf %103 : vector<1x128x8xf32> to vector<1x128x8xbf16>
    "tpu.trace_start"() <{level = 10 : i32, message = "bqd,bkd->bqk"}> : () -> ()
    %cst_42 = arith.constant dense<0.000000e+00> : vector<1x128x128xf32>
    %105 = tpu.matmul %100, %102, %cst_42 {dimension_numbers = #tpu.dot_dimension_numbers<[2], [2], [1], [1], [0, 0, 0, 1, 1, 1], [0], [0]>} : vector<1x128x8xbf16>, vector<1x128x8xbf16>, vector<1x128x128xf32> -> vector<1x128x128xf32>
    "tpu.trace_stop"() : () -> ()
    %106 = vector.broadcast %7 : vector<1x1x128xf32> to vector<1x128x128xf32>
    %107 = arith.addf %105, %106 : vector<1x128x128xf32>
    %cst_43 = arith.constant dense<0xFF800000> : vector<1x128xf32>
    %108 = vector.multi_reduction <maximumf>, %107, %cst_43 [2] : vector<1x128x128xf32> to vector<1x128xf32>
    %109 = vector.shape_cast %108 : vector<1x128xf32> to vector<1x128x1xf32>
    %110 = vector.broadcast %109 : vector<1x128x1xf32> to vector<1x128x128xf32>
    %111 = arith.subf %107, %110 : vector<1x128x128xf32>
    %112 = math.exp %111 : vector<1x128x128xf32>
    %cst_44 = arith.constant dense<0.000000e+00> : vector<1x128xf32>
    %113 = vector.multi_reduction <add>, %112, %cst_44 [2] : vector<1x128x128xf32> to vector<1x128xf32>
    %114 = vector.shape_cast %113 : vector<1x128xf32> to vector<1x128x1xf32>
    %115 = tpu.reciprocal %114 {approx = true} : vector<1x128x1xf32> -> vector<1x128x1xf32>
    %116 = vector.broadcast %115 : vector<1x128x1xf32> to vector<1x128x128xf32>
    %117 = arith.mulf %112, %116 : vector<1x128x128xf32>
    %118 = arith.truncf %117 : vector<1x128x128xf32> to vector<1x128x128xbf16>
    "tpu.trace_start"() <{level = 10 : i32, message = "bqk,bkd->bqd"}> : () -> ()
    %cst_45 = arith.constant dense<0.000000e+00> : vector<1x128x8xf32>
    %119 = tpu.matmul %118, %104, %cst_45 {dimension_numbers = #tpu.dot_dimension_numbers<[2], [1], [1], [2], [0, 0, 0, 1, 1, 2], [0], [0]>} : vector<1x128x128xbf16>, vector<1x128x8xbf16>, vector<1x128x8xf32> -> vector<1x128x8xf32>
    "tpu.trace_stop"() : () -> ()
    %120 = vector.shape_cast %119 : vector<1x128x8xf32> to vector<128x8xf32>
    %121 = arith.truncf %120 : vector<128x8xf32> to vector<128x8xbf16>
    %c0_46 = arith.constant 0 : index
    %c16 = arith.constant 16 : index
    %122 = vector.load %arg22[%c0_46, %c16] : memref<128x32xbf16, #tpu.memory_space<vmem>>, vector<128x8xbf16>
    tpu.vector_store %arg22[%c0_46, %c16], %121 {strides = array<i32>} : memref<128x32xbf16, #tpu.memory_space<vmem>>, vector<128x8xbf16>,
    %123 = vector.extract_strided_slice %48 {offsets = [0, 0, 24], sizes = [1, 128, 8], strides = [1, 1, 1]} : vector<1x128x32xf32> to vector<1x128x8xf32>
    %124 = arith.truncf %123 : vector<1x128x8xf32> to vector<1x128x8xbf16>
    %125 = vector.extract_strided_slice %49 {offsets = [0, 0, 24], sizes = [1, 128, 8], strides = [1, 1, 1]} : vector<1x128x32xf32> to vector<1x128x8xf32>
    %126 = arith.truncf %125 : vector<1x128x8xf32> to vector<1x128x8xbf16>
    %127 = vector.extract_strided_slice %50 {offsets = [0, 0, 24], sizes = [1, 128, 8], strides = [1, 1, 1]} : vector<1x128x32xf32> to vector<1x128x8xf32>
    %128 = arith.truncf %127 : vector<1x128x8xf32> to vector<1x128x8xbf16>
    "tpu.trace_start"() <{level = 10 : i32, message = "bqd,bkd->bqk"}> : () -> ()
    %cst_47 = arith.constant dense<0.000000e+00> : vector<1x128x128xf32>
    %129 = tpu.matmul %124, %126, %cst_47 {dimension_numbers = #tpu.dot_dimension_numbers<[2], [2], [1], [1], [0, 0, 0, 1, 1, 1], [0], [0]>} : vector<1x128x8xbf16>, vector<1x128x8xbf16>, vector<1x128x128xf32> -> vector<1x128x128xf32>
    "tpu.trace_stop"() : () -> ()
    %130 = vector.broadcast %7 : vector<1x1x128xf32> to vector<1x128x128xf32>
    %131 = arith.addf %129, %130 : vector<1x128x128xf32>
    %cst_48 = arith.constant dense<0xFF800000> : vector<1x128xf32>
    %132 = vector.multi_reduction <maximumf>, %131, %cst_48 [2] : vector<1x128x128xf32> to vector<1x128xf32>
    %133 = vector.shape_cast %132 : vector<1x128xf32> to vector<1x128x1xf32>
    %134 = vector.broadcast %133 : vector<1x128x1xf32> to vector<1x128x128xf32>
    %135 = arith.subf %131, %134 : vector<1x128x128xf32>
    %136 = math.exp %135 : vector<1x128x128xf32>
    %cst_49 = arith.constant dense<0.000000e+00> : vector<1x128xf32>
    %137 = vector.multi_reduction <add>, %136, %cst_49 [2] : vector<1x128x128xf32> to vector<1x128xf32>
    %138 = vector.shape_cast %137 : vector<1x128xf32> to vector<1x128x1xf32>
    %139 = tpu.reciprocal %138 {approx = true} : vector<1x128x1xf32> -> vector<1x128x1xf32>
    %140 = vector.broadcast %139 : vector<1x128x1xf32> to vector<1x128x128xf32>
    %141 = arith.mulf %136, %140 : vector<1x128x128xf32>
    %142 = arith.truncf %141 : vector<1x128x128xf32> to vector<1x128x128xbf16>
    "tpu.trace_start"() <{level = 10 : i32, message = "bqk,bkd->bqd"}> : () -> ()
    %cst_50 = arith.constant dense<0.000000e+00> : vector<1x128x8xf32>
    %143 = tpu.matmul %142, %128, %cst_50 {dimension_numbers = #tpu.dot_dimension_numbers<[2], [1], [1], [2], [0, 0, 0, 1, 1, 2], [0], [0]>} : vector<1x128x128xbf16>, vector<1x128x8xbf16>, vector<1x128x8xf32> -> vector<1x128x8xf32>
    "tpu.trace_stop"() : () -> ()
    %144 = vector.shape_cast %143 : vector<1x128x8xf32> to vector<128x8xf32>
    %145 = arith.truncf %144 : vector<128x8xf32> to vector<128x8xbf16>
    %c0_51 = arith.constant 0 : index
    %c24 = arith.constant 24 : index
    %146 = vector.load %arg22[%c0_51, %c24] : memref<128x32xbf16, #tpu.memory_space<vmem>>, vector<128x8xbf16>
    tpu.vector_store %arg22[%c0_51, %c24], %145 {strides = array<i32>} : memref<128x32xbf16, #tpu.memory_space<vmem>>, vector<128x8xbf16>,
    %c0_52 = arith.constant 0 : index
    %c0_53 = arith.constant 0 : index
    %147 = vector.load %arg22[%c0_52, %c0_53] : memref<128x32xbf16, #tpu.memory_space<vmem>>, vector<128x32xbf16>
    %c0_54 = arith.constant 0 : index
    %c0_55 = arith.constant 0 : index
    %148 = vector.load %arg11[%c0_54, %c0_55] : memref<32x32xbf16, #tpu.memory_space<vmem>>, vector<32x32xbf16>
    %cst_56 = arith.constant dense<0.000000e+00> : vector<128x32xf32>
    %149 = tpu.matmul %147, %148, %cst_56 {dimension_numbers = #tpu.dot_dimension_numbers<[1], [0], [0], [1], [0, 0, 1, 1], [], []>} : vector<128x32xbf16>, vector<32x32xbf16>, vector<128x32xf32> -> vector<128x32xf32>
    %c0_57 = arith.constant 0 : index
    %c0_58 = arith.constant 0 : index
    %150 = vector.load %arg12[%c0_57, %c0_58] : memref<1x32xf32, #tpu.memory_space<vmem>>, vector<1x32xf32>
    %151 = vector.broadcast %150 : vector<1x32xf32> to vector<128x32xf32>
    %152 = arith.addf %149, %151 : vector<128x32xf32>
    %153 = arith.addf %152, %1 : vector<128x32xf32>
    %c0_59 = arith.constant 0 : index
    %c0_60 = arith.constant 0 : index
    %154 = vector.load %arg13[%c0_59, %c0_60] : memref<1x32xf32, #tpu.memory_space<vmem>>, vector<1x32xf32>
    %c0_61 = arith.constant 0 : index
    %c0_62 = arith.constant 0 : index
    %155 = vector.load %arg14[%c0_61, %c0_62] : memref<1x32xf32, #tpu.memory_space<vmem>>, vector<1x32xf32>
    %cst_63 = arith.constant dense<0.000000e+00> : vector<128xf32>
    %156 = vector.multi_reduction <add>, %153, %cst_63 [1] : vector<128x32xf32> to vector<128xf32>
    %157 = vector.shape_cast %156 : vector<128xf32> to vector<128x1xf32>
    %cst_64 = arith.constant 3.200000e+01 : f32
    %158 = vector.broadcast %cst_64 : f32 to vector<128x1xf32>
    %159 = arith.divf %157, %158 : vector<128x1xf32>
    %160 = vector.broadcast %159 : vector<128x1xf32> to vector<128x32xf32>
    %161 = arith.subf %153, %160 : vector<128x32xf32>
    %162 = arith.mulf %161, %161 : vector<128x32xf32>
    %cst_65 = arith.constant dense<0.000000e+00> : vector<128xf32>
    %163 = vector.multi_reduction <add>, %162, %cst_65 [1] : vector<128x32xf32> to vector<128xf32>
    %164 = vector.shape_cast %163 : vector<128xf32> to vector<128x1xf32>
    %cst_66 = arith.constant 3.200000e+01 : f32
    %165 = vector.broadcast %cst_66 : f32 to vector<128x1xf32>
    %166 = arith.divf %164, %165 : vector<128x1xf32>
    %167 = vector.broadcast %159 : vector<128x1xf32> to vector<128x32xf32>
    %168 = arith.subf %153, %167 : vector<128x32xf32>
    %cst_67 = arith.constant 9.99999997E-7 : f32
    %169 = vector.broadcast %cst_67 : f32 to vector<128x1xf32>
    %170 = arith.addf %166, %169 : vector<128x1xf32>
    %171 = math.rsqrt %170 : vector<128x1xf32>
    %172 = vector.broadcast %171 : vector<128x1xf32> to vector<128x32xf32>
    %173 = arith.mulf %168, %172 : vector<128x32xf32>
    %174 = vector.broadcast %154 : vector<1x32xf32> to vector<128x32xf32>
    %175 = arith.mulf %173, %174 : vector<128x32xf32>
    %176 = vector.broadcast %155 : vector<1x32xf32> to vector<128x32xf32>
    %177 = arith.addf %175, %176 : vector<128x32xf32>
    %178 = arith.truncf %177 : vector<128x32xf32> to vector<128x32xbf16>
    %c0_68 = arith.constant 0 : index
    %c0_69 = arith.constant 0 : index
    %179 = vector.load %arg15[%c0_68, %c0_69] : memref<32x64xbf16, #tpu.memory_space<vmem>>, vector<32x64xbf16>
    %cst_70 = arith.constant dense<0.000000e+00> : vector<128x64xf32>
    %180 = tpu.matmul %178, %179, %cst_70 {dimension_numbers = #tpu.dot_dimension_numbers<[1], [0], [0], [1], [0, 0, 1, 1], [], []>} : vector<128x32xbf16>, vector<32x64xbf16>, vector<128x64xf32> -> vector<128x64xf32>
    %c0_71 = arith.constant 0 : index
    %c0_72 = arith.constant 0 : index
    %181 = vector.load %arg16[%c0_71, %c0_72] : memref<1x64xf32, #tpu.memory_space<vmem>>, vector<1x64xf32>
    %182 = vector.broadcast %181 : vector<1x64xf32> to vector<128x64xf32>
    %183 = arith.addf %180, %182 : vector<128x64xf32>
    %cst_73 = arith.constant 0.000000e+00 : f32
    %184 = vector.broadcast %cst_73 : f32 to vector<128x64xf32>
    %185 = arith.maximumf %183, %184 : vector<128x64xf32>
    %186 = arith.truncf %185 : vector<128x64xf32> to vector<128x64xbf16>
    %c0_74 = arith.constant 0 : index
    %c0_75 = arith.constant 0 : index
    %187 = vector.load %arg17[%c0_74, %c0_75] : memref<64x32xbf16, #tpu.memory_space<vmem>>, vector<64x32xbf16>
    %cst_76 = arith.constant dense<0.000000e+00> : vector<128x32xf32>
    %188 = tpu.matmul %186, %187, %cst_76 {dimension_numbers = #tpu.dot_dimension_numbers<[1], [0], [0], [1], [0, 0, 1, 1], [], []>} : vector<128x64xbf16>, vector<64x32xbf16>, vector<128x32xf32> -> vector<128x32xf32>
    %c0_77 = arith.constant 0 : index
    %c0_78 = arith.constant 0 : index
    %189 = vector.load %arg18[%c0_77, %c0_78] : memref<1x32xf32, #tpu.memory_space<vmem>>, vector<1x32xf32>
    %190 = vector.broadcast %189 : vector<1x32xf32> to vector<128x32xf32>
    %191 = arith.addf %188, %190 : vector<128x32xf32>
    %192 = arith.addf %191, %153 : vector<128x32xf32>
    %c0_79 = arith.constant 0 : index
    %c0_80 = arith.constant 0 : index
    %193 = vector.load %arg19[%c0_79, %c0_80] : memref<1x32xf32, #tpu.memory_space<vmem>>, vector<1x32xf32>
    %c0_81 = arith.constant 0 : index
    %c0_82 = arith.constant 0 : index
    %194 = vector.load %arg20[%c0_81, %c0_82] : memref<1x32xf32, #tpu.memory_space<vmem>>, vector<1x32xf32>
    %cst_83 = arith.constant dense<0.000000e+00> : vector<128xf32>
    %195 = vector.multi_reduction <add>, %192, %cst_83 [1] : vector<128x32xf32> to vector<128xf32>
    %196 = vector.shape_cast %195 : vector<128xf32> to vector<128x1xf32>
    %cst_84 = arith.constant 3.200000e+01 : f32
    %197 = vector.broadcast %cst_84 : f32 to vector<128x1xf32>
    %198 = arith.divf %196, %197 : vector<128x1xf32>
    %199 = vector.broadcast %198 : vector<128x1xf32> to vector<128x32xf32>
    %200 = arith.subf %192, %199 : vector<128x32xf32>
    %201 = arith.mulf %200, %200 : vector<128x32xf32>
    %cst_85 = arith.constant dense<0.000000e+00> : vector<128xf32>
    %202 = vector.multi_reduction <add>, %201, %cst_85 [1] : vector<128x32xf32> to vector<128xf32>
    %203 = vector.shape_cast %202 : vector<128xf32> to vector<128x1xf32>
    %cst_86 = arith.constant 3.200000e+01 : f32
    %204 = vector.broadcast %cst_86 : f32 to vector<128x1xf32>
    %205 = arith.divf %203, %204 : vector<128x1xf32>
    %206 = vector.broadcast %198 : vector<128x1xf32> to vector<128x32xf32>
    %207 = arith.subf %192, %206 : vector<128x32xf32>
    %cst_87 = arith.constant 9.99999997E-7 : f32
    %208 = vector.broadcast %cst_87 : f32 to vector<128x1xf32>
    %209 = arith.addf %205, %208 : vector<128x1xf32>
    %210 = math.rsqrt %209 : vector<128x1xf32>
    %211 = vector.broadcast %210 : vector<128x1xf32> to vector<128x32xf32>
    %212 = arith.mulf %207, %211 : vector<128x32xf32>
    %213 = vector.broadcast %193 : vector<1x32xf32> to vector<128x32xf32>
    %214 = arith.mulf %212, %213 : vector<128x32xf32>
    %215 = vector.broadcast %194 : vector<1x32xf32> to vector<128x32xf32>
    %216 = arith.addf %214, %215 : vector<128x32xf32>
    %217 = vector.shape_cast %216 : vector<128x32xf32> to vector<1x128x32xf32>
    %c0_88 = arith.constant 0 : index
    %c0_89 = arith.constant 0 : index
    %c0_90 = arith.constant 0 : index
    %218 = vector.load %arg21[%c0_88, %c0_89, %c0_90] : memref<1x128x32xf32, #tpu.memory_space<vmem>>, vector<1x128x32xf32>
    tpu.vector_store %arg21[%c0_88, %c0_89, %c0_90], %217 {strides = array<i32>} : memref<1x128x32xf32, #tpu.memory_space<vmem>>, vector<1x128x32xf32>,
    return
  }
  func.func @transform_0(%arg0: i32) -> (i32, i32, i32) {
    %c0_i32 = arith.constant 0 : i32
    %c0_i32_0 = arith.constant 0 : i32
    %c0_i32_1 = arith.constant 0 : i32
    return %arg0, %c0_i32, %c0_i32_0 : i32, i32, i32
  }
  func.func @transform_1(%arg0: i32) -> (i32, i32, i32) {
    %c0_i32 = arith.constant 0 : i32
    %c0_i32_0 = arith.constant 0 : i32
    %c0_i32_1 = arith.constant 0 : i32
    return %arg0, %c0_i32, %c0_i32_0 : i32, i32, i32
  }
  func.func @transform_2(%arg0: i32) -> (i32, i32) {
    %c0_i32 = arith.constant 0 : i32
    %c0_i32_0 = arith.constant 0 : i32
    %c0_i32_1 = arith.constant 0 : i32
    return %c0_i32, %c0_i32_0 : i32, i32
  }
  func.func @transform_3(%arg0: i32) -> (i32, i32) {
    %c0_i32 = arith.constant 0 : i32
    %c0_i32_0 = arith.constant 0 : i32
    %c0_i32_1 = arith.constant 0 : i32
    return %c0_i32, %c0_i32_0 : i32, i32
  }
  func.func @transform_4(%arg0: i32) -> (i32, i32) {
    %c0_i32 = arith.constant 0 : i32
    %c0_i32_0 = arith.constant 0 : i32
    %c0_i32_1 = arith.constant 0 : i32
    return %c0_i32, %c0_i32_0 : i32, i32
  }
  func.func @transform_5(%arg0: i32) -> (i32, i32) {
    %c0_i32 = arith.constant 0 : i32
    %c0_i32_0 = arith.constant 0 : i32
    %c0_i32_1 = arith.constant 0 : i32
    return %c0_i32, %c0_i32_0 : i32, i32
  }
  func.func @transform_6(%arg0: i32) -> (i32, i32) {
    %c0_i32 = arith.constant 0 : i32
    %c0_i32_0 = arith.constant 0 : i32
    %c0_i32_1 = arith.constant 0 : i32
    return %c0_i32, %c0_i32_0 : i32, i32
  }
  func.func @transform_7(%arg0: i32) -> (i32, i32) {
    %c0_i32 = arith.constant 0 : i32
    %c0_i32_0 = arith.constant 0 : i32
    %c0_i32_1 = arith.constant 0 : i32
    return %c0_i32, %c0_i32_0 : i32, i32
  }
  func.func @transform_8(%arg0: i32) -> (i32, i32) {
    %c0_i32 = arith.constant 0 : i32
    %c0_i32_0 = arith.constant 0 : i32
    %c0_i32_1 = arith.constant 0 : i32
    return %c0_i32, %c0_i32_0 : i32, i32
  }
  func.func @transform_9(%arg0: i32) -> (i32, i32) {
    %c0_i32 = arith.constant 0 : i32
    %c0_i32_0 = arith.constant 0 : i32
    %c0_i32_1 = arith.constant 0 : i32
    return %c0_i32, %c0_i32_0 : i32, i32
  }
  func.func @transform_10(%arg0: i32) -> (i32, i32) {
    %c0_i32 = arith.constant 0 : i32
    %c0_i32_0 = arith.constant 0 : i32
    %c0_i32_1 = arith.constant 0 : i32
    return %c0_i32, %c0_i32_0 : i32, i32
  }
  func.func @transform_11(%arg0: i32) -> (i32, i32) {
    %c0_i32 = arith.constant 0 : i32
    %c0_i32_0 = arith.constant 0 : i32
    %c0_i32_1 = arith.constant 0 : i32
    return %c0_i32, %c0_i32_0 : i32, i32
  }
  func.func @transform_12(%arg0: i32) -> (i32, i32) {
    %c0_i32 = arith.constant 0 : i32
    %c0_i32_0 = arith.constant 0 : i32
    %c0_i32_1 = arith.constant 0 : i32
    return %c0_i32, %c0_i32_0 : i32, i32
  }
  func.func @transform_13(%arg0: i32) -> (i32, i32) {
    %c0_i32 = arith.constant 0 : i32
    %c0_i32_0 = arith.constant 0 : i32
    %c0_i32_1 = arith.constant 0 : i32
    return %c0_i32, %c0_i32_0 : i32, i32
  }
  func.func @transform_14(%arg0: i32) -> (i32, i32) {
    %c0_i32 = arith.constant 0 : i32
    %c0_i32_0 = arith.constant 0 : i32
    %c0_i32_1 = arith.constant 0 : i32
    return %c0_i32, %c0_i32_0 : i32, i32
  }
  func.func @transform_15(%arg0: i32) -> (i32, i32) {
    %c0_i32 = arith.constant 0 : i32
    %c0_i32_0 = arith.constant 0 : i32
    %c0_i32_1 = arith.constant 0 : i32
    return %c0_i32, %c0_i32_0 : i32, i32
  }
  func.func @transform_16(%arg0: i32) -> (i32, i32) {
    %c0_i32 = arith.constant 0 : i32
    %c0_i32_0 = arith.constant 0 : i32
    %c0_i32_1 = arith.constant 0 : i32
    return %c0_i32, %c0_i32_0 : i32, i32
  }
  func.func @transform_17(%arg0: i32) -> (i32, i32) {
    %c0_i32 = arith.constant 0 : i32
    %c0_i32_0 = arith.constant 0 : i32
    %c0_i32_1 = arith.constant 0 : i32
    return %c0_i32, %c0_i32_0 : i32, i32
  }
  func.func @transform_18(%arg0: i32) -> (i32, i32) {
    %c0_i32 = arith.constant 0 : i32
    %c0_i32_0 = arith.constant 0 : i32
    %c0_i32_1 = arith.constant 0 : i32
    return %c0_i32, %c0_i32_0 : i32, i32
  }
  func.func @transform_19(%arg0: i32) -> (i32, i32) {
    %c0_i32 = arith.constant 0 : i32
    %c0_i32_0 = arith.constant 0 : i32
    %c0_i32_1 = arith.constant 0 : i32
    return %c0_i32, %c0_i32_0 : i32, i32
  }
  func.func @transform_20(%arg0: i32) -> (i32, i32, i32) {
    %c0_i32 = arith.constant 0 : i32
    %c0_i32_0 = arith.constant 0 : i32
    %c0_i32_1 = arith.constant 0 : i32
    return %arg0, %c0_i32, %c0_i32_0 : i32, i32, i32
  }
}

module attributes {stable_mosaic.version = 11 : i64} {
  func.func @label_attn_kernel(%arg0: i32, %arg1: i32, %arg2: memref<2x128x32xf32, #tpu.memory_space<vmem>>, %arg3: memref<32x8xbf16, #tpu.memory_space<vmem>>, %arg4: memref<32x8xbf16, #tpu.memory_space<vmem>>, %arg5: memref<1x8xf32, #tpu.memory_space<vmem>>, %arg6: memref<2x8xf32, #tpu.memory_space<vmem>>, %arg7: memref<2x128x8xf32, #tpu.memory_space<vmem>>) attributes {dimension_semantics = [#tpu.dimension_semantics<parallel>, #tpu.dimension_semantics<parallel>], iteration_bounds = array<i64: 1, 1>, scalar_prefetch = 0 : i64, scratch_operands = 0 : i64, tpu.core_type = #tpu.core_type<tc>, window_params = [{transform_indices = @transform_0, window_bounds = array<i64: 2, 128, 32>}, {transform_indices = @transform_1, window_bounds = array<i64: 32, 8>}, {transform_indices = @transform_2, window_bounds = array<i64: 32, 8>}, {transform_indices = @transform_3, window_bounds = array<i64: 1, 8>}, {transform_indices = @transform_4, window_bounds = array<i64: 2, 8>}, {transform_indices = @transform_5, window_bounds = array<i64: 2, 128, 8>}]} {
    %c0 = arith.constant 0 : index
    %c0_0 = arith.constant 0 : index
    %c0_1 = arith.constant 0 : index
    %0 = vector.load %arg2[%c0, %c0_0, %c0_1] : memref<2x128x32xf32, #tpu.memory_space<vmem>>, vector<2x128x32xf32>
    %1 = vector.shape_cast %0 : vector<2x128x32xf32> to vector<256x32xf32>
    %2 = arith.truncf %1 : vector<256x32xf32> to vector<256x32xbf16>
    %c0_2 = arith.constant 0 : index
    %c0_3 = arith.constant 0 : index
    %3 = vector.load %arg3[%c0_2, %c0_3] : memref<32x8xbf16, #tpu.memory_space<vmem>>, vector<32x8xbf16>
    %cst = arith.constant dense<0.000000e+00> : vector<256x8xf32>
    %4 = tpu.matmul %2, %3, %cst {dimension_numbers = #tpu.dot_dimension_numbers<[1], [0], [0], [1], [0, 0, 1, 1], [], []>} : vector<256x32xbf16>, vector<32x8xbf16>, vector<256x8xf32> -> vector<256x8xf32>
    %5 = vector.shape_cast %4 : vector<256x8xf32> to vector<2x128x8xf32>
    %6 = tpu.iota {dimensions = array<i32: 0>} : vector<128x8xi32>
    %c16_i32 = arith.constant 16 : i32
    %7 = vector.broadcast %c16_i32 : i32 to vector<128x8xi32>
    %8 = arith.cmpi sge, %6, %7 : vector<128x8xi32>
    %cst_4 = arith.constant -9.99999984E+17 : f32
    %cst_5 = arith.constant 0.000000e+00 : f32
    %9 = vector.broadcast %cst_4 : f32 to vector<128x8xf32>
    %10 = vector.broadcast %cst_5 : f32 to vector<128x8xf32>
    %11 = arith.select %8, %9, %10 : vector<128x8xi1>, vector<128x8xf32>
    %12 = vector.shape_cast %11 : vector<128x8xf32> to vector<1x128x8xf32>
    %13 = vector.broadcast %12 : vector<1x128x8xf32> to vector<2x128x8xf32>
    %14 = arith.addf %5, %13 : vector<2x128x8xf32>
    %cst_6 = arith.constant dense<0xFF800000> : vector<2x8xf32>
    %15 = vector.multi_reduction <maximumf>, %14, %cst_6 [1] : vector<2x128x8xf32> to vector<2x8xf32>
    %16 = vector.shape_cast %15 : vector<2x8xf32> to vector<2x1x8xf32>
    %17 = vector.broadcast %16 : vector<2x1x8xf32> to vector<2x128x8xf32>
    %18 = arith.subf %14, %17 : vector<2x128x8xf32>
    %19 = math.exp %18 : vector<2x128x8xf32>
    %cst_7 = arith.constant dense<0.000000e+00> : vector<2x8xf32>
    %20 = vector.multi_reduction <add>, %19, %cst_7 [1] : vector<2x128x8xf32> to vector<2x8xf32>
    %21 = vector.shape_cast %20 : vector<2x8xf32> to vector<2x1x8xf32>
    %22 = vector.broadcast %21 : vector<2x1x8xf32> to vector<2x128x8xf32>
    %23 = arith.divf %19, %22 : vector<2x128x8xf32>
    %c0_8 = arith.constant 0 : index
    %c0_9 = arith.constant 0 : index
    %24 = vector.load %arg4[%c0_8, %c0_9] : memref<32x8xbf16, #tpu.memory_space<vmem>>, vector<32x8xbf16>
    %cst_10 = arith.constant dense<0.000000e+00> : vector<256x8xf32>
    %25 = tpu.matmul %2, %24, %cst_10 {dimension_numbers = #tpu.dot_dimension_numbers<[1], [0], [0], [1], [0, 0, 1, 1], [], []>} : vector<256x32xbf16>, vector<32x8xbf16>, vector<256x8xf32> -> vector<256x8xf32>
    %26 = vector.shape_cast %25 : vector<256x8xf32> to vector<2x128x8xf32>
    %27 = arith.mulf %23, %26 : vector<2x128x8xf32>
    %cst_11 = arith.constant dense<0.000000e+00> : vector<2x8xf32>
    %28 = vector.multi_reduction <add>, %27, %cst_11 [1] : vector<2x128x8xf32> to vector<2x8xf32>
    %c0_12 = arith.constant 0 : index
    %c0_13 = arith.constant 0 : index
    %29 = vector.load %arg5[%c0_12, %c0_13] : memref<1x8xf32, #tpu.memory_space<vmem>>, vector<1x8xf32>
    %30 = vector.broadcast %29 : vector<1x8xf32> to vector<2x8xf32>
    %31 = arith.addf %28, %30 : vector<2x8xf32>
    %c0_14 = arith.constant 0 : index
    %c0_15 = arith.constant 0 : index
    %32 = vector.load %arg6[%c0_14, %c0_15] : memref<2x8xf32, #tpu.memory_space<vmem>>, vector<2x8xf32>
    tpu.vector_store %arg6[%c0_14, %c0_15], %31 {strides = array<i32>} : memref<2x8xf32, #tpu.memory_space<vmem>>, vector<2x8xf32>,
    %c0_16 = arith.constant 0 : index
    %c0_17 = arith.constant 0 : index
    %c0_18 = arith.constant 0 : index
    %33 = vector.load %arg7[%c0_16, %c0_17, %c0_18] : memref<2x128x8xf32, #tpu.memory_space<vmem>>, vector<2x128x8xf32>
    tpu.vector_store %arg7[%c0_16, %c0_17, %c0_18], %23 {strides = array<i32>} : memref<2x128x8xf32, #tpu.memory_space<vmem>>, vector<2x128x8xf32>,
    return
  }
  func.func @transform_0(%arg0: i32, %arg1: i32) -> (i32, i32, i32) {
    %c0_i32 = arith.constant 0 : i32
    %c0_i32_0 = arith.constant 0 : i32
    %c0_i32_1 = arith.constant 0 : i32
    return %arg0, %c0_i32, %c0_i32_0 : i32, i32, i32
  }
  func.func @transform_1(%arg0: i32, %arg1: i32) -> (i32, i32) {
    %c0_i32 = arith.constant 0 : i32
    %c0_i32_0 = arith.constant 0 : i32
    return %c0_i32, %arg1 : i32, i32
  }
  func.func @transform_2(%arg0: i32, %arg1: i32) -> (i32, i32) {
    %c0_i32 = arith.constant 0 : i32
    %c0_i32_0 = arith.constant 0 : i32
    return %c0_i32, %arg1 : i32, i32
  }
  func.func @transform_3(%arg0: i32, %arg1: i32) -> (i32, i32) {
    %c0_i32 = arith.constant 0 : i32
    %c0_i32_0 = arith.constant 0 : i32
    return %c0_i32, %arg1 : i32, i32
  }
  func.func @transform_4(%arg0: i32, %arg1: i32) -> (i32, i32) {
    %c0_i32 = arith.constant 0 : i32
    return %arg0, %arg1 : i32, i32
  }
  func.func @transform_5(%arg0: i32, %arg1: i32) -> (i32, i32, i32) {
    %c0_i32 = arith.constant 0 : i32
    %c0_i32_0 = arith.constant 0 : i32
    return %arg0, %c0_i32, %arg1 : i32, i32, i32
  }
}

</mosaic_0001>

<bundles_post_ra>
// kernel: transformer_attn_forward.5
= control target key start
LH: loop header
LB: loop body
LE: loop exit
PB: predicated region body
PF: predicated region fallthrough
CT: control target
= control target key end

     0   :  { %vm84_vm0 = vcmask 261120   ;;  %vm375_vm1 = vcmask 64512   ;;  %vm949_vm2 = vcmask 1041409   ;;  %vm952_vm3 = vcmask 58368   ;;  %s2045_s1 = inlined_call_operand.vmem [shape: bf16[32,8], index: 1, kind: input, shape index: {}]   ;;  %s2046_s0 = inlined_call_operand.vmem [shape: f32[2,128,32], index: 0, kind: input, shape index: {}]   ;;  %s2047_s2 = inlined_call_operand.vmem [shape: bf16[32,8], index: 2, kind: input, shape index: {}]   ;;  %s2048_s5 = inlined_call_operand.vmem [shape: f32[2,128,8], index: 5, kind: output, shape index: {1}]   ;;  %s2049_s3 = inlined_call_operand.vmem [shape: f32[1,8], index: 3, kind: input, shape index: {}]   ;;  %s2050_s4 = inlined_call_operand.vmem [shape: f32[2,8], index: 4, kind: output, shape index: {0}]  }
   0x1   :  { %v1139_v0 = vld [vmem:[%s2045_s1] sm:$0xff]   ;;  %v1140_v1 = vld [vmem:[%s2045_s1 + $0x8] sm:$0xff]   ;;  %v22_v5 = vld [vmem:[%s2046_s0 + $0x10] sm:$0xff] }
   0x2   :  { %1067 = vmatprep.subr.bf16.mxu0 %v1139_v0  ;;  %v20_v2 = vld [vmem:[%s2046_s0] sm:$0xff]  ;;  %v21_v3 = vld [vmem:[%s2046_s0 + $0x8] sm:$0xff]  ;;  %v23_v6 = vld [vmem:[%s2046_s0 + $0x18] sm:$0xff] }
   0x3   :  { %1068 = vmatpush3.bf16.msra.mxu0 %v1139_v0  ;;  %v52_v4 = vpack.c.bf16 %v21_v3, %v20_v2  ;;  %v24_v7 = vld [vmem:[%s2046_s0 + $0x20] sm:$0xff]  ;;  %v25_v8 = vld [vmem:[%s2046_s0 + $0x28] sm:$0xff]  ;;  %v53_v9 = vpack.c.bf16 %v23_v6, %v22_v5  ;;  %v26_v11 = vld [vmem:[%s2046_s0 + $0x30] sm:$0xff] }
   0x4   :  { %1069 = vmatprep.subr.bf16.mxu0 %v1140_v1  ;;  %v54_v10 = vpack.c.bf16 %v25_v8, %v24_v7  ;;  %v27_v12 = vld [vmem:[%s2046_s0 + $0x38] sm:$0xff]  ;;  %v28_v13 = vld [vmem:[%s2046_s0 + $0x40] sm:$0xff]  ;;  %v29_v14 = vld [vmem:[%s2046_s0 + $0x48] sm:$0xff] }
   0x5   :  { %1071 = vmatprep.mubr.msk.bf16.mxu0 %vm84_vm0, %v52_v4  ;;  %1107 = vmatprep.mubr.msk.bf16.mxu1 %vm84_vm0, %v52_v4  ;;  %v1141_v15 = vld [vmem:[%s2047_s2] sm:$0xff]   ;;  %v55_v16 = vpack.c.bf16 %v27_v12, %v26_v11  ;;  %v1142_v17 = vld [vmem:[%s2047_s2 + $0x8] sm:$0xff]   ;;  %v56_v18 = vpack.c.bf16 %v29_v14, %v28_v13  ;;  %v30_v19 = vld [vmem:[%s2046_s0 + $0x50] sm:$0xff] }
   0x6   :  { %1103 = vmatprep.subr.bf16.mxu1 %v1141_v15  ;;  %v31_v20 = vld [vmem:[%s2046_s0 + $0x58] sm:$0xff]  ;;  %v32_v21 = vld [vmem:[%s2046_s0 + $0x60] sm:$0xff]  ;;  %v33_v22 = vld [vmem:[%s2046_s0 + $0x68] sm:$0xff] }
   0x7   :  { %1070 = vmatpush3.bf16.msra.mxu0 %v1140_v1  ;;  %1104 = vmatpush3.bf16.msra.mxu1 %v1141_v15  ;;  %v57_v23 = vpack.c.bf16 %v31_v20, %v30_v19  ;;  %v58_v24 = vpack.c.bf16 %v33_v22, %v32_v21  ;;  %v34_v25 = vld [vmem:[%s2046_s0 + $0x70] sm:$0xff]  ;;  %v35_v26 = vld [vmem:[%s2046_s0 + $0x78] sm:$0xff]  ;;  %v36_v27 = vld [vmem:[%s2046_s0 + $0x80] sm:$0xff] }
   0x8   :  { %1105 = vmatprep.subr.bf16.mxu1 %v1142_v17  ;;  %v37_v28 = vld [vmem:[%s2046_s0 + $0x88] sm:$0xff]  ;;  %v59_v29 = vpack.c.bf16 %v35_v26, %v34_v25  ;;  %v38_v31 = vld [vmem:[%s2046_s0 + $0x90] sm:$0xff]  ;;  %v39_v32 = vld [vmem:[%s2046_s0 + $0x98] sm:$0xff] }
   0x9   :  { %v60_v30 = vpack.c.bf16 %v37_v28, %v36_v27  ;;  %v40_v33 = vld [vmem:[%s2046_s0 + $0xa0] sm:$0xff]  ;;  %v41_v34 = vld [vmem:[%s2046_s0 + $0xa8] sm:$0xff]  ;;  %v61_v35 = vpack.c.bf16 %v39_v32, %v38_v31  ;;  %v42_v37 = vld [vmem:[%s2046_s0 + $0xb0] sm:$0xff] }
   0xa   :  { %1072 = vmatmul.mubr.msk.bf16.vlgmr.msra.gmra.mrb[0].mxu0 %vm84_vm0, %v53_v9  ;;  %v62_v36 = vpack.c.bf16 %v41_v34, %v40_v33  ;;  %v43_v38 = vld [vmem:[%s2046_s0 + $0xb8] sm:$0xff]  ;;  %v44_v39 = vld [vmem:[%s2046_s0 + $0xc0] sm:$0xff]  ;;  %v45_v40 = vld [vmem:[%s2046_s0 + $0xc8] sm:$0xff] }
   0xb   :  { %1075 = vmatprep.mubr.msk.bf16.mxu0 %vm84_vm0, %v54_v10  ;;  %1106 = vmatpush3.bf16.msra.mxu1 %v1142_v17  ;;  %v63_v41 = vpack.c.bf16 %v43_v38, %v42_v37  ;;  %v64_v42 = vpack.c.bf16 %v45_v40, %v44_v39  ;;  %v46_v43 = vld [vmem:[%s2046_s0 + $0xd0] sm:$0xff]  ;;  %v47_v44 = vld [vmem:[%s2046_s0 + $0xd8] sm:$0xff]  ;;  %v48_v45 = vld [vmem:[%s2046_s0 + $0xe0] sm:$0xff] }
   0xc   :  { %v49_v46 = vld [vmem:[%s2046_s0 + $0xe8] sm:$0xff]  ;;  %v65_v47 = vpack.c.bf16 %v47_v44, %v46_v43  ;;  %v50_v49 = vld [vmem:[%s2046_s0 + $0xf0] sm:$0xff]  ;;  %v51_v50 = vld [vmem:[%s2046_s0 + $0xf8] sm:$0xff] }
   0xd   :  { %v66_v48 = vpack.c.bf16 %v49_v46, %v48_v45  ;;  %v67_v51 = vpack.c.bf16 %v51_v50, %v50_v49 }
   0xe   :  { %1108 = vmatmul.mubr.msk.bf16.vlgmr.msra.gmra.mrb[0].mxu1 %vm84_vm0, %v53_v9 }
   0xf   :  { %1111 = vmatprep.mubr.msk.bf16.mxu1 %vm84_vm0, %v54_v10 }
  0x12   :  { %1076 = vmatmul.mubr.msk.bf16.gmra.mrb[4].mxu0 %vm84_vm0, %v55_v16 }
  0x13   :  { %1079 = vmatprep.mubr.msk.bf16.mxu0 %vm84_vm0, %v56_v18 }
  0x16   :  { %1112 = vmatmul.mubr.msk.bf16.gmra.mrb[4].mxu1 %vm84_vm0, %v55_v16 }
  0x17   :  { %1115 = vmatprep.mubr.msk.bf16.mxu1 %vm84_vm0, %v56_v18 }
  0x1a   :  { %1080 = vmatmul.mubr.msk.bf16.gmra.mrb[8].mxu0 %vm84_vm0, %v57_v23 }
  0x1b   :  { %1083 = vmatprep.mubr.msk.bf16.mxu0 %vm84_vm0, %v58_v24 }
  0x1e   :  { %1116 = vmatmul.mubr.msk.bf16.gmra.mrb[8].mxu1 %vm84_vm0, %v57_v23 }
  0x1f   :  { %1119 = vmatprep.mubr.msk.bf16.mxu1 %vm84_vm0, %v58_v24 }
  0x22   :  { %1084 = vmatmul.mubr.msk.bf16.gmra.mrb[12].mxu0 %vm84_vm0, %v59_v29 }
  0x23   :  { %1087 = vmatprep.mubr.msk.bf16.mxu0 %vm84_vm0, %v60_v30 }
  0x26   :  { %1120 = vmatmul.mubr.msk.bf16.gmra.mrb[12].mxu1 %vm84_vm0, %v59_v29 }
  0x27   :  { %1123 = vmatprep.mubr.msk.bf16.mxu1 %vm84_vm0, %v60_v30 }
  0x2a   :  { %1088 = vmatmul.mubr.msk.bf16.gmra.mrb[16].mxu0 %vm84_vm0, %v61_v35 }
  0x2b   :  { %1091 = vmatprep.mubr.msk.bf16.mxu0 %vm84_vm0, %v62_v36 }
  0x2e   :  { %1124 = vmatmul.mubr.msk.bf16.gmra.mrb[16].mxu1 %vm84_vm0, %v61_v35 }
  0x2f   :  { %1127 = vmatprep.mubr.msk.bf16.mxu1 %vm84_vm0, %v62_v36 }
  0x32   :  { %1092 = vmatmul.mubr.msk.bf16.gmra.mrb[20].mxu0 %vm84_vm0, %v63_v41 }
  0x33   :  { %1095 = vmatprep.mubr.msk.bf16.mxu0 %vm84_vm0, %v64_v42 }
  0x36   :  { %1128 = vmatmul.mubr.msk.bf16.gmra.mrb[20].mxu1 %vm84_vm0, %v63_v41 }
  0x37   :  { %1131 = vmatprep.mubr.msk.bf16.mxu1 %vm84_vm0, %v64_v42 }
  0x3a   :  { %1096 = vmatmul.mubr.msk.bf16.gmra.mrb[24].mxu0 %vm84_vm0, %v65_v47 }
  0x3b   :  { %1099 = vmatprep.mubr.msk.bf16.mxu0 %vm84_vm0, %v66_v48 }
  0x3e   :  { %1132 = vmatmul.mubr.msk.bf16.gmra.mrb[24].mxu1 %vm84_vm0, %v65_v47 }
  0x3f   :  { %1135 = vmatprep.mubr.msk.bf16.mxu1 %vm84_vm0, %v66_v48 }
  0x42   :  { %1100 = vmatmul.mubr.msk.bf16.gmra.mrb[28].mxu0 %vm84_vm0, %v67_v51 }
  0x46   :  { %1136 = vmatmul.mubr.msk.bf16.gmra.mrb[28].mxu1 %vm84_vm0, %v67_v51 }
  0xdd   :  { %v1073_v52 = vpop.f32.mrb[0].mxu0 }
  0xde   :  { %v1381_v53 = vadd.f32 -1e+18, %v1073_v52  ;;  %v1383_v54 = vpop.f32.mrb[1].mxu0 }
  0xdf   :  { %v376_v55 = vsel %vm375_vm1, %v1383_v54, -inf  ;;  %v1074_v56 = vpop.f32.mrb[2].mxu0 }
  0xe0   :  { %v378_v57 = vsel %vm375_vm1, %v1381_v53, -inf  ;;  %v1389_v58 = vadd.f32 -1e+18, %v1074_v56  ;;  %v1391_v59 = vpop.f32.mrb[3].mxu0 }
  0xe1   :  { %v379_v60 = vmax.f32 %v376_v55, %v378_v57  ;;  %v377_v61 = vsel %vm375_vm1, %v1391_v59, -inf  ;;  %v1407_v10 = vpop.f32.mrb[0].mxu1 }
  0xe2   :  { %v380_v62 = vsel %vm375_vm1, %v1389_v58, -inf  ;;  %v1413_v13 = vpop.f32.mrb[1].mxu1 }
  0xe3   :  { %v381_v63 = vmax.f32 %v377_v61, %v380_v62  ;;  %v1415_v16 = vpop.f32.mrb[2].mxu1 }
  0xe4   :  { %v1419_v19 = vpop.f32.mrb[3].mxu1 }
  0xe5   :  { %v1077_v0 = vpop.f32.mrb[4].mxu0 }
  0xe6   :  { %v183_v1 = vpop.f32.mrb[5].mxu0  ;;  %v1397_v2 = vadd.f32 -1e+18, %v1077_v0 }
  0xe7   :  { %v1399_v3 = vadd.f32 -1e+18, %v183_v1  ;;  %v1078_v4 = vpop.f32.mrb[6].mxu0 }
  0xe8   :  { %v186_v5 = vpop.f32.mrb[7].mxu0  ;;  %v1403_v7 = vadd.f32 -1e+18, %v1078_v4  ;;  %v386_v11 = vsel %vm375_vm1, %v1397_v2, -inf }
  0xe9   :  { %v382_v6 = vsel %vm375_vm1, %v1399_v3, -inf  ;;  %v1405_v8 = vadd.f32 -1e+18, %v186_v5  ;;  %v1431_v30 = vpop.f32.mrb[4].mxu1 }
  0xea   :  { %v383_v9 = vmax.f32 %v379_v60, %v382_v6  ;;  %v388_v17 = vsel %vm375_vm1, %v1403_v7, -inf  ;;  %v1437_v33 = vpop.f32.mrb[5].mxu1 }
  0xeb   :  { %v384_v12 = vsel %vm375_vm1, %v1405_v8, -inf  ;;  %v1439_v36 = vpop.f32.mrb[6].mxu1 }
  0xec   :  { %v385_v14 = vmax.f32 %v381_v63, %v384_v12  ;;  %v387_v15 = vmax.f32 %v383_v9, %v386_v11  ;;  %v1443_v39 = vpop.f32.mrb[7].mxu1 }
  0xed   :  { %v1081_v18 = vpop.f32.mrb[8].mxu0 }
  0xee   :  { %v199_v20 = vpop.f32.mrb[9].mxu0  ;;  %v389_v21 = vmax.f32 %v385_v14, %v388_v17  ;;  %v1421_v22 = vadd.f32 -1e+18, %v1081_v18 }
  0xef   :  { %v1423_v23 = vadd.f32 -1e+18, %v199_v20  ;;  %v1082_v24 = vpop.f32.mrb[10].mxu0 }
  0xf0   :  { %v202_v25 = vpop.f32.mrb[11].mxu0  ;;  %v1427_v27 = vadd.f32 -1e+18, %v1082_v24  ;;  %v394_v31 = vsel %vm375_vm1, %v1421_v22, -inf }
  0xf1   :  { %v390_v26 = vsel %vm375_vm1, %v1423_v23, -inf  ;;  %v1429_v28 = vadd.f32 -1e+18, %v202_v25  ;;  %v1455_v50 = vpop.f32.mrb[8].mxu1 }
  0xf2   :  { %v391_v29 = vmax.f32 %v387_v15, %v390_v26  ;;  %v396_v37 = vsel %vm375_vm1, %v1427_v27, -inf  ;;  %v1461_v55 = vpop.f32.mrb[9].mxu1 }
  0xf3   :  { %v392_v32 = vsel %vm375_vm1, %v1429_v28, -inf  ;;  %v1463_v60 = vpop.f32.mrb[10].mxu1 }
  0xf4   :  { %v393_v34 = vmax.f32 %v389_v21, %v392_v32  ;;  %v395_v35 = vmax.f32 %v391_v29, %v394_v31  ;;  %v1467_v63 = vpop.f32.mrb[11].mxu1 }
  0xf5   :  { %v1085_v38 = vpop.f32.mrb[12].mxu0 }
  0xf6   :  { %v215_v40 = vpop.f32.mrb[13].mxu0  ;;  %v397_v41 = vmax.f32 %v393_v34, %v396_v37  ;;  %v1445_v42 = vadd.f32 -1e+18, %v1085_v38 }
  0xf7   :  { %v1447_v43 = vadd.f32 -1e+18, %v215_v40  ;;  %v1086_v44 = vpop.f32.mrb[14].mxu0 }
  0xf8   :  { %v218_v45 = vpop.f32.mrb[15].mxu0  ;;  %v1451_v47 = vadd.f32 -1e+18, %v1086_v44  ;;  %v402_v51 = vsel %vm375_vm1, %v1445_v42, -inf }
  0xf9   :  { %v398_v46 = vsel %vm375_vm1, %v1447_v43, -inf  ;;  %v1453_v48 = vadd.f32 -1e+18, %v218_v45  ;;  %v1485_v21 = vpop.f32.mrb[12].mxu1 }
  0xfa   :  { %v399_v49 = vmax.f32 %v395_v35, %v398_v46  ;;  %v404_v61 = vsel %vm375_vm1, %v1451_v47, -inf  ;;  %v1487_v25 = vpop.f32.mrb[13].mxu1 }
  0xfb   :  { %v400_v52 = vsel %vm375_vm1, %v1453_v48, -inf  ;;  %v1489_v29 = vpop.f32.mrb[14].mxu1 }
  0xfc   :  { %v403_v56 = vmax.f32 %v399_v49, %v402_v51  ;;  %v401_v57 = vmax.f32 %v397_v41, %v400_v52  ;;  %v1491_v32 = vpop.f32.mrb[15].mxu1 }
  0xfd   :  { %v1089_v62 = vpop.f32.mrb[16].mxu0  ;;  %2051 = vst [vmem:[#allocation2_spill] sm:$0xff] %v1491_v32 }
  0xfe   :  { %v405_v0 = vmax.f32 %v401_v57, %v404_v61  ;;  %v1469_v1 = vadd.f32 -1e+18, %v1089_v62  ;;  %v1471_v4 = vpop.f32.mrb[17].mxu0 }
  0xff   :  { %v413_v5 = vsel %vm375_vm1, %v1471_v4, -inf  ;;  %v1090_v6 = vpop.f32.mrb[18].mxu0 }
 0x100   :  { %v406_v9 = vmax.f32 %v403_v56, %v405_v0  ;;  %v415_v11 = vsel %vm375_vm1, %v1469_v1, -inf  ;;  %v1477_v12 = vadd.f32 -1e+18, %v1090_v6  ;;  %v1479_v14 = vpop.f32.mrb[19].mxu0 }
 0x101   :  { %v416_v15 = vmax.f32 %v413_v5, %v415_v11  ;;  %v414_v17 = vsel %vm375_vm1, %v1479_v14, -inf  ;;  %v1503_v56 = vpop.f32.mrb[16].mxu1 }
 0x102   :  { %v407_v18 = vrot.slane %v406_v9, 4  ;;  %v417_v20 = vsel %vm375_vm1, %v1477_v12, -inf  ;;  %2052 = vst [vmem:[#allocation3_spill] sm:$0xff] %v1503_v56  ;;  %v1509_v62 = vpop.f32.mrb[17].mxu1 }
 0x103   :  { %v418_v24 = vmax.f32 %v414_v17, %v417_v20  ;;  %2053 = vst [vmem:[#allocation4_spill] sm:$0xff] %v1509_v62 }
 0x104   :  { %v408_v26 = vmax.f32 %v406_v9, %v407_v18  ;;  %v1513_v9 = vpop.f32.mrb[18].mxu1 }
 0x105   :  { %v1093_v31 = vpop.f32.mrb[20].mxu0  ;;  %2054 = vst [vmem:[#allocation5_spill] sm:$0xff] %v1513_v9  ;;  %v1517_v17 = vpop.f32.mrb[19].mxu1 }
 0x106   :  { %v409_v34 = vrot.slane %v408_v26, 2  ;;  %v247_v35 = vpop.f32.mrb[21].mxu0  ;;  %v1493_v37 = vadd.f32 -1e+18, %v1093_v31  ;;  %2055 = vst [vmem:[#allocation6_spill] sm:$0xff] %v1517_v17 }
 0x107   :  { %v1495_v38 = vadd.f32 -1e+18, %v247_v35  ;;  %v1094_v40 = vpop.f32.mrb[22].mxu0 }
 0x108   :  { %v410_v41 = vmax.f32 %v408_v26, %v409_v34  ;;  %v250_v44 = vpop.f32.mrb[23].mxu0  ;;  %v1499_v46 = vadd.f32 -1e+18, %v1094_v40  ;;  %v423_v57 = vsel %vm375_vm1, %v1493_v37, -inf }
 0x109   :  { %v419_v45 = vsel %vm375_vm1, %v1495_v38, -inf  ;;  %v1501_v49 = vadd.f32 -1e+18, %v250_v44  ;;  %v1543_v35 = vpop.f32.mrb[20].mxu1 }
 0x10a   :  { %v411_v51 = vrot.slane %v410_v41, 1  ;;  %v420_v52 = vmax.f32 %v416_v15, %v419_v45  ;;  %v425_v11 = vsel %vm375_vm1, %v1499_v46, -inf  ;;  %2056 = vst [vmem:[#allocation7_spill] sm:$0xff] %v1543_v35 }
 0x10b   :  { %v421_v61 = vsel %vm375_vm1, %v1501_v49, -inf }
 0x10c   :  { %v1511_v0 = vmax.f32 %v410_v41, %v411_v51  ;;  %v422_v5 = vmax.f32 %v418_v24, %v421_v61  ;;  %v424_v6 = vmax.f32 %v420_v52, %v423_v57 }
 0x10d   :  { %v1097_v15 = vpop.f32.mrb[24].mxu0 }
 0x10e   :  { %v453_v18 = vsub.f32 %v1389_v58, %v1511_v0  ;;  %v263_v31 = vpop.f32.mrb[25].mxu0  ;;  %v426_v44 = vmax.f32 %v422_v5, %v425_v11  ;;  %v450_v45 = vsub.f32 %v1383_v54, %v1511_v0  ;;  %v1537_v51 = vadd.f32 -1e+18, %v1097_v15  ;;  %v1551_v11 = vpop.f32.mrb[21].mxu1 }
 0x10f   :  { %v1098_v41 = vpop.f32.mrb[26].mxu0  ;;  %v1539_v52 = vadd.f32 -1e+18, %v263_v31  ;;  %v451_v61 = vsub.f32 %v1391_v59, %v1511_v0  ;;  %v452_v5 = vsub.f32 %v1381_v53, %v1511_v0  ;;  %2057 = vst [vmem:[#allocation8_spill] sm:$0xff] %v1551_v11  ;;  %v454_v31 = vsub.f32 %v1399_v3, %v1511_v0  ;;  %v1557_v58 = vpop.f32.mrb[22].mxu1 }
 0x110   :  { %v266_v57 = vpop.f32.mrb[27].mxu0  ;;  %v1545_v34 = vadd.f32 -1e+18, %v1098_v41  ;;  %2058 = vst [vmem:[#allocation9_spill] sm:$0xff] %v1557_v58  ;;  %v1563_v26 = vpop.f32.mrb[23].mxu1  ;;  %v431_v53 = vsel %vm375_vm1, %v1537_v51, -inf  ;;  %v455_v3 = vsub.f32 %v1405_v8, %v1511_v0  ;;  %v458_v8 = vsub.f32 %v1423_v23, %v1511_v0 }
 0x111   :  { %v1547_v40 = vadd.f32 -1e+18, %v266_v57  ;;  %v427_v54 = vsel %vm375_vm1, %v1539_v52, -inf  ;;  %2059 = vst [vmem:[#allocation10_spill] sm:$0xff] %v1563_v26  ;;  %v488_v62 = vmul.f32 1.442695, %v453_v18 }
 0x112   :  { %v428_v59 = vmax.f32 %v424_v6, %v427_v54  ;;  %v433_v6 = vsel %vm375_vm1, %v1545_v34, -inf  ;;  %v486_v56 = vmul.f32 1.442695, %v452_v5  ;;  %v2062_v5 = vsub.f32 %v1397_v2, %v1511_v0 }
 0x113   :  { %v429_v41 = vsel %vm375_vm1, %v1547_v40, -inf  ;;  %v498_v2 = vmul.f32 1.442695, %v458_v8  ;;  %v2066_v8 = vsub.f32 %v1421_v22, %v1511_v0 }
 0x114   :  { %v430_v20 = vmax.f32 %v426_v44, %v429_v41  ;;  %v432_v54 = vmax.f32 %v428_v59, %v431_v53  ;;  %v459_v41 = vsub.f32 %v1429_v28, %v1511_v0  ;;  %v1585_v59 = vpop.f32.mrb[24].mxu1 }
 0x115   :  { %v1101_v15 = vpop.f32.mrb[28].mxu0  ;;  %2060 = vst [vmem:[#allocation11_spill] sm:$0xff] %v1585_v59 }
 0x116   :  { %v1561_v57 = vadd.f32 -1e+18, %v1101_v15  ;;  %v279_v24 = vpop.f32.mrb[29].mxu0  ;;  %v434_v9 = vmax.f32 %v430_v20, %v433_v6  ;;  %v484_v20 = vmul.f32 1.442695, %v451_v61  ;;  %v1591_v6 = vpop.f32.mrb[25].mxu1 }
 0x117   :  { %v1567_v11 = vadd.f32 -1e+18, %v279_v24  ;;  %v1102_v35 = vpop.f32.mrb[30].mxu0  ;;  %2061 = vst [vmem:[#allocation12_spill] sm:$0xff] %v1591_v6  ;;  %v1593_v23 = vpop.f32.mrb[26].mxu1 }
 0x118   :  { %v282_v58 = vpop.f32.mrb[31].mxu0  ;;  %v1575_v17 = vadd.f32 -1e+18, %v1102_v35  ;;  %v439_v24 = vsel %vm375_vm1, %v1561_v57, -inf  ;;  %v462_v35 = vsub.f32 %v1447_v43, %v1511_v0  ;;  %v1597_v32 = vpop.f32.mrb[27].mxu1 }
 0x119   :  { %v435_v15 = vsel %vm375_vm1, %v1567_v11, -inf  ;;  %v1577_v26 = vadd.f32 -1e+18, %v282_v58  ;;  %v482_v58 = vmul.f32 1.442695, %v450_v45  ;;  %v1599_v18 = vpop.f32.mrb[28].mxu1 }
 0x11a   :  { %v436_v44 = vmax.f32 %v432_v54, %v435_v15  ;;  %v441_v28 = vsel %vm375_vm1, %v1575_v17, -inf  ;;  %v490_v45 = vmul.f32 1.442695, %v454_v31  ;;  %v492_v6 = vmul.f32 1.442695, %v455_v3 }
 0x11b   :  { %v437_v53 = vsel %vm375_vm1, %v1577_v26, -inf  ;;  %1143 = vpow2.f32 %v482_v58 }
 0x11c   :  { %v440_v54 = vmax.f32 %v436_v44, %v439_v24  ;;  %v438_v15 = vmax.f32 %v434_v9, %v437_v53  ;;  %1145 = vpow2.f32 %v484_v20  ;;  %v1601_v9 = vpop.f32.mrb[29].mxu1  ;;  %v494_v24 = vmul.f32 1.442695, %v2062_v5 }
 0x11d   :  { %1147 = vpow2.f32 %v486_v56  ;;  %v1606_v53 = vpop.f32.mrb[30].mxu1  ;;  %v2065_v56 = vsub.f32 %v1403_v7, %v1511_v0  ;;  %v502_v5 = vmul.f32 1.442695, %v2066_v8 }
 0x11e   :  { %v442_v59 = vmax.f32 %v438_v15, %v441_v28  ;;  %1149 = vpow2.f32 %v488_v62  ;;  %2063 = vst [vmem:[#allocation13_spill] sm:$0xff] %v1606_v53  ;;  %v1608_v58 = vpop.f32.mrb[31].mxu1  ;;  %v500_v28 = vmul.f32 1.442695, %v459_v41  ;;  %v2067_v41 = vsub.f32 %v1427_v27, %v1511_v0 }
 0x11f   :  { %1151 = vpow2.f32 %v490_v45  ;;  %2064 = vst [vmem:[#allocation14_spill] sm:$0xff] %v1608_v58  ;;  %v496_v62 = vmul.f32 1.442695, %v2065_v56 }
 0x120   :  { %v443_v43 = vmax.f32 %v440_v54, %v442_v59  ;;  %1153 = vpow2.f32 %v492_v6  ;;  %v504_v56 = vmul.f32 1.442695, %v2067_v41  ;;  %v2068_v41 = vsub.f32 %v1453_v48, %v1511_v0 }
 0x121   :  { %1155 = vpow2.f32 %v494_v24 }
 0x122   :  { %v444_v61 = vrot.slane %v443_v43, 4  ;;  %1157 = vpow2.f32 %v496_v62 }
 0x123   :  { %1159 = vpow2.f32 %v498_v2 }
 0x124   :  { %v445_v44 = vmax.f32 %v443_v43, %v444_v61  ;;  %1161 = vpow2.f32 %v500_v28 }
 0x125   :  { %v1613_v3 = vpop.eup %1143  ;;  %1163 = vpow2.f32 %v502_v5 }
 0x126   :  { %v446_v31 = vrot.slane %v445_v44, 2  ;;  %v1615_v59 = vpop.eup %1145  ;;  %v546_v54 = vsel %vm375_vm1, %v1613_v3, 0.0  ;;  %1165 = vpow2.f32 %v504_v56 }
 0x127   :  { %v1619_v15 = vpop.eup %1147  ;;  %v547_v43 = vsel %vm375_vm1, %v1615_v59, 0.0 }
 0x128   :  { %v447_v20 = vmax.f32 %v445_v44, %v446_v31  ;;  %v1623_v7 = vpop.eup %1149  ;;  %v548_v45 = vadd.f32 %v547_v43, %v546_v54  ;;  %v549_v61 = vsel %vm375_vm1, %v1619_v15, 0.0  ;;  %v508_v43 = vmul.f32 1.442695, %v2068_v41 }
 0x129   :  { %v551_v62 = vsel %vm375_vm1, %v1623_v7, 0.0  ;;  %v1637_v31 = vpop.eup %1151 }
 0x12a   :  { %v448_v6 = vrot.slane %v447_v20, 1  ;;  %v550_v44 = vadd.f32 %v549_v61, %v548_v45  ;;  %v553_v45 = vsel %vm375_vm1, %v1637_v31, 0.0 }
 0x12c   :  { %v1630_v24 = vmax.f32 %v447_v20, %v448_v6  ;;  %v1655_v6 = vpop.eup %1153 }
 0x12d   :  { %v1661_v8 = vpop.eup %1155 }
 0x12e   :  { %v469_v54 = vsub.f32 %v1477_v12, %v1630_v24  ;;  %v472_v22 = vsub.f32 %v1493_v37, %v1630_v24  ;;  %v473_v20 = vsub.f32 %v1499_v46, %v1630_v24  ;;  %v476_v2 = vsub.f32 %v1537_v51, %v1630_v24  ;;  %v1676_v56 = vpop.eup %1157 }
 0x12f   :  { %v477_v27 = vsub.f32 %v1545_v34, %v1630_v24  ;;  %v506_v37 = vmul.f32 1.442695, %v462_v35  ;;  %v552_v46 = vadd.f32 %v551_v62, %v550_v44  ;;  %v466_v61 = vsub.f32 %v1471_v4, %v1630_v24 }
 0x130   :  { %v2069_v12 = vsub.f32 %v1445_v42, %v1511_v0  ;;  %v2070_v35 = vsub.f32 %v1451_v47, %v1511_v0  ;;  %v555_v62 = vsel %vm375_vm1, %v1655_v6, 0.0  ;;  %v467_v4 = vsub.f32 %v1479_v14, %v1630_v24 }
 0x131   :  { %v554_v28 = vadd.f32 %v553_v45, %v552_v46  ;;  %1167 = vpow2.f32 %v506_v37  ;;  %v468_v46 = vsub.f32 %v1469_v1, %v1630_v24  ;;  %v470_v42 = vsub.f32 %v1495_v38, %v1630_v24  ;;  %v1690_v37 = vpop.eup %1159 }
 0x132   :  { %v510_v5 = vmul.f32 1.442695, %v2069_v12  ;;  %v512_v44 = vmul.f32 1.442695, %v2070_v35  ;;  %v557_v47 = vsel %vm375_vm1, %v1661_v8, 0.0  ;;  %v471_v0 = vsub.f32 %v1501_v49, %v1630_v24  ;;  %v1694_v45 = vpop.eup %1161 }
 0x133   :  { %v556_v48 = vadd.f32 %v555_v62, %v554_v28  ;;  %v474_v12 = vsub.f32 %v1539_v52, %v1630_v24  ;;  %v475_v14 = vsub.f32 %v1547_v40, %v1630_v24  ;;  %1169 = vpow2.f32 %v508_v43  ;;  %v1700_v43 = vpop.eup %1163 }
 0x134   :  { %v514_v38 = vmul.f32 1.442695, %v466_v61  ;;  %v559_v41 = vsel %vm375_vm1, %v1676_v56, 0.0  ;;  %v516_v49 = vmul.f32 1.442695, %v467_v4  ;;  %1171 = vpow2.f32 %v510_v5  ;;  %v1704_v1 = vpop.eup %1165 }
 0x135   :  { %v558_v28 = vadd.f32 %v557_v47, %v556_v48  ;;  %v518_v52 = vmul.f32 1.442695, %v468_v46  ;;  %1173 = vpow2.f32 %v512_v44  ;;  %v520_v62 = vmul.f32 1.442695, %v469_v54 }
 0x136   :  { %v561_v40 = vsel %vm375_vm1, %v1690_v37, 0.0  ;;  %1175 = vpow2.f32 %v514_v38  ;;  %v563_v61 = vsel %vm375_vm1, %v1694_v45, 0.0  ;;  %v522_v47 = vmul.f32 1.442695, %v470_v42 }
 0x137   :  { %v560_v35 = vadd.f32 %v559_v41, %v558_v28  ;;  %1177 = vpow2.f32 %v516_v49  ;;  %v565_v54 = vsel %vm375_vm1, %v1700_v43, 0.0  ;;  %v524_v5 = vmul.f32 1.442695, %v471_v0 }
 0x138   :  { %1179 = vpow2.f32 %v518_v52  ;;  %v526_v28 = vmul.f32 1.442695, %v472_v22  ;;  %v567_v38 = vsel %vm375_vm1, %v1704_v1, 0.0  ;;  %v528_v49 = vmul.f32 1.442695, %v473_v20 }
 0x139   :  { %v562_v48 = vadd.f32 %v561_v40, %v560_v35  ;;  %1181 = vpow2.f32 %v520_v62  ;;  %v530_v40 = vmul.f32 1.442695, %v474_v12 }
 0x13a   :  { %1183 = vpow2.f32 %v522_v47 }
 0x13b   :  { %v564_v4 = vadd.f32 %v563_v61, %v562_v48  ;;  %v1708_v44 = vpop.eup %1167  ;;  %1185 = vpow2.f32 %v524_v5 }
 0x13c   :  { %v569_v35 = vsel %vm375_vm1, %v1708_v44, 0.0  ;;  %1187 = vpow2.f32 %v526_v28 }
 0x13d   :  { %v566_v46 = vadd.f32 %v565_v54, %v564_v4  ;;  %v1712_v41 = vpop.eup %1169  ;;  %1189 = vpow2.f32 %v528_v49  ;;  %v532_v4 = vmul.f32 1.442695, %v475_v14 }
 0x13e   :  { %v1716_v52 = vpop.eup %1171  ;;  %v571_v22 = vsel %vm375_vm1, %v1712_v41, 0.0  ;;  %1191 = vpow2.f32 %v530_v40  ;;  %v2071_v40 = vsub.f32 %v1567_v11, %v1630_v24 }
 0x13f   :  { %v568_v42 = vadd.f32 %v567_v38, %v566_v46  ;;  %v1718_v0 = vpop.eup %1173  ;;  %v573_v20 = vsel %vm375_vm1, %v1716_v52, 0.0  ;;  %v534_v38 = vmul.f32 1.442695, %v476_v2  ;;  %1193 = vpow2.f32 %v532_v4 }
 0x140   :  { %v1722_v48 = vpop.eup %1175 }
 0x141   :  { %v570_v62 = vadd.f32 %v569_v35, %v568_v42  ;;  %v1724_v47 = vpop.eup %1177  ;;  %v583_v54 = vsel %vm375_vm1, %v1722_v48, 0.0  ;;  %v575_v42 = vsel %vm375_vm1, %v1718_v0, 0.0  ;;  %1195 = vpow2.f32 %v534_v38 }
 0x142   :  { %v1730_v5 = vpop.eup %1179  ;;  %v584_v28 = vsel %vm375_vm1, %v1724_v47, 0.0 }
 0x143   :  { %v572_v61 = vadd.f32 %v571_v22, %v570_v62  ;;  %v1734_v12 = vpop.eup %1181  ;;  %v585_v14 = vadd.f32 %v584_v28, %v583_v54  ;;  %v586_v35 = vsel %vm375_vm1, %v1730_v5, 0.0  ;;  %v536_v22 = vmul.f32 1.442695, %v477_v27 }
 0x144   :  { %v1743_v62 = vpop.eup %1183  ;;  %v588_v51 = vsel %vm375_vm1, %v1734_v12, 0.0  ;;  %v538_v54 = vmul.f32 1.442695, %v2071_v40  ;;  %v2072_v27 = vsub.f32 %v1577_v26, %v1630_v24 }
 0x145   :  { %v574_v46 = vadd.f32 %v573_v20, %v572_v61  ;;  %v587_v61 = vadd.f32 %v586_v35, %v585_v14  ;;  %v1750_v2 = vpop.eup %1185  ;;  %1197 = vpow2.f32 %v536_v22 }
 0x146   :  { %v1757_v34 = vpop.eup %1187  ;;  %v540_v4 = vmul.f32 1.442695, %v2072_v27  ;;  %v592_v38 = vsel %vm375_vm1, %v1750_v2, 0.0  ;;  %1199 = vpow2.f32 %v538_v54 }
 0x147   :  { %v576_v49 = vadd.f32 %v575_v42, %v574_v46  ;;  %v589_v46 = vadd.f32 %v588_v51, %v587_v61  ;;  %v590_v42 = vsel %vm375_vm1, %v1743_v62, 0.0  ;;  %v1764_v58 = vpop.eup %1189  ;;  %v594_v61 = vsel %vm375_vm1, %v1757_v34, 0.0 }
 0x148   :  { %1201 = vpow2.f32 %v540_v4  ;;  %v596_v26 = vsel %vm375_vm1, %v1764_v58, 0.0 }
 0x149   :  { %v577_v20 = vrot.slane %v576_v49, 4  ;;  %v591_v14 = vadd.f32 %v590_v42, %v589_v46 }
 0x14b   :  { %v578_v28 = vadd.f32 %v577_v20, %v576_v49  ;;  %v593_v11 = vadd.f32 %v592_v38, %v591_v14  ;;  %v1768_v20 = vpop.eup %1191 }
 0x14c   :  { %v1772_v40 = vpop.eup %1193  ;;  %v598_v54 = vsel %vm375_vm1, %v1768_v20, 0.0 }
 0x14d   :  { %v579_v35 = vrot.slane %v578_v28, 2  ;;  %v595_v22 = vadd.f32 %v594_v61, %v593_v11  ;;  %v1776_v27 = vpop.eup %1195  ;;  %v600_v14 = vsel %vm375_vm1, %v1772_v40, 0.0 }
 0x14e   :  { %v602_v38 = vsel %vm375_vm1, %v1776_v27, 0.0 }
 0x14f   :  { %v580_v49 = vadd.f32 %v579_v35, %v578_v28  ;;  %v597_v46 = vadd.f32 %v596_v26, %v595_v22  ;;  %v1780_v4 = vpop.eup %1197 }
 0x150   :  { %v1784_v11 = vpop.eup %1199 }
 0x151   :  { %v581_v51 = vrot.slane %v580_v49, 1  ;;  %v599_v28 = vadd.f32 %v598_v54, %v597_v46 }
 0x152   :  { %v1788_v22 = vpop.eup %1201 }
 0x153   :  { %v582_v42 = vadd.f32 %v581_v51, %v580_v49  ;;  %v601_v35 = vadd.f32 %v600_v14, %v599_v28  ;;  %v604_v49 = vsel %vm375_vm1, %v1780_v4, 0.0  ;;  %v2073_v51 = vsub.f32 %v1561_v57, %v1630_v24 }
 0x154   :  { %v606_v28 = vsel %vm375_vm1, %v1784_v11, 0.0 }
 0x155   :  { %1203 = vrcp.f32 %v582_v42  ;;  %v603_v61 = vadd.f32 %v602_v38, %v601_v35  ;;  %v542_v26 = vmul.f32 1.442695, %v2073_v51  ;;  %v2074_v42 = vsub.f32 %v1575_v17, %v1630_v24 }
 0x156   :  { %v608_v35 = vsel %vm375_vm1, %v1788_v22, 0.0 }
 0x157   :  { %v605_v46 = vadd.f32 %v604_v49, %v603_v61  ;;  %v544_v54 = vmul.f32 1.442695, %v2074_v42  ;;  %1205 = vpow2.f32 %v542_v26 }
 0x159   :  { %v607_v14 = vadd.f32 %v606_v28, %v605_v46  ;;  %1207 = vpow2.f32 %v544_v54 }
 0x15b   :  { %v1800_v38 = vadd.f32 %v608_v35, %v607_v14 }
 0x15f   :  { %v1204_v53 = vpop.eup %1203 }
 0x160   :  { %v623_v57 = vmul.f32 %v1204_v53, %v1619_v15  ;;  %v621_v61 = vmul.f32 %v1204_v53, %v1613_v3  ;;  %v624_v49 = vmul.f32 %v1204_v53, %v1623_v7  ;;  %v622_v17 = vmul.f32 %v1204_v53, %v1615_v59 }
 0x161   :  { %v627_v24 = vmul.f32 %v1204_v53, %v1661_v8  ;;  %v625_v51 = vmul.f32 %v1204_v53, %v1637_v31  ;;  %v628_v46 = vmul.f32 %v1204_v53, %v1676_v56  ;;  %v626_v26 = vmul.f32 %v1204_v53, %v1655_v6  ;;  %v1860_v35 = vpop.eup %1205 }
 0x162   :  { %v833_v42 = vmul.f32 %v1407_v10, %v623_v57  ;;  %956 = vst.msk [vmem:[%s2048_s5 + $0x10] sm:$0xff] %vm375_vm1, %v623_v57  ;;  %v831_v3 = vmul.f32 %v1413_v13, %v621_v61  ;;  %954 = vst.msk [vmem:[%s2048_s5] sm:$0xff] %vm375_vm1, %v621_v61  ;;  %v834_v59 = vmul.f32 %v1415_v16, %v624_v49 }
 0x163   :  { %957 = vst.msk [vmem:[%s2048_s5 + $0x18] sm:$0xff] %vm375_vm1, %v624_v49  ;;  %v832_v10 = vmul.f32 %v1419_v19, %v622_v17  ;;  %955 = vst.msk [vmem:[%s2048_s5 + $0x8] sm:$0xff] %vm375_vm1, %v622_v17  ;;  %v837_v13 = vmul.f32 %v1431_v30, %v627_v24  ;;  %v835_v16 = vmul.f32 %v1437_v33, %v625_v51 }
 0x164   :  { %960 = vst.msk [vmem:[%s2048_s5 + $0x30] sm:$0xff] %vm375_vm1, %v627_v24  ;;  %958 = vst.msk [vmem:[%s2048_s5 + $0x20] sm:$0xff] %vm375_vm1, %v625_v51  ;;  %v838_v19 = vmul.f32 %v1439_v36, %v628_v46  ;;  %v836_v30 = vmul.f32 %v1443_v39, %v626_v26  ;;  %v863_v33 = vsel %vm375_vm1, %v831_v3, 0.0  ;;  %v866_v7 = vsel %vm375_vm1, %v833_v42, 0.0  ;;  %v2075_v51 = vld [vmem:[#allocation2_spill] sm:$0xff] }
 0x165   :  { %961 = vst.msk [vmem:[%s2048_s5 + $0x38] sm:$0xff] %vm375_vm1, %v628_v46  ;;  %959 = vst.msk [vmem:[%s2048_s5 + $0x28] sm:$0xff] %vm375_vm1, %v626_v26  ;;  %v864_v15 = vsel %vm375_vm1, %v832_v10, 0.0  ;;  %v868_v36 = vsel %vm375_vm1, %v834_v59, 0.0  ;;  %v631_v6 = vmul.f32 %v1204_v53, %v1700_v43  ;;  %v629_v8 = vmul.f32 %v1204_v53, %v1690_v37 }
 0x166   :  { %v865_v31 = vadd.f32 %v864_v15, %v863_v33  ;;  %v632_v39 = vmul.f32 %v1204_v53, %v1704_v1  ;;  %v630_v54 = vmul.f32 %v1204_v53, %v1694_v45  ;;  %v635_v28 = vmul.f32 %v1204_v53, %v1716_v52  ;;  %v1878_v45 = vpop.eup %1207 }
 0x167   :  { %v633_v14 = vmul.f32 %v1204_v53, %v1708_v44  ;;  %v841_v57 = vmul.f32 %v1455_v50, %v631_v6  ;;  %964 = vst.msk [vmem:[%s2048_s5 + $0x50] sm:$0xff] %vm375_vm1, %v631_v6  ;;  %v839_v37 = vmul.f32 %v1461_v55, %v629_v8  ;;  %962 = vst.msk [vmem:[%s2048_s5 + $0x40] sm:$0xff] %vm375_vm1, %v629_v8  ;;  %v612_v24 = vsel %vm375_vm1, %v1878_v45, 0.0 }
 0x168   :  { %v867_v56 = vadd.f32 %v866_v7, %v865_v31  ;;  %v842_v1 = vmul.f32 %v1463_v60, %v632_v39  ;;  %965 = vst.msk [vmem:[%s2048_s5 + $0x58] sm:$0xff] %vm375_vm1, %v632_v39  ;;  %v636_v50 = vmul.f32 %v1204_v53, %v1718_v0  ;;  %v840_v44 = vmul.f32 %v1467_v63, %v630_v54 }
 0x169   :  { %963 = vst.msk [vmem:[%s2048_s5 + $0x48] sm:$0xff] %vm375_vm1, %v630_v54  ;;  %v845_v55 = vmul.f32 %v1485_v21, %v635_v28  ;;  %968 = vst.msk [vmem:[%s2048_s5 + $0x70] sm:$0xff] %vm375_vm1, %v635_v28  ;;  %v843_v60 = vmul.f32 %v1487_v25, %v633_v14  ;;  %v870_v63 = vsel %vm375_vm1, %v835_v16, 0.0  ;;  %v610_v0 = vsel %vm375_vm1, %v1860_v35, 0.0 }
 0x16a   :  { %v869_v43 = vadd.f32 %v868_v36, %v867_v56  ;;  %966 = vst.msk [vmem:[%s2048_s5 + $0x60] sm:$0xff] %vm375_vm1, %v633_v14  ;;  %v846_v52 = vmul.f32 %v1489_v29, %v636_v50  ;;  %969 = vst.msk [vmem:[%s2048_s5 + $0x78] sm:$0xff] %vm375_vm1, %v636_v50  ;;  %v872_v25 = vsel %vm375_vm1, %v836_v30, 0.0  ;;  %v634_v61 = vmul.f32 %v1204_v53, %v1712_v41 }
 0x16b   :  { %v611_v49 = vadd.f32 %v610_v0, %v1800_v38  ;;  %v874_v29 = vsel %vm375_vm1, %v837_v13, 0.0  ;;  %v876_v3 = vsel %vm375_vm1, %v838_v19, 0.0  ;;  %v878_v38 = vsel %vm375_vm1, %v839_v37, 0.0  ;;  %v2076_v0 = vld [vmem:[#allocation3_spill] sm:$0xff] }
 0x16c   :  { %v871_v21 = vadd.f32 %v870_v63, %v869_v43  ;;  %v844_v46 = vmul.f32 %v2075_v51, %v634_v61  ;;  %967 = vst.msk [vmem:[%s2048_s5 + $0x68] sm:$0xff] %vm375_vm1, %v634_v61  ;;  %v880_v16 = vsel %vm375_vm1, %v840_v44, 0.0  ;;  %v882_v33 = vsel %vm375_vm1, %v841_v57, 0.0  ;;  %v2081_v61 = vld [vmem:[#allocation8_spill] sm:$0xff] }
 0x16d   :  { %v613_v26 = vadd.f32 %v612_v24, %v611_v49  ;;  %v884_v31 = vsel %vm375_vm1, %v842_v1, 0.0  ;;  %v886_v19 = vsel %vm375_vm1, %v843_v60, 0.0  ;;  %v890_v28 = vsel %vm375_vm1, %v845_v55, 0.0 }
 0x16e   :  { %v873_v17 = vadd.f32 %v872_v25, %v871_v21  ;;  %v888_v56 = vsel %vm375_vm1, %v844_v46, 0.0  ;;  %v892_v37 = vsel %vm375_vm1, %v846_v52, 0.0 }
 0x16f   :  { %v614_v53 = vrot.slane %v613_v26, 4 }
 0x170   :  { %v875_v42 = vadd.f32 %v874_v29, %v873_v17  ;;  %v2082_v17 = vld [vmem:[#allocation9_spill] sm:$0xff] }
 0x171   :  { %v615_v59 = vadd.f32 %v614_v53, %v613_v26 }
 0x172   :  { %v877_v41 = vadd.f32 %v876_v3, %v875_v42 }
 0x173   :  { %v616_v13 = vrot.slane %v615_v59, 2 }
 0x174   :  { %v879_v10 = vadd.f32 %v878_v38, %v877_v41 }
 0x175   :  { %v617_v15 = vadd.f32 %v616_v13, %v615_v59  ;;  %v2083_v13 = vld [vmem:[#allocation10_spill] sm:$0xff] }
 0x176   :  { %v881_v30 = vadd.f32 %v880_v16, %v879_v10 }
 0x177   :  { %v618_v36 = vrot.slane %v617_v15, 1 }
 0x178   :  { %v883_v7 = vadd.f32 %v882_v33, %v881_v30 }
 0x179   :  { %v619_v8 = vadd.f32 %v618_v36, %v617_v15 }
 0x17a   :  { %v885_v6 = vadd.f32 %v884_v31, %v883_v7 }
 0x17b   :  { %1209 = vrcp.f32 %v619_v8  ;;  %v2086_v8 = vld [vmem:[#allocation13_spill] sm:$0xff] }
 0x17c   :  { %v887_v39 = vadd.f32 %v886_v19, %v885_v6 }
 0x17e   :  { %v889_v54 = vadd.f32 %v888_v56, %v887_v39 }
 0x180   :  { %v891_v14 = vadd.f32 %v890_v28, %v889_v54 }
 0x182   :  { %v1923_v57 = vadd.f32 %v892_v37, %v891_v14 }
 0x185   :  { %v1210_v50 = vpop.eup %1209 }
 0x186   :  { %v640_v1 = vmul.f32 %v1210_v50, %v1730_v5  ;;  %v638_v43 = vmul.f32 %v1210_v50, %v1722_v48  ;;  %v641_v44 = vmul.f32 %v1210_v50, %v1734_v12  ;;  %v639_v60 = vmul.f32 %v1210_v50, %v1724_v47  ;;  %v2077_v5 = vld [vmem:[#allocation4_spill] sm:$0xff]  ;;  %v2078_v48 = vld [vmem:[#allocation5_spill] sm:$0xff] }
 0x187   :  { %v644_v63 = vmul.f32 %v1210_v50, %v1757_v34  ;;  %v642_v21 = vmul.f32 %v1210_v50, %v1743_v62  ;;  %v645_v55 = vmul.f32 %v1210_v50, %v1764_v58  ;;  %v2079_v58 = vld [vmem:[#allocation6_spill] sm:$0xff]  ;;  %v2080_v62 = vld [vmem:[#allocation7_spill] sm:$0xff]  ;;  %v643_v42 = vmul.f32 %v1210_v50, %v1750_v2 }
 0x188   :  { %v849_v25 = vmul.f32 %v2076_v0, %v640_v1  ;;  %972 = vst.msk [vmem:[%s2048_s5 + $0x90] sm:$0xff] %vm375_vm1, %v640_v1  ;;  %v847_v52 = vmul.f32 %v2077_v5, %v638_v43  ;;  %970 = vst.msk [vmem:[%s2048_s5 + $0x80] sm:$0xff] %vm375_vm1, %v638_v43  ;;  %v850_v47 = vmul.f32 %v2078_v48, %v641_v44  ;;  %v2084_v2 = vld [vmem:[#allocation11_spill] sm:$0xff] }
 0x189   :  { %973 = vst.msk [vmem:[%s2048_s5 + $0x98] sm:$0xff] %vm375_vm1, %v641_v44  ;;  %v848_v12 = vmul.f32 %v2079_v58, %v639_v60  ;;  %971 = vst.msk [vmem:[%s2048_s5 + $0x88] sm:$0xff] %vm375_vm1, %v639_v60  ;;  %v853_v34 = vmul.f32 %v2080_v62, %v644_v63  ;;  %v851_v49 = vmul.f32 %v2081_v61, %v642_v21  ;;  %v894_v60 = vrot.slane %v1923_v57, 4 }
 0x18a   :  { %976 = vst.msk [vmem:[%s2048_s5 + $0xb0] sm:$0xff] %vm375_vm1, %v644_v63  ;;  %974 = vst.msk [vmem:[%s2048_s5 + $0xa0] sm:$0xff] %vm375_vm1, %v642_v21  ;;  %v854_v24 = vmul.f32 %v2082_v17, %v645_v55  ;;  %v900_v29 = vsel %vm375_vm1, %v847_v52, 0.0  ;;  %v903_v46 = vsel %vm375_vm1, %v849_v25, 0.0  ;;  %v648_v3 = vmul.f32 %v1210_v50, %v1776_v27 }
 0x18b   :  { %977 = vst.msk [vmem:[%s2048_s5 + $0xb8] sm:$0xff] %vm375_vm1, %v645_v55  ;;  %v901_v51 = vsel %vm375_vm1, %v848_v12, 0.0  ;;  %v646_v53 = vmul.f32 %v1210_v50, %v1768_v20  ;;  %v649_v41 = vmul.f32 %v1210_v50, %v1780_v4  ;;  %v647_v38 = vmul.f32 %v1210_v50, %v1772_v40  ;;  %975 = vst.msk [vmem:[%s2048_s5 + $0xa8] sm:$0xff] %vm375_vm1, %v643_v42  ;;  %v2085_v20 = vld [vmem:[#allocation12_spill] sm:$0xff] }
 0x18c   :  { %v902_v26 = vadd.f32 %v901_v51, %v900_v29  ;;  %v652_v59 = vmul.f32 %v1210_v50, %v1860_v35  ;;  %v905_v10 = vsel %vm375_vm1, %v850_v47, 0.0  ;;  %v852_v30 = vmul.f32 %v2083_v13, %v643_v42  ;;  %980 = vst.msk [vmem:[%s2048_s5 + $0xd0] sm:$0xff] %vm375_vm1, %v648_v3 }
 0x18d   :  { %v857_v27 = vmul.f32 %v2084_v2, %v648_v3  ;;  %v855_v40 = vmul.f32 %v2085_v20, %v646_v53  ;;  %978 = vst.msk [vmem:[%s2048_s5 + $0xc0] sm:$0xff] %vm375_vm1, %v646_v53  ;;  %v858_v4 = vmul.f32 %v1593_v23, %v649_v41  ;;  %981 = vst.msk [vmem:[%s2048_s5 + $0xd8] sm:$0xff] %vm375_vm1, %v649_v41  ;;  %v907_v7 = vsel %vm375_vm1, %v851_v49, 0.0 }
 0x18e   :  { %v904_v16 = vadd.f32 %v903_v46, %v902_v26  ;;  %v856_v35 = vmul.f32 %v1597_v32, %v647_v38  ;;  %979 = vst.msk [vmem:[%s2048_s5 + $0xc8] sm:$0xff] %vm375_vm1, %v647_v38  ;;  %v861_v33 = vmul.f32 %v1599_v18, %v652_v59  ;;  %984 = vst.msk [vmem:[%s2048_s5 + $0xf0] sm:$0xff] %vm375_vm1, %v652_v59  ;;  %v909_v6 = vsel %vm375_vm1, %v852_v30, 0.0 }
 0x18f   :  { %v650_v15 = vmul.f32 %v1210_v50, %v1784_v11  ;;  %v653_v18 = vmul.f32 %v1210_v50, %v1878_v45  ;;  %v651_v36 = vmul.f32 %v1210_v50, %v1788_v22  ;;  %v911_v45 = vsel %vm375_vm1, %v853_v34, 0.0 }
 0x190   :  { %v906_v23 = vadd.f32 %v905_v10, %v904_v16  ;;  %v913_v56 = vsel %vm375_vm1, %v854_v24, 0.0  ;;  %v915_v28 = vsel %vm375_vm1, %v855_v40, 0.0  ;;  %v917_v37 = vsel %vm375_vm1, %v856_v35, 0.0 }
 0x191   :  { %v859_v32 = vmul.f32 %v1601_v9, %v650_v15  ;;  %982 = vst.msk [vmem:[%s2048_s5 + $0xe0] sm:$0xff] %vm375_vm1, %v650_v15  ;;  %v862_v39 = vmul.f32 %v2086_v8, %v653_v18  ;;  %985 = vst.msk [vmem:[%s2048_s5 + $0xf8] sm:$0xff] %vm375_vm1, %v653_v18  ;;  %v2087_v9 = vld [vmem:[#allocation14_spill] sm:$0xff]  ;;  %v919_v1 = vsel %vm375_vm1, %v857_v27, 0.0  ;;  %v921_v44 = vsel %vm375_vm1, %v858_v4, 0.0 }
 0x192   :  { %v908_v31 = vadd.f32 %v907_v7, %v906_v23  ;;  %v860_v11 = vmul.f32 %v2087_v9, %v651_v36  ;;  %983 = vst.msk [vmem:[%s2048_s5 + $0xe8] sm:$0xff] %vm375_vm1, %v651_v36  ;;  %v895_v25 = vadd.f32 %v894_v60, %v1923_v57  ;;  %v927_v52 = vsel %vm375_vm1, %v861_v33, 0.0  ;;  %v1030_v57 = vld [vmem:[%s2049_s3] ss:$0 sm:$0xff] }
 0x193   :  { %v923_v21 = vsel %vm375_vm1, %v859_v32, 0.0  ;;  %v929_v47 = vsel %vm375_vm1, %v862_v39, 0.0 }
 0x194   :  { %v910_v19 = vadd.f32 %v909_v6, %v908_v31  ;;  %v925_v0 = vsel %vm375_vm1, %v860_v11, 0.0  ;;  %v896_v58 = vrot.slane %v895_v25, 2 }
 0x196   :  { %v912_v22 = vadd.f32 %v911_v45, %v910_v19  ;;  %v897_v34 = vadd.f32 %v896_v58, %v895_v25 }
 0x198   :  { %v914_v54 = vadd.f32 %v913_v56, %v912_v22  ;;  %v898_v17 = vrot.slane %v897_v34, 1 }
 0x19a   :  { %v916_v14 = vadd.f32 %v915_v28, %v914_v54  ;;  %v899_v51 = vadd.f32 %v898_v17, %v897_v34 }
 0x19c   :  { %v918_v50 = vadd.f32 %v917_v37, %v916_v14  ;;  %v944_v42 = vadd.f32 %v1030_v57, %v899_v51 }
 0x19e   :  { %v920_v43 = vadd.f32 %v919_v1, %v918_v50 }
 0x1a0   :  { %v922_v63 = vadd.f32 %v921_v44, %v920_v43 }
 0x1a2   :  { %v924_v55 = vadd.f32 %v923_v21, %v922_v63 }
 0x1a4   :  { %v926_v5 = vadd.f32 %v925_v0, %v924_v55 }
 0x1a6   :  { %v928_v48 = vadd.f32 %v927_v52, %v926_v5 }
 0x1a8   :  { %v930_v12 = vadd.f32 %v929_v47, %v928_v48 }
 0x1aa   :  { %v931_v62 = vrot.slane %v930_v12, 4 }
 0x1ac   :  { %v932_v61 = vadd.f32 %v931_v62, %v930_v12 }
 0x1ae   :  { %v933_v49 = vrot.slane %v932_v61, 2 }
 0x1b0   :  { %v934_v24 = vadd.f32 %v933_v49, %v932_v61 }
 0x1b2   :  { %v935_v29 = vrot.slane %v934_v24, 1 }
 0x1b4   :  { %v936_v46 = vadd.f32 %v935_v29, %v934_v24 }
 0x1b6   :  { %v945_v26 = vadd.f32 %v1030_v57, %v936_v46 }
 0x1b8   :  { %v948_v3 = vrot.slane %v945_v26, 7 }
 0x1ba   :  { %v950_v53 = vsel %vm949_vm2, %v948_v3, %v944_v42 }
 0x1bb   :  { %953 = vst.msk [vmem:[%s2050_s4] sm:$0x3] %vm952_vm3, %v950_v53 }

// kernel: transformer_attn_forward.3
= control target key start
LH: loop header
LB: loop body
LE: loop exit
PB: predicated region body
PF: predicated region fallthrough
CT: control target
= control target key end

     0   :  { %s7095_s0 = inlined_call_operand.vmem [shape: f32[2,128,32], index: 0, kind: input, shape index: {}]   ;;  %s7096_s1 = inlined_call_operand.vmem [shape: f32[2,1,128], index: 1, kind: input, shape index: {}]   ;;  %s7097_s2 = inlined_call_operand.vmem [shape: f32[1,32], index: 2, kind: input, shape index: {}]   ;;  %s7098_s3 = inlined_call_operand.vmem [shape: f32[1,32], index: 3, kind: input, shape index: {}]   ;;  %s7099_s4 = inlined_call_operand.vmem [shape: bf16[32,32], index: 4, kind: input, shape index: {}]   ;;  %s7100_s5 = inlined_call_operand.vmem [shape: f32[1,32], index: 5, kind: input, shape index: {}]   ;;  %s7101_s6 = inlined_call_operand.vmem [shape: bf16[32,32], index: 6, kind: input, shape index: {}]   ;;  %s7102_s7 = inlined_call_operand.vmem [shape: f32[1,32], index: 7, kind: input, shape index: {}]   ;;  %s7103_s8 = inlined_call_operand.vmem [shape: bf16[32,32], index: 8, kind: input, shape index: {}]   ;;  %s7104_s9 = inlined_call_operand.vmem [shape: f32[1,32], index: 9, kind: input, shape index: {}]   ;;  %s7105_s10 = inlined_call_operand.vmem [shape: bf16[32,32], index: 10, kind: input, shape index: {}]   ;;  %s7106_s11 = inlined_call_operand.vmem [shape: f32[1,32], index: 11, kind: input, shape index: {}]   ;;  %s7107_s12 = inlined_call_operand.vmem [shape: f32[1,32], index: 12, kind: input, shape index: {}]   ;;  %s7108_s13 = inlined_call_operand.vmem [shape: f32[1,32], index: 13, kind: input, shape index: {}]   ;;  %s7109_s14 = inlined_call_operand.vmem [shape: bf16[32,64], index: 14, kind: input, shape index: {}]   ;;  %s7110_s15 = inlined_call_operand.vmem [shape: f32[1,64], index: 15, kind: input, shape index: {}]   ;;  %s7111_s16 = inlined_call_operand.vmem [shape: bf16[64,32], index: 16, kind: input, shape index: {}]   ;;  %s7112_s17 = inlined_call_operand.vmem [shape: f32[1,32], index: 17, kind: input, shape index: {}]   ;;  %s7113_s18 = inlined_call_operand.vmem [shape: f32[1,32], index: 18, kind: input, shape index: {}]   ;;  %s7114_s19 = inlined_call_operand.vmem [shape: f32[1,32], index: 19, kind: input, shape index: {}]   ;;  %s7115_s20 = inlined_call_operand.vmem [shape: f32[2,128,32], index: 20, kind: output, shape index: {}]  }
   0x1   :  { %7124 = sst [smem:[#allocation10_spill]] %s7095_s0 }
   0x2   :  { %7125 = sst [smem:[#allocation11_spill]] %s7096_s1  ;;  %s5333_s1 = smov 0  }
   0x3   :  { %7126 = sst [smem:[#allocation12_spill]] %s7097_s2 }
   0x4   :  { %7127 = sst [smem:[#allocation13_spill]] %s7098_s3 }
   0x5   :  { %7128 = sst [smem:[#allocation14_spill]] %s7099_s4 }
   0x6 LB: > { %s4129_s22 = sadd.s32 4294967295, %s5219_s1   ;;  %p4133_p0 = scmp.ge.s32.totalorder %s5219_s1, 1  ;;  %s5219_s1 = sphi %s5333_s1, %s30_s1  }
   0x7   : > { %p570_p1 = scmp.lt.s32.totalorder %s5219_s1, 3 }
   0x9   : > { %p571_p2 = pnand %p4133_p0, %p570_p1 }
   0xb   : > { %574 = sbr.rel (%p571_p2) target bundleno = 4438 (0x1156), region = 100 }
  0x12   : > { %p631_p3 = scmp.lt.s32.totalorder %s4129_s22, 1  ;;  %vm666_vm0 = vcmask 261120   ;;  %s7129_s24 = sld [smem:[#allocation10_spill]]  ;;  %vm1342_vm1 = vcmask 64512   ;;  %vm2267_vm3 = vcmask 130112   ;;  %vm2766_vm4 = vcmask 195712  }
  0x13   : > { %s7130_s26 = sld [smem:[#allocation14_spill]]  ;;  %s7131_s25 = sld [smem:[#allocation12_spill]]  ;;  %vm3265_vm5 = vcmask 261312   ;;  %vm3911_vm6 = vcmask 523264  }
  0x14   : > { %s7161_s22 = smov (!%p631_p3, %s4129_s22), 1  ;;  %s7132_s28 = sld [smem:[#allocation13_spill]] }
  0x15   : > { %s4244_s18 = sshll.u32 %s7161_s22, 7  ;;  %s5221_s23 = smov 120  }
  0x16   : > { %s5223_s29 = smov 112   ;;  %s5224_s30 = smov 104  }
  0x17   : > { %s5225_s0 = smov 8   ;;  %s5226_s21 = smov 16  }
  0x18   : > { %s5349_s2 = scalar_lea.vmem %s7129_s24, %s4244_s18  ;;  %s5227_s3 = smov 24  }
  0x19   : > { %v645_v0 = vld [vmem:[%s5349_s2] sm:$0xff]  ;;  %v647_v1 = vld [vmem:[%s5349_s2 + $0x10] sm:$0xff]  ;;  %v646_v2 = vld [vmem:[%s5349_s2 + $0x8] sm:$0xff] }
  0x1a   : > { %v667_v3 = vsel %vm666_vm0, %v645_v0, 0.0  ;;  %v673_v4 = vsel %vm666_vm0, %v647_v1, 0.0  ;;  %v648_v5 = vld [vmem:[%s5349_s2 + $0x18] sm:$0xff]  ;;  %v670_v6 = vsel %vm666_vm0, %v646_v2, 0.0  ;;  %v649_v8 = vld [vmem:[%s5349_s2 + $0x20] sm:$0xff]  ;;  %v650_v9 = vld [vmem:[%s5349_s2 + $0x28] sm:$0xff] }
  0x1b   : > { %668 = vadd.xlane.f32.xlu0 %v667_v3  ;;  %674 = vadd.xlane.f32.xlu1 %v673_v4  ;;  %v676_v7 = vsel %vm666_vm0, %v648_v5, 0.0  ;;  %v679_v10 = vsel %vm666_vm0, %v649_v8, 0.0  ;;  %v682_v11 = vsel %vm666_vm0, %v650_v9, 0.0  ;;  %v5364_v12 = vld [vmem:[%s5349_s2 + $0x30] sm:$0xff]  ;;  %v5367_v13 = vld [vmem:[%s5349_s2 + $0x38] sm:$0xff]  ;;  %v5374_v16 = vld [vmem:[%s5349_s2 + $0x40] sm:$0xff] }
  0x1c   : > { %v685_v14 = vsel %vm666_vm0, %v5364_v12, 0.0  ;;  %v688_v15 = vsel %vm666_vm0, %v5367_v13, 0.0  ;;  %v5377_v17 = vld [vmem:[%s5349_s2 + $0x48] sm:$0xff]  ;;  %v691_v18 = vsel %vm666_vm0, %v5374_v16, 0.0  ;;  %v5384_v20 = vld [vmem:[%s5349_s2 + $0x50] sm:$0xff]  ;;  %v5387_v21 = vld [vmem:[%s5349_s2 + $0x58] sm:$0xff] }
  0x1d   : > { %v694_v19 = vsel %vm666_vm0, %v5377_v17, 0.0  ;;  %v697_v22 = vsel %vm666_vm0, %v5384_v20, 0.0  ;;  %v700_v23 = vsel %vm666_vm0, %v5387_v21, 0.0  ;;  %v5394_v24 = vld [vmem:[%s5349_s2 + $0x60] sm:$0xff]  ;;  %v5397_v25 = vld [vmem:[%s5349_s2 + $0x68] sm:$0xff]  ;;  %v5404_v28 = vld [vmem:[%s5349_s2 + $0x70] sm:$0xff] }
  0x1e   : > { %v703_v26 = vsel %vm666_vm0, %v5394_v24, 0.0  ;;  %v706_v27 = vsel %vm666_vm0, %v5397_v25, 0.0  ;;  %v5407_v29 = vld [vmem:[%s5349_s2 + $0x78] sm:$0xff]  ;;  %v709_v30 = vsel %vm666_vm0, %v5404_v28, 0.0 }
  0x1f   : > { %671 = vadd.xlane.f32.xlu0 %v670_v6  ;;  %677 = vadd.xlane.f32.xlu1 %v676_v7  ;;  %v712_v31 = vsel %vm666_vm0, %v5407_v29, 0.0 }
  0x23   : > { %680 = vadd.xlane.f32.xlu0 %v679_v10  ;;  %683 = vadd.xlane.f32.xlu1 %v682_v11 }
  0x27   : > { %686 = vadd.xlane.f32.xlu0 %v685_v14  ;;  %689 = vadd.xlane.f32.xlu1 %v688_v15 }
  0x2b   : > { %692 = vadd.xlane.f32.xlu0 %v691_v18  ;;  %695 = vadd.xlane.f32.xlu1 %v694_v19 }
  0x2f   : > { %698 = vadd.xlane.f32.xlu0 %v697_v22  ;;  %701 = vadd.xlane.f32.xlu1 %v700_v23 }
  0x33   : > { %704 = vadd.xlane.f32.xlu0 %v703_v26  ;;  %707 = vadd.xlane.f32.xlu1 %v706_v27 }
  0x37   : > { %710 = vadd.xlane.f32.xlu0 %v709_v30  ;;  %713 = vadd.xlane.f32.xlu1 %v712_v31 }
  0xa8   : > { %v669_v32 = vpop.xlane.xlu0 %668  ;;  %v675_v33 = vpop.xlane.xlu1 %674 }
  0xa9   : > { %v716_v34 = vmul.f32 0.03125, %v669_v32  ;;  %v718_v35 = vmul.f32 0.03125, %v675_v33 }
  0xab   : > { %v5413_v36 = vsub.f32 %v645_v0, %v716_v34  ;;  %v5415_v37 = vsub.f32 %v647_v1, %v718_v35 }
  0xac   : > { %v672_v38 = vpop.xlane.xlu0 %671  ;;  %v678_v39 = vpop.xlane.xlu1 %677 }
  0xad   : > { %v717_v40 = vmul.f32 0.03125, %v672_v38  ;;  %v719_v41 = vmul.f32 0.03125, %v678_v39  ;;  %v748_v42 = vmul.f32 %v5413_v36, %v5413_v36  ;;  %v750_v43 = vmul.f32 %v5415_v37, %v5415_v37 }
  0xaf   : > { %v5421_v44 = vsub.f32 %v646_v2, %v717_v40  ;;  %v5423_v45 = vsub.f32 %v648_v5, %v719_v41  ;;  %v764_v46 = vsel %vm666_vm0, %v748_v42, 0.0  ;;  %v770_v49 = vsel %vm666_vm0, %v750_v43, 0.0 }
  0xb0   : > { %765 = vadd.xlane.f32.xlu0 %v764_v46  ;;  %v681_v47 = vpop.xlane.xlu0 %680  ;;  %v684_v48 = vpop.xlane.xlu1 %683 }
  0xb1   : > { %v720_v50 = vmul.f32 0.03125, %v681_v47  ;;  %v721_v51 = vmul.f32 0.03125, %v684_v48  ;;  %v749_v52 = vmul.f32 %v5421_v44, %v5421_v44  ;;  %v751_v53 = vmul.f32 %v5423_v45, %v5423_v45 }
  0xb3   : > { %v5431_v54 = vsub.f32 %v649_v8, %v720_v50  ;;  %v5433_v55 = vsub.f32 %v650_v9, %v721_v51  ;;  %v767_v56 = vsel %vm666_vm0, %v749_v52, 0.0  ;;  %v773_v59 = vsel %vm666_vm0, %v751_v53, 0.0  ;;  %v4864_v53 = vld [vmem:[%s7101_s6] sm:$0xff]  }
  0xb4   : > { %771 = vadd.xlane.f32.xlu0 %v770_v49  ;;  %768 = vadd.xlane.f32.xlu1 %v767_v56  ;;  %v687_v57 = vpop.xlane.xlu0 %686  ;;  %v690_v58 = vpop.xlane.xlu1 %689  ;;  %v4865_v56 = vld [vmem:[%s7130_s26 + $0x8] sm:$0xff]  }
  0xb5   : > { %v722_v60 = vmul.f32 0.03125, %v687_v57  ;;  %v723_v61 = vmul.f32 0.03125, %v690_v58  ;;  %v752_v62 = vmul.f32 %v5431_v54, %v5431_v54  ;;  %v753_v63 = vmul.f32 %v5433_v55, %v5433_v55  ;;  %4456 = vmatprep.subr.bf16.mxu1 %v4864_v53  ;;  %v4866_v57 = vld [vmem:[%s7101_s6 + $0x8] sm:$0xff]   ;;  %v5518_v58 = vld [vmem:[%s7103_s8] sm:$0xff]  }
  0xb6   : > { %4457 = vmatpush3.bf16.msra.mxu1 %v4864_v53 }
  0xb7   : > { %v5442_v0 = vsub.f32 %v5364_v12, %v722_v60  ;;  %v5445_v1 = vsub.f32 %v5367_v13, %v723_v61  ;;  %v776_v2 = vsel %vm666_vm0, %v752_v62, 0.0  ;;  %v779_v5 = vsel %vm666_vm0, %v753_v63, 0.0  ;;  %4458 = vmatprep.subr.bf16.mxu1 %v4866_v57 }
  0xb8   : > { %774 = vadd.xlane.f32.xlu1 %v773_v59  ;;  %777 = vadd.xlane.f32.xlu0 %v776_v2  ;;  %v693_v3 = vpop.xlane.xlu0 %692  ;;  %v696_v4 = vpop.xlane.xlu1 %695 }
  0xb9   : > { %v724_v6 = vmul.f32 0.03125, %v693_v3  ;;  %v725_v7 = vmul.f32 0.03125, %v696_v4  ;;  %v754_v8 = vmul.f32 %v5442_v0, %v5442_v0  ;;  %v755_v9 = vmul.f32 %v5445_v1, %v5445_v1 }
  0xba   : > { %4459 = vmatpush3.bf16.msra.mxu1 %v4866_v57 }
  0xbb   : > { %v5454_v10 = vsub.f32 %v5374_v16, %v724_v6  ;;  %v5457_v11 = vsub.f32 %v5377_v17, %v725_v7  ;;  %v782_v12 = vsel %vm666_vm0, %v754_v8, 0.0  ;;  %v785_v15 = vsel %vm666_vm0, %v755_v9, 0.0 }
  0xbc   : > { %780 = vadd.xlane.f32.xlu1 %v779_v5  ;;  %783 = vadd.xlane.f32.xlu0 %v782_v12  ;;  %v699_v13 = vpop.xlane.xlu0 %698  ;;  %v702_v14 = vpop.xlane.xlu1 %701 }
  0xbd   : > { %v726_v18 = vmul.f32 0.03125, %v699_v13  ;;  %v727_v19 = vmul.f32 0.03125, %v702_v14  ;;  %v756_v22 = vmul.f32 %v5454_v10, %v5454_v10  ;;  %v757_v16 = vmul.f32 %v5457_v11, %v5457_v11 }
  0xbf   : > { %v5466_v23 = vsub.f32 %v5384_v20, %v726_v18  ;;  %v5469_v17 = vsub.f32 %v5387_v21, %v727_v19  ;;  %v788_v26 = vsel %vm666_vm0, %v756_v22, 0.0  ;;  %v791_v31 = vsel %vm666_vm0, %v757_v16, 0.0 }
  0xc0   : > { %786 = vadd.xlane.f32.xlu1 %v785_v15  ;;  %789 = vadd.xlane.f32.xlu0 %v788_v26  ;;  %v705_v27 = vpop.xlane.xlu0 %704  ;;  %v708_v30 = vpop.xlane.xlu1 %707 }
  0xc1   : > { %v728_v32 = vmul.f32 0.03125, %v705_v27  ;;  %v729_v33 = vmul.f32 0.03125, %v708_v30  ;;  %v758_v34 = vmul.f32 %v5466_v23, %v5466_v23  ;;  %v759_v20 = vmul.f32 %v5469_v17, %v5469_v17 }
  0xc3   : > { %v5478_v35 = vsub.f32 %v5394_v24, %v728_v32  ;;  %v5481_v21 = vsub.f32 %v5397_v25, %v729_v33  ;;  %v794_v38 = vsel %vm666_vm0, %v758_v34, 0.0  ;;  %v797_v41 = vsel %vm666_vm0, %v759_v20, 0.0  ;;  %v5525_v34 = vld [vmem:[%s7131_s25] ss:$0 sm:$0xff]  ;;  %s7042_s25 = scalar_lea.vmem %s7115_s20, %s4244_s18 }
  0xc4   : > { %792 = vadd.xlane.f32.xlu1 %v791_v31  ;;  %795 = vadd.xlane.f32.xlu0 %v794_v38  ;;  %v711_v39 = vpop.xlane.xlu0 %710  ;;  %v714_v40 = vpop.xlane.xlu1 %713 }
  0xc5   : > { %v730_v42 = vmul.f32 0.03125, %v711_v39  ;;  %v731_v43 = vmul.f32 0.03125, %v714_v40  ;;  %v760_v46 = vmul.f32 %v5478_v35, %v5478_v35  ;;  %v761_v24 = vmul.f32 %v5481_v21, %v5481_v21 }
  0xc7   : > { %v5490_v47 = vsub.f32 %v5404_v28, %v730_v42  ;;  %v5493_v25 = vsub.f32 %v5407_v29, %v731_v43  ;;  %v800_v48 = vsel %vm666_vm0, %v760_v46, 0.0  ;;  %v803_v49 = vsel %vm666_vm0, %v761_v24, 0.0  ;;  %v4863_v29 = vld [vmem:[%s7130_s26] sm:$0xff]  }
  0xc8   : > { %798 = vadd.xlane.f32.xlu1 %v797_v41  ;;  %801 = vadd.xlane.f32.xlu0 %v800_v48  ;;  %v5532_v48 = vld [vmem:[%s7132_s28] ss:$0 sm:$0xff]  ;;  %s7133_s28 = sld [smem:[#allocation11_spill]] }
  0xc9   : > { %v762_v50 = vmul.f32 %v5490_v47, %v5490_v47  ;;  %v763_v51 = vmul.f32 %v5493_v25, %v5493_v25  ;;  %4436 = vmatprep.subr.bf16.mxu0 %v4863_v29 }
  0xca   : > { %4437 = vmatpush3.bf16.msra.mxu0 %v4863_v29 }
  0xcb   : > { %v806_v52 = vsel %vm666_vm0, %v762_v50, 0.0  ;;  %v809_v28 = vsel %vm666_vm0, %v763_v51, 0.0  ;;  %4438 = vmatprep.subr.bf16.mxu0 %v4865_v56 }
  0xcc   : > { %804 = vadd.xlane.f32.xlu1 %v803_v49  ;;  %807 = vadd.xlane.f32.xlu0 %v806_v52 }
  0xce   : > { %4439 = vmatpush3.bf16.msra.mxu0 %v4865_v56  ;;  %s638_s4 = scalar_lea.vmem %s7133_s28, %s7161_s22 }
  0xcf   : > { %4476 = vmatprep.subr.bf16.mxu0 %v5518_v58 }
  0xd0   : > { %810 = vadd.xlane.f32.xlu1 %v809_v28 }
 0x13d   : > { %v766_v59 = vpop.xlane.xlu0 %765 }
 0x13e   : > { %v812_v60 = vmul.f32 0.03125, %v766_v59 }
 0x140   : > { %v828_v61 = vadd.f32 1e-06, %v812_v60 }
 0x141   : > { %v769_v62 = vpop.xlane.xlu1 %768  ;;  %v772_v63 = vpop.xlane.xlu0 %771 }
 0x142   : > { %4877 = vrsqrt.f32 %v828_v61  ;;  %v813_v2 = vmul.f32 0.03125, %v769_v62  ;;  %v814_v3 = vmul.f32 0.03125, %v772_v63 }
 0x144   : > { %v829_v4 = vadd.f32 1e-06, %v813_v2  ;;  %v830_v5 = vadd.f32 1e-06, %v814_v3 }
 0x145   : > { %v775_v6 = vpop.xlane.xlu1 %774  ;;  %v778_v7 = vpop.xlane.xlu0 %777 }
 0x146   : > { %4879 = vrsqrt.f32 %v829_v4  ;;  %v815_v8 = vmul.f32 0.03125, %v775_v6  ;;  %v816_v9 = vmul.f32 0.03125, %v778_v7 }
 0x147   : > { %4881 = vrsqrt.f32 %v830_v5 }
 0x148   : > { %v831_v12 = vadd.f32 1e-06, %v815_v8  ;;  %v832_v13 = vadd.f32 1e-06, %v816_v9 }
 0x149   : > { %v781_v14 = vpop.xlane.xlu1 %780  ;;  %v784_v15 = vpop.xlane.xlu0 %783 }
 0x14a   : > { %4883 = vrsqrt.f32 %v831_v12  ;;  %v817_v18 = vmul.f32 0.03125, %v781_v14  ;;  %v818_v19 = vmul.f32 0.03125, %v784_v15 }
 0x14b   : > { %4885 = vrsqrt.f32 %v832_v13 }
 0x14c   : > { %v4878_v22 = vpop.eup %4877  ;;  %v833_v16 = vadd.f32 1e-06, %v817_v18  ;;  %v834_v26 = vadd.f32 1e-06, %v818_v19 }
 0x14d   : > { %v787_v27 = vpop.xlane.xlu1 %786  ;;  %v790_v30 = vpop.xlane.xlu0 %789  ;;  %v860_v31 = vmul.f32 %v4878_v22, %v5413_v36  ;;  %v4868_v22 = vld [vmem:[%s7103_s8 + $0x8] sm:$0xff]  }
 0x14e   : > { %4887 = vrsqrt.f32 %v833_v16  ;;  %v819_v32 = vmul.f32 0.03125, %v787_v27  ;;  %v820_v33 = vmul.f32 0.03125, %v790_v30 }
 0x14f   : > { %4889 = vrsqrt.f32 %v834_v26  ;;  %v882_v46 = vmul.f32 %v5525_v34, %v860_v31 }
 0x150   : > { %v4880_v20 = vpop.eup %4879  ;;  %v835_v38 = vadd.f32 1e-06, %v819_v32  ;;  %v836_v39 = vadd.f32 1e-06, %v820_v33 }
 0x151   : > { %v4882_v40 = vpop.eup %4881  ;;  %v793_v41 = vpop.xlane.xlu1 %792  ;;  %v861_v43 = vmul.f32 %v4880_v20, %v5421_v44  ;;  %v904_v57 = vadd.f32 %v5532_v48, %v882_v46 }
 0x152   : > { %v796_v42 = vpop.xlane.xlu0 %795  ;;  %4891 = vrsqrt.f32 %v835_v38  ;;  %v821_v36 = vmul.f32 0.03125, %v793_v41  ;;  %v862_v49 = vmul.f32 %v4882_v40, %v5415_v37 }
 0x153   : > { %v822_v24 = vmul.f32 0.03125, %v796_v42  ;;  %4893 = vrsqrt.f32 %v836_v39  ;;  %v883_v50 = vmul.f32 %v5525_v34, %v861_v43 }
 0x154   : > { %v4884_v51 = vpop.eup %4883  ;;  %v837_v52 = vadd.f32 1e-06, %v821_v36  ;;  %v884_v44 = vmul.f32 %v5525_v34, %v862_v49 }
 0x155   : > { %v838_v28 = vadd.f32 1e-06, %v822_v24  ;;  %v4886_v29 = vpop.eup %4885  ;;  %v799_v53 = vpop.xlane.xlu1 %798  ;;  %v905_v59 = vadd.f32 %v5532_v48, %v883_v50  ;;  %v863_v60 = vmul.f32 %v4884_v51, %v5423_v45 }
 0x156   : > { %v802_v56 = vpop.xlane.xlu0 %801  ;;  %4895 = vrsqrt.f32 %v837_v52  ;;  %v823_v61 = vmul.f32 0.03125, %v799_v53  ;;  %v864_v2 = vmul.f32 %v4886_v29, %v5431_v54  ;;  %v906_v6 = vadd.f32 %v5532_v48, %v884_v44 }
 0x157   : > { %v824_v37 = vmul.f32 0.03125, %v802_v56  ;;  %4897 = vrsqrt.f32 %v838_v28  ;;  %v5540_v62 = vpack.c.bf16 %v905_v59, %v904_v57  ;;  %v885_v63 = vmul.f32 %v5525_v34, %v863_v60 }
 0x158   : > { %v4888_v3 = vpop.eup %4887  ;;  %v839_v4 = vadd.f32 1e-06, %v823_v61  ;;  %v886_v54 = vmul.f32 %v5525_v34, %v864_v2 }
 0x159   : > { %v840_v5 = vadd.f32 1e-06, %v824_v37  ;;  %v4890_v7 = vpop.eup %4889  ;;  %v805_v8 = vpop.xlane.xlu1 %804  ;;  %4440 = vmatprep.mubr.msk.bf16.mxu0 %vm666_vm0, %v5540_v62  ;;  %4460 = vmatprep.mubr.msk.bf16.mxu1 %vm666_vm0, %v5540_v62  ;;  %v907_v9 = vadd.f32 %v5532_v48, %v885_v63  ;;  %v865_v12 = vmul.f32 %v4888_v3, %v5433_v55 }
 0x15a   : > { %v808_v45 = vpop.xlane.xlu0 %807  ;;  %4899 = vrsqrt.f32 %v839_v4  ;;  %v825_v13 = vmul.f32 0.03125, %v805_v8  ;;  %v866_v15 = vmul.f32 %v4890_v7, %v5442_v0  ;;  %v908_v55 = vadd.f32 %v5532_v48, %v886_v54 }
 0x15b   : > { %v826_v14 = vmul.f32 0.03125, %v808_v45  ;;  %4901 = vrsqrt.f32 %v840_v5  ;;  %v5553_v18 = vpack.c.bf16 %v907_v9, %v906_v6  ;;  %v887_v19 = vmul.f32 %v5525_v34, %v865_v12 }
 0x15c   : > { %v4892_v16 = vpop.eup %4891  ;;  %v841_v26 = vadd.f32 1e-06, %v825_v13  ;;  %v888_v33 = vmul.f32 %v5525_v34, %v866_v15 }
 0x15d   : > { %v842_v27 = vadd.f32 1e-06, %v826_v14  ;;  %v4894_v30 = vpop.eup %4893  ;;  %v811_v31 = vpop.xlane.xlu1 %810  ;;  %4441 = vmatmul.mubr.msk.bf16.vlgmr.msra.gmra.mrb[0].mxu0 %vm666_vm0, %v5553_v18  ;;  %4461 = vmatmul.mubr.msk.bf16.vlgmr.msra.gmra.mrb[0].mxu1 %vm666_vm0, %v5553_v18  ;;  %v909_v0 = vadd.f32 %v5532_v48, %v887_v19  ;;  %v867_v32 = vmul.f32 %v4892_v16, %v5445_v1 }
 0x15e   : > { %4903 = vrsqrt.f32 %v841_v26  ;;  %v827_v20 = vmul.f32 0.03125, %v811_v31  ;;  %v868_v38 = vmul.f32 %v4894_v30, %v5454_v10  ;;  %4477 = vmatpush3.bf16.msra.mxu0 %v5518_v58  ;;  %v910_v1 = vadd.f32 %v5532_v48, %v888_v33 }
 0x15f   : > { %4905 = vrsqrt.f32 %v842_v27  ;;  %v922_v39 = vpack.c.bf16 %v909_v0, %v908_v55  ;;  %v889_v40 = vmul.f32 %v5525_v34, %v867_v32  ;;  %4478 = vmatprep.subr.bf16.mxu0 %v4868_v22 }
 0x160   : > { %v4896_v41 = vpop.eup %4895  ;;  %v843_v42 = vadd.f32 1e-06, %v827_v20  ;;  %v890_v43 = vmul.f32 %v5525_v34, %v868_v38 }
 0x161   : > { %v4898_v46 = vpop.eup %4897  ;;  %4444 = vmatprep.mubr.msk.bf16.mxu0 %vm666_vm0, %v922_v39  ;;  %4464 = vmatprep.mubr.msk.bf16.mxu1 %vm666_vm0, %v922_v39  ;;  %v911_v10 = vadd.f32 %v5532_v48, %v889_v40  ;;  %v869_v58 = vmul.f32 %v4896_v41, %v5457_v11 }
 0x162   : > { %4907 = vrsqrt.f32 %v843_v42  ;;  %v870_v36 = vmul.f32 %v4898_v46, %v5466_v23  ;;  %4479 = vmatpush3.bf16.msra.mxu0 %v4868_v22  ;;  %v912_v51 = vadd.f32 %v5532_v48, %v890_v43 }
 0x163   : > { %v923_v24 = vpack.c.bf16 %v911_v10, %v910_v1  ;;  %v891_v49 = vmul.f32 %v5525_v34, %v869_v58 }
 0x164   : > { %v4900_v50 = vpop.eup %4899  ;;  %v892_v11 = vmul.f32 %v5525_v34, %v870_v36 }
 0x165   : > { %v4902_v52 = vpop.eup %4901  ;;  %4445 = vmatmul.mubr.msk.bf16.gmra.mrb[4].mxu0 %vm666_vm0, %v923_v24  ;;  %4465 = vmatmul.mubr.msk.bf16.gmra.mrb[4].mxu1 %vm666_vm0, %v923_v24  ;;  %v913_v28 = vadd.f32 %v5532_v48, %v891_v49  ;;  %v871_v44 = vmul.f32 %v4900_v50, %v5469_v17 }
 0x166   : > { %v872_v23 = vmul.f32 %v4902_v52, %v5478_v35  ;;  %v914_v60 = vadd.f32 %v5532_v48, %v892_v11 }
 0x167   : > { %v924_v29 = vpack.c.bf16 %v913_v28, %v912_v51  ;;  %v893_v53 = vmul.f32 %v5525_v34, %v871_v44 }
 0x168   : > { %v4904_v56 = vpop.eup %4903  ;;  %v894_v57 = vmul.f32 %v5525_v34, %v872_v23 }
 0x169   : > { %v4906_v59 = vpop.eup %4905  ;;  %4448 = vmatprep.mubr.msk.bf16.mxu0 %vm666_vm0, %v924_v29  ;;  %4468 = vmatprep.mubr.msk.bf16.mxu1 %vm666_vm0, %v924_v29  ;;  %v915_v61 = vadd.f32 %v5532_v48, %v893_v53  ;;  %v873_v17 = vmul.f32 %v4904_v56, %v5481_v21 }
 0x16a   : > { %v874_v37 = vmul.f32 %v4906_v59, %v5490_v47  ;;  %v916_v3 = vadd.f32 %v5532_v48, %v894_v57 }
 0x16b   : > { %v925_v35 = vpack.c.bf16 %v915_v61, %v914_v60  ;;  %v895_v63 = vmul.f32 %v5525_v34, %v873_v17 }
 0x16c   : > { %v4908_v2 = vpop.eup %4907  ;;  %v896_v6 = vmul.f32 %v5525_v34, %v874_v37 }
 0x16d   : > { %4449 = vmatmul.mubr.msk.bf16.gmra.mrb[8].mxu0 %vm666_vm0, %v925_v35  ;;  %4469 = vmatmul.mubr.msk.bf16.gmra.mrb[8].mxu1 %vm666_vm0, %v925_v35  ;;  %v917_v4 = vadd.f32 %v5532_v48, %v895_v63  ;;  %v875_v5 = vmul.f32 %v4908_v2, %v5493_v25 }
 0x16e   : > { %v918_v47 = vadd.f32 %v5532_v48, %v896_v6 }
 0x16f   : > { %v926_v7 = vpack.c.bf16 %v917_v4, %v916_v3  ;;  %v897_v21 = vmul.f32 %v5525_v34, %v875_v5  ;;  %v5620_v34 = vld [vmem:[%s7100_s5] ss:$0 sm:$0xff] }
 0x171   : > { %4452 = vmatprep.mubr.msk.bf16.mxu0 %vm666_vm0, %v926_v7  ;;  %4472 = vmatprep.mubr.msk.bf16.mxu1 %vm666_vm0, %v926_v7  ;;  %v919_v8 = vadd.f32 %v5532_v48, %v897_v21 }
 0x173   : > { %v927_v45 = vpack.c.bf16 %v919_v8, %v918_v47 }
 0x175   : > { %4453 = vmatmul.mubr.msk.bf16.gmra.mrb[12].mxu0 %vm666_vm0, %v927_v45  ;;  %4473 = vmatmul.mubr.msk.bf16.gmra.mrb[12].mxu1 %vm666_vm0, %v927_v45 }
 0x176   : > { %4480 = vmatprep.mubr.msk.bf16.mxu0 %vm666_vm0, %v5540_v62  ;;  %v5625_v62 = vld [vmem:[%s7102_s7] ss:$0 sm:$0xff] }
 0x17d   : > { %4481 = vmatmul.mubr.msk.bf16.vlgmr.msra.gmra.mrb[16].mxu0 %vm666_vm0, %v5553_v18 }
 0x17e   : > { %4484 = vmatprep.mubr.msk.bf16.mxu0 %vm666_vm0, %v922_v39 }
 0x185   : > { %4485 = vmatmul.mubr.msk.bf16.gmra.mrb[20].mxu0 %vm666_vm0, %v923_v24 }
 0x186   : > { %4488 = vmatprep.mubr.msk.bf16.mxu0 %vm666_vm0, %v924_v29 }
 0x18d   : > { %4489 = vmatmul.mubr.msk.bf16.gmra.mrb[24].mxu0 %vm666_vm0, %v925_v35 }
 0x18e   : > { %4492 = vmatprep.mubr.msk.bf16.mxu0 %vm666_vm0, %v926_v7 }
 0x195   : > { %4493 = vmatmul.mubr.msk.bf16.gmra.mrb[28].mxu0 %vm666_vm0, %v927_v45 }
 0x230   : > { %v4442_v25 = vpop.f32.mrb[0].mxu0  ;;  %v4462_v48 = vpop.f32.mrb[0].mxu1 }
 0x231   : > { %v1009_v9 = vpop.f32.mrb[1].mxu0  ;;  %v1129_v12 = vpop.f32.mrb[1].mxu1  ;;  %v1018_v14 = vadd.f32 %v4442_v25, %v5620_v34  ;;  %v1138_v15 = vadd.f32 %v4462_v48, %v5625_v62 }
 0x232   : > { %v4443_v54 = vpop.f32.mrb[2].mxu0  ;;  %v4463_v13 = vpop.f32.mrb[2].mxu1  ;;  %v1010_v26 = vadd.f32 %v5620_v34, %v1009_v9  ;;  %v1130_v27 = vadd.f32 %v5625_v62, %v1129_v12 }
 0x233   : > { %v1021_v18 = vadd.f32 %v4443_v54, %v5620_v34  ;;  %v1141_v19 = vadd.f32 %v4463_v13, %v5625_v62  ;;  %v1012_v22 = vpop.f32.mrb[3].mxu0  ;;  %v1132_v16 = vpop.f32.mrb[3].mxu1 }
 0x234   : > { %v1013_v55 = vadd.f32 %v5620_v34, %v1012_v22  ;;  %v1133_v30 = vadd.f32 %v5625_v62, %v1132_v16 }
 0x235   : > { %v5635_v31 = vpack.c.bf16 %v1021_v18, %v1018_v14  ;;  %v5637_v0 = vpack.c.bf16 %v1141_v19, %v1138_v15 }
 0x236   : > { %v5639_v32 = vpack.c.bf16 %v1013_v55, %v1010_v26  ;;  %v5641_v33 = vpack.c.bf16 %v1133_v30, %v1130_v27 }
 0x237   : > { %1787 = vrot.lane.b32.xlu1 %v5637_v0, %s5221_s23  ;;  %v1371_v56 = vsel %vm1342_vm1, %v5637_v0, 0 }
 0x238   : > { %1785 = vrot.lane.b32.xlu0 %v5641_v33, %s5221_s23  ;;  %v4446_v20 = vpop.f32.mrb[4].mxu0  ;;  %v4466_v38 = vpop.f32.mrb[4].mxu1  ;;  %4816 = vmatprep.subr.msk.bf16.mxu1 %vm1342_vm1, %v5641_v33  ;;  %v1368_v39 = vsel %vm1342_vm1, %v5641_v33, 0 }
 0x239   : > { %v1034_v40 = vadd.f32 %v4446_v20, %v5620_v34  ;;  %4512 = vmatprep.mubr.msk.bf16.mxu1 %vm1342_vm1, %v5639_v32  ;;  %v1025_v41 = vpop.f32.mrb[5].mxu0  ;;  %v1145_v42 = vpop.f32.mrb[5].mxu1  ;;  %4497 = vmatpush3.bf16.xpose.msra.mxu1 %v1368_v39  ;;  %v1154_v10 = vadd.f32 %v4466_v38, %v5625_v62 }
 0x23a   : > { %v1026_v43 = vadd.f32 %v5620_v34, %v1025_v41  ;;  %v4447_v46 = vpop.f32.mrb[6].mxu0  ;;  %v4467_v1 = vpop.f32.mrb[6].mxu1  ;;  %4817 = vmatprep.subr.msk.bf16.mxu1 %vm1342_vm1, %v5637_v0  ;;  %v1146_v50 = vadd.f32 %v5625_v62, %v1145_v42 }
 0x23b   : > { %v1037_v58 = vadd.f32 %v4447_v46, %v5620_v34  ;;  %v1157_v36 = vadd.f32 %v4467_v1, %v5625_v62  ;;  %v1028_v24 = vpop.f32.mrb[7].mxu0  ;;  %v1148_v49 = vpop.f32.mrb[7].mxu1 }
 0x23c   : > { %v1029_v51 = vadd.f32 %v5620_v34, %v1028_v24  ;;  %v1149_v52 = vadd.f32 %v5625_v62, %v1148_v49 }
 0x23d   : > { %v5663_v28 = vpack.c.bf16 %v1037_v58, %v1034_v40  ;;  %v5665_v44 = vpack.c.bf16 %v1157_v36, %v1154_v10 }
 0x23e   : > { %v5667_v11 = vpack.c.bf16 %v1029_v51, %v1026_v43  ;;  %v5669_v23 = vpack.c.bf16 %v1149_v52, %v1146_v50  ;;  %v4162_v43 = vld [vmem:[%s7104_s9] ss:$0 sm:$0xff] }
 0x23f   : > { %v1377_v46 = vsel %vm1342_vm1, %v5665_v44, 0 }
 0x240   : > { %v4450_v29 = vpop.f32.mrb[8].mxu0  ;;  %v4470_v53 = vpop.f32.mrb[8].mxu1  ;;  %v1374_v9 = vsel %vm1342_vm1, %v5669_v23, 0 }
 0x241   : > { %v1050_v57 = vadd.f32 %v4450_v29, %v5620_v34  ;;  %v1041_v59 = vpop.f32.mrb[9].mxu0  ;;  %v1161_v60 = vpop.f32.mrb[9].mxu1  ;;  %4499 = vmatpush3.bf16.xpose.msra.mxu1 %v1371_v56  ;;  %v1170_v35 = vadd.f32 %v4470_v53, %v5625_v62 }
 0x242   : > { %v1042_v61 = vadd.f32 %v5620_v34, %v1041_v59  ;;  %v4451_v17 = vpop.f32.mrb[10].mxu0  ;;  %v4471_v37 = vpop.f32.mrb[10].mxu1  ;;  %4818 = vmatprep.subr.msk.bf16.mxu1 %vm1342_vm1, %v5669_v23  ;;  %v1162_v5 = vadd.f32 %v5625_v62, %v1161_v60 }
 0x243   : > { %v1053_v63 = vadd.f32 %v4451_v17, %v5620_v34  ;;  %v1173_v2 = vadd.f32 %v4471_v37, %v5625_v62  ;;  %v1044_v3 = vpop.f32.mrb[11].mxu0  ;;  %v1164_v4 = vpop.f32.mrb[11].mxu1 }
 0x244   : > { %v1045_v6 = vadd.f32 %v5620_v34, %v1044_v3  ;;  %v1165_v7 = vadd.f32 %v5625_v62, %v1164_v4 }
 0x245   : > { %v5683_v21 = vpack.c.bf16 %v1053_v63, %v1050_v57  ;;  %v5685_v47 = vpack.c.bf16 %v1173_v2, %v1170_v35 }
 0x246   : > { %v5687_v8 = vpack.c.bf16 %v1045_v6, %v1042_v61  ;;  %v5689_v45 = vpack.c.bf16 %v1165_v7, %v1162_v5 }
 0x247   : > { %v1383_v63 = vsel %vm1342_vm1, %v5685_v47, 0 }
 0x248   : > { %v4454_v25 = vpop.f32.mrb[12].mxu0  ;;  %v4474_v48 = vpop.f32.mrb[12].mxu1  ;;  %v1380_v52 = vsel %vm1342_vm1, %v5689_v45, 0 }
 0x249   : > { %v1066_v12 = vadd.f32 %v4454_v25, %v5620_v34  ;;  %v1057_v54 = vpop.f32.mrb[13].mxu0  ;;  %v1177_v13 = vpop.f32.mrb[13].mxu1  ;;  %4501 = vmatpush3.bf16.xpose.msra.mxu1 %v1374_v9  ;;  %v1186_v19 = vadd.f32 %v4474_v48, %v5625_v62 }
 0x24a   : > { %v1058_v14 = vadd.f32 %v5620_v34, %v1057_v54  ;;  %v4455_v15 = vpop.f32.mrb[14].mxu0  ;;  %v4475_v18 = vpop.f32.mrb[14].mxu1  ;;  %4819 = vmatprep.subr.msk.bf16.mxu1 %vm1342_vm1, %v5665_v44  ;;  %v1178_v55 = vadd.f32 %v5625_v62, %v1177_v13 }
 0x24b   : > { %v1069_v22 = vadd.f32 %v4455_v15, %v5620_v34  ;;  %v1189_v16 = vadd.f32 %v4475_v18, %v5625_v62  ;;  %v1060_v26 = vpop.f32.mrb[15].mxu0  ;;  %v1180_v27 = vpop.f32.mrb[15].mxu1 }
 0x24c   : > { %v1061_v30 = vadd.f32 %v5620_v34, %v1060_v26  ;;  %v1181_v20 = vadd.f32 %v5625_v62, %v1180_v27 }
 0x24d   : > { %v5703_v38 = vpack.c.bf16 %v1069_v22, %v1066_v12  ;;  %v5705_v39 = vpack.c.bf16 %v1189_v16, %v1186_v19 }
 0x24e   : > { %v5707_v40 = vpack.c.bf16 %v1061_v30, %v1058_v14  ;;  %v5709_v41 = vpack.c.bf16 %v1181_v20, %v1178_v55  ;;  %v1337_v20 = vlaneseq }
 0x24f   : > { %v1389_v55 = vsel %vm1342_vm1, %v5705_v39, 0 }
 0x250   : > { %v4482_v42 = vpop.f32.mrb[16].mxu0  ;;  %v1386_v54 = vsel %vm1342_vm1, %v5709_v41, 0 }
 0x251   : > { %v1249_v1 = vpop.f32.mrb[17].mxu0  ;;  %4503 = vmatpush3.bf16.xpose.msra.mxu1 %v1377_v46  ;;  %v1258_v62 = vadd.f32 %v4482_v42, %v4162_v43  ;;  %v661_v42 = vld [vmem:[%s638_s4] sm:$0x1] }
 0x252   : > { %v4483_v34 = vpop.f32.mrb[18].mxu0  ;;  %4820 = vmatprep.subr.msk.bf16.mxu1 %vm1342_vm1, %v5689_v45  ;;  %v1250_v36 = vadd.f32 %v4162_v43, %v1249_v1  ;;  %vm662_vm2 = vcmp.gt.f32.partialorder %v661_v42, 0.5  ;;  %v5222_v1 = vmov 0.0  }
 0x253   : > { %v1261_v10 = vadd.f32 %v4483_v34, %v4162_v43  ;;  %v1252_v58 = vpop.f32.mrb[19].mxu0  ;;  %v663_v34 = vsel %vm662_vm2, -1e+18, %v5222_v1 }
 0x254   : > { %v1253_v24 = vadd.f32 %v4162_v43, %v1252_v58 }
 0x255   : > { %v5718_v49 = vpack.c.bf16 %v1261_v10, %v1258_v62 }
 0x256   : > { %v5720_v50 = vpack.c.bf16 %v1253_v24, %v1250_v36 }
 0x258   : > { %v4486_v51 = vpop.f32.mrb[20].mxu0  ;;  %4528 = vmatprep.subr.bf16.mxu0 %v5720_v50 }
 0x259   : > { %v1265_v29 = vpop.f32.mrb[21].mxu0  ;;  %4505 = vmatpush3.bf16.xpose.msra.mxu1 %v1380_v52  ;;  %4529 = vmatpush3.bf16.msra.mxu0 %v5720_v50  ;;  %v1274_v56 = vadd.f32 %v4486_v51, %v4162_v43 }
 0x25a   : > { %v4487_v53 = vpop.f32.mrb[22].mxu0  ;;  %4821 = vmatprep.subr.msk.bf16.mxu1 %vm1342_vm1, %v5685_v47  ;;  %4530 = vmatprep.subr.bf16.mxu0 %v5718_v49  ;;  %v1266_v60 = vadd.f32 %v4162_v43, %v1265_v29 }
 0x25b   : > { %v1277_v57 = vadd.f32 %v4487_v53, %v4162_v43  ;;  %v1268_v59 = vpop.f32.mrb[23].mxu0 }
 0x25c   : > { %v1269_v61 = vadd.f32 %v4162_v43, %v1268_v59 }
 0x25d   : > { %v5729_v17 = vpack.c.bf16 %v1277_v57, %v1274_v56  ;;  %4531 = vmatpush3.bf16.msra.mxu0 %v5718_v49 }
 0x25e   : > { %v5732_v37 = vpack.c.bf16 %v1269_v61, %v1266_v60 }
 0x260   : > { %v4490_v35 = vpop.f32.mrb[24].mxu0  ;;  %4532 = vmatprep.subr.bf16.mxu0 %v5732_v37 }
 0x261   : > { %v1281_v2 = vpop.f32.mrb[25].mxu0  ;;  %4507 = vmatpush3.bf16.xpose.msra.mxu1 %v1383_v63  ;;  %4533 = vmatpush3.bf16.msra.mxu0 %v5732_v37  ;;  %v1290_v4 = vadd.f32 %v4490_v35, %v4162_v43 }
 0x262   : > { %v4491_v3 = vpop.f32.mrb[26].mxu0  ;;  %4822 = vmatprep.subr.msk.bf16.mxu1 %vm1342_vm1, %v5709_v41  ;;  %4534 = vmatprep.subr.bf16.mxu0 %v5729_v17  ;;  %v1282_v7 = vadd.f32 %v4162_v43, %v1281_v2 }
 0x263   : > { %v1293_v5 = vadd.f32 %v4491_v3, %v4162_v43  ;;  %v1284_v6 = vpop.f32.mrb[27].mxu0 }
 0x264   : > { %v1285_v25 = vadd.f32 %v4162_v43, %v1284_v6 }
 0x265   : > { %v5741_v48 = vpack.c.bf16 %v1293_v5, %v1290_v4  ;;  %4535 = vmatpush3.bf16.msra.mxu0 %v5729_v17 }
 0x266   : > { %v5744_v9 = vpack.c.bf16 %v1285_v25, %v1282_v7 }
 0x268   : > { %v4494_v12 = vpop.f32.mrb[28].mxu0  ;;  %4536 = vmatprep.subr.bf16.mxu0 %v5744_v9 }
 0x269   : > { %v1297_v13 = vpop.f32.mrb[29].mxu0  ;;  %4509 = vmatpush3.bf16.xpose.msra.mxu1 %v1386_v54  ;;  %4537 = vmatpush3.bf16.msra.mxu0 %v5744_v9  ;;  %v1306_v15 = vadd.f32 %v4494_v12, %v4162_v43 }
 0x26a   : > { %v4495_v14 = vpop.f32.mrb[30].mxu0  ;;  %4823 = vmatprep.subr.msk.bf16.mxu1 %vm1342_vm1, %v5705_v39  ;;  %4538 = vmatprep.subr.bf16.mxu0 %v5741_v48  ;;  %v1298_v22 = vadd.f32 %v4162_v43, %v1297_v13 }
 0x26b   : > { %v1309_v18 = vadd.f32 %v4495_v14, %v4162_v43  ;;  %v1300_v19 = vpop.f32.mrb[31].mxu0 }
 0x26c   : > { %v1301_v16 = vadd.f32 %v4162_v43, %v1300_v19  ;;  %v1338_v43 = vshrl.u32 %v1337_v20, 7 }
 0x26d   : > { %v5753_v26 = vpack.c.bf16 %v1309_v18, %v1306_v15  ;;  %4539 = vmatpush3.bf16.msra.mxu0 %v5741_v48 }
 0x26e   : > { %v5756_v27 = vpack.c.bf16 %v1301_v16, %v1298_v22  ;;  %v1339_v46 = vsub.s32 0, %v1338_v43 }
 0x270   : > { %4540 = vmatprep.subr.bf16.mxu0 %v5756_v27  ;;  %v5786_v62 = vrot.slane %v663_v34, %v1339_v46 }
 0x271   : > { %4511 = vmatpush3.bf16.xpose.msra.mxu1 %v1389_v55  ;;  %4541 = vmatpush3.bf16.msra.mxu0 %v5756_v27 }
 0x272   : > { %4542 = vmatprep.subr.bf16.mxu0 %v5753_v26 }
 0x275   : > { %4543 = vmatpush3.bf16.msra.mxu0 %v5753_v26 }
 0x278   : > { %4513 = vmatmul.mubr.msk.bf16.vlgmr.msra.gmra.mrb[16].mxu1 %vm1342_vm1, %v5635_v31 }
 0x279   : > { %4516 = vmatprep.mubr.msk.bf16.mxu1 %vm1342_vm1, %v5667_v11 }
 0x280   : > { %4517 = vmatmul.mubr.msk.bf16.gmra.mrb[20].mxu1 %vm1342_vm1, %v5663_v28 }
 0x281   : > { %4520 = vmatprep.mubr.msk.bf16.mxu1 %vm1342_vm1, %v5687_v8 }
 0x288   : > { %4521 = vmatmul.mubr.msk.bf16.gmra.mrb[24].mxu1 %vm1342_vm1, %v5683_v21 }
 0x289   : > { %4524 = vmatprep.mubr.msk.bf16.mxu1 %vm1342_vm1, %v5707_v40 }
 0x290   : > { %4525 = vmatmul.mubr.msk.bf16.gmra.mrb[28].mxu1 %vm1342_vm1, %v5703_v38 }
 0x2a9   : > { %v5844_v20 = vpop.permute.xlu1 %1787 }
 0x2aa   : > { %v5778_v30 = vpop.permute.xlu0 %1785 }
 0x2ab   : > { %4824 = vmatprep.subr.msk.bf16.mxu0 %vm1342_vm1, %v5778_v30 }
 0x34b   : > { %v4514_v10 = vpop.f32.mrb[16].mxu1 }
 0x34c   : > { %v1434_v58 = vadd.f32 %v4514_v10, %v5786_v62  ;;  %v1425_v36 = vpop.f32.mrb[17].mxu1 }
 0x34d   : > { %v4515_v24 = vpop.f32.mrb[18].mxu1  ;;  %v1426_v29 = vadd.f32 %v1425_v36, %v5786_v62 }
 0x34e   : > { %v1437_v51 = vadd.f32 %v4515_v24, %v5786_v62  ;;  %1492 = vmax.xlane.f32.xlu0 %v1434_v58  ;;  %v1428_v52 = vpop.f32.mrb[19].mxu1 }
 0x34f   : > { %v1429_v53 = vadd.f32 %v1428_v52, %v5786_v62 }
 0x350   : > { %1494 = vmax.xlane.f32.xlu1 %v1437_v51 }
 0x352   : > { %1488 = vmax.xlane.f32.xlu0 %v1426_v29 }
 0x353   : > { %v4518_v56 = vpop.f32.mrb[20].mxu1 }
 0x354   : > { %v5793_v57 = vadd.f32 %v4518_v56, %v5786_v62  ;;  %v1441_v59 = vpop.f32.mrb[21].mxu1  ;;  %1490 = vmax.xlane.f32.xlu1 %v1429_v53 }
 0x355   : > { %v4519_v60 = vpop.f32.mrb[22].mxu1  ;;  %v5800_v63 = vadd.f32 %v1441_v59, %v5786_v62 }
 0x356   : > { %v5796_v61 = vadd.f32 %v4519_v60, %v5786_v62  ;;  %v1444_v35 = vpop.f32.mrb[23].mxu1  ;;  %1500 = vmax.xlane.f32.xlu0 %v5793_v57 }
 0x357   : > { %v5804_v2 = vadd.f32 %v1444_v35, %v5786_v62 }
 0x358   : > { %1502 = vmax.xlane.f32.xlu1 %v5796_v61 }
 0x35a   : > { %1496 = vmax.xlane.f32.xlu0 %v5800_v63 }
 0x35b   : > { %v4522_v3 = vpop.f32.mrb[24].mxu1 }
 0x35c   : > { %v5808_v4 = vadd.f32 %v4522_v3, %v5786_v62  ;;  %v1457_v5 = vpop.f32.mrb[25].mxu1  ;;  %1498 = vmax.xlane.f32.xlu1 %v5804_v2 }
 0x35d   : > { %v4523_v6 = vpop.f32.mrb[26].mxu1  ;;  %v5816_v12 = vadd.f32 %v1457_v5, %v5786_v62 }
 0x35e   : > { %v5812_v7 = vadd.f32 %v4523_v6, %v5786_v62  ;;  %v1460_v25 = vpop.f32.mrb[27].mxu1  ;;  %1508 = vmax.xlane.f32.xlu0 %v5808_v4 }
 0x35f   : > { %v5820_v54 = vadd.f32 %v1460_v25, %v5786_v62 }
 0x360   : > { %1510 = vmax.xlane.f32.xlu1 %v5812_v7 }
 0x362   : > { %1504 = vmax.xlane.f32.xlu0 %v5816_v12 }
 0x363   : > { %v4526_v13 = vpop.f32.mrb[28].mxu1 }
 0x364   : > { %v5824_v14 = vadd.f32 %v4526_v13, %v5786_v62  ;;  %1506 = vmax.xlane.f32.xlu1 %v5820_v54  ;;  %v1473_v15 = vpop.f32.mrb[29].mxu1 }
 0x365   : > { %v4527_v18 = vpop.f32.mrb[30].mxu1  ;;  %v5829_v22 = vadd.f32 %v1473_v15, %v5786_v62 }
 0x366   : > { %1516 = vmax.xlane.f32.xlu0 %v5824_v14  ;;  %v1476_v19 = vpop.f32.mrb[31].mxu1  ;;  %v5837_v16 = vadd.f32 %v4527_v18, %v5786_v62 }
 0x367   : > { %v5841_v55 = vadd.f32 %v1476_v19, %v5786_v62 }
 0x36a   : > { %1512 = vmax.xlane.f32.xlu0 %v5829_v22 }
 0x375   : > { %1791 = vrot.lane.b32.xlu1 %v5665_v44, %s5221_s23 }
 0x380   : > { %1789 = vrot.lane.b32.xlu0 %v5669_v23, %s5221_s23 }
 0x399   : > { %1518 = vmax.xlane.f32.xlu1 %v5837_v16 }
 0x39d   : > { %1514 = vmax.xlane.f32.xlu1 %v5841_v55 }
 0x3db   : > { %v1493_v42 = vpop.xlane.xlu0 %1492 }
 0x3dc   : > { %v1522_v43 = vsub.f32 %v1434_v58, %v1493_v42 }
 0x3dd   : > { %v1495_v46 = vpop.xlane.xlu1 %1494 }
 0x3de   : > { %v1540_v1 = vmul.f32 1.442695, %v1522_v43  ;;  %v1523_v34 = vsub.f32 %v1437_v51, %v1495_v46 }
 0x3df   : > { %v1489_v10 = vpop.xlane.xlu0 %1488 }
 0x3e0   : > { %4909 = vpow2.f32 %v1540_v1  ;;  %v1542_v36 = vmul.f32 1.442695, %v1523_v34  ;;  %v1520_v24 = vsub.f32 %v1426_v29, %v1489_v10 }
 0x3e1   : > { %v1491_v52 = vpop.xlane.xlu1 %1490 }
 0x3e2   : > { %4911 = vpow2.f32 %v1542_v36  ;;  %v1536_v56 = vmul.f32 1.442695, %v1520_v24  ;;  %v1521_v59 = vsub.f32 %v1429_v53, %v1491_v52 }
 0x3e3   : > { %v1501_v29 = vpop.xlane.xlu0 %1500 }
 0x3e4   : > { %4913 = vpow2.f32 %v1536_v56  ;;  %v1538_v60 = vmul.f32 1.442695, %v1521_v59  ;;  %v1526_v15 = vsub.f32 %v5793_v57, %v1501_v29 }
 0x3e5   : > { %v1503_v6 = vpop.xlane.xlu1 %1502 }
 0x3e6   : > { %4915 = vpow2.f32 %v1538_v60  ;;  %v1548_v42 = vmul.f32 1.442695, %v1526_v15  ;;  %v1527_v1 = vsub.f32 %v5796_v61, %v1503_v6 }
 0x3e7   : > { %v1497_v53 = vpop.xlane.xlu0 %1496 }
 0x3e8   : > { %v1524_v18 = vsub.f32 %v5800_v63, %v1497_v53  ;;  %4917 = vpow2.f32 %v1548_v42  ;;  %v1550_v52 = vmul.f32 1.442695, %v1527_v1 }
 0x3e9   : > { %v1499_v13 = vpop.xlane.xlu1 %1498 }
 0x3ea   : > { %v5846_v35 = vpop.eup %4909  ;;  %v1525_v43 = vsub.f32 %v5804_v2, %v1499_v13  ;;  %v1544_v34 = vmul.f32 1.442695, %v1524_v18 }
 0x3eb   : > { %1572 = vadd.xlane.f32.xlu0 %v5846_v35  ;;  %v1509_v5 = vpop.xlane.xlu0 %1508 }
 0x3ec   : > { %v5849_v3 = vpop.eup %4911  ;;  %v1546_v10 = vmul.f32 1.442695, %v1525_v43  ;;  %4919 = vpow2.f32 %v1544_v34  ;;  %v1530_v56 = vsub.f32 %v5808_v4, %v1509_v5 }
 0x3ed   : > { %1574 = vadd.xlane.f32.xlu1 %v5849_v3  ;;  %v1511_v46 = vpop.xlane.xlu1 %1510 }
 0x3ee   : > { %v5852_v58 = vpop.eup %4913  ;;  %4921 = vpow2.f32 %v1546_v10  ;;  %v1556_v2 = vmul.f32 1.442695, %v1530_v56  ;;  %v1531_v29 = vsub.f32 %v5812_v7, %v1511_v46 }
 0x3ef   : > { %1568 = vadd.xlane.f32.xlu0 %v5852_v58  ;;  %v1505_v25 = vpop.xlane.xlu0 %1504  ;;  %4923 = vpow2.f32 %v1550_v52 }
 0x3f0   : > { %v5855_v51 = vpop.eup %4915  ;;  %v1528_v60 = vsub.f32 %v5816_v12, %v1505_v25 }
 0x3f1   : > { %1570 = vadd.xlane.f32.xlu1 %v5855_v51  ;;  %v1507_v57 = vpop.xlane.xlu1 %1506 }
 0x3f2   : > { %v1552_v6 = vmul.f32 1.442695, %v1528_v60  ;;  %v1529_v7 = vsub.f32 %v5820_v54, %v1507_v57 }
 0x3f3   : > { %v1517_v19 = vpop.xlane.xlu0 %1516 }
 0x3f4   : > { %v1534_v36 = vsub.f32 %v5824_v14, %v1517_v19  ;;  %v5873_v14 = vpop.eup %4917  ;;  %v1554_v42 = vmul.f32 1.442695, %v1529_v7 }
 0x3f5   : > { %v5871_v53 = vpop.permute.xlu1 %1791 }
 0x3f6   : > { %v1564_v63 = vmul.f32 1.442695, %v1534_v36  ;;  %v5876_v4 = vpop.eup %4919 }
 0x3f7   : > { %v1513_v24 = vpop.xlane.xlu0 %1512 }
 0x3f8   : > { %v1532_v59 = vsub.f32 %v5829_v22, %v1513_v24  ;;  %4925 = vpow2.f32 %v1564_v63  ;;  %v1558_v22 = vmul.f32 1.442695, %v1531_v29  ;;  %v5879_v12 = vpop.eup %4921 }
 0x3f9   : > { %4927 = vpow2.f32 %v1556_v2  ;;  %v5884_v13 = vpop.eup %4923 }
 0x3fa   : > { %v1560_v61 = vmul.f32 1.442695, %v1532_v59 }
 0x3fb   : > { %v1790_v24 = vpop.permute.xlu0 %1789 }
 0x3fc   : > { %4929 = vpow2.f32 %v1560_v61 }
 0x3fd   : > { %4931 = vpow2.f32 %v1552_v6 }
 0x3fe   : > { %4933 = vpow2.f32 %v1558_v22 }
 0x402   : > { %1795 = vrot.lane.b32.xlu1 %v5685_v47, %s5221_s23  ;;  %v5887_v19 = vpop.eup %4925 }
 0x403   : > { %v5891_v54 = vpop.eup %4927 }
 0x405   : > { %1793 = vrot.lane.b32.xlu0 %v5689_v45, %s5221_s23 }
 0x424   : > { %1580 = vadd.xlane.f32.xlu0 %v5873_v14 }
 0x426   : > { %v1519_v5 = vpop.xlane.xlu1 %1518  ;;  %1576 = vadd.xlane.f32.xlu1 %v5876_v4 }
 0x427   : > { %v1535_v25 = vsub.f32 %v5837_v16, %v1519_v5  ;;  %v5894_v16 = vpop.eup %4929 }
 0x428   : > { %1578 = vadd.xlane.f32.xlu0 %v5879_v12  ;;  %v5897_v1 = vpop.eup %4931 }
 0x429   : > { %v1566_v15 = vmul.f32 1.442695, %v1535_v25  ;;  %v5900_v34 = vpop.eup %4933 }
 0x42a   : > { %v1515_v18 = vpop.xlane.xlu1 %1514  ;;  %1582 = vadd.xlane.f32.xlu1 %v5884_v13 }
 0x42b   : > { %4935 = vpow2.f32 %v1566_v15  ;;  %v1533_v43 = vsub.f32 %v5841_v55, %v1515_v18  ;;  %v1826_v15 = vsel %vm1342_vm1, %v5778_v30, 0 }
 0x42c   : > { %1596 = vadd.xlane.f32.xlu0 %v5887_v19  ;;  %4937 = vpow2.f32 %v1554_v42 }
 0x42d   : > { %v1562_v46 = vmul.f32 1.442695, %v1533_v43 }
 0x42e   : > { %1588 = vadd.xlane.f32.xlu1 %v5891_v54 }
 0x42f   : > { %4939 = vpow2.f32 %v1562_v46 }
 0x430   : > { %1592 = vadd.xlane.f32.xlu0 %v5894_v16 }
 0x432   : > { %1584 = vadd.xlane.f32.xlu1 %v5897_v1 }
 0x435   : > { %v5902_v55 = vpop.eup %4935 }
 0x436   : > { %1590 = vadd.xlane.f32.xlu1 %v5900_v34  ;;  %1598 = vadd.xlane.f32.xlu0 %v5902_v55  ;;  %v5906_v10 = vpop.eup %4937 }
 0x439   : > { %v5909_v36 = vpop.eup %4939 }
 0x43a   : > { %1586 = vadd.xlane.f32.xlu1 %v5906_v10 }
 0x43e   : > { %1594 = vadd.xlane.f32.xlu1 %v5909_v36 }
 0x44c   : > { %1797 = vrot.lane.b32.xlu0 %v5709_v41, %s5221_s23 }
 0x44f   : > { %1799 = vrot.lane.b32.xlu1 %v5705_v39, %s5221_s23 }
 0x450   : > { %1761 = vrot.lane.b32.xlu0 %v5639_v32, %s5221_s23 }
 0x453   : > { %1763 = vrot.lane.b32.xlu1 %v5635_v31, %s5221_s23 }
 0x454   : > { %1765 = vrot.lane.b32.xlu0 %v5667_v11, %s5221_s23 }
 0x457   : > { %1767 = vrot.lane.b32.xlu1 %v5663_v28, %s5221_s23 }
 0x458   : > { %1769 = vrot.lane.b32.xlu0 %v5687_v8, %s5221_s23 }
 0x45b   : > { %1771 = vrot.lane.b32.xlu1 %v5683_v21, %s5221_s23 }
 0x45c   : > { %1773 = vrot.lane.b32.xlu0 %v5707_v40, %s5221_s23 }
 0x45f   : > { %1775 = vrot.lane.b32.xlu1 %v5703_v38, %s5221_s23 }
 0x460   : > { %2106 = vrot.lane.b32.xlu0 %v5720_v50, %s5221_s23 }
 0x463   : > { %2108 = vrot.lane.b32.xlu1 %v5718_v49, %s5221_s23 }
 0x464   : > { %2110 = vrot.lane.b32.xlu0 %v5732_v37, %s5221_s23 }
 0x467   : > { %2112 = vrot.lane.b32.xlu1 %v5729_v17, %s5221_s23 }
 0x468   : > { %2114 = vrot.lane.b32.xlu0 %v5744_v9, %s5221_s23 }
 0x46b   : > { %2116 = vrot.lane.b32.xlu1 %v5741_v48, %s5221_s23 }
 0x46c   : > { %2118 = vrot.lane.b32.xlu0 %v5756_v27, %s5221_s23 }
 0x46f   : > { %2120 = vrot.lane.b32.xlu1 %v5753_v26, %s5221_s23 }
 0x470   : > { %2292 = vrot.lane.b32.xlu0 %v5641_v33, %s5223_s29 }
 0x473   : > { %2294 = vrot.lane.b32.xlu1 %v5637_v0, %s5223_s29 }
 0x478   : > { %v1573_v52 = vpop.xlane.xlu0 %1572 }
 0x47a   : > { %v1575_v56 = vpop.xlane.xlu1 %1574 }
 0x47b   : > { %4941 = vrcp.f32 %v1575_v56 }
 0x47c   : > { %v1569_v57 = vpop.xlane.xlu0 %1568 }
 0x47d   : > { %4943 = vrcp.f32 %v1569_v57 }
 0x47e   : > { %4945 = vrcp.f32 %v1573_v52  ;;  %v1571_v63 = vpop.xlane.xlu1 %1570 }
 0x47f   : > { %4947 = vrcp.f32 %v1571_v63 }
 0x480   : > { %v1794_v30 = vpop.permute.xlu0 %1793 }
 0x481   : > { %v1838_v18 = vsel %vm1342_vm1, %v1794_v30, 0 }
 0x485   : > { %v4942_v59 = vpop.eup %4941 }
 0x486   : > { %v1619_v29 = vmul.f32 %v4942_v59, %v5849_v3  ;;  %v1829_v3 = vsel %vm1342_vm1, %v5844_v20, 0 }
 0x487   : > { %v4944_v2 = vpop.eup %4943 }
 0x488   : > { %v4946_v60 = vpop.eup %4945  ;;  %v1616_v6 = vmul.f32 %v4944_v2, %v5852_v58  ;;  %v1832_v58 = vsel %vm1342_vm1, %v1790_v24, 0 }
 0x489   : > { %v4948_v61 = vpop.eup %4947  ;;  %v1618_v5 = vmul.f32 %v4946_v60, %v5846_v35  ;;  %v1835_v35 = vsel %vm1342_vm1, %v5871_v53, 0 }
 0x48a   : > { %v1617_v22 = vmul.f32 %v4948_v61, %v5855_v51  ;;  %v1796_v51 = vpop.permute.xlu1 %1795 }
 0x48b   : > { %v1633_v25 = vpack.c.bf16 %v1619_v29, %v1618_v5 }
 0x48c   : > { %v1632_v7 = vpack.c.bf16 %v1617_v22, %v1616_v6 }
 0x48e   : > { %4544 = vmatprep.mubr.bf16.mxu0 %v1632_v7 }
 0x48f   : > { %4545 = vmatmul.mubr.bf16.vlgmr.msra.gmra.mrb[32].mxu0 %v1633_v25 }
 0x490   : > { %4561 = vmatpush3.bf16.xpose.msra.mxu0 %v1826_v15 }
 0x491   : > { %4825 = vmatprep.subr.msk.bf16.mxu0 %vm1342_vm1, %v5844_v20 }
 0x498   : > { %4563 = vmatpush3.bf16.xpose.msra.mxu0 %v1829_v3 }
 0x499   : > { %4826 = vmatprep.subr.msk.bf16.mxu0 %vm1342_vm1, %v1790_v24  ;;  %v1841_v24 = vsel %vm1342_vm1, %v1796_v51, 0 }
 0x4a0   : > { %4565 = vmatpush3.bf16.xpose.msra.mxu0 %v1832_v58 }
 0x4a1   : > { %4827 = vmatprep.subr.msk.bf16.mxu0 %vm1342_vm1, %v5871_v53 }
 0x4a8   : > { %4567 = vmatpush3.bf16.xpose.msra.mxu0 %v1835_v35 }
 0x4a9   : > { %4828 = vmatprep.subr.msk.bf16.mxu0 %vm1342_vm1, %v1794_v30 }
 0x4b0   : > { %4569 = vmatpush3.bf16.xpose.msra.mxu0 %v1838_v18 }
 0x4b1   : > { %4829 = vmatprep.subr.msk.bf16.mxu0 %vm1342_vm1, %v1796_v51  ;;  %v1581_v20 = vpop.xlane.xlu0 %1580 }
 0x4b3   : > { %v1577_v42 = vpop.xlane.xlu1 %1576 }
 0x4b4   : > { %4949 = vrcp.f32 %v1577_v42 }
 0x4b5   : > { %4951 = vrcp.f32 %v1581_v20  ;;  %v1579_v43 = vpop.xlane.xlu0 %1578 }
 0x4b6   : > { %4953 = vrcp.f32 %v1579_v43 }
 0x4b7   : > { %v1583_v46 = vpop.xlane.xlu1 %1582 }
 0x4b8   : > { %4955 = vrcp.f32 %v1583_v46  ;;  %4571 = vmatpush3.bf16.xpose.msra.mxu0 %v1841_v24 }
 0x4b9   : > { %v1597_v53 = vpop.xlane.xlu0 %1596 }
 0x4bb   : > { %v1589_v52 = vpop.xlane.xlu1 %1588 }
 0x4bd   : > { %v1593_v63 = vpop.xlane.xlu0 %1592 }
 0x4be   : > { %v4950_v56 = vpop.eup %4949 }
 0x4bf   : > { %v4952_v57 = vpop.eup %4951  ;;  %v1585_v59 = vpop.xlane.xlu1 %1584  ;;  %v1620_v60 = vmul.f32 %v4950_v56, %v5876_v4 }
 0x4c0   : > { %v4954_v2 = vpop.eup %4953  ;;  %v1622_v7 = vmul.f32 %v4952_v57, %v5873_v14 }
 0x4c1   : > { %v1621_v61 = vmul.f32 %v4954_v2, %v5879_v12 }
 0x4c2   : > { %v4956_v29 = vpop.eup %4955 }
 0x4c3   : > { %v1591_v6 = vpop.xlane.xlu1 %1590  ;;  %v1599_v22 = vpop.xlane.xlu0 %1598  ;;  %v1634_v5 = vpack.c.bf16 %v1621_v61, %v1620_v60  ;;  %v1623_v25 = vmul.f32 %v4956_v29, %v5884_v13 }
 0x4c4   : > { %4957 = vrcp.f32 %v1591_v6 }
 0x4c5   : > { %4548 = vmatprep.mubr.bf16.mxu0 %v1634_v5  ;;  %v1635_v15 = vpack.c.bf16 %v1623_v25, %v1622_v7  ;;  %4959 = vrcp.f32 %v1585_v59 }
 0x4c6   : > { %4961 = vrcp.f32 %v1589_v52 }
 0x4c7   : > { %v1587_v3 = vpop.xlane.xlu1 %1586  ;;  %4549 = vmatmul.mubr.bf16.gmra.mrb[36].mxu0 %v1635_v15  ;;  %v1798_v58 = vpop.permute.xlu0 %1797 }
 0x4c8   : > { %4963 = vrcp.f32 %v1587_v3  ;;  %4830 = vmatprep.subr.msk.bf16.mxu0 %vm1342_vm1, %v1798_v58  ;;  %v1844_v4 = vsel %vm1342_vm1, %v1798_v58, 0 }
 0x4c9   : > { %4573 = vmatpush3.bf16.xpose.msra.mxu0 %v1844_v4  ;;  %4965 = vrcp.f32 %v1593_v63 }
 0x4cb   : > { %v1595_v12 = vpop.xlane.xlu1 %1594  ;;  %v1762_v35 = vpop.permute.xlu0 %1761 }
 0x4cc   : > { %4967 = vrcp.f32 %v1595_v12 }
 0x4cd   : > { %4969 = vrcp.f32 %v1599_v22 }
 0x4ce   : > { %v4958_v14 = vpop.eup %4957  ;;  %4971 = vrcp.f32 %v1597_v53 }
 0x4cf   : > { %v1800_v13 = vpop.permute.xlu1 %1799  ;;  %v1766_v30 = vpop.permute.xlu0 %1765  ;;  %v1627_v43 = vmul.f32 %v4958_v14, %v5900_v34 }
 0x4d0   : > { %v4960_v51 = vpop.eup %4959  ;;  %4831 = vmatprep.subr.msk.bf16.mxu0 %vm1342_vm1, %v1800_v13  ;;  %v1847_v18 = vsel %vm1342_vm1, %v1800_v13, 0 }
 0x4d1   : > { %v4962_v20 = vpop.eup %4961  ;;  %4575 = vmatpush3.bf16.xpose.msra.mxu0 %v1847_v18  ;;  %v1624_v52 = vmul.f32 %v4960_v51, %v5897_v1 }
 0x4d2   : > { %v4964_v42 = vpop.eup %4963  ;;  %v1626_v53 = vmul.f32 %v4962_v20, %v5891_v54 }
 0x4d3   : > { %v1764_v46 = vpop.permute.xlu1 %1763  ;;  %v1770_v24 = vpop.permute.xlu0 %1769  ;;  %v1625_v56 = vmul.f32 %v4964_v42, %v5906_v10 }
 0x4d4   : > { %v4966_v57 = vpop.eup %4965  ;;  %v1637_v2 = vpack.c.bf16 %v1627_v43, %v1626_v53 }
 0x4d5   : > { %v1636_v63 = vpack.c.bf16 %v1625_v56, %v1624_v52  ;;  %v1628_v6 = vmul.f32 %v4966_v57, %v5894_v16 }
 0x4d6   : > { %v4968_v59 = vpop.eup %4967 }
 0x4d7   : > { %v4970_v60 = vpop.eup %4969  ;;  %v1768_v61 = vpop.permute.xlu1 %1767  ;;  %4552 = vmatprep.mubr.bf16.mxu0 %v1636_v63  ;;  %v1629_v34 = vmul.f32 %v4968_v59, %v5909_v36 }
 0x4d8   : > { %v1774_v29 = vpop.permute.xlu0 %1773  ;;  %4553 = vmatmul.mubr.bf16.gmra.mrb[40].mxu0 %v1637_v2  ;;  %v4972_v22 = vpop.eup %4971  ;;  %v1631_v1 = vmul.f32 %v4970_v60, %v5902_v55 }
 0x4d9   : > { %v1638_v5 = vpack.c.bf16 %v1629_v34, %v1628_v6  ;;  %v1630_v54 = vmul.f32 %v4972_v22, %v5887_v19 }
 0x4db   : > { %v1772_v10 = vpop.permute.xlu1 %1771  ;;  %4556 = vmatprep.mubr.bf16.mxu0 %v1638_v5  ;;  %v1639_v25 = vpack.c.bf16 %v1631_v1, %v1630_v54 }
 0x4dc   : > { %v2107_v7 = vpop.permute.xlu0 %2106 }
 0x4dd   : > { %4592 = vmatprep.subr.bf16.mxu1 %v2107_v7 }
 0x4de   : > { %4593 = vmatpush3.bf16.msra.mxu1 %v2107_v7 }
 0x4df   : > { %v1776_v15 = vpop.permute.xlu1 %1775 }
 0x4e0   : > { %4557 = vmatmul.mubr.bf16.gmra.mrb[44].mxu0 %v1639_v25  ;;  %v2111_v36 = vpop.permute.xlu0 %2110 }
 0x4e1   : > { %4576 = vmatprep.mubr.msk.bf16.mxu0 %vm1342_vm1, %v1762_v35 }
 0x4e3   : > { %v2109_v16 = vpop.permute.xlu1 %2108 }
 0x4e4   : > { %4594 = vmatprep.subr.bf16.mxu1 %v2109_v16  ;;  %v2115_v3 = vpop.permute.xlu0 %2114 }
 0x4e5   : > { %4595 = vmatpush3.bf16.msra.mxu1 %v2109_v16 }
 0x4e6   : > { %4596 = vmatprep.subr.bf16.mxu1 %v2111_v36 }
 0x4e7   : > { %v2113_v55 = vpop.permute.xlu1 %2112 }
 0x4e8   : > { %4577 = vmatmul.mubr.msk.bf16.vlgmr.msra.gmra.mrb[48].mxu0 %vm1342_vm1, %v1764_v46  ;;  %v2119_v58 = vpop.permute.xlu0 %2118 }
 0x4e9   : > { %4580 = vmatprep.mubr.msk.bf16.mxu0 %vm1342_vm1, %v1766_v30  ;;  %4597 = vmatpush3.bf16.msra.mxu1 %v2111_v36 }
 0x4ea   : > { %4598 = vmatprep.subr.bf16.mxu1 %v2113_v55 }
 0x4eb   : > { %v2117_v19 = vpop.permute.xlu1 %2116 }
 0x4ec   : > { %v5995_v12 = vpop.permute.xlu0 %2292 }
 0x4ed   : > { %4599 = vmatpush3.bf16.msra.mxu1 %v2113_v55 }
 0x4ee   : > { %4600 = vmatprep.subr.bf16.mxu1 %v2115_v3 }
 0x4ef   : > { %v2121_v4 = vpop.permute.xlu1 %2120 }
 0x4f0   : > { %4581 = vmatmul.mubr.msk.bf16.gmra.mrb[52].mxu0 %vm1342_vm1, %v1768_v61 }
 0x4f1   : > { %4584 = vmatprep.mubr.msk.bf16.mxu0 %vm1342_vm1, %v1770_v24  ;;  %4601 = vmatpush3.bf16.msra.mxu1 %v2115_v3 }
 0x4f2   : > { %4602 = vmatprep.subr.bf16.mxu1 %v2117_v19 }
 0x4f5   : > { %4603 = vmatpush3.bf16.msra.mxu1 %v2117_v19 }
 0x4f6   : > { %4604 = vmatprep.subr.bf16.mxu1 %v2119_v58 }
 0x4f8   : > { %4585 = vmatmul.mubr.msk.bf16.gmra.mrb[56].mxu0 %vm1342_vm1, %v1772_v10 }
 0x4f9   : > { %4588 = vmatprep.mubr.msk.bf16.mxu0 %vm1342_vm1, %v1774_v29  ;;  %4605 = vmatpush3.bf16.msra.mxu1 %v2119_v58 }
 0x4fa   : > { %4606 = vmatprep.subr.bf16.mxu1 %v2121_v4 }
 0x4fd   : > { %4607 = vmatpush3.bf16.msra.mxu1 %v2121_v4 }
 0x4fe   : > { %4832 = vmatprep.subr.msk.bf16.mxu1 %vm1342_vm1, %v5995_v12 }
 0x500   : > { %4589 = vmatmul.mubr.msk.bf16.gmra.mrb[60].mxu0 %vm1342_vm1, %v1776_v15 }
 0x562   : > { %v4546_v35 = vpop.f32.mrb[32].mxu0 }
 0x563   : > { %v1674_v14 = vpop.f32.mrb[33].mxu0 }
 0x564   : > { %v4547_v13 = vpop.f32.mrb[34].mxu0 }
 0x565   : > { %v1738_v30 = vpack.c.bf16 %v4547_v13, %v4546_v35  ;;  %v1677_v51 = vpop.f32.mrb[35].mxu0 }
 0x566   : > { %v1737_v18 = vpack.c.bf16 %v1677_v51, %v1674_v14 }
 0x567   : > { %1746 = vst.msk [vmem:[#allocation2 + $0x8] sm:$0xff] %vm1342_vm1, %v1738_v30 }
 0x568   : > { %1745 = vst.msk [vmem:[#allocation2] sm:$0xff] %vm1342_vm1, %v1737_v18 }
 0x59a   : > { %v4550_v20 = vpop.f32.mrb[36].mxu0 }
 0x59b   : > { %v1690_v42 = vpop.f32.mrb[37].mxu0 }
 0x59c   : > { %v4551_v43 = vpop.f32.mrb[38].mxu0 }
 0x59d   : > { %v1740_v46 = vpack.c.bf16 %v4551_v43, %v4550_v20  ;;  %v1693_v24 = vpop.f32.mrb[39].mxu0 }
 0x59e   : > { %v1739_v52 = vpack.c.bf16 %v1693_v24, %v1690_v42 }
 0x59f   : > { %1748 = vst.msk [vmem:[#allocation2 + $0x18] sm:$0xff] %vm1342_vm1, %v1740_v46 }
 0x5a0   : > { %1747 = vst.msk [vmem:[#allocation2 + $0x10] sm:$0xff] %vm1342_vm1, %v1739_v52 }
 0x5ab   : > { %v4554_v56 = vpop.f32.mrb[40].mxu0 }
 0x5ac   : > { %v1706_v57 = vpop.f32.mrb[41].mxu0 }
 0x5ad   : > { %v4555_v53 = vpop.f32.mrb[42].mxu0 }
 0x5ae   : > { %v1742_v63 = vpack.c.bf16 %v4555_v53, %v4554_v56  ;;  %v1709_v59 = vpop.f32.mrb[43].mxu0 }
 0x5af   : > { %v1741_v2 = vpack.c.bf16 %v1709_v59, %v1706_v57 }
 0x5b0   : > { %1750 = vst.msk [vmem:[#allocation2 + $0x28] sm:$0xff] %vm1342_vm1, %v1742_v63 }
 0x5b1   : > { %1749 = vst.msk [vmem:[#allocation2 + $0x20] sm:$0xff] %vm1342_vm1, %v1741_v2 }
 0x5b3   : > { %v4558_v60 = vpop.f32.mrb[44].mxu0 }
 0x5b4   : > { %v1722_v61 = vpop.f32.mrb[45].mxu0 }
 0x5b5   : > { %v4559_v29 = vpop.f32.mrb[46].mxu0 }
 0x5b6   : > { %v1744_v6 = vpack.c.bf16 %v4559_v29, %v4558_v60  ;;  %v1725_v34 = vpop.f32.mrb[47].mxu0  ;;  %v6064_v60 = vpop.permute.xlu1 %2294 }
 0x5b7   : > { %v1743_v22 = vpack.c.bf16 %v1725_v34, %v1722_v61 }
 0x5b8   : > { %1752 = vst.msk [vmem:[#allocation2 + $0x38] sm:$0xff] %vm1342_vm1, %v1744_v6 }
 0x5b9   : > { %1751 = vst.msk [vmem:[#allocation2 + $0x30] sm:$0xff] %vm1342_vm1, %v1743_v22 }
 0x5bb   : > { %v4578_v5 = vpop.f32.mrb[48].mxu0 }
 0x5bc   : > { %v1892_v1 = vadd.f32 %v4578_v5, %v5786_v62  ;;  %v1883_v10 = vpop.f32.mrb[49].mxu0 }
 0x5bd   : > { %v4579_v7 = vpop.f32.mrb[50].mxu0  ;;  %v1884_v15 = vadd.f32 %v1883_v10, %v5786_v62 }
 0x5be   : > { %1950 = vmax.xlane.f32.xlu0 %v1892_v1  ;;  %v1886_v54 = vpop.f32.mrb[51].mxu0  ;;  %v1895_v36 = vadd.f32 %v4579_v7, %v5786_v62 }
 0x5bf   : > { %v1887_v25 = vadd.f32 %v1886_v54, %v5786_v62 }
 0x5c1   : > { %1948 = vmax.xlane.f32.xlu1 %v1887_v25 }
 0x5c2   : > { %1946 = vmax.xlane.f32.xlu0 %v1884_v15 }
 0x5c3   : > { %v4582_v16 = vpop.f32.mrb[52].mxu0 }
 0x5c4   : > { %v1899_v55 = vpop.f32.mrb[53].mxu0  ;;  %v6016_v4 = vadd.f32 %v4582_v16, %v5786_v62 }
 0x5c5   : > { %v4583_v3 = vpop.f32.mrb[54].mxu0  ;;  %v6024_v13 = vadd.f32 %v1899_v55, %v5786_v62 }
 0x5c6   : > { %v6013_v19 = vadd.f32 %v4583_v3, %v5786_v62  ;;  %1952 = vmax.xlane.f32.xlu0 %v1895_v36  ;;  %v1902_v58 = vpop.f32.mrb[55].mxu0 }
 0x5c7   : > { %v6020_v35 = vadd.f32 %v1902_v58, %v5786_v62 }
 0x5c8   : > { %1960 = vmax.xlane.f32.xlu1 %v6013_v19 }
 0x5ca   : > { %1958 = vmax.xlane.f32.xlu0 %v6016_v4 }
 0x5cb   : > { %v4586_v14 = vpop.f32.mrb[56].mxu0 }
 0x5cc   : > { %1956 = vmax.xlane.f32.xlu1 %v6020_v35  ;;  %v1915_v30 = vpop.f32.mrb[57].mxu0  ;;  %v6032_v42 = vadd.f32 %v4586_v14, %v5786_v62 }
 0x5cd   : > { %v4587_v51 = vpop.f32.mrb[58].mxu0  ;;  %v6040_v24 = vadd.f32 %v1915_v30, %v5786_v62 }
 0x5ce   : > { %v6028_v18 = vadd.f32 %v4587_v51, %v5786_v62  ;;  %1954 = vmax.xlane.f32.xlu0 %v6024_v13  ;;  %v1918_v20 = vpop.f32.mrb[59].mxu0 }
 0x5cf   : > { %v6036_v43 = vadd.f32 %v1918_v20, %v5786_v62 }
 0x5d0   : > { %1968 = vmax.xlane.f32.xlu1 %v6028_v18 }
 0x5d2   : > { %1966 = vmax.xlane.f32.xlu0 %v6032_v42 }
 0x5d3   : > { %v4590_v46 = vpop.f32.mrb[60].mxu0 }
 0x5d4   : > { %1964 = vmax.xlane.f32.xlu1 %v6036_v43  ;;  %v1931_v52 = vpop.f32.mrb[61].mxu0  ;;  %v6045_v53 = vadd.f32 %v4590_v46, %v5786_v62 }
 0x5d5   : > { %v4591_v56 = vpop.f32.mrb[62].mxu0  ;;  %v6049_v63 = vadd.f32 %v1931_v52, %v5786_v62 }
 0x5d6   : > { %1962 = vmax.xlane.f32.xlu0 %v6040_v24  ;;  %v1934_v57 = vpop.f32.mrb[63].mxu0  ;;  %v6057_v59 = vadd.f32 %v4591_v56, %v5786_v62 }
 0x5d7   : > { %v6061_v2 = vadd.f32 %v1934_v57, %v5786_v62 }
 0x5da   : > { %1974 = vmax.xlane.f32.xlu0 %v6045_v53 }
 0x5de   : > { %1970 = vmax.xlane.f32.xlu0 %v6049_v63 }
 0x5e5   : > { %2298 = vrot.lane.b32.xlu1 %v5665_v44, %s5223_s29 }
 0x5f4   : > { %2296 = vrot.lane.b32.xlu0 %v5669_v23, %s5223_s29 }
 0x609   : > { %1976 = vmax.xlane.f32.xlu1 %v6057_v59 }
 0x60d   : > { %1972 = vmax.xlane.f32.xlu1 %v6061_v2 }
 0x64b   : > { %v1951_v61 = vpop.xlane.xlu0 %1950 }
 0x64c   : > { %v1980_v29 = vsub.f32 %v1892_v1, %v1951_v61 }
 0x64e   : > { %v1998_v6 = vmul.f32 1.442695, %v1980_v29  ;;  %v1949_v34 = vpop.xlane.xlu1 %1948 }
 0x64f   : > { %v1979_v22 = vsub.f32 %v1887_v25, %v1949_v34  ;;  %v1947_v5 = vpop.xlane.xlu0 %1946 }
 0x650   : > { %4973 = vpow2.f32 %v1998_v6  ;;  %v1978_v10 = vsub.f32 %v1884_v15, %v1947_v5 }
 0x651   : > { %v1996_v7 = vmul.f32 1.442695, %v1979_v22 }
 0x652   : > { %v1994_v54 = vmul.f32 1.442695, %v1978_v10 }
 0x653   : > { %4975 = vpow2.f32 %v1996_v7  ;;  %v1953_v16 = vpop.xlane.xlu0 %1952 }
 0x654   : > { %4977 = vpow2.f32 %v1994_v54  ;;  %v1981_v55 = vsub.f32 %v1895_v36, %v1953_v16 }
 0x655   : > { %v1961_v30 = vpop.xlane.xlu1 %1960 }
 0x656   : > { %v2000_v3 = vmul.f32 1.442695, %v1981_v55  ;;  %v1985_v34 = vsub.f32 %v6013_v19, %v1961_v30 }
 0x657   : > { %v1959_v15 = vpop.xlane.xlu0 %1958 }
 0x658   : > { %4979 = vpow2.f32 %v2000_v3  ;;  %v1984_v20 = vsub.f32 %v6016_v4, %v1959_v15  ;;  %v2008_v7 = vmul.f32 1.442695, %v1985_v34 }
 0x659   : > { %v1957_v46 = vpop.xlane.xlu1 %1956 }
 0x65a   : > { %v6066_v58 = vpop.eup %4973  ;;  %v2006_v56 = vmul.f32 1.442695, %v1984_v20  ;;  %v1983_v61 = vsub.f32 %v6020_v35, %v1957_v46 }
 0x65b   : > { %2030 = vadd.xlane.f32.xlu1 %v6066_v58  ;;  %v1955_v36 = vpop.xlane.xlu0 %1954 }
 0x65c   : > { %v1982_v57 = vsub.f32 %v6024_v13, %v1955_v36  ;;  %4981 = vpow2.f32 %v2006_v56  ;;  %v2004_v5 = vmul.f32 1.442695, %v1983_v61 }
 0x65d   : > { %v6069_v14 = vpop.eup %4975  ;;  %v1969_v29 = vpop.xlane.xlu1 %1968 }
 0x65e   : > { %v6071_v1 = vpop.eup %4977  ;;  %2028 = vadd.xlane.f32.xlu0 %v6069_v14  ;;  %v2002_v22 = vmul.f32 1.442695, %v1982_v57  ;;  %v1989_v19 = vsub.f32 %v6028_v18, %v1969_v29 }
 0x65f   : > { %2026 = vadd.xlane.f32.xlu1 %v6071_v1  ;;  %v1967_v51 = vpop.xlane.xlu0 %1966 }
 0x660   : > { %v1988_v10 = vsub.f32 %v6032_v42, %v1967_v51  ;;  %4983 = vpow2.f32 %v2002_v22  ;;  %v2016_v30 = vmul.f32 1.442695, %v1989_v19 }
 0x661   : > { %v1965_v54 = vpop.xlane.xlu1 %1964  ;;  %4985 = vpow2.f32 %v2004_v5 }
 0x662   : > { %v6075_v25 = vpop.eup %4979  ;;  %v2014_v16 = vmul.f32 1.442695, %v1988_v10  ;;  %4987 = vpow2.f32 %v2008_v7 }
 0x663   : > { %2032 = vadd.xlane.f32.xlu1 %v6075_v25  ;;  %v1963_v52 = vpop.xlane.xlu0 %1962 }
 0x664   : > { %v1986_v13 = vsub.f32 %v6040_v24, %v1963_v52  ;;  %4989 = vpow2.f32 %v2014_v16  ;;  %v1987_v24 = vsub.f32 %v6036_v43, %v1965_v54 }
 0x665   : > { %v6093_v42 = vpop.permute.xlu1 %2298 }
 0x666   : > { %v2010_v15 = vmul.f32 1.442695, %v1986_v13  ;;  %v6091_v36 = vpop.eup %4981  ;;  %v2012_v46 = vmul.f32 1.442695, %v1987_v24 }
 0x667   : > { %v1975_v6 = vpop.xlane.xlu0 %1974 }
 0x668   : > { %v1992_v4 = vsub.f32 %v6045_v53, %v1975_v6 }
 0x66a   : > { %v2022_v35 = vmul.f32 1.442695, %v1992_v4  ;;  %v6097_v51 = vpop.eup %4983 }
 0x66b   : > { %v1971_v55 = vpop.xlane.xlu0 %1970 }
 0x66c   : > { %v1990_v3 = vsub.f32 %v6049_v63, %v1971_v55  ;;  %4991 = vpow2.f32 %v2022_v35  ;;  %v6099_v63 = vpop.eup %4985 }
 0x66d   : > { %4993 = vpow2.f32 %v2010_v15  ;;  %v6104_v56 = vpop.eup %4987 }
 0x66e   : > { %v2018_v53 = vmul.f32 1.442695, %v1990_v3  ;;  %v6106_v43 = vpop.eup %4989 }
 0x66f   : > { %v2297_v7 = vpop.permute.xlu0 %2296 }
 0x670   : > { %4995 = vpow2.f32 %v2018_v53 }
 0x671   : > { %4997 = vpow2.f32 %v2016_v30 }
 0x674   : > { %2300 = vrot.lane.b32.xlu0 %v5689_v45, %s5223_s29  ;;  %2302 = vrot.lane.b32.xlu1 %v5685_v47, %s5223_s29 }
 0x676   : > { %v6111_v29 = vpop.eup %4991 }
 0x677   : > { %v6113_v6 = vpop.eup %4993 }
 0x67a   : > { %v6117_v34 = vpop.eup %4995 }
 0x67b   : > { %v6119_v22 = vpop.eup %4997 }
 0x693   : > { %2038 = vadd.xlane.f32.xlu0 %v6091_v36 }
 0x696   : > { %v1977_v20 = vpop.xlane.xlu1 %1976 }
 0x697   : > { %v1993_v18 = vsub.f32 %v6057_v59, %v1977_v20  ;;  %2034 = vadd.xlane.f32.xlu0 %v6097_v51  ;;  %v2333_v20 = vsel %vm1342_vm1, %v5995_v12, 0 }
 0x698   : > { %2036 = vadd.xlane.f32.xlu1 %v6099_v63 }
 0x699   : > { %v2024_v52 = vmul.f32 1.442695, %v1993_v18 }
 0x69a   : > { %v1973_v57 = vpop.xlane.xlu1 %1972 }
 0x69b   : > { %4999 = vpow2.f32 %v2024_v52  ;;  %v1991_v61 = vsub.f32 %v6061_v2, %v1973_v57  ;;  %2040 = vadd.xlane.f32.xlu0 %v6104_v56 }
 0x69c   : > { %2046 = vadd.xlane.f32.xlu1 %v6106_v43  ;;  %5001 = vpow2.f32 %v2012_v46 }
 0x69d   : > { %v2020_v59 = vmul.f32 1.442695, %v1991_v61 }
 0x69f   : > { %2054 = vadd.xlane.f32.xlu0 %v6111_v29  ;;  %5003 = vpow2.f32 %v2020_v59 }
 0x6a0   : > { %2042 = vadd.xlane.f32.xlu1 %v6113_v6 }
 0x6a3   : > { %2050 = vadd.xlane.f32.xlu0 %v6117_v34 }
 0x6a4   : > { %2048 = vadd.xlane.f32.xlu1 %v6119_v22 }
 0x6a5   : > { %v6123_v2 = vpop.eup %4999 }
 0x6a6   : > { %v6125_v5 = vpop.eup %5001 }
 0x6a7   : > { %2056 = vadd.xlane.f32.xlu0 %v6123_v2 }
 0x6a8   : > { %2044 = vadd.xlane.f32.xlu1 %v6125_v5 }
 0x6a9   : > { %v6129_v10 = vpop.eup %5003 }
 0x6ac   : > { %2052 = vadd.xlane.f32.xlu1 %v6129_v10 }
 0x6bd   : > { %2306 = vrot.lane.b32.xlu1 %v5705_v39, %s5223_s29  ;;  %2304 = vrot.lane.b32.xlu0 %v5709_v41, %s5223_s29 }
 0x6c1   : > { %2278 = vrot.lane.b32.xlu1 %v5635_v31, %s5223_s29  ;;  %2276 = vrot.lane.b32.xlu0 %v5639_v32, %s5223_s29 }
 0x6c5   : > { %2282 = vrot.lane.b32.xlu1 %v5663_v28, %s5223_s29  ;;  %2280 = vrot.lane.b32.xlu0 %v5667_v11, %s5223_s29 }
 0x6c9   : > { %2286 = vrot.lane.b32.xlu1 %v5683_v21, %s5223_s29  ;;  %2284 = vrot.lane.b32.xlu0 %v5687_v8, %s5223_s29 }
 0x6cd   : > { %2290 = vrot.lane.b32.xlu1 %v5703_v38, %s5223_s29  ;;  %2288 = vrot.lane.b32.xlu0 %v5707_v40, %s5223_s29 }
 0x6d1   : > { %2607 = vrot.lane.b32.xlu1 %v5718_v49, %s5223_s29  ;;  %2605 = vrot.lane.b32.xlu0 %v5720_v50, %s5223_s29 }
 0x6d5   : > { %2611 = vrot.lane.b32.xlu1 %v5729_v17, %s5223_s29  ;;  %2609 = vrot.lane.b32.xlu0 %v5732_v37, %s5223_s29 }
 0x6d9   : > { %2615 = vrot.lane.b32.xlu1 %v5741_v48, %s5223_s29  ;;  %2613 = vrot.lane.b32.xlu0 %v5744_v9, %s5223_s29 }
 0x6dd   : > { %2619 = vrot.lane.b32.xlu1 %v5753_v26, %s5223_s29  ;;  %2617 = vrot.lane.b32.xlu0 %v5756_v27, %s5223_s29 }
 0x6e1   : > { %2793 = vrot.lane.b32.xlu1 %v5637_v0, %s5224_s30  ;;  %2791 = vrot.lane.b32.xlu0 %v5641_v33, %s5224_s30 }
 0x6e8   : > { %v2031_v54 = vpop.xlane.xlu1 %2030 }
 0x6eb   : > { %v2029_v4 = vpop.xlane.xlu0 %2028 }
 0x6ec   : > { %5005 = vrcp.f32 %v2029_v4  ;;  %v2027_v16 = vpop.xlane.xlu1 %2026 }
 0x6ed   : > { %5007 = vrcp.f32 %v2027_v16 }
 0x6ee   : > { %5009 = vrcp.f32 %v2031_v54 }
 0x6ef   : > { %v2301_v12 = vpop.permute.xlu0 %2300 }
 0x6f0   : > { %v2033_v13 = vpop.xlane.xlu1 %2032 }
 0x6f1   : > { %5011 = vrcp.f32 %v2033_v13 }
 0x6f6   : > { %v5006_v55 = vpop.eup %5005 }
 0x6f7   : > { %v5008_v35 = vpop.eup %5007  ;;  %v2075_v3 = vmul.f32 %v5006_v55, %v6069_v14  ;;  %v2336_v14 = vsel %vm1342_vm1, %v6064_v60, 0 }
 0x6f8   : > { %v2074_v19 = vmul.f32 %v5008_v35, %v6071_v1  ;;  %v5010_v15 = vpop.eup %5009  ;;  %v2342_v1 = vsel %vm1342_vm1, %v6093_v42, 0 }
 0x6f9   : > { %v2076_v33 = vmul.f32 %v5010_v15, %v6066_v58  ;;  %v2339_v58 = vsel %vm1342_vm1, %v2297_v7, 0 }
 0x6fa   : > { %v2090_v0 = vpack.c.bf16 %v2075_v3, %v2074_v19 }
 0x6fb   : > { %v5012_v53 = vpop.eup %5011 }
 0x6fc   : > { %v2077_v30 = vmul.f32 %v5012_v53, %v6075_v25  ;;  %4608 = vmatprep.mubr.bf16.mxu1 %v2090_v0  ;;  %v2345_v25 = vsel %vm1342_vm1, %v2301_v12, 0 }
 0x6fe   : > { %v2091_v24 = vpack.c.bf16 %v2077_v30, %v2076_v33 }
 0x700   : > { %4609 = vmatmul.mubr.bf16.vlgmr.msra.gmra.mrb[32].mxu1 %v2091_v24 }
 0x701   : > { %4625 = vmatpush3.bf16.xpose.msra.mxu1 %v2333_v20 }
 0x702   : > { %4833 = vmatprep.subr.msk.bf16.mxu1 %vm1342_vm1, %v6064_v60  ;;  %v2303_v60 = vpop.permute.xlu1 %2302 }
 0x703   : > { %v2348_v57 = vsel %vm1342_vm1, %v2303_v60, 0 }
 0x709   : > { %4627 = vmatpush3.bf16.xpose.msra.mxu1 %v2336_v14 }
 0x70a   : > { %4834 = vmatprep.subr.msk.bf16.mxu1 %vm1342_vm1, %v2297_v7 }
 0x711   : > { %4629 = vmatpush3.bf16.xpose.msra.mxu1 %v2339_v58 }
 0x712   : > { %4835 = vmatprep.subr.msk.bf16.mxu1 %vm1342_vm1, %v6093_v42 }
 0x719   : > { %4631 = vmatpush3.bf16.xpose.msra.mxu1 %v2342_v1 }
 0x71a   : > { %4836 = vmatprep.subr.msk.bf16.mxu1 %vm1342_vm1, %v2301_v12 }
 0x720   : > { %v2039_v18 = vpop.xlane.xlu0 %2038 }
 0x721   : > { %4633 = vmatpush3.bf16.xpose.msra.mxu1 %v2345_v25 }
 0x722   : > { %4837 = vmatprep.subr.msk.bf16.mxu1 %vm1342_vm1, %v2303_v60 }
 0x724   : > { %v2035_v46 = vpop.xlane.xlu0 %2034 }
 0x725   : > { %5013 = vrcp.f32 %v2035_v46  ;;  %v2037_v52 = vpop.xlane.xlu1 %2036 }
 0x726   : > { %5015 = vrcp.f32 %v2037_v52 }
 0x727   : > { %5017 = vrcp.f32 %v2039_v18 }
 0x728   : > { %v2041_v61 = vpop.xlane.xlu0 %2040 }
 0x729   : > { %4635 = vmatpush3.bf16.xpose.msra.mxu1 %v2348_v57  ;;  %5019 = vrcp.f32 %v2041_v61  ;;  %v2047_v42 = vpop.xlane.xlu1 %2046 }
 0x72c   : > { %v2055_v59 = vpop.xlane.xlu0 %2054 }
 0x72d   : > { %v2043_v7 = vpop.xlane.xlu1 %2042 }
 0x72f   : > { %v5014_v54 = vpop.eup %5013 }
 0x730   : > { %v5016_v4 = vpop.eup %5015  ;;  %v2051_v16 = vpop.xlane.xlu0 %2050  ;;  %v2078_v13 = vmul.f32 %v5014_v54, %v6097_v51 }
 0x731   : > { %v5018_v55 = vpop.eup %5017  ;;  %v2049_v35 = vpop.xlane.xlu1 %2048  ;;  %v2079_v3 = vmul.f32 %v5016_v4, %v6099_v63 }
 0x732   : > { %5021 = vrcp.f32 %v2049_v35  ;;  %v2080_v53 = vmul.f32 %v5018_v55, %v6091_v36 }
 0x733   : > { %v5020_v19 = vpop.eup %5019  ;;  %v2092_v15 = vpack.c.bf16 %v2079_v3, %v2078_v13  ;;  %5023 = vrcp.f32 %v2043_v7 }
 0x734   : > { %v2057_v0 = vpop.xlane.xlu0 %2056  ;;  %v2081_v33 = vmul.f32 %v5020_v19, %v6104_v56  ;;  %5025 = vrcp.f32 %v2047_v42 }
 0x735   : > { %v2045_v30 = vpop.xlane.xlu1 %2044  ;;  %4612 = vmatprep.mubr.bf16.mxu1 %v2092_v15 }
 0x736   : > { %5027 = vrcp.f32 %v2045_v30  ;;  %v2093_v24 = vpack.c.bf16 %v2081_v33, %v2080_v53 }
 0x737   : > { %5029 = vrcp.f32 %v2051_v16 }
 0x738   : > { %4613 = vmatmul.mubr.bf16.gmra.mrb[36].mxu1 %v2093_v24  ;;  %v2305_v51 = vpop.permute.xlu0 %2304 }
 0x739   : > { %v2053_v20 = vpop.xlane.xlu1 %2052  ;;  %4838 = vmatprep.subr.msk.bf16.mxu1 %vm1342_vm1, %v2305_v51  ;;  %v2351_v63 = vsel %vm1342_vm1, %v2305_v51, 0 }
 0x73a   : > { %5031 = vrcp.f32 %v2053_v20  ;;  %4637 = vmatpush3.bf16.xpose.msra.mxu1 %v2351_v63 }
 0x73b   : > { %5033 = vrcp.f32 %v2057_v0 }
 0x73c   : > { %v2277_v14 = vpop.permute.xlu0 %2276  ;;  %v5022_v36 = vpop.eup %5021  ;;  %5035 = vrcp.f32 %v2055_v59 }
 0x73d   : > { %v2307_v56 = vpop.permute.xlu1 %2306  ;;  %v5024_v58 = vpop.eup %5023  ;;  %v2085_v18 = vmul.f32 %v5022_v36, %v6119_v22 }
 0x73e   : > { %4839 = vmatprep.subr.msk.bf16.mxu1 %vm1342_vm1, %v2307_v56  ;;  %v5026_v1 = vpop.eup %5025  ;;  %v2354_v46 = vsel %vm1342_vm1, %v2307_v56, 0  ;;  %v2082_v52 = vmul.f32 %v5024_v58, %v6113_v6 }
 0x73f   : > { %v2084_v42 = vmul.f32 %v5026_v1, %v6106_v43 }
 0x740   : > { %v5028_v12 = vpop.eup %5027  ;;  %v2281_v25 = vpop.permute.xlu0 %2280 }
 0x741   : > { %v2279_v60 = vpop.permute.xlu1 %2278  ;;  %v2083_v57 = vmul.f32 %v5028_v12, %v6125_v5  ;;  %v5030_v61 = vpop.eup %5029  ;;  %v2095_v4 = vpack.c.bf16 %v2085_v18, %v2084_v42 }
 0x742   : > { %4639 = vmatpush3.bf16.xpose.msra.mxu1 %v2354_v46  ;;  %v2086_v22 = vmul.f32 %v5030_v61, %v6117_v34 }
 0x743   : > { %v2094_v59 = vpack.c.bf16 %v2083_v57, %v2082_v52 }
 0x744   : > { %v5032_v7 = vpop.eup %5031  ;;  %v2285_v54 = vpop.permute.xlu0 %2284 }
 0x745   : > { %v5034_v16 = vpop.eup %5033  ;;  %v2283_v13 = vpop.permute.xlu1 %2282  ;;  %4616 = vmatprep.mubr.bf16.mxu1 %v2094_v59  ;;  %v2087_v55 = vmul.f32 %v5032_v7, %v6129_v10 }
 0x746   : > { %4617 = vmatmul.mubr.bf16.gmra.mrb[40].mxu1 %v2095_v4  ;;  %v5036_v35 = vpop.eup %5035  ;;  %v2089_v5 = vmul.f32 %v5034_v16, %v6123_v2 }
 0x747   : > { %v2096_v6 = vpack.c.bf16 %v2087_v55, %v2086_v22  ;;  %v2088_v43 = vmul.f32 %v5036_v35, %v6111_v29 }
 0x748   : > { %v2289_v3 = vpop.permute.xlu0 %2288 }
 0x749   : > { %v2287_v19 = vpop.permute.xlu1 %2286  ;;  %4620 = vmatprep.mubr.bf16.mxu1 %v2096_v6  ;;  %v2097_v0 = vpack.c.bf16 %v2089_v5, %v2088_v43 }
 0x74c   : > { %v2606_v15 = vpop.permute.xlu0 %2605 }
 0x74d   : > { %v2291_v53 = vpop.permute.xlu1 %2290  ;;  %4656 = vmatprep.subr.bf16.mxu0 %v2606_v15 }
 0x74e   : > { %4621 = vmatmul.mubr.bf16.gmra.mrb[44].mxu1 %v2097_v0  ;;  %4657 = vmatpush3.bf16.msra.mxu0 %v2606_v15 }
 0x74f   : > { %4640 = vmatprep.mubr.msk.bf16.mxu1 %vm1342_vm1, %v2277_v14 }
 0x750   : > { %v2610_v10 = vpop.permute.xlu0 %2609 }
 0x751   : > { %v2608_v34 = vpop.permute.xlu1 %2607 }
 0x752   : > { %4658 = vmatprep.subr.bf16.mxu0 %v2608_v34 }
 0x753   : > { %4659 = vmatpush3.bf16.msra.mxu0 %v2608_v34 }
 0x754   : > { %4660 = vmatprep.subr.bf16.mxu0 %v2610_v10  ;;  %v2614_v29 = vpop.permute.xlu0 %2613 }
 0x755   : > { %v2612_v2 = vpop.permute.xlu1 %2611 }
 0x756   : > { %4641 = vmatmul.mubr.msk.bf16.vlgmr.msra.gmra.mrb[48].mxu1 %vm1342_vm1, %v2279_v60 }
 0x757   : > { %4644 = vmatprep.mubr.msk.bf16.mxu1 %vm1342_vm1, %v2281_v25  ;;  %4661 = vmatpush3.bf16.msra.mxu0 %v2610_v10 }
 0x758   : > { %4662 = vmatprep.subr.bf16.mxu0 %v2612_v2  ;;  %v2618_v30 = vpop.permute.xlu0 %2617 }
 0x759   : > { %v2616_v33 = vpop.permute.xlu1 %2615 }
 0x75b   : > { %4663 = vmatpush3.bf16.msra.mxu0 %v2612_v2 }
 0x75c   : > { %4664 = vmatprep.subr.bf16.mxu0 %v2614_v29  ;;  %v6215_v51 = vpop.permute.xlu0 %2791 }
 0x75d   : > { %v2620_v24 = vpop.permute.xlu1 %2619 }
 0x75e   : > { %4645 = vmatmul.mubr.msk.bf16.gmra.mrb[52].mxu1 %vm1342_vm1, %v2283_v13 }
 0x75f   : > { %4648 = vmatprep.mubr.msk.bf16.mxu1 %vm1342_vm1, %v2285_v54  ;;  %4665 = vmatpush3.bf16.msra.mxu0 %v2614_v29 }
 0x760   : > { %4666 = vmatprep.subr.bf16.mxu0 %v2616_v33 }
 0x763   : > { %4667 = vmatpush3.bf16.msra.mxu0 %v2616_v33 }
 0x764   : > { %4668 = vmatprep.subr.bf16.mxu0 %v2618_v30 }
 0x766   : > { %4649 = vmatmul.mubr.msk.bf16.gmra.mrb[56].mxu1 %vm1342_vm1, %v2287_v19 }
 0x767   : > { %4652 = vmatprep.mubr.msk.bf16.mxu1 %vm1342_vm1, %v2289_v3  ;;  %4669 = vmatpush3.bf16.msra.mxu0 %v2618_v30 }
 0x768   : > { %4670 = vmatprep.subr.bf16.mxu0 %v2620_v24 }
 0x76b   : > { %4671 = vmatpush3.bf16.msra.mxu0 %v2620_v24 }
 0x76c   : > { %4840 = vmatprep.subr.msk.bf16.mxu0 %vm1342_vm1, %v6215_v51 }
 0x76e   : > { %4653 = vmatmul.mubr.msk.bf16.gmra.mrb[60].mxu1 %vm1342_vm1, %v2291_v53 }
 0x7d3   : > { %v6220_v20 = vpop.f32.mrb[32].mxu1 }
 0x7d4   : > { %v6222_v63 = vpop.f32.mrb[33].mxu1 }
 0x7d5   : > { %v6224_v14 = vpop.f32.mrb[34].mxu1 }
 0x7d6   : > { %v6228_v56 = vpop.f32.mrb[35].mxu1 }
 0x80b   : > { %v6232_v1 = vpop.f32.mrb[36].mxu1 }
 0x80c   : > { %v6234_v12 = vpop.f32.mrb[37].mxu1 }
 0x80d   : > { %7134 = vst [vmem:[#allocation3_spill] sm:$0xff] %v6234_v12  ;;  %v6236_v25 = vpop.f32.mrb[38].mxu1 }
 0x80e   : > { %v6240_v60 = vpop.f32.mrb[39].mxu1 }
 0x819   : > { %v6244_v52 = vpop.f32.mrb[40].mxu1 }
 0x81a   : > { %v6246_v57 = vpop.f32.mrb[41].mxu1 }
 0x81b   : > { %7135 = vst [vmem:[#allocation4_spill] sm:$0xff] %v6246_v57  ;;  %v6248_v61 = vpop.f32.mrb[42].mxu1 }
 0x81c   : > { %v6252_v59 = vpop.f32.mrb[43].mxu1 }
 0x81d   : > { %7136 = vst [vmem:[#allocation5_spill] sm:$0xff] %v6252_v59 }
 0x821   : > { %v6256_v54 = vpop.f32.mrb[44].mxu1 }
 0x822   : > { %7137 = vst [vmem:[#allocation6_spill] sm:$0xff] %v6256_v54  ;;  %v6258_v4 = vpop.f32.mrb[45].mxu1 }
 0x823   : > { %7138 = vst [vmem:[#allocation7_spill] sm:$0xff] %v6258_v4  ;;  %v6260_v16 = vpop.f32.mrb[46].mxu1 }
 0x824   : > { %7139 = vst [vmem:[#allocation8_spill] sm:$0xff] %v6260_v16  ;;  %v6264_v22 = vpop.f32.mrb[47].mxu1 }
 0x825   : > { %7140 = vst [vmem:[#allocation9_spill] sm:$0xff] %v6264_v22 }
 0x829   : > { %v4642_v35 = vpop.f32.mrb[48].mxu1 }
 0x82a   : > { %v2399_v6 = vadd.f32 %v4642_v35, %v5786_v62  ;;  %v2390_v3 = vpop.f32.mrb[49].mxu1 }
 0x82b   : > { %v4643_v5 = vpop.f32.mrb[50].mxu1  ;;  %v2391_v15 = vadd.f32 %v2390_v3, %v5786_v62 }
 0x82c   : > { %2457 = vmax.xlane.f32.xlu0 %v2399_v6  ;;  %v2393_v19 = vpop.f32.mrb[51].mxu1  ;;  %v2402_v53 = vadd.f32 %v4643_v5, %v5786_v62 }
 0x82d   : > { %v2394_v43 = vadd.f32 %v2393_v19, %v5786_v62 }
 0x82f   : > { %2455 = vmax.xlane.f32.xlu1 %v2394_v43 }
 0x830   : > { %2453 = vmax.xlane.f32.xlu0 %v2391_v15 }
 0x831   : > { %v4646_v0 = vpop.f32.mrb[52].mxu1 }
 0x832   : > { %v2406_v34 = vpop.f32.mrb[53].mxu1  ;;  %v6276_v33 = vadd.f32 %v4646_v0, %v5786_v62 }
 0x833   : > { %v4647_v10 = vpop.f32.mrb[54].mxu1  ;;  %v6284_v35 = vadd.f32 %v2406_v34, %v5786_v62 }
 0x834   : > { %v6273_v2 = vadd.f32 %v4647_v10, %v5786_v62  ;;  %2459 = vmax.xlane.f32.xlu0 %v2402_v53  ;;  %v2409_v29 = vpop.f32.mrb[55].mxu1 }
 0x835   : > { %v6280_v30 = vadd.f32 %v2409_v29, %v5786_v62 }
 0x836   : > { %2467 = vmax.xlane.f32.xlu1 %v6273_v2 }
 0x838   : > { %2465 = vmax.xlane.f32.xlu0 %v6276_v33 }
 0x839   : > { %v4650_v24 = vpop.f32.mrb[56].mxu1 }
 0x83a   : > { %2463 = vmax.xlane.f32.xlu1 %v6280_v30  ;;  %v2422_v3 = vpop.f32.mrb[57].mxu1  ;;  %v6292_v10 = vadd.f32 %v4650_v24, %v5786_v62 }
 0x83b   : > { %v4651_v5 = vpop.f32.mrb[58].mxu1  ;;  %v6300_v55 = vadd.f32 %v2422_v3, %v5786_v62 }
 0x83c   : > { %v6288_v19 = vadd.f32 %v4651_v5, %v5786_v62  ;;  %2461 = vmax.xlane.f32.xlu0 %v6284_v35  ;;  %v2425_v0 = vpop.f32.mrb[59].mxu1 }
 0x83d   : > { %v6296_v29 = vadd.f32 %v2425_v0, %v5786_v62 }
 0x83e   : > { %2475 = vmax.xlane.f32.xlu1 %v6288_v19 }
 0x840   : > { %2473 = vmax.xlane.f32.xlu0 %v6292_v10 }
 0x841   : > { %v4654_v34 = vpop.f32.mrb[60].mxu1 }
 0x842   : > { %2471 = vmax.xlane.f32.xlu1 %v6296_v29  ;;  %v2438_v5 = vpop.f32.mrb[61].mxu1  ;;  %v6305_v24 = vadd.f32 %v4654_v34, %v5786_v62 }
 0x843   : > { %v4655_v13 = vpop.f32.mrb[62].mxu1  ;;  %v6309_v0 = vadd.f32 %v2438_v5, %v5786_v62  ;;  %v6324_v5 = vpop.permute.xlu1 %2793 }
 0x844   : > { %2469 = vmax.xlane.f32.xlu0 %v6300_v55  ;;  %v2441_v7 = vpop.f32.mrb[63].mxu1  ;;  %v6317_v3 = vadd.f32 %v4655_v13, %v5786_v62 }
 0x845   : > { %v6321_v34 = vadd.f32 %v2441_v7, %v5786_v62 }
 0x848   : > { %2481 = vmax.xlane.f32.xlu0 %v6305_v24 }
 0x84c   : > { %2477 = vmax.xlane.f32.xlu0 %v6309_v0 }
 0x853   : > { %2797 = vrot.lane.b32.xlu1 %v5665_v44, %s5224_s30 }
 0x862   : > { %2795 = vrot.lane.b32.xlu0 %v5669_v23, %s5224_s30 }
 0x877   : > { %2483 = vmax.xlane.f32.xlu1 %v6317_v3 }
 0x87b   : > { %2479 = vmax.xlane.f32.xlu1 %v6321_v34 }
 0x8b9   : > { %v2458_v46 = vpop.xlane.xlu0 %2457 }
 0x8ba   : > { %v2487_v58 = vsub.f32 %v2399_v6, %v2458_v46 }
 0x8bc   : > { %v2505_v42 = vmul.f32 1.442695, %v2487_v58  ;;  %v2456_v18 = vpop.xlane.xlu1 %2455 }
 0x8bd   : > { %v2486_v44 = vsub.f32 %v2394_v43, %v2456_v18  ;;  %v2454_v36 = vpop.xlane.xlu0 %2453 }
 0x8be   : > { %5037 = vpow2.f32 %v2505_v42  ;;  %v2485_v23 = vsub.f32 %v2391_v15, %v2454_v36 }
 0x8bf   : > { %v2503_v4 = vmul.f32 1.442695, %v2486_v44 }
 0x8c0   : > { %v2501_v13 = vmul.f32 1.442695, %v2485_v23 }
 0x8c1   : > { %5039 = vpow2.f32 %v2503_v4  ;;  %v2460_v22 = vpop.xlane.xlu0 %2459 }
 0x8c2   : > { %5041 = vpow2.f32 %v2501_v13  ;;  %v2488_v54 = vsub.f32 %v2402_v53, %v2460_v22 }
 0x8c3   : > { %v2468_v42 = vpop.xlane.xlu1 %2467 }
 0x8c4   : > { %v2507_v7 = vmul.f32 1.442695, %v2488_v54  ;;  %v2492_v13 = vsub.f32 %v6273_v2, %v2468_v42 }
 0x8c5   : > { %v2466_v18 = vpop.xlane.xlu0 %2465 }
 0x8c6   : > { %5043 = vpow2.f32 %v2507_v7  ;;  %v2491_v4 = vsub.f32 %v6276_v33, %v2466_v18  ;;  %v2515_v59 = vmul.f32 1.442695, %v2492_v13 }
 0x8c7   : > { %v2464_v22 = vpop.xlane.xlu1 %2463 }
 0x8c8   : > { %v6326_v16 = vpop.eup %5037  ;;  %v2513_v43 = vmul.f32 1.442695, %v2491_v4  ;;  %v2490_v53 = vsub.f32 %v6280_v30, %v2464_v22 }
 0x8c9   : > { %2537 = vadd.xlane.f32.xlu1 %v6326_v16  ;;  %v2462_v46 = vpop.xlane.xlu0 %2461 }
 0x8ca   : > { %v2489_v15 = vsub.f32 %v6284_v35, %v2462_v46  ;;  %5045 = vpow2.f32 %v2513_v43  ;;  %v2511_v7 = vmul.f32 1.442695, %v2490_v53 }
 0x8cb   : > { %v6329_v57 = vpop.eup %5039  ;;  %v2476_v44 = vpop.xlane.xlu1 %2475 }
 0x8cc   : > { %v6331_v58 = vpop.eup %5041  ;;  %2535 = vadd.xlane.f32.xlu0 %v6329_v57  ;;  %v2496_v2 = vsub.f32 %v6288_v19, %v2476_v44 }
 0x8cd   : > { %2533 = vadd.xlane.f32.xlu1 %v6331_v58  ;;  %v2474_v54 = vpop.xlane.xlu0 %2473 }
 0x8cf   : > { %v2472_v12 = vpop.xlane.xlu1 %2471 }
 0x8d0   : > { %v6335_v36 = vpop.eup %5043 }
 0x8d1   : > { %2539 = vadd.xlane.f32.xlu1 %v6335_v36  ;;  %v2470_v6 = vpop.xlane.xlu0 %2469 }
 0x8d2   : > { %v2493_v35 = vsub.f32 %v6300_v55, %v2470_v6  ;;  %v2494_v55 = vsub.f32 %v6296_v29, %v2472_v12 }
 0x8d4   : > { %v2517_v42 = vmul.f32 1.442695, %v2493_v35  ;;  %v6351_v22 = vpop.eup %5045  ;;  %v2519_v43 = vmul.f32 1.442695, %v2494_v55 }
 0x8d5   : > { %v2482_v23 = vpop.xlane.xlu0 %2481 }
 0x8d6   : > { %v2499_v33 = vsub.f32 %v6305_v24, %v2482_v23 }
 0x8d8   : > { %v2529_v30 = vmul.f32 1.442695, %v2499_v33 }
 0x8d9   : > { %v2478_v46 = vpop.xlane.xlu0 %2477 }
 0x8da   : > { %v2497_v4 = vsub.f32 %v6309_v0, %v2478_v46  ;;  %v2832_v46 = vsel %vm1342_vm1, %v6215_v51, 0 }
 0x8dc   : > { %v2525_v24 = vmul.f32 1.442695, %v2497_v4 }
 0x8e2   : > { %2799 = vrot.lane.b32.xlu0 %v5689_v45, %s5224_s30  ;;  %2801 = vrot.lane.b32.xlu1 %v5685_v47, %s5224_s30  ;;  %v2509_v45 = vmul.f32 1.442695, %v2489_v15  ;;  %v2495_v47 = vsub.f32 %v6292_v10, %v2474_v54  ;;  %v6353_v10 = vpop.permute.xlu1 %2797  ;;  %v2523_v54 = vmul.f32 1.442695, %v2496_v2 }
 0x8e4   : > { %5047 = vpow2.f32 %v2509_v45  ;;  %v2521_v18 = vmul.f32 1.442695, %v2495_v47 }
 0x8e5   : > { %5049 = vpow2.f32 %v2511_v7 }
 0x8e6   : > { %5051 = vpow2.f32 %v2515_v59 }
 0x8e7   : > { %5053 = vpow2.f32 %v2521_v18 }
 0x8e8   : > { %5055 = vpow2.f32 %v2529_v30 }
 0x8e9   : > { %5057 = vpow2.f32 %v2517_v42 }
 0x8ea   : > { %5059 = vpow2.f32 %v2525_v24 }
 0x8eb   : > { %5061 = vpow2.f32 %v2523_v54 }
 0x8ee   : > { %v6357_v59 = vpop.eup %5047 }
 0x8ef   : > { %v6359_v0 = vpop.eup %5049 }
 0x8f0   : > { %v6364_v53 = vpop.eup %5051 }
 0x8f1   : > { %v6366_v12 = vpop.eup %5053 }
 0x8f2   : > { %v6371_v23 = vpop.eup %5055 }
 0x8f3   : > { %v6373_v13 = vpop.eup %5057 }
 0x8f4   : > { %v6377_v45 = vpop.eup %5059 }
 0x8f5   : > { %v6379_v7 = vpop.eup %5061 }
 0x901   : > { %2545 = vadd.xlane.f32.xlu0 %v6351_v22 }
 0x904   : > { %v2484_v6 = vpop.xlane.xlu1 %2483 }
 0x905   : > { %v2500_v19 = vsub.f32 %v6317_v3, %v2484_v6  ;;  %2541 = vadd.xlane.f32.xlu0 %v6357_v59 }
 0x906   : > { %2543 = vadd.xlane.f32.xlu1 %v6359_v0 }
 0x907   : > { %v2531_v15 = vmul.f32 1.442695, %v2500_v19 }
 0x908   : > { %v2480_v44 = vpop.xlane.xlu1 %2479 }
 0x909   : > { %5063 = vpow2.f32 %v2531_v15  ;;  %v2498_v29 = vsub.f32 %v6321_v34, %v2480_v44  ;;  %2547 = vadd.xlane.f32.xlu0 %v6364_v53 }
 0x90a   : > { %2553 = vadd.xlane.f32.xlu1 %v6366_v12  ;;  %5065 = vpow2.f32 %v2519_v43 }
 0x90b   : > { %v2527_v3 = vmul.f32 1.442695, %v2498_v29 }
 0x90d   : > { %2561 = vadd.xlane.f32.xlu0 %v6371_v23  ;;  %5067 = vpow2.f32 %v2527_v3 }
 0x90e   : > { %2549 = vadd.xlane.f32.xlu1 %v6373_v13 }
 0x911   : > { %2557 = vadd.xlane.f32.xlu0 %v6377_v45 }
 0x912   : > { %2555 = vadd.xlane.f32.xlu1 %v6379_v7 }
 0x913   : > { %v6383_v34 = vpop.eup %5063 }
 0x914   : > { %v6385_v47 = vpop.eup %5065 }
 0x915   : > { %2563 = vadd.xlane.f32.xlu0 %v6383_v34 }
 0x916   : > { %2551 = vadd.xlane.f32.xlu1 %v6385_v47 }
 0x917   : > { %v6389_v33 = vpop.eup %5067 }
 0x91a   : > { %2559 = vadd.xlane.f32.xlu1 %v6389_v33 }
 0x92b   : > { %2805 = vrot.lane.b32.xlu1 %v5705_v39, %s5224_s30  ;;  %2803 = vrot.lane.b32.xlu0 %v5709_v41, %s5224_s30 }
 0x92f   : > { %2777 = vrot.lane.b32.xlu1 %v5635_v31, %s5224_s30  ;;  %2775 = vrot.lane.b32.xlu0 %v5639_v32, %s5224_s30  ;;  %v2796_v31 = vpop.permute.xlu0 %2795 }
 0x933   : > { %2781 = vrot.lane.b32.xlu1 %v5663_v28, %s5224_s30  ;;  %2779 = vrot.lane.b32.xlu0 %v5667_v11, %s5224_s30 }
 0x937   : > { %2785 = vrot.lane.b32.xlu1 %v5683_v21, %s5224_s30  ;;  %2783 = vrot.lane.b32.xlu0 %v5687_v8, %s5224_s30 }
 0x93b   : > { %2789 = vrot.lane.b32.xlu1 %v5703_v38, %s5224_s30  ;;  %2787 = vrot.lane.b32.xlu0 %v5707_v40, %s5224_s30 }
 0x93f   : > { %3106 = vrot.lane.b32.xlu1 %v5718_v49, %s5224_s30  ;;  %3104 = vrot.lane.b32.xlu0 %v5720_v50, %s5224_s30 }
 0x943   : > { %3108 = vrot.lane.b32.xlu0 %v5732_v37, %s5224_s30 }
 0x956   : > { %v2538_v32 = vpop.xlane.xlu1 %2537 }
 0x959   : > { %v2536_v28 = vpop.xlane.xlu0 %2535 }
 0x95a   : > { %5069 = vrcp.f32 %v2536_v28  ;;  %v2534_v11 = vpop.xlane.xlu1 %2533 }
 0x95b   : > { %5071 = vrcp.f32 %v2534_v11 }
 0x95c   : > { %5073 = vrcp.f32 %v2538_v32 }
 0x95d   : > { %v2800_v51 = vpop.permute.xlu0 %2799 }
 0x95e   : > { %v2540_v21 = vpop.xlane.xlu1 %2539 }
 0x95f   : > { %5075 = vrcp.f32 %v2540_v21 }
 0x964   : > { %v5070_v8 = vpop.eup %5069 }
 0x965   : > { %v5072_v38 = vpop.eup %5071  ;;  %v2582_v39 = vmul.f32 %v5070_v8, %v6329_v57  ;;  %v2835_v57 = vsel %vm1342_vm1, %v6324_v5, 0 }
 0x966   : > { %v2581_v40 = vmul.f32 %v5072_v38, %v6331_v58  ;;  %v5074_v41 = vpop.eup %5073  ;;  %v2841_v58 = vsel %vm1342_vm1, %v6353_v10, 0 }
 0x967   : > { %v2583_v37 = vmul.f32 %v5074_v41, %v6326_v16  ;;  %v2838_v16 = vsel %vm1342_vm1, %v2796_v31, 0 }
 0x968   : > { %v2597_v49 = vpack.c.bf16 %v2582_v39, %v2581_v40 }
 0x969   : > { %v5076_v50 = vpop.eup %5075 }
 0x96a   : > { %v2584_v18 = vmul.f32 %v5076_v50, %v6335_v36  ;;  %4672 = vmatprep.mubr.bf16.mxu0 %v2597_v49  ;;  %v2844_v36 = vsel %vm1342_vm1, %v2800_v51, 0 }
 0x96c   : > { %v2598_v35 = vpack.c.bf16 %v2584_v18, %v2583_v37 }
 0x96e   : > { %4673 = vmatmul.mubr.bf16.vlgmr.msra.gmra.mrb[64].mxu0 %v2598_v35 }
 0x96f   : > { %4689 = vmatpush3.bf16.xpose.msra.mxu0 %v2832_v46 }
 0x970   : > { %4841 = vmatprep.subr.msk.bf16.mxu0 %vm1342_vm1, %v6324_v5  ;;  %v2802_v5 = vpop.permute.xlu1 %2801 }
 0x971   : > { %v2847_v42 = vsel %vm1342_vm1, %v2802_v5, 0 }
 0x977   : > { %4691 = vmatpush3.bf16.xpose.msra.mxu0 %v2835_v57 }
 0x978   : > { %4842 = vmatprep.subr.msk.bf16.mxu0 %vm1342_vm1, %v2796_v31 }
 0x97f   : > { %4693 = vmatpush3.bf16.xpose.msra.mxu0 %v2838_v16 }
 0x980   : > { %4843 = vmatprep.subr.msk.bf16.mxu0 %vm1342_vm1, %v6353_v10 }
 0x987   : > { %4695 = vmatpush3.bf16.xpose.msra.mxu0 %v2841_v58 }
 0x988   : > { %4844 = vmatprep.subr.msk.bf16.mxu0 %vm1342_vm1, %v2800_v51 }
 0x98e   : > { %v2546_v30 = vpop.xlane.xlu0 %2545 }
 0x98f   : > { %4697 = vmatpush3.bf16.xpose.msra.mxu0 %v2844_v36 }
 0x990   : > { %4845 = vmatprep.subr.msk.bf16.mxu0 %vm1342_vm1, %v2802_v5 }
 0x992   : > { %v2542_v4 = vpop.xlane.xlu0 %2541 }
 0x993   : > { %5077 = vrcp.f32 %v2542_v4  ;;  %v2544_v2 = vpop.xlane.xlu1 %2543 }
 0x994   : > { %5079 = vrcp.f32 %v2544_v2 }
 0x995   : > { %5081 = vrcp.f32 %v2546_v30 }
 0x996   : > { %v2548_v24 = vpop.xlane.xlu0 %2547 }
 0x997   : > { %4699 = vmatpush3.bf16.xpose.msra.mxu0 %v2847_v42  ;;  %5083 = vrcp.f32 %v2548_v24  ;;  %v2554_v10 = vpop.xlane.xlu1 %2553 }
 0x99a   : > { %v2562_v54 = vpop.xlane.xlu0 %2561 }
 0x99b   : > { %v2550_v55 = vpop.xlane.xlu1 %2549 }
 0x99d   : > { %v5078_v6 = vpop.eup %5077 }
 0x99e   : > { %v5080_v19 = vpop.eup %5079  ;;  %v2558_v43 = vpop.xlane.xlu0 %2557  ;;  %v2585_v15 = vmul.f32 %v5078_v6, %v6357_v59 }
 0x99f   : > { %v5082_v44 = vpop.eup %5081  ;;  %v2556_v29 = vpop.xlane.xlu1 %2555  ;;  %v2586_v3 = vmul.f32 %v5080_v19, %v6359_v0 }
 0x9a0   : > { %5085 = vrcp.f32 %v2556_v29  ;;  %v2587_v11 = vmul.f32 %v5082_v44, %v6351_v22 }
 0x9a1   : > { %v5084_v31 = vpop.eup %5083  ;;  %v2599_v32 = vpack.c.bf16 %v2586_v3, %v2585_v15  ;;  %5087 = vrcp.f32 %v2550_v55 }
 0x9a2   : > { %v2564_v28 = vpop.xlane.xlu0 %2563  ;;  %v2588_v21 = vmul.f32 %v5084_v31, %v6364_v53  ;;  %5089 = vrcp.f32 %v2554_v10 }
 0x9a3   : > { %v2552_v8 = vpop.xlane.xlu1 %2551  ;;  %4676 = vmatprep.mubr.bf16.mxu0 %v2599_v32 }
 0x9a4   : > { %5091 = vrcp.f32 %v2552_v8  ;;  %v2600_v38 = vpack.c.bf16 %v2588_v21, %v2587_v11 }
 0x9a5   : > { %5093 = vrcp.f32 %v2558_v43 }
 0x9a6   : > { %4677 = vmatmul.mubr.bf16.gmra.mrb[68].mxu0 %v2600_v38  ;;  %v2804_v59 = vpop.permute.xlu0 %2803 }
 0x9a7   : > { %v2560_v39 = vpop.xlane.xlu1 %2559  ;;  %4846 = vmatprep.subr.msk.bf16.mxu0 %vm1342_vm1, %v2804_v59  ;;  %v2850_v0 = vsel %vm1342_vm1, %v2804_v59, 0 }
 0x9a8   : > { %5095 = vrcp.f32 %v2560_v39  ;;  %4701 = vmatpush3.bf16.xpose.msra.mxu0 %v2850_v0 }
 0x9a9   : > { %5097 = vrcp.f32 %v2564_v28 }
 0x9aa   : > { %v2776_v40 = vpop.permute.xlu0 %2775  ;;  %v5086_v22 = vpop.eup %5085  ;;  %5099 = vrcp.f32 %v2562_v54 }
 0x9ab   : > { %v2806_v53 = vpop.permute.xlu1 %2805  ;;  %v5088_v41 = vpop.eup %5087  ;;  %v2592_v18 = vmul.f32 %v5086_v22, %v6379_v7 }
 0x9ac   : > { %4847 = vmatprep.subr.msk.bf16.mxu0 %vm1342_vm1, %v2806_v53  ;;  %v5090_v49 = vpop.eup %5089  ;;  %v2853_v46 = vsel %vm1342_vm1, %v2806_v53, 0  ;;  %v2589_v57 = vmul.f32 %v5088_v41, %v6373_v13 }
 0x9ad   : > { %v2591_v51 = vmul.f32 %v5090_v49, %v6366_v12 }
 0x9ae   : > { %v5092_v50 = vpop.eup %5091  ;;  %v2780_v37 = vpop.permute.xlu0 %2779 }
 0x9af   : > { %v2778_v35 = vpop.permute.xlu1 %2777  ;;  %v2590_v16 = vmul.f32 %v5092_v50, %v6385_v47  ;;  %v5094_v58 = vpop.eup %5093  ;;  %v2602_v4 = vpack.c.bf16 %v2592_v18, %v2591_v51 }
 0x9b0   : > { %4703 = vmatpush3.bf16.xpose.msra.mxu0 %v2853_v46  ;;  %v2593_v7 = vmul.f32 %v5094_v58, %v6377_v45 }
 0x9b1   : > { %v2601_v36 = vpack.c.bf16 %v2590_v16, %v2589_v57 }
 0x9b2   : > { %v5096_v30 = vpop.eup %5095  ;;  %v2784_v5 = vpop.permute.xlu0 %2783 }
 0x9b3   : > { %v5098_v2 = vpop.eup %5097  ;;  %v2782_v42 = vpop.permute.xlu1 %2781  ;;  %4680 = vmatprep.mubr.bf16.mxu0 %v2601_v36  ;;  %v2594_v24 = vmul.f32 %v5096_v30, %v6389_v33 }
 0x9b4   : > { %4681 = vmatmul.mubr.bf16.gmra.mrb[72].mxu0 %v2602_v4  ;;  %v5100_v10 = vpop.eup %5099  ;;  %v2596_v47 = vmul.f32 %v5098_v2, %v6383_v34 }
 0x9b5   : > { %v2603_v13 = vpack.c.bf16 %v2594_v24, %v2593_v7  ;;  %v2595_v12 = vmul.f32 %v5100_v10, %v6371_v23 }
 0x9b6   : > { %v2788_v54 = vpop.permute.xlu0 %2787 }
 0x9b7   : > { %v2786_v55 = vpop.permute.xlu1 %2785  ;;  %4684 = vmatprep.mubr.bf16.mxu0 %v2603_v13  ;;  %v2604_v19 = vpack.c.bf16 %v2596_v47, %v2595_v12 }
 0x9ba   : > { %v3105_v6 = vpop.permute.xlu0 %3104 }
 0x9bb   : > { %v2790_v43 = vpop.permute.xlu1 %2789  ;;  %4720 = vmatprep.subr.bf16.mxu1 %v3105_v6 }
 0x9bc   : > { %4685 = vmatmul.mubr.bf16.gmra.mrb[76].mxu0 %v2604_v19  ;;  %4721 = vmatpush3.bf16.msra.mxu1 %v3105_v6 }
 0x9bd   : > { %4704 = vmatprep.mubr.msk.bf16.mxu0 %vm1342_vm1, %v2776_v40 }
 0x9be   : > { %v3109_v33 = vpop.permute.xlu0 %3108 }
 0x9bf   : > { %v3107_v45 = vpop.permute.xlu1 %3106 }
 0x9c0   : > { %4722 = vmatprep.subr.bf16.mxu1 %v3107_v45 }
 0x9c1   : > { %4723 = vmatpush3.bf16.msra.mxu1 %v3107_v45 }
 0x9c2   : > { %4724 = vmatprep.subr.bf16.mxu1 %v3109_v33 }
 0x9c4   : > { %4705 = vmatmul.mubr.msk.bf16.vlgmr.msra.gmra.mrb[80].mxu0 %vm1342_vm1, %v2778_v35 }
 0x9c5   : > { %4708 = vmatprep.mubr.msk.bf16.mxu0 %vm1342_vm1, %v2780_v37  ;;  %4725 = vmatpush3.bf16.msra.mxu1 %v3109_v33 }
 0x9cc   : > { %4709 = vmatmul.mubr.msk.bf16.gmra.mrb[84].mxu0 %vm1342_vm1, %v2782_v42 }
 0x9cd   : > { %4712 = vmatprep.mubr.msk.bf16.mxu0 %vm1342_vm1, %v2784_v5 }
 0x9d4   : > { %4713 = vmatmul.mubr.msk.bf16.gmra.mrb[88].mxu0 %vm1342_vm1, %v2786_v55 }
 0x9d5   : > { %4716 = vmatprep.mubr.msk.bf16.mxu0 %vm1342_vm1, %v2788_v54 }
 0x9dc   : > { %4717 = vmatmul.mubr.msk.bf16.gmra.mrb[92].mxu0 %vm1342_vm1, %v2790_v43 }
 0xa41   : > { %v6462_v23 = vpop.f32.mrb[64].mxu0 }
 0xa42   : > { %v6464_v34 = vpop.f32.mrb[65].mxu0 }
 0xa43   : > { %v6466_v15 = vpop.f32.mrb[66].mxu0 }
 0xa44   : > { %v2727_v44 = vpack.c.bf16 %v6466_v15, %v6462_v23  ;;  %v6470_v29 = vpop.f32.mrb[67].mxu0  ;;  %v7143_v15 = vpack.c.bf16 %v6248_v61, %v6244_v52  ;;  %v7145_v52 = vld [vmem:[#allocation3_spill] sm:$0xff] }
 0xa45   : > { %v2726_v3 = vpack.c.bf16 %v6470_v29, %v6464_v34  ;;  %v7144_v29 = vpack.c.bf16 %v6228_v56, %v6222_v63  ;;  %v7146_v61 = vpack.c.bf16 %v6240_v60, %v7145_v52 }
 0xa79   : > { %v6474_v31 = vpop.f32.mrb[68].mxu0 }
 0xa7a   : > { %v6476_v32 = vpop.f32.mrb[69].mxu0 }
 0xa7b   : > { %v6478_v28 = vpop.f32.mrb[70].mxu0 }
 0xa7c   : > { %v2729_v11 = vpack.c.bf16 %v6478_v28, %v6474_v31  ;;  %v6482_v21 = vpop.f32.mrb[71].mxu0  ;;  %v7148_v31 = vld [vmem:[#allocation4_spill] sm:$0xff] }
 0xa7d   : > { %v2728_v8 = vpack.c.bf16 %v6482_v21, %v6476_v32 }
 0xa87   : > { %v6486_v38 = vpop.f32.mrb[72].mxu0 }
 0xa88   : > { %v6488_v59 = vpop.f32.mrb[73].mxu0 }
 0xa89   : > { %v6490_v39 = vpop.f32.mrb[74].mxu0 }
 0xa8a   : > { %v6494_v40 = vpop.f32.mrb[75].mxu0 }
 0xa8f   : > { %v6498_v53 = vpop.f32.mrb[76].mxu0 }
 0xa90   : > { %v6500_v41 = vpop.f32.mrb[77].mxu0 }
 0xa91   : > { %v6502_v49 = vpop.f32.mrb[78].mxu0 }
 0xa92   : > { %v6506_v37 = vpop.f32.mrb[79].mxu0 }
 0xa97   : > { %v4706_v35 = vpop.f32.mrb[80].mxu0 }
 0xa98   : > { %v2898_v46 = vadd.f32 %v4706_v35, %v5786_v62  ;;  %v2889_v57 = vpop.f32.mrb[81].mxu0 }
 0xa99   : > { %v4707_v16 = vpop.f32.mrb[82].mxu0  ;;  %v2890_v36 = vadd.f32 %v2889_v57, %v5786_v62 }
 0xa9a   : > { %2956 = vmax.xlane.f32.xlu0 %v2898_v46  ;;  %v2892_v58 = vpop.f32.mrb[83].mxu0  ;;  %v2901_v5 = vadd.f32 %v4707_v16, %v5786_v62 }
 0xa9b   : > { %v2893_v51 = vadd.f32 %v2892_v58, %v5786_v62 }
 0xa9d   : > { %2954 = vmax.xlane.f32.xlu1 %v2893_v51 }
 0xa9e   : > { %2952 = vmax.xlane.f32.xlu0 %v2890_v36 }
 0xa9f   : > { %v4710_v30 = vpop.f32.mrb[84].mxu0 }
 0xaa0   : > { %v2905_v4 = vpop.f32.mrb[85].mxu0  ;;  %v2914_v24 = vadd.f32 %v4710_v30, %v5786_v62 }
 0xaa1   : > { %v4711_v2 = vpop.f32.mrb[86].mxu0  ;;  %v2906_v54 = vadd.f32 %v2905_v4, %v5786_v62 }
 0xaa2   : > { %v6515_v42 = vadd.f32 %v4711_v2, %v5786_v62  ;;  %2958 = vmax.xlane.f32.xlu0 %v2901_v5  ;;  %v2908_v7 = vpop.f32.mrb[87].mxu0 }
 0xaa3   : > { %v2909_v10 = vadd.f32 %v2908_v7, %v5786_v62 }
 0xaa4   : > { %2966 = vmax.xlane.f32.xlu1 %v6515_v42 }
 0xaa6   : > { %2964 = vmax.xlane.f32.xlu0 %v2914_v24 }
 0xaa7   : > { %v4714_v13 = vpop.f32.mrb[88].mxu0 }
 0xaa8   : > { %2962 = vmax.xlane.f32.xlu1 %v2909_v10  ;;  %v2921_v47 = vpop.f32.mrb[89].mxu0  ;;  %v2930_v19 = vadd.f32 %v4714_v13, %v5786_v62 }
 0xaa9   : > { %v4715_v55 = vpop.f32.mrb[90].mxu0  ;;  %v6530_v33 = vadd.f32 %v2921_v47, %v5786_v62 }
 0xaaa   : > { %v6522_v12 = vadd.f32 %v4715_v55, %v5786_v62  ;;  %2960 = vmax.xlane.f32.xlu0 %v2906_v54  ;;  %v2924_v6 = vpop.f32.mrb[91].mxu0 }
 0xaab   : > { %v6527_v43 = vadd.f32 %v2924_v6, %v5786_v62 }
 0xaac   : > { %2974 = vmax.xlane.f32.xlu1 %v6522_v12 }
 0xaae   : > { %2972 = vmax.xlane.f32.xlu0 %v2930_v19 }
 0xaaf   : > { %v4718_v45 = vpop.f32.mrb[92].mxu0 }
 0xab0   : > { %2970 = vmax.xlane.f32.xlu1 %v6527_v43  ;;  %v2937_v35 = vpop.f32.mrb[93].mxu0  ;;  %v6535_v58 = vadd.f32 %v4718_v45, %v5786_v62 }
 0xab1   : > { %v4719_v57 = vpop.f32.mrb[94].mxu0  ;;  %v6539_v30 = vadd.f32 %v2937_v35, %v5786_v62 }
 0xab2   : > { %2968 = vmax.xlane.f32.xlu0 %v6530_v33  ;;  %v2940_v16 = vpop.f32.mrb[95].mxu0  ;;  %v6547_v4 = vadd.f32 %v4719_v57, %v5786_v62 }
 0xab3   : > { %v6551_v2 = vadd.f32 %v2940_v16, %v5786_v62 }
 0xab6   : > { %2980 = vmax.xlane.f32.xlu0 %v6535_v58 }
 0xaba   : > { %2976 = vmax.xlane.f32.xlu0 %v6539_v30 }
 0xac1   : > { %3112 = vrot.lane.b32.xlu1 %v5744_v9, %s5224_s30 }
 0xad0   : > { %3110 = vrot.lane.b32.xlu0 %v5729_v17, %s5224_s30 }
 0xae5   : > { %2982 = vmax.xlane.f32.xlu1 %v6547_v4 }
 0xae9   : > { %2978 = vmax.xlane.f32.xlu1 %v6551_v2 }
 0xafa   : > { %3114 = vrot.lane.b32.xlu1 %v5741_v48, %s5224_s30 }
 0xb27   : > { %v2957_v7 = vpop.xlane.xlu0 %2956 }
 0xb28   : > { %v2986_v13 = vsub.f32 %v2898_v46, %v2957_v7 }
 0xb2a   : > { %v3004_v47 = vmul.f32 1.442695, %v2986_v13  ;;  %v2955_v55 = vpop.xlane.xlu1 %2954 }
 0xb2b   : > { %v2953_v9 = vpop.xlane.xlu0 %2952  ;;  %v2985_v45 = vsub.f32 %v2893_v51, %v2955_v55 }
 0xb2c   : > { %5101 = vpow2.f32 %v3004_v47  ;;  %v2984_v17 = vsub.f32 %v2890_v36, %v2953_v9 }
 0xb2d   : > { %v3002_v16 = vmul.f32 1.442695, %v2985_v45 }
 0xb2e   : > { %v3000_v6 = vmul.f32 1.442695, %v2984_v17 }
 0xb2f   : > { %v2959_v35 = vpop.xlane.xlu0 %2958 }
 0xb30   : > { %5103 = vpow2.f32 %v3000_v6  ;;  %v2987_v57 = vsub.f32 %v2901_v5, %v2959_v35 }
 0xb31   : > { %v2967_v18 = vpop.xlane.xlu1 %2966 }
 0xb32   : > { %v3006_v62 = vmul.f32 1.442695, %v2987_v57  ;;  %v2991_v51 = vsub.f32 %v6515_v42, %v2967_v18 }
 0xb33   : > { %v2965_v50 = vpop.xlane.xlu0 %2964 }
 0xb34   : > { %5105 = vpow2.f32 %v3006_v62  ;;  %v2990_v22 = vsub.f32 %v2914_v24, %v2965_v50  ;;  %v3014_v24 = vmul.f32 1.442695, %v2991_v51 }
 0xb35   : > { %v2963_v0 = vpop.xlane.xlu1 %2962  ;;  %5107 = vpow2.f32 %v3002_v16 }
 0xb36   : > { %v6556_v48 = vpop.eup %5101  ;;  %v3012_v46 = vmul.f32 1.442695, %v2990_v22  ;;  %v2989_v7 = vsub.f32 %v2909_v10, %v2963_v0 }
 0xb37   : > { %3036 = vadd.xlane.f32.xlu1 %v6556_v48  ;;  %v2961_v36 = vpop.xlane.xlu0 %2960 }
 0xb38   : > { %5109 = vpow2.f32 %v3012_v46  ;;  %v3010_v13 = vmul.f32 1.442695, %v2989_v7  ;;  %v2988_v5 = vsub.f32 %v2906_v54, %v2961_v36 }
 0xb39   : > { %v2975_v55 = vpop.xlane.xlu1 %2974 }
 0xb3a   : > { %v6560_v47 = vpop.eup %5103  ;;  %v3008_v9 = vmul.f32 1.442695, %v2988_v5  ;;  %5111 = vpow2.f32 %v3010_v13  ;;  %v2995_v10 = vsub.f32 %v6522_v12, %v2975_v55 }
 0xb3b   : > { %3032 = vadd.xlane.f32.xlu1 %v6560_v47  ;;  %v2973_v50 = vpop.xlane.xlu0 %2972 }
 0xb3c   : > { %5113 = vpow2.f32 %v3008_v9  ;;  %v2994_v0 = vsub.f32 %v2930_v19, %v2973_v50  ;;  %v3022_v57 = vmul.f32 1.442695, %v2995_v10  ;;  %v7141_v10 = vpack.c.bf16 %v6224_v14, %v6220_v20 }
 0xb3d   : > { %5115 = vpow2.f32 %v3014_v24  ;;  %v2971_v42 = vpop.xlane.xlu1 %2970  ;;  %v7142_v20 = vpack.c.bf16 %v6236_v25, %v6232_v1 }
 0xb3e   : > { %v6563_v22 = vpop.eup %5105  ;;  %v3020_v17 = vmul.f32 1.442695, %v2994_v0  ;;  %v2993_v19 = vsub.f32 %v6527_v43, %v2971_v42 }
 0xb3f   : > { %3038 = vadd.xlane.f32.xlu1 %v6563_v22  ;;  %v2969_v18 = vpop.xlane.xlu0 %2968  ;;  %v6568_v6 = vpop.eup %5107 }
 0xb40   : > { %v2992_v54 = vsub.f32 %v6530_v33, %v2969_v18  ;;  %5117 = vpow2.f32 %v3020_v17  ;;  %v3018_v7 = vmul.f32 1.442695, %v2993_v19 }
 0xb41   : > { %v3113_v9 = vpop.permute.xlu1 %3112 }
 0xb42   : > { %v6570_v45 = vpop.eup %5109  ;;  %v3016_v35 = vmul.f32 1.442695, %v2992_v54 }
 0xb43   : > { %3034 = vadd.xlane.f32.xlu1 %v6568_v6  ;;  %3044 = vadd.xlane.f32.xlu0 %v6570_v45  ;;  %v2981_v12 = vpop.xlane.xlu0 %2980 }
 0xb44   : > { %5119 = vpow2.f32 %v3016_v35  ;;  %v2998_v62 = vsub.f32 %v6535_v58, %v2981_v12  ;;  %v6576_v16 = vpop.eup %5111 }
 0xb45   : > { %5121 = vpow2.f32 %v3022_v57 }
 0xb46   : > { %v6578_v33 = vpop.eup %5113  ;;  %v3028_v46 = vmul.f32 1.442695, %v2998_v62 }
 0xb47   : > { %3042 = vadd.xlane.f32.xlu1 %v6576_v16  ;;  %3040 = vadd.xlane.f32.xlu0 %v6578_v33  ;;  %v2977_v43 = vpop.xlane.xlu0 %2976  ;;  %v6583_v51 = vpop.eup %5115 }
 0xb48   : > { %5123 = vpow2.f32 %v3028_v46  ;;  %v2996_v36 = vsub.f32 %v6539_v30, %v2977_v43 }
 0xb49   : > { %5125 = vpow2.f32 %v3018_v7 }
 0xb4a   : > { %v3024_v13 = vmul.f32 1.442695, %v2996_v36  ;;  %v6586_v5 = vpop.eup %5117 }
 0xb4b   : > { %3046 = vadd.xlane.f32.xlu0 %v6583_v51  ;;  %v3111_v58 = vpop.permute.xlu0 %3110 }
 0xb4c   : > { %5127 = vpow2.f32 %v3024_v13  ;;  %4726 = vmatprep.subr.bf16.mxu1 %v3111_v58 }
 0xb4d   : > { %4727 = vmatpush3.bf16.msra.mxu1 %v3111_v58 }
 0xb4e   : > { %v6588_v55 = vpop.eup %5119  ;;  %4728 = vmatprep.subr.bf16.mxu1 %v3113_v9 }
 0xb4f   : > { %3052 = vadd.xlane.f32.xlu0 %v6586_v5  ;;  %3048 = vadd.xlane.f32.xlu1 %v6588_v55  ;;  %v6592_v30 = vpop.eup %5121 }
 0xb51   : > { %4729 = vmatpush3.bf16.msra.mxu1 %v3113_v9 }
 0xb52   : > { %v6594_v50 = vpop.eup %5123 }
 0xb53   : > { %3054 = vadd.xlane.f32.xlu0 %v6592_v30  ;;  %3060 = vadd.xlane.f32.xlu1 %v6594_v50  ;;  %v6598_v24 = vpop.eup %5125 }
 0xb56   : > { %v6600_v0 = vpop.eup %5127 }
 0xb57   : > { %3050 = vadd.xlane.f32.xlu0 %v6598_v24  ;;  %3056 = vadd.xlane.f32.xlu1 %v6600_v0 }
 0xb68   : > { %3118 = vrot.lane.b32.xlu1 %v5753_v26, %s5224_s30 }
 0xb6c   : > { %2245 = vrot.lane.b32.xlu1 %v7141_v10, %s5225_s0 }
 0xb6d   : > { %3116 = vrot.lane.b32.xlu0 %v5756_v27, %s5224_s30 }
 0xb70   : > { %2742 = vrot.lane.b32.xlu1 %v2726_v3, %s5226_s21  ;;  %v7147_v3 = vld [vmem:[#allocation5_spill] sm:$0xff] }
 0xb71   : > { %v7149_v28 = vpack.c.bf16 %v7147_v3, %v7148_v31 }
 0xb72   : > { %v2983_v17 = vpop.xlane.xlu1 %2982 }
 0xb73   : > { %v2999_v34 = vsub.f32 %v6547_v4, %v2983_v17 }
 0xb74   : > { %2744 = vrot.lane.b32.xlu1 %v2727_v44, %s5226_s21 }
 0xb75   : > { %v3030_v1 = vmul.f32 1.442695, %v2999_v34 }
 0xb76   : > { %v2979_v26 = vpop.xlane.xlu1 %2978 }
 0xb77   : > { %v2997_v27 = vsub.f32 %v6551_v2, %v2979_v26 }
 0xb78   : > { %2249 = vrot.lane.b32.xlu1 %v7142_v20, %s5225_s0 }
 0xb79   : > { %v3026_v23 = vmul.f32 1.442695, %v2997_v27 }
 0xb7a   : > { %v3115_v14 = vpop.permute.xlu1 %3114 }
 0xb7b   : > { %4730 = vmatprep.subr.bf16.mxu1 %v3115_v14  ;;  %5129 = vpow2.f32 %v3026_v23 }
 0xb7c   : > { %2748 = vrot.lane.b32.xlu1 %v2729_v11, %s5226_s21  ;;  %4731 = vmatpush3.bf16.msra.mxu1 %v3115_v14  ;;  %5131 = vpow2.f32 %v3030_v1 }
 0xb80   : > { %2253 = vrot.lane.b32.xlu1 %v7143_v15, %s5225_s0 }
 0xb85   : > { %v6634_v25 = vpop.eup %5129 }
 0xb86   : > { %v6637_v44 = vpop.eup %5131 }
 0xb8c   : > { %3058 = vadd.xlane.f32.xlu0 %v6634_v25 }
 0xb90   : > { %3062 = vadd.xlane.f32.xlu0 %v6637_v44 }
 0xba6   : > { %2243 = vrot.lane.b32.xlu0 %v7144_v29, %s5225_s0 }
 0xbaa   : > { %2247 = vrot.lane.b32.xlu0 %v7146_v61, %s5225_s0 }
 0xbae   : > { %2746 = vrot.lane.b32.xlu0 %v2728_v8, %s5226_s21 }
 0xbb2   : > { %2251 = vrot.lane.b32.xlu0 %v7149_v28, %s5225_s0 }
 0xbc4   : > { %v3037_v11 = vpop.xlane.xlu1 %3036 }
 0xbc8   : > { %v3033_v4 = vpop.xlane.xlu1 %3032 }
 0xbc9   : > { %5133 = vrcp.f32 %v3033_v4 }
 0xbcc   : > { %v3039_v2 = vpop.xlane.xlu1 %3038 }
 0xbd0   : > { %v3035_v63 = vpop.xlane.xlu1 %3034  ;;  %v3045_v56 = vpop.xlane.xlu0 %3044 }
 0xbd1   : > { %5135 = vrcp.f32 %v3035_v63 }
 0xbd2   : > { %5137 = vrcp.f32 %v3039_v2 }
 0xbd3   : > { %v5134_v54 = vpop.eup %5133 }
 0xbd4   : > { %v3041_v18 = vpop.xlane.xlu0 %3040  ;;  %v3043_v60 = vpop.xlane.xlu1 %3042  ;;  %v3080_v21 = vmul.f32 %v5134_v54, %v6560_v47 }
 0xbd5   : > { %5139 = vrcp.f32 %v3043_v60 }
 0xbd6   : > { %5141 = vrcp.f32 %v3041_v18 }
 0xbd7   : > { %5143 = vrcp.f32 %v3037_v11 }
 0xbd8   : > { %v3047_v42 = vpop.xlane.xlu0 %3046 }
 0xbd9   : > { %5145 = vrcp.f32 %v3047_v42 }
 0xbdb   : > { %v5136_v35 = vpop.eup %5135 }
 0xbdc   : > { %v3049_v57 = vpop.xlane.xlu1 %3048  ;;  %v3053_v32 = vpop.xlane.xlu0 %3052  ;;  %v3081_v8 = vmul.f32 %v5136_v35, %v6568_v6 }
 0xbdd   : > { %v5138_v43 = vpop.eup %5137 }
 0xbde   : > { %v3096_v19 = vpack.c.bf16 %v3081_v8, %v3080_v21  ;;  %v3083_v9 = vmul.f32 %v5138_v43, %v6563_v22 }
 0xbdf   : > { %v5140_v36 = vpop.eup %5139 }
 0xbe0   : > { %4736 = vmatprep.mubr.bf16.mxu1 %v3096_v19  ;;  %v3061_v12 = vpop.xlane.xlu1 %3060  ;;  %v3055_v62 = vpop.xlane.xlu0 %3054  ;;  %v3085_v26 = vmul.f32 %v5140_v36, %v6576_v16 }
 0xbe1   : > { %v5142_v47 = vpop.eup %5141 }
 0xbe2   : > { %v5144_v6 = vpop.eup %5143  ;;  %v3084_v17 = vmul.f32 %v5142_v47, %v6578_v33  ;;  %v7151_v47 = vpack.c.bf16 %v6494_v40, %v6488_v59 }
 0xbe3   : > { %v3082_v20 = vmul.f32 %v5144_v6, %v6556_v48  ;;  %v5146_v14 = vpop.eup %5145 }
 0xbe4   : > { %v3057_v46 = vpop.xlane.xlu1 %3056  ;;  %v3051_v7 = vpop.xlane.xlu0 %3050  ;;  %v3098_v23 = vpack.c.bf16 %v3085_v26, %v3084_v17  ;;  %v3087_v33 = vmul.f32 %v5146_v14, %v6583_v51  ;;  %v7155_v14 = vld [vmem:[#allocation9_spill] sm:$0xff] }
 0xbe5   : > { %5147 = vrcp.f32 %v3051_v7  ;;  %v3097_v27 = vpack.c.bf16 %v3083_v9, %v3082_v20  ;;  %v7152_v20 = vld [vmem:[#allocation8_spill] sm:$0xff] }
 0xbe6   : > { %5149 = vrcp.f32 %v3045_v56 }
 0xbe7   : > { %5151 = vrcp.f32 %v3049_v57 }
 0xbe8   : > { %v3119_v13 = vpop.permute.xlu1 %3118  ;;  %v3117_v58 = vpop.permute.xlu0 %3116  ;;  %5153 = vrcp.f32 %v3055_v62 }
 0xbe9   : > { %4732 = vmatprep.subr.bf16.mxu1 %v3117_v58  ;;  %5155 = vrcp.f32 %v3053_v32 }
 0xbea   : > { %4733 = vmatpush3.bf16.msra.mxu1 %v3117_v58  ;;  %5157 = vrcp.f32 %v3057_v46 }
 0xbeb   : > { %4734 = vmatprep.subr.bf16.mxu1 %v3119_v13 }
 0xbec   : > { %v2246_v10 = vpop.permute.xlu1 %2245 }
 0xbed   : > { %2269 = vst.msk [vmem:[#allocation2 + $0x8] sm:$0xff] %vm2267_vm3, %v2246_v10 }
 0xbee   : > { %4735 = vmatpush3.bf16.msra.mxu1 %v3119_v13  ;;  %v7150_v13 = vpack.c.bf16 %v6490_v39, %v6486_v38 }
 0xbef   : > { %v5148_v15 = vpop.eup %5147 }
 0xbf0   : > { %v2743_v34 = vpop.permute.xlu1 %2742  ;;  %v5150_v22 = vpop.eup %5149  ;;  %v3089_v48 = vmul.f32 %v5148_v15, %v6598_v24 }
 0xbf1   : > { %4737 = vmatmul.mubr.bf16.vlgmr.msra.gmra.mrb[64].mxu1 %v3097_v27  ;;  %v5152_v1 = vpop.eup %5151  ;;  %v3086_v29 = vmul.f32 %v5150_v22, %v6570_v45  ;;  %v7153_v27 = vld [vmem:[#allocation6_spill] sm:$0xff] }
 0xbf2   : > { %4740 = vmatprep.mubr.bf16.mxu1 %v3098_v23  ;;  %v3088_v52 = vmul.f32 %v5152_v1, %v6588_v55  ;;  %v5154_v3 = vpop.eup %5153  ;;  %v7154_v38 = vpack.c.bf16 %v7152_v20, %v7153_v27  ;;  %v7158_v1 = vpack.c.bf16 %v6502_v49, %v6498_v53 }
 0xbf3   : > { %v3099_v61 = vpack.c.bf16 %v3087_v33, %v3086_v29  ;;  %v5156_v11 = vpop.eup %5155  ;;  %v3091_v51 = vmul.f32 %v5154_v3, %v6592_v30  ;;  %v7159_v33 = vpack.c.bf16 %v6506_v37, %v6500_v41 }
 0xbf4   : > { %v2745_v16 = vpop.permute.xlu1 %2744  ;;  %v3100_v28 = vpack.c.bf16 %v3089_v48, %v3088_v52  ;;  %v3090_v24 = vmul.f32 %v5156_v11, %v6586_v5  ;;  %v5158_v18 = vpop.eup %5157 }
 0xbf5   : > { %2768 = vst.msk [vmem:[#allocation2 + $0x8] sm:$0xff] %vm2766_vm4, %v2745_v16  ;;  %v3092_v5 = vmul.f32 %v5158_v18, %v6600_v0  ;;  %v4869_v0 = vld [vmem:[%s7105_s10] sm:$0xff]  }
 0xbf6   : > { %v3101_v2 = vpack.c.bf16 %v3091_v51, %v3090_v24  ;;  %4752 = vmatprep.subr.bf16.mxu1 %v4869_v0 }
 0xbf7   : > { %4753 = vmatpush3.bf16.msra.mxu1 %v4869_v0 }
 0xbf8   : > { %v2250_v31 = vpop.permute.xlu1 %2249 }
 0xbf9   : > { %2271 = vst.msk [vmem:[#allocation2 + $0x18] sm:$0xff] %vm2267_vm3, %v2250_v31  ;;  %4741 = vmatmul.mubr.bf16.gmra.mrb[68].mxu1 %v3099_v61 }
 0xbfa   : > { %4744 = vmatprep.mubr.bf16.mxu1 %v3100_v28 }
 0xbfc   : > { %v2749_v4 = vpop.permute.xlu1 %2748 }
 0xbfd   : > { %2770 = vst.msk [vmem:[#allocation2 + $0x18] sm:$0xff] %vm2766_vm4, %v2749_v4 }
 0xc00   : > { %v2254_v45 = vpop.permute.xlu1 %2253 }
 0xc01   : > { %2273 = vst.msk [vmem:[#allocation2 + $0x28] sm:$0xff] %vm2267_vm3, %v2254_v45  ;;  %4745 = vmatmul.mubr.bf16.gmra.mrb[72].mxu1 %v3101_v2 }
 0xc19   : > { %v3059_v55 = vpop.xlane.xlu0 %3058 }
 0xc1a   : > { %5159 = vrcp.f32 %v3059_v55 }
 0xc1b   : > { %5161 = vrcp.f32 %v3061_v12 }
 0xc1d   : > { %v3063_v63 = vpop.xlane.xlu0 %3062 }
 0xc1e   : > { %5163 = vrcp.f32 %v3063_v63 }
 0xc21   : > { %v2244_v56 = vpop.permute.xlu0 %2243 }
 0xc22   : > { %2268 = vst.msk [vmem:[#allocation2] sm:$0xff] %vm2267_vm3, %v2244_v56 }
 0xc23   : > { %2767 = vst.msk [vmem:[#allocation2] sm:$0xff] %vm2766_vm4, %v2743_v34  ;;  %v7156_v34 = vld [vmem:[#allocation7_spill] sm:$0xff] }
 0xc24   : > { %v5160_v30 = vpop.eup %5159  ;;  %v7157_v59 = vpack.c.bf16 %v7155_v14, %v7156_v34  ;;  %v5201_v34 = vld [vmem:[%s5349_s2 + $0x20] sm:$0xff] }
 0xc25   : > { %v2248_v60 = vpop.permute.xlu0 %2247  ;;  %v3093_v42 = vmul.f32 %v5160_v30, %v6634_v25  ;;  %v5162_v54 = vpop.eup %5161  ;;  %v4870_v25 = vld [vmem:[%s7105_s10 + $0x8] sm:$0xff]  }
 0xc26   : > { %2270 = vst.msk [vmem:[#allocation2 + $0x10] sm:$0xff] %vm2267_vm3, %v2248_v60  ;;  %v3094_v21 = vmul.f32 %v5162_v54, %v6594_v50  ;;  %4754 = vmatprep.subr.bf16.mxu1 %v4870_v25 }
 0xc27   : > { %v3102_v35 = vpack.c.bf16 %v3093_v42, %v3092_v5  ;;  %4755 = vmatpush3.bf16.msra.mxu1 %v4870_v25  ;;  %v5197_v25 = vld [vmem:[%s5349_s2] sm:$0xff] }
 0xc28   : > { %v5164_v57 = vpop.eup %5163 }
 0xc29   : > { %4748 = vmatprep.mubr.bf16.mxu1 %v3102_v35  ;;  %v2747_v32 = vpop.permute.xlu0 %2746  ;;  %v3095_v8 = vmul.f32 %v5164_v57, %v6637_v44  ;;  %v6745_v57 = vld [vmem:[%s7106_s11] ss:$0 sm:$0xff] }
 0xc2a   : > { %2769 = vst.msk [vmem:[#allocation2 + $0x10] sm:$0xff] %vm2766_vm4, %v2747_v32 }
 0xc2b   : > { %v3103_v19 = vpack.c.bf16 %v3095_v8, %v3094_v21 }
 0xc2d   : > { %4749 = vmatmul.mubr.bf16.gmra.mrb[76].mxu1 %v3103_v19  ;;  %v2252_v12 = vpop.permute.xlu0 %2251 }
 0xc2e   : > { %2272 = vst.msk [vmem:[#allocation2 + $0x20] sm:$0xff] %vm2267_vm3, %v2252_v12 }
 0xcc4   : > { %v4738_v50 = vpop.f32.mrb[64].mxu1 }
 0xcc5   : > { %v3162_v44 = vpop.f32.mrb[65].mxu1 }
 0xcc6   : > { %v4739_v62 = vpop.f32.mrb[66].mxu1 }
 0xcc7   : > { %v3226_v46 = vpack.c.bf16 %v4739_v62, %v4738_v50  ;;  %v3165_v7 = vpop.f32.mrb[67].mxu1  ;;  %v5198_v62 = vld [vmem:[%s5349_s2 + $0x10] sm:$0xff] }
 0xcc8   : > { %v3225_v43 = vpack.c.bf16 %v3165_v7, %v3162_v44 }
 0xcc9   : > { %3243 = vrot.lane.b32.xlu1 %v3226_v46, %s5227_s3 }
 0xcca   : > { %3241 = vrot.lane.b32.xlu0 %v3225_v43, %s5227_s3  ;;  %v5199_v43 = vld [vmem:[%s5349_s2 + $0x8] sm:$0xff] }
 0xccc   : > { %v4742_v36 = vpop.f32.mrb[68].mxu1 }
 0xccd   : > { %2752 = vrot.lane.b32.xlu1 %v7150_v13, %s5226_s21  ;;  %v3178_v58 = vpop.f32.mrb[69].mxu1 }
 0xcce   : > { %2750 = vrot.lane.b32.xlu0 %v7151_v47, %s5226_s21  ;;  %v4743_v6 = vpop.f32.mrb[70].mxu1 }
 0xccf   : > { %v3228_v9 = vpack.c.bf16 %v4743_v6, %v4742_v36  ;;  %v3181_v10 = vpop.f32.mrb[71].mxu1 }
 0xcd0   : > { %v3227_v17 = vpack.c.bf16 %v3181_v10, %v3178_v58 }
 0xcd1   : > { %3247 = vrot.lane.b32.xlu1 %v3228_v9, %s5227_s3  ;;  %v5200_v9 = vld [vmem:[%s5349_s2 + $0x18] sm:$0xff] }
 0xcd2   : > { %3245 = vrot.lane.b32.xlu0 %v3227_v17, %s5227_s3 }
 0xcd4   : > { %v4746_v26 = vpop.f32.mrb[72].mxu1 }
 0xcd5   : > { %2257 = vrot.lane.b32.xlu1 %v7154_v38, %s5225_s0  ;;  %v3194_v39 = vpop.f32.mrb[73].mxu1 }
 0xcd6   : > { %2255 = vrot.lane.b32.xlu0 %v7157_v59, %s5225_s0  ;;  %v4747_v40 = vpop.f32.mrb[74].mxu1 }
 0xcd7   : > { %v3230_v23 = vpack.c.bf16 %v4747_v40, %v4746_v26  ;;  %v3197_v15 = vpop.f32.mrb[75].mxu1  ;;  %v5202_v40 = vld [vmem:[%s5349_s2 + $0x28] sm:$0xff] }
 0xcd8   : > { %v3229_v22 = vpack.c.bf16 %v3197_v15, %v3194_v39 }
 0xcd9   : > { %3251 = vrot.lane.b32.xlu1 %v3230_v23, %s5227_s3 }
 0xcda   : > { %3249 = vrot.lane.b32.xlu0 %v3229_v22, %s5227_s3  ;;  %v5203_v22 = vld [vmem:[%s5349_s2 + $0x38] sm:$0xff] }
 0xcdd   : > { %2756 = vrot.lane.b32.xlu1 %v7158_v1, %s5226_s21 }
 0xcde   : > { %2754 = vrot.lane.b32.xlu0 %v7159_v33, %s5226_s21 }
 0xd00   : > { %v4750_v16 = vpop.f32.mrb[76].mxu1 }
 0xd01   : > { %v3210_v48 = vpop.f32.mrb[77].mxu1 }
 0xd02   : > { %v4751_v29 = vpop.f32.mrb[78].mxu1 }
 0xd03   : > { %v3232_v52 = vpack.c.bf16 %v4751_v29, %v4750_v16  ;;  %v3213_v61 = vpop.f32.mrb[79].mxu1  ;;  %v5204_v29 = vld [vmem:[%s5349_s2 + $0x30] sm:$0xff] }
 0xd04   : > { %v3231_v3 = vpack.c.bf16 %v3213_v61, %v3210_v48 }
 0xd05   : > { %3255 = vrot.lane.b32.xlu1 %v3232_v52, %s5227_s3 }
 0xd06   : > { %3253 = vrot.lane.b32.xlu0 %v3231_v3, %s5227_s3 }
 0xd3b   : > { %v3244_v31 = vpop.permute.xlu1 %3243 }
 0xd3c   : > { %3267 = vst.msk [vmem:[#allocation2 + $0x8] sm:$0xff] %vm3265_vm5, %v3244_v31  ;;  %v3242_v53 = vpop.permute.xlu0 %3241 }
 0xd3d   : > { %3266 = vst.msk [vmem:[#allocation2] sm:$0xff] %vm3265_vm5, %v3242_v53 }
 0xd3f   : > { %v2753_v49 = vpop.permute.xlu1 %2752 }
 0xd40   : > { %2772 = vst.msk [vmem:[#allocation2 + $0x28] sm:$0xff] %vm2766_vm4, %v2753_v49  ;;  %v2751_v41 = vpop.permute.xlu0 %2750 }
 0xd41   : > { %2771 = vst.msk [vmem:[#allocation2 + $0x20] sm:$0xff] %vm2766_vm4, %v2751_v41 }
 0xd43   : > { %v3248_v37 = vpop.permute.xlu1 %3247  ;;  %v3275_v51 = vld [vmem:[#allocation2 + $0x8] sm:$0xff] }
 0xd44   : > { %3269 = vst.msk [vmem:[#allocation2 + $0x18] sm:$0xff] %vm3265_vm5, %v3248_v37  ;;  %v3246_v28 = vpop.permute.xlu0 %3245  ;;  %v3274_v11 = vld [vmem:[#allocation2] sm:$0xff] }
 0xd45   : > { %3268 = vst.msk [vmem:[#allocation2 + $0x10] sm:$0xff] %vm3265_vm5, %v3246_v28  ;;  %4756 = vmatprep.mubr.msk.bf16.mxu1 %vm666_vm0, %v3274_v11  ;;  %v5205_v11 = vld [vmem:[%s5349_s2 + $0x40] sm:$0xff] }
 0xd46   : > { %4757 = vmatmul.mubr.msk.bf16.vlgmr.msra.gmra.mrb[80].mxu1 %vm666_vm0, %v3275_v51 }
 0xd47   : > { %v2258_v4 = vpop.permute.xlu1 %2257 }
 0xd48   : > { %2275 = vst.msk [vmem:[#allocation2 + $0x38] sm:$0xff] %vm2267_vm3, %v2258_v4  ;;  %v2256_v24 = vpop.permute.xlu0 %2255  ;;  %v5206_v4 = vld [vmem:[%s5349_s2 + $0x48] sm:$0xff] }
 0xd49   : > { %2274 = vst.msk [vmem:[#allocation2 + $0x30] sm:$0xff] %vm2267_vm3, %v2256_v24 }
 0xd4b   : > { %v3252_v2 = vpop.permute.xlu1 %3251  ;;  %v3277_v63 = vld [vmem:[#allocation2 + $0x18] sm:$0xff] }
 0xd4c   : > { %3271 = vst.msk [vmem:[#allocation2 + $0x28] sm:$0xff] %vm3265_vm5, %v3252_v2  ;;  %v3250_v45 = vpop.permute.xlu0 %3249  ;;  %v3276_v55 = vld [vmem:[#allocation2 + $0x10] sm:$0xff] }
 0xd4d   : > { %3270 = vst.msk [vmem:[#allocation2 + $0x20] sm:$0xff] %vm3265_vm5, %v3250_v45  ;;  %4760 = vmatprep.mubr.msk.bf16.mxu1 %vm666_vm0, %v3276_v55  ;;  %v5207_v45 = vld [vmem:[%s5349_s2 + $0x58] sm:$0xff] }
 0xd4e   : > { %4761 = vmatmul.mubr.msk.bf16.gmra.mrb[84].mxu1 %vm666_vm0, %v3277_v63 }
 0xd4f   : > { %v2757_v56 = vpop.permute.xlu1 %2756 }
 0xd50   : > { %2774 = vst.msk [vmem:[#allocation2 + $0x38] sm:$0xff] %vm2766_vm4, %v2757_v56  ;;  %v2755_v18 = vpop.permute.xlu0 %2754  ;;  %v5208_v56 = vld [vmem:[%s5349_s2 + $0x50] sm:$0xff] }
 0xd51   : > { %2773 = vst.msk [vmem:[#allocation2 + $0x30] sm:$0xff] %vm2766_vm4, %v2755_v18 }
 0xd53   : > { %v3279_v60 = vld [vmem:[#allocation2 + $0x28] sm:$0xff] }
 0xd54   : > { %v3278_v30 = vld [vmem:[#allocation2 + $0x20] sm:$0xff] }
 0xd55   : > { %4764 = vmatprep.mubr.msk.bf16.mxu1 %vm666_vm0, %v3278_v30 }
 0xd56   : > { %4765 = vmatmul.mubr.msk.bf16.gmra.mrb[88].mxu1 %vm666_vm0, %v3279_v60 }
 0xd77   : > { %v3256_v5 = vpop.permute.xlu1 %3255 }
 0xd78   : > { %3273 = vst.msk [vmem:[#allocation2 + $0x38] sm:$0xff] %vm3265_vm5, %v3256_v5  ;;  %v3254_v42 = vpop.permute.xlu0 %3253 }
 0xd79   : > { %3272 = vst.msk [vmem:[#allocation2 + $0x30] sm:$0xff] %vm3265_vm5, %v3254_v42 }
 0xd7f   : > { %v3281_v35 = vld [vmem:[#allocation2 + $0x38] sm:$0xff] }
 0xd80   : > { %v3280_v54 = vld [vmem:[#allocation2 + $0x30] sm:$0xff] }
 0xd81   : > { %4768 = vmatprep.mubr.msk.bf16.mxu1 %vm666_vm0, %v3280_v54 }
 0xd82   : > { %4769 = vmatmul.mubr.msk.bf16.gmra.mrb[92].mxu1 %vm666_vm0, %v3281_v35 }
 0xe19   : > { %v4758_v32 = vpop.f32.mrb[80].mxu1 }
 0xe1a   : > { %v3363_v21 = vpop.f32.mrb[81].mxu1  ;;  %v3372_v8 = vadd.f32 %v4758_v32, %v6745_v57 }
 0xe1b   : > { %v3364_v19 = vadd.f32 %v6745_v57, %v3363_v21  ;;  %v4759_v12 = vpop.f32.mrb[82].mxu1 }
 0xe1c   : > { %v3366_v0 = vpop.f32.mrb[83].mxu1  ;;  %v6754_v46 = vadd.f32 %v5198_v62, %v3372_v8  ;;  %v3375_v7 = vadd.f32 %v4759_v12, %v6745_v57  ;;  %v5209_v12 = vld [vmem:[%s5349_s2 + $0x60] sm:$0xff] }
 0xe1d   : > { %v6750_v50 = vadd.f32 %v5197_v25, %v3364_v19  ;;  %v3367_v44 = vadd.f32 %v6745_v57, %v3366_v0 }
 0xe1e   : > { %v6765_v10 = vadd.f32 %v5200_v9, %v3375_v7  ;;  %v3450_v20 = vsel %vm666_vm0, %v6754_v46, 0.0  ;;  %v5211_v7 = vld [vmem:[%s5349_s2 + $0x68] sm:$0xff] }
 0xe1f   : > { %v6758_v36 = vadd.f32 %v5199_v43, %v3367_v44  ;;  %v3444_v13 = vsel %vm666_vm0, %v6750_v50, 0.0  ;;  %v5210_v44 = vld [vmem:[%s5349_s2 + $0x70] sm:$0xff] }
 0xe20   : > { %3445 = vadd.xlane.f32.xlu0 %v3444_v13  ;;  %v3453_v15 = vsel %vm666_vm0, %v6765_v10, 0.0 }
 0xe21   : > { %v4762_v58 = vpop.f32.mrb[84].mxu1  ;;  %v3447_v47 = vsel %vm666_vm0, %v6758_v36, 0.0 }
 0xe22   : > { %3448 = vadd.xlane.f32.xlu1 %v3447_v47  ;;  %v3379_v6 = vpop.f32.mrb[85].mxu1  ;;  %v3388_v14 = vadd.f32 %v4762_v58, %v6745_v57  ;;  %v5212_v58 = vld [vmem:[%s5349_s2 + $0x78] sm:$0xff] }
 0xe23   : > { %v3380_v17 = vadd.f32 %v6745_v57, %v3379_v6  ;;  %v4763_v26 = vpop.f32.mrb[86].mxu1 }
 0xe24   : > { %3451 = vadd.xlane.f32.xlu0 %v3450_v20  ;;  %v3382_v27 = vpop.f32.mrb[87].mxu1  ;;  %v3391_v38 = vadd.f32 %v4763_v26, %v6745_v57  ;;  %v6787_v52 = vadd.f32 %v5204_v29, %v3388_v14 }
 0xe25   : > { %v3383_v39 = vadd.f32 %v6745_v57, %v3382_v27  ;;  %v6774_v59 = vadd.f32 %v5201_v34, %v3380_v17 }
 0xe26   : > { %v6782_v1 = vadd.f32 %v5203_v22, %v3391_v38  ;;  %v3462_v2 = vsel %vm666_vm0, %v6787_v52, 0.0 }
 0xe27   : > { %v6777_v23 = vadd.f32 %v5202_v40, %v3383_v39  ;;  %v3456_v31 = vsel %vm666_vm0, %v6774_v59, 0.0 }
 0xe28   : > { %3454 = vadd.xlane.f32.xlu0 %v3453_v15  ;;  %v3465_v37 = vsel %vm666_vm0, %v6782_v1, 0.0 }
 0xe29   : > { %v4766_v33 = vpop.f32.mrb[88].mxu1  ;;  %v3459_v16 = vsel %vm666_vm0, %v6777_v23, 0.0 }
 0xe2a   : > { %3460 = vadd.xlane.f32.xlu1 %v3459_v16  ;;  %v3395_v48 = vpop.f32.mrb[89].mxu1  ;;  %v3404_v28 = vadd.f32 %v4766_v33, %v6745_v57 }
 0xe2b   : > { %v3396_v61 = vadd.f32 %v6745_v57, %v3395_v48  ;;  %v4767_v3 = vpop.f32.mrb[90].mxu1 }
 0xe2c   : > { %3457 = vadd.xlane.f32.xlu0 %v3456_v31  ;;  %v3398_v53 = vpop.f32.mrb[91].mxu1  ;;  %v3407_v49 = vadd.f32 %v4767_v3, %v6745_v57  ;;  %v6811_v18 = vadd.f32 %v5208_v56, %v3404_v28 }
 0xe2d   : > { %v3399_v41 = vadd.f32 %v6745_v57, %v3398_v53  ;;  %v6798_v51 = vadd.f32 %v5205_v11, %v3396_v61 }
 0xe2e   : > { %3466 = vadd.xlane.f32.xlu1 %v3465_v37  ;;  %v6806_v55 = vadd.f32 %v5207_v45, %v3407_v49  ;;  %v3474_v5 = vsel %vm666_vm0, %v6811_v18, 0.0 }
 0xe2f   : > { %v6801_v24 = vadd.f32 %v5206_v4, %v3399_v41  ;;  %v3468_v30 = vsel %vm666_vm0, %v6798_v51, 0.0 }
 0xe30   : > { %3463 = vadd.xlane.f32.xlu0 %v3462_v2  ;;  %v3477_v60 = vsel %vm666_vm0, %v6806_v55, 0.0 }
 0xe31   : > { %v3471_v63 = vsel %vm666_vm0, %v6801_v24, 0.0 }
 0xe32   : > { %3472 = vadd.xlane.f32.xlu1 %v3471_v63 }
 0xe34   : > { %3469 = vadd.xlane.f32.xlu0 %v3468_v30 }
 0xe36   : > { %3478 = vadd.xlane.f32.xlu1 %v3477_v60 }
 0xe38   : > { %3475 = vadd.xlane.f32.xlu0 %v3474_v5 }
 0xe55   : > { %v4770_v42 = vpop.f32.mrb[92].mxu1 }
 0xe56   : > { %v3420_v54 = vadd.f32 %v4770_v42, %v6745_v57  ;;  %v3411_v35 = vpop.f32.mrb[93].mxu1 }
 0xe57   : > { %v3412_v32 = vadd.f32 %v6745_v57, %v3411_v35  ;;  %v4771_v21 = vpop.f32.mrb[94].mxu1 }
 0xe58   : > { %v3423_v8 = vadd.f32 %v4771_v21, %v6745_v57  ;;  %v3414_v19 = vpop.f32.mrb[95].mxu1  ;;  %v6827_v62 = vadd.f32 %v5210_v44, %v3420_v54 }
 0xe59   : > { %v6823_v0 = vadd.f32 %v5209_v12, %v3412_v32  ;;  %v3415_v25 = vadd.f32 %v6745_v57, %v3414_v19 }
 0xe5a   : > { %v6835_v47 = vadd.f32 %v5212_v58, %v3423_v8  ;;  %v3486_v57 = vsel %vm666_vm0, %v6827_v62, 0.0 }
 0xe5b   : > { %v6830_v43 = vadd.f32 %v5211_v7, %v3415_v25  ;;  %v3480_v13 = vsel %vm666_vm0, %v6823_v0, 0.0 }
 0xe5c   : > { %3481 = vadd.xlane.f32.xlu0 %v3480_v13  ;;  %v3489_v9 = vsel %vm666_vm0, %v6835_v47, 0.0 }
 0xe5d   : > { %v3483_v6 = vsel %vm666_vm0, %v6830_v43, 0.0 }
 0xe5e   : > { %3484 = vadd.xlane.f32.xlu1 %v3483_v6 }
 0xe60   : > { %3487 = vadd.xlane.f32.xlu0 %v3486_v57 }
 0xe62   : > { %3490 = vadd.xlane.f32.xlu1 %v3489_v9 }
 0xead   : > { %v3446_v17 = vpop.xlane.xlu0 %3445 }
 0xeae   : > { %v3492_v26 = vmul.f32 0.03125, %v3446_v17 }
 0xeaf   : > { %v3449_v20 = vpop.xlane.xlu1 %3448 }
 0xeb0   : > { %v6844_v27 = vsub.f32 %v6750_v50, %v3492_v26  ;;  %v3493_v38 = vmul.f32 0.03125, %v3449_v20 }
 0xeb1   : > { %v3452_v39 = vpop.xlane.xlu0 %3451 }
 0xeb2   : > { %v6847_v14 = vsub.f32 %v6758_v36, %v3493_v38  ;;  %v3494_v34 = vmul.f32 0.03125, %v3452_v39  ;;  %v3524_v40 = vmul.f32 %v6844_v27, %v6844_v27 }
 0xeb4   : > { %v6852_v15 = vsub.f32 %v6754_v46, %v3494_v34  ;;  %v3540_v22 = vsel %vm666_vm0, %v3524_v40, 0.0  ;;  %v3525_v33 = vmul.f32 %v6847_v14, %v6847_v14 }
 0xeb5   : > { %3541 = vadd.xlane.f32.xlu0 %v3540_v22  ;;  %v3455_v16 = vpop.xlane.xlu0 %3454 }
 0xeb6   : > { %v3495_v48 = vmul.f32 0.03125, %v3455_v16  ;;  %v3543_v29 = vsel %vm666_vm0, %v3525_v33, 0.0  ;;  %v3526_v61 = vmul.f32 %v6852_v15, %v6852_v15 }
 0xeb7   : > { %v3461_v3 = vpop.xlane.xlu1 %3460  ;;  %3544 = vadd.xlane.f32.xlu1 %v3543_v29 }
 0xeb8   : > { %v6861_v31 = vsub.f32 %v6765_v10, %v3495_v48  ;;  %v3497_v53 = vmul.f32 0.03125, %v3461_v3  ;;  %v3546_v49 = vsel %vm666_vm0, %v3526_v61, 0.0  ;;  %v4871_v61 = vld [vmem:[%s7109_s14] sm:$0xff]   ;;  %v4872_v3 = vld [vmem:[%s7109_s14 + $0x8] sm:$0xff]  }
 0xeb9   : > { %3547 = vadd.xlane.f32.xlu0 %v3546_v49  ;;  %v3458_v41 = vpop.xlane.xlu0 %3457  ;;  %4772 = vmatprep.subr.bf16.mxu0 %v4871_v61 }
 0xeba   : > { %v6865_v37 = vsub.f32 %v6777_v23, %v3497_v53  ;;  %v3496_v28 = vmul.f32 0.03125, %v3458_v41  ;;  %v3527_v11 = vmul.f32 %v6861_v31, %v6861_v31  ;;  %4773 = vmatpush3.bf16.msra.mxu0 %v4871_v61 }
 0xebb   : > { %v3467_v4 = vpop.xlane.xlu1 %3466  ;;  %4774 = vmatprep.subr.bf16.mxu0 %v4872_v3 }
 0xebc   : > { %v6870_v2 = vsub.f32 %v6774_v59, %v3496_v28  ;;  %v3499_v45 = vmul.f32 0.03125, %v3467_v4  ;;  %v3549_v63 = vsel %vm666_vm0, %v3527_v11, 0.0  ;;  %v3529_v56 = vmul.f32 %v6865_v37, %v6865_v37 }
 0xebd   : > { %3550 = vadd.xlane.f32.xlu1 %v3549_v63  ;;  %v3464_v30 = vpop.xlane.xlu0 %3463 }
 0xebe   : > { %v6876_v60 = vsub.f32 %v6782_v1, %v3499_v45  ;;  %v3498_v5 = vmul.f32 0.03125, %v3464_v30  ;;  %v3528_v42 = vmul.f32 %v6870_v2, %v6870_v2  ;;  %v3555_v35 = vsel %vm666_vm0, %v3529_v56, 0.0  ;;  %4775 = vmatpush3.bf16.msra.mxu0 %v4872_v3 }
 0xebf   : > { %v3473_v54 = vpop.xlane.xlu1 %3472 }
 0xec0   : > { %v6882_v32 = vsub.f32 %v6787_v52, %v3498_v5  ;;  %v3501_v21 = vmul.f32 0.03125, %v3473_v54  ;;  %v3552_v8 = vsel %vm666_vm0, %v3528_v42, 0.0  ;;  %v3531_v19 = vmul.f32 %v6876_v60, %v6876_v60 }
 0xec1   : > { %3556 = vadd.xlane.f32.xlu1 %v3555_v35  ;;  %3553 = vadd.xlane.f32.xlu0 %v3552_v8  ;;  %v3470_v12 = vpop.xlane.xlu0 %3469 }
 0xec2   : > { %v6888_v25 = vsub.f32 %v6801_v24, %v3501_v21  ;;  %v3500_v44 = vmul.f32 0.03125, %v3470_v12  ;;  %v3530_v7 = vmul.f32 %v6882_v32, %v6882_v32  ;;  %v3561_v58 = vsel %vm666_vm0, %v3531_v19, 0.0 }
 0xec3   : > { %v3479_v13 = vpop.xlane.xlu1 %3478 }
 0xec4   : > { %v6894_v6 = vsub.f32 %v6798_v51, %v3500_v44  ;;  %v3503_v57 = vmul.f32 0.03125, %v3479_v13  ;;  %v3558_v9 = vsel %vm666_vm0, %v3530_v7, 0.0  ;;  %v3533_v17 = vmul.f32 %v6888_v25, %v6888_v25  ;;  %v4873_v13 = vld [vmem:[%s7111_s16] sm:$0xff]  }
 0xec5   : > { %3562 = vadd.xlane.f32.xlu1 %v3561_v58  ;;  %3559 = vadd.xlane.f32.xlu0 %v3558_v9  ;;  %v3476_v26 = vpop.xlane.xlu0 %3475  ;;  %v4874_v58 = vld [vmem:[%s7111_s16 + $0x8] sm:$0xff]  }
 0xec6   : > { %v6900_v20 = vsub.f32 %v6806_v55, %v3503_v57  ;;  %v3502_v38 = vmul.f32 0.03125, %v3476_v26  ;;  %v3532_v39 = vmul.f32 %v6894_v6, %v6894_v6  ;;  %v3567_v40 = vsel %vm666_vm0, %v3533_v17, 0.0  ;;  %4792 = vmatprep.subr.bf16.mxu1 %v4873_v13 }
 0xec7   : > { %4793 = vmatpush3.bf16.msra.mxu1 %v4873_v13 }
 0xec8   : > { %v6905_v34 = vsub.f32 %v6811_v18, %v3502_v38  ;;  %v3564_v22 = vsel %vm666_vm0, %v3532_v39, 0.0  ;;  %v3535_v33 = vmul.f32 %v6900_v20, %v6900_v20  ;;  %4794 = vmatprep.subr.bf16.mxu1 %v4874_v58 }
 0xec9   : > { %3568 = vadd.xlane.f32.xlu1 %v3567_v40  ;;  %3565 = vadd.xlane.f32.xlu0 %v3564_v22 }
 0xeca   : > { %v3534_v16 = vmul.f32 %v6905_v34, %v6905_v34  ;;  %v3573_v48 = vsel %vm666_vm0, %v3535_v33, 0.0 }
 0xecb   : > { %4795 = vmatpush3.bf16.msra.mxu1 %v4874_v58 }
 0xecc   : > { %v3570_v29 = vsel %vm666_vm0, %v3534_v16, 0.0 }
 0xecd   : > { %3574 = vadd.xlane.f32.xlu1 %v3573_v48  ;;  %3571 = vadd.xlane.f32.xlu0 %v3570_v29 }
 0xee9   : > { %v3482_v53 = vpop.xlane.xlu0 %3481 }
 0xeea   : > { %v3504_v49 = vmul.f32 0.03125, %v3482_v53 }
 0xeeb   : > { %v3485_v41 = vpop.xlane.xlu1 %3484 }
 0xeec   : > { %v6922_v28 = vsub.f32 %v6823_v0, %v3504_v49  ;;  %v3505_v11 = vmul.f32 0.03125, %v3485_v41 }
 0xeed   : > { %v3488_v4 = vpop.xlane.xlu0 %3487 }
 0xeee   : > { %v6925_v45 = vsub.f32 %v6830_v43, %v3505_v11  ;;  %v3506_v63 = vmul.f32 0.03125, %v3488_v4  ;;  %v3536_v56 = vmul.f32 %v6922_v28, %v6922_v28  ;;  %v6954_v11 = vld [vmem:[%s7107_s12] ss:$0 sm:$0xff] }
 0xeef   : > { %v3491_v30 = vpop.xlane.xlu1 %3490 }
 0xef0   : > { %v6930_v5 = vsub.f32 %v6827_v62, %v3506_v63  ;;  %v3507_v42 = vmul.f32 0.03125, %v3491_v30  ;;  %v3576_v54 = vsel %vm666_vm0, %v3536_v56, 0.0  ;;  %v3537_v35 = vmul.f32 %v6925_v45, %v6925_v45 }
 0xef1   : > { %3577 = vadd.xlane.f32.xlu0 %v3576_v54 }
 0xef2   : > { %v6936_v21 = vsub.f32 %v6835_v47, %v3507_v42  ;;  %v3579_v8 = vsel %vm666_vm0, %v3537_v35, 0.0  ;;  %v3538_v19 = vmul.f32 %v6930_v5, %v6930_v5 }
 0xef3   : > { %3580 = vadd.xlane.f32.xlu1 %v3579_v8 }
 0xef4   : > { %v3582_v12 = vsel %vm666_vm0, %v3538_v19, 0.0  ;;  %v3539_v44 = vmul.f32 %v6936_v21, %v6936_v21 }
 0xef5   : > { %3583 = vadd.xlane.f32.xlu0 %v3582_v12 }
 0xef6   : > { %v3585_v7 = vsel %vm666_vm0, %v3539_v44, 0.0 }
 0xef7   : > { %3586 = vadd.xlane.f32.xlu1 %v3585_v7  ;;  %v6962_v7 = vld [vmem:[%s7108_s13] ss:$0 sm:$0xff] }
 0xf42   : > { %v3542_v57 = vpop.xlane.xlu0 %3541 }
 0xf43   : > { %v3588_v9 = vmul.f32 0.03125, %v3542_v57 }
 0xf44   : > { %v3545_v17 = vpop.xlane.xlu1 %3544 }
 0xf45   : > { %v3604_v26 = vadd.f32 1e-06, %v3588_v9  ;;  %v3589_v38 = vmul.f32 0.03125, %v3545_v17 }
 0xf46   : > { %v3548_v39 = vpop.xlane.xlu0 %3547 }
 0xf47   : > { %5165 = vrsqrt.f32 %v3604_v26  ;;  %v3605_v40 = vadd.f32 1e-06, %v3589_v38  ;;  %v3590_v22 = vmul.f32 0.03125, %v3548_v39 }
 0xf49   : > { %5167 = vrsqrt.f32 %v3605_v40  ;;  %v3606_v33 = vadd.f32 1e-06, %v3590_v22 }
 0xf4a   : > { %v3551_v16 = vpop.xlane.xlu1 %3550 }
 0xf4b   : > { %5169 = vrsqrt.f32 %v3606_v33  ;;  %v3591_v48 = vmul.f32 0.03125, %v3551_v16 }
 0xf4d   : > { %v3607_v29 = vadd.f32 1e-06, %v3591_v48 }
 0xf4e   : > { %v3557_v61 = vpop.xlane.xlu1 %3556  ;;  %v3554_v3 = vpop.xlane.xlu0 %3553 }
 0xf4f   : > { %5171 = vrsqrt.f32 %v3607_v29  ;;  %v3593_v53 = vmul.f32 0.03125, %v3557_v61  ;;  %v3592_v49 = vmul.f32 0.03125, %v3554_v3 }
 0xf51   : > { %v5166_v41 = vpop.eup %5165  ;;  %v3609_v4 = vadd.f32 1e-06, %v3593_v53  ;;  %v3608_v63 = vadd.f32 1e-06, %v3592_v49 }
 0xf52   : > { %v3636_v56 = vmul.f32 %v5166_v41, %v6844_v27  ;;  %v3563_v30 = vpop.xlane.xlu1 %3562  ;;  %v3560_v42 = vpop.xlane.xlu0 %3559 }
 0xf53   : > { %v5168_v54 = vpop.eup %5167  ;;  %5173 = vrsqrt.f32 %v3609_v4  ;;  %v3595_v35 = vmul.f32 0.03125, %v3563_v30  ;;  %v3594_v8 = vmul.f32 0.03125, %v3560_v42 }
 0xf54   : > { %v3637_v19 = vmul.f32 %v5168_v54, %v6847_v14  ;;  %5175 = vrsqrt.f32 %v3608_v63  ;;  %v3658_v12 = vmul.f32 %v6954_v11, %v3636_v56 }
 0xf55   : > { %v5170_v44 = vpop.eup %5169  ;;  %v3611_v13 = vadd.f32 1e-06, %v3595_v35  ;;  %v3610_v58 = vadd.f32 1e-06, %v3594_v8 }
 0xf56   : > { %v3638_v27 = vmul.f32 %v5170_v44, %v6852_v15  ;;  %v3569_v57 = vpop.xlane.xlu1 %3568  ;;  %v3566_v9 = vpop.xlane.xlu0 %3565  ;;  %v3659_v17 = vmul.f32 %v6954_v11, %v3637_v19  ;;  %v3680_v38 = vadd.f32 %v6962_v7, %v3658_v12 }
 0xf57   : > { %5177 = vrsqrt.f32 %v3611_v13  ;;  %v3597_v26 = vmul.f32 0.03125, %v3569_v57  ;;  %v3596_v14 = vmul.f32 0.03125, %v3566_v9 }
 0xf58   : > { %5179 = vrsqrt.f32 %v3610_v58  ;;  %v3681_v39 = vadd.f32 %v6962_v7, %v3659_v17  ;;  %v3660_v16 = vmul.f32 %v6954_v11, %v3638_v27 }
 0xf59   : > { %v5172_v40 = vpop.eup %5171  ;;  %v3613_v22 = vadd.f32 1e-06, %v3597_v26  ;;  %v3612_v33 = vadd.f32 1e-06, %v3596_v14 }
 0xf5a   : > { %v3639_v48 = vmul.f32 %v5172_v40, %v6861_v31  ;;  %v3575_v15 = vpop.xlane.xlu1 %3574  ;;  %v3572_v29 = vpop.xlane.xlu0 %3571  ;;  %v3696_v61 = vpack.c.bf16 %v3681_v39, %v3680_v38  ;;  %v3682_v30 = vadd.f32 %v6962_v7, %v3660_v16 }
 0xf5b   : > { %5181 = vrsqrt.f32 %v3613_v22  ;;  %v3599_v3 = vmul.f32 0.03125, %v3575_v15  ;;  %v3598_v53 = vmul.f32 0.03125, %v3572_v29 }
 0xf5c   : > { %v3661_v49 = vmul.f32 %v6954_v11, %v3639_v48  ;;  %5183 = vrsqrt.f32 %v3612_v33  ;;  %4776 = vmatprep.mubr.msk.bf16.mxu0 %vm666_vm0, %v3696_v61 }
 0xf5d   : > { %v5174_v41 = vpop.eup %5173  ;;  %v3615_v4 = vadd.f32 1e-06, %v3599_v3  ;;  %v3614_v63 = vadd.f32 1e-06, %v3598_v53 }
 0xf5e   : > { %v5176_v56 = vpop.eup %5175  ;;  %v3683_v42 = vadd.f32 %v6962_v7, %v3661_v49  ;;  %v3641_v31 = vmul.f32 %v5174_v41, %v6865_v37 }
 0xf5f   : > { %v3640_v54 = vmul.f32 %v5176_v56, %v6870_v2  ;;  %5185 = vrsqrt.f32 %v3615_v4 }
 0xf60   : > { %5187 = vrsqrt.f32 %v3614_v63  ;;  %v3697_v35 = vpack.c.bf16 %v3683_v42, %v3682_v30  ;;  %v3663_v8 = vmul.f32 %v6954_v11, %v3641_v31 }
 0xf61   : > { %v5178_v19 = vpop.eup %5177  ;;  %v3662_v12 = vmul.f32 %v6954_v11, %v3640_v54 }
 0xf62   : > { %v5180_v44 = vpop.eup %5179  ;;  %v3643_v13 = vmul.f32 %v5178_v19, %v6876_v60  ;;  %4777 = vmatmul.mubr.msk.bf16.vlgmr.msra.gmra.mrb[96].mxu0 %vm666_vm0, %v3697_v35  ;;  %v3685_v58 = vadd.f32 %v6962_v7, %v3663_v8 }
 0xf63   : > { %v3642_v27 = vmul.f32 %v5180_v44, %v6882_v32  ;;  %v3684_v37 = vadd.f32 %v6962_v7, %v3662_v12 }
 0xf64   : > { %v3665_v2 = vmul.f32 %v6954_v11, %v3643_v13 }
 0xf65   : > { %v5182_v57 = vpop.eup %5181  ;;  %v3698_v9 = vpack.c.bf16 %v3685_v58, %v3684_v37  ;;  %v3664_v17 = vmul.f32 %v6954_v11, %v3642_v27 }
 0xf66   : > { %v5184_v26 = vpop.eup %5183  ;;  %v3645_v14 = vmul.f32 %v5182_v57, %v6888_v25  ;;  %v3687_v38 = vadd.f32 %v6962_v7, %v3665_v2 }
 0xf67   : > { %v3644_v60 = vmul.f32 %v5184_v26, %v6894_v6  ;;  %4780 = vmatprep.mubr.msk.bf16.mxu0 %vm666_vm0, %v3698_v9  ;;  %v3686_v39 = vadd.f32 %v6962_v7, %v3664_v17 }
 0xf68   : > { %v3667_v32 = vmul.f32 %v6954_v11, %v3645_v14 }
 0xf69   : > { %v5186_v40 = vpop.eup %5185  ;;  %v3699_v22 = vpack.c.bf16 %v3687_v38, %v3686_v39  ;;  %v3666_v33 = vmul.f32 %v6954_v11, %v3644_v60 }
 0xf6a   : > { %v5188_v16 = vpop.eup %5187  ;;  %v3647_v48 = vmul.f32 %v5186_v40, %v6900_v20  ;;  %v3689_v15 = vadd.f32 %v6962_v7, %v3667_v32  ;;  %v4876_v32 = vld [vmem:[%s7111_s16 + $0x18] sm:$0xff]  }
 0xf6b   : > { %v3646_v25 = vmul.f32 %v5188_v16, %v6905_v34  ;;  %4781 = vmatmul.mubr.msk.bf16.gmra.mrb[100].mxu0 %vm666_vm0, %v3699_v22  ;;  %v3688_v6 = vadd.f32 %v6962_v7, %v3666_v33 }
 0xf6c   : > { %v3669_v29 = vmul.f32 %v6954_v11, %v3647_v48 }
 0xf6d   : > { %v3700_v61 = vpack.c.bf16 %v3689_v15, %v3688_v6  ;;  %v3668_v3 = vmul.f32 %v6954_v11, %v3646_v25 }
 0xf6e   : > { %v3691_v53 = vadd.f32 %v6962_v7, %v3669_v29 }
 0xf6f   : > { %4784 = vmatprep.mubr.msk.bf16.mxu0 %vm666_vm0, %v3700_v61  ;;  %v3690_v49 = vadd.f32 %v6962_v7, %v3668_v3 }
 0xf71   : > { %v3701_v20 = vpack.c.bf16 %v3691_v53, %v3690_v49 }
 0xf73   : > { %4785 = vmatmul.mubr.msk.bf16.gmra.mrb[104].mxu0 %vm666_vm0, %v3701_v20 }
 0xf7e   : > { %v3578_v41 = vpop.xlane.xlu0 %3577 }
 0xf7f   : > { %v3600_v34 = vmul.f32 0.03125, %v3578_v41 }
 0xf80   : > { %v3581_v4 = vpop.xlane.xlu1 %3580 }
 0xf81   : > { %v3616_v63 = vadd.f32 1e-06, %v3600_v34  ;;  %v3601_v56 = vmul.f32 0.03125, %v3581_v4 }
 0xf82   : > { %v3584_v30 = vpop.xlane.xlu0 %3583 }
 0xf83   : > { %5189 = vrsqrt.f32 %v3616_v63  ;;  %v3617_v42 = vadd.f32 1e-06, %v3601_v56  ;;  %v3602_v31 = vmul.f32 0.03125, %v3584_v30 }
 0xf84   : > { %v3587_v54 = vpop.xlane.xlu1 %3586 }
 0xf85   : > { %5191 = vrsqrt.f32 %v3617_v42  ;;  %v3618_v35 = vadd.f32 1e-06, %v3602_v31  ;;  %v3603_v8 = vmul.f32 0.03125, %v3587_v54 }
 0xf87   : > { %5193 = vrsqrt.f32 %v3618_v35  ;;  %v3619_v19 = vadd.f32 1e-06, %v3603_v8 }
 0xf89   : > { %5195 = vrsqrt.f32 %v3619_v19 }
 0xf8d   : > { %v5190_v12 = vpop.eup %5189 }
 0xf8e   : > { %v3648_v44 = vmul.f32 %v5190_v12, %v6922_v28 }
 0xf8f   : > { %v5192_v13 = vpop.eup %5191 }
 0xf90   : > { %v3649_v58 = vmul.f32 %v5192_v13, %v6925_v45  ;;  %v3670_v27 = vmul.f32 %v6954_v11, %v3648_v44 }
 0xf91   : > { %v5194_v37 = vpop.eup %5193 }
 0xf92   : > { %v3650_v2 = vmul.f32 %v5194_v37, %v6930_v5  ;;  %v3671_v57 = vmul.f32 %v6954_v11, %v3649_v58  ;;  %v3692_v26 = vadd.f32 %v6962_v7, %v3670_v27 }
 0xf93   : > { %v5196_v9 = vpop.eup %5195 }
 0xf94   : > { %v3651_v17 = vmul.f32 %v5196_v9, %v6936_v21  ;;  %v3693_v14 = vadd.f32 %v6962_v7, %v3671_v57  ;;  %v3672_v38 = vmul.f32 %v6954_v11, %v3650_v2  ;;  %v4875_v21 = vld [vmem:[%s7111_s16 + $0x10] sm:$0xff]  }
 0xf95   : > { %4796 = vmatprep.subr.bf16.mxu1 %v4875_v21 }
 0xf96   : > { %v3702_v28 = vpack.c.bf16 %v3693_v14, %v3692_v26  ;;  %v3673_v60 = vmul.f32 %v6954_v11, %v3651_v17  ;;  %v3694_v45 = vadd.f32 %v6962_v7, %v3672_v38  ;;  %4797 = vmatpush3.bf16.msra.mxu1 %v4875_v21  ;;  %v4218_v11 = vld [vmem:[%s7110_s15] ss:$0 sm:$0xff] }
 0xf97   : > { %4798 = vmatprep.subr.bf16.mxu1 %v4876_v32 }
 0xf98   : > { %4788 = vmatprep.mubr.msk.bf16.mxu0 %vm666_vm0, %v3702_v28  ;;  %v3695_v5 = vadd.f32 %v6962_v7, %v3673_v60 }
 0xf9a   : > { %v3703_v39 = vpack.c.bf16 %v3695_v5, %v3694_v45  ;;  %4799 = vmatpush3.bf16.msra.mxu1 %v4876_v32 }
 0xf9c   : > { %4789 = vmatmul.mubr.msk.bf16.gmra.mrb[108].mxu0 %vm666_vm0, %v3703_v39 }
0x1035   : > { %v4778_v7 = vpop.f32.mrb[96].mxu0 }
0x1036   : > { %v3794_v40 = vadd.f32 %v4778_v7, %v4218_v11  ;;  %v3785_v22 = vpop.f32.mrb[97].mxu0 }
0x1037   : > { %v3786_v33 = vadd.f32 %v4218_v11, %v3785_v22  ;;  %v4779_v16 = vpop.f32.mrb[98].mxu0 }
0x1038   : > { %v3797_v48 = vadd.f32 %v4779_v16, %v4218_v11  ;;  %v3788_v15 = vpop.f32.mrb[99].mxu0  ;;  %v3850_v6 = vmax.f32 %v3794_v40, 0.0 }
0x1039   : > { %v3789_v25 = vadd.f32 %v4218_v11, %v3788_v15  ;;  %v3848_v61 = vmax.f32 %v3786_v33, 0.0 }
0x103a   : > { %v3851_v29 = vmax.f32 %v3797_v48, 0.0 }
0x103b   : > { %v3849_v3 = vmax.f32 %v3789_v25, 0.0 }
0x103c   : > { %v3865_v53 = vpack.c.bf16 %v3851_v29, %v3850_v6  ;;  %v4229_v29 = vld [vmem:[%s7112_s17] ss:$0 sm:$0xff] }
0x103d   : > { %v3864_v49 = vpack.c.bf16 %v3849_v3, %v3848_v61 }
0x103e   : > { %v4782_v20 = vpop.f32.mrb[100].mxu0 }
0x103f   : > { %v3810_v41 = vadd.f32 %v4782_v20, %v4218_v11  ;;  %v3801_v34 = vpop.f32.mrb[101].mxu0  ;;  %4800 = vmatprep.mubr.msk.bf16.mxu1 %vm3911_vm6, %v3864_v49 }
0x1040   : > { %v3802_v4 = vadd.f32 %v4218_v11, %v3801_v34  ;;  %v4783_v63 = vpop.f32.mrb[102].mxu0  ;;  %4801 = vmatmul.mubr.msk.bf16.vlgmr.msra.gmra.mrb[96].mxu1 %vm3911_vm6, %v3865_v53 }
0x1041   : > { %v3813_v56 = vadd.f32 %v4783_v63, %v4218_v11  ;;  %v3804_v30 = vpop.f32.mrb[103].mxu0  ;;  %v3854_v31 = vmax.f32 %v3810_v41, 0.0 }
0x1042   : > { %v3805_v42 = vadd.f32 %v4218_v11, %v3804_v30  ;;  %v3852_v35 = vmax.f32 %v3802_v4, 0.0 }
0x1043   : > { %v3855_v54 = vmax.f32 %v3813_v56, 0.0 }
0x1044   : > { %v3853_v8 = vmax.f32 %v3805_v42, 0.0 }
0x1045   : > { %v3867_v19 = vpack.c.bf16 %v3855_v54, %v3854_v31 }
0x1046   : > { %v3866_v12 = vpack.c.bf16 %v3853_v8, %v3852_v35  ;;  %v4786_v44 = vpop.f32.mrb[104].mxu0 }
0x1047   : > { %v3826_v13 = vadd.f32 %v4786_v44, %v4218_v11  ;;  %v3817_v58 = vpop.f32.mrb[105].mxu0 }
0x1048   : > { %v3818_v27 = vadd.f32 %v4218_v11, %v3817_v58  ;;  %v4787_v37 = vpop.f32.mrb[106].mxu0  ;;  %4804 = vmatprep.mubr.msk.bf16.mxu1 %vm3911_vm6, %v3866_v12 }
0x1049   : > { %v3829_v2 = vadd.f32 %v4787_v37, %v4218_v11  ;;  %v3820_v57 = vpop.f32.mrb[107].mxu0  ;;  %4805 = vmatmul.mubr.msk.bf16.gmra.mrb[100].mxu1 %vm3911_vm6, %v3867_v19  ;;  %v3858_v17 = vmax.f32 %v3826_v13, 0.0 }
0x104a   : > { %v3821_v9 = vadd.f32 %v4218_v11, %v3820_v57  ;;  %v3856_v14 = vmax.f32 %v3818_v27, 0.0 }
0x104b   : > { %v3859_v26 = vmax.f32 %v3829_v2, 0.0 }
0x104c   : > { %v3857_v38 = vmax.f32 %v3821_v9, 0.0 }
0x104d   : > { %v3869_v28 = vpack.c.bf16 %v3859_v26, %v3858_v17 }
0x104e   : > { %v3868_v60 = vpack.c.bf16 %v3857_v38, %v3856_v14 }
0x1050   : > { %4808 = vmatprep.mubr.msk.bf16.mxu1 %vm3911_vm6, %v3868_v60 }
0x1051   : > { %4809 = vmatmul.mubr.msk.bf16.gmra.mrb[104].mxu1 %vm3911_vm6, %v3869_v28 }
0x106f   : > { %v4790_v45 = vpop.f32.mrb[108].mxu0 }
0x1070   : > { %v3842_v5 = vadd.f32 %v4790_v45, %v4218_v11  ;;  %v3833_v39 = vpop.f32.mrb[109].mxu0 }
0x1071   : > { %v3834_v21 = vadd.f32 %v4218_v11, %v3833_v39  ;;  %v4791_v32 = vpop.f32.mrb[110].mxu0 }
0x1072   : > { %v3845_v7 = vadd.f32 %v4791_v32, %v4218_v11  ;;  %v3836_v40 = vpop.f32.mrb[111].mxu0  ;;  %v3862_v33 = vmax.f32 %v3842_v5, 0.0 }
0x1073   : > { %v3837_v22 = vadd.f32 %v4218_v11, %v3836_v40  ;;  %v3860_v48 = vmax.f32 %v3834_v21, 0.0 }
0x1074   : > { %v3863_v16 = vmax.f32 %v3845_v7, 0.0 }
0x1075   : > { %v3861_v15 = vmax.f32 %v3837_v22, 0.0 }
0x1076   : > { %v3871_v25 = vpack.c.bf16 %v3863_v16, %v3862_v33 }
0x1077   : > { %v3870_v6 = vpack.c.bf16 %v3861_v15, %v3860_v48 }
0x1079   : > { %4812 = vmatprep.mubr.msk.bf16.mxu1 %vm3911_vm6, %v3870_v6 }
0x107a   : > { %4813 = vmatmul.mubr.msk.bf16.gmra.mrb[108].mxu1 %vm3911_vm6, %v3871_v25 }
0x1113   : > { %v4802_v61 = vpop.f32.mrb[96].mxu1 }
0x1114   : > { %v3979_v3 = vadd.f32 %v4802_v61, %v4229_v29  ;;  %v3970_v53 = vpop.f32.mrb[97].mxu1 }
0x1115   : > { %v3971_v11 = vadd.f32 %v4229_v29, %v3970_v53  ;;  %v4803_v49 = vpop.f32.mrb[98].mxu1 }
0x1116   : > { %v4035_v20 = vadd.f32 %v3979_v3, %v6754_v46  ;;  %v3982_v41 = vadd.f32 %v4803_v49, %v4229_v29  ;;  %v3973_v34 = vpop.f32.mrb[99].mxu1 }
0x1117   : > { %v4033_v4 = vadd.f32 %v3971_v11, %v6750_v50  ;;  %v3974_v63 = vadd.f32 %v4229_v29, %v3973_v34 }
0x1118   : > { %4051 = vst.msk [vmem:[%s7042_s25 + $0x10] sm:$0xff] %vm666_vm0, %v4035_v20  ;;  %v4036_v56 = vadd.f32 %v3982_v41, %v6765_v10 }
0x1119   : > { %4049 = vst.msk [vmem:[%s7042_s25] sm:$0xff] %vm666_vm0, %v4033_v4  ;;  %v4034_v30 = vadd.f32 %v3974_v63, %v6758_v36 }
0x111a   : > { %4052 = vst.msk [vmem:[%s7042_s25 + $0x18] sm:$0xff] %vm666_vm0, %v4036_v56 }
0x111b   : > { %4050 = vst.msk [vmem:[%s7042_s25 + $0x8] sm:$0xff] %vm666_vm0, %v4034_v30 }
0x111c   : > { %v4806_v46 = vpop.f32.mrb[100].mxu1 }
0x111d   : > { %v3995_v42 = vadd.f32 %v4806_v46, %v4229_v29  ;;  %v3986_v50 = vpop.f32.mrb[101].mxu1 }
0x111e   : > { %v3987_v31 = vadd.f32 %v4229_v29, %v3986_v50  ;;  %v4807_v54 = vpop.f32.mrb[102].mxu1 }
0x111f   : > { %v4039_v35 = vadd.f32 %v3995_v42, %v6787_v52  ;;  %v3998_v8 = vadd.f32 %v4807_v54, %v4229_v29  ;;  %v3989_v10 = vpop.f32.mrb[103].mxu1 }
0x1120   : > { %v4037_v19 = vadd.f32 %v3987_v31, %v6774_v59  ;;  %v3990_v12 = vadd.f32 %v4229_v29, %v3989_v10 }
0x1121   : > { %4055 = vst.msk [vmem:[%s7042_s25 + $0x30] sm:$0xff] %vm666_vm0, %v4039_v35  ;;  %v4040_v36 = vadd.f32 %v3998_v8, %v6782_v1 }
0x1122   : > { %4053 = vst.msk [vmem:[%s7042_s25 + $0x20] sm:$0xff] %vm666_vm0, %v4037_v19  ;;  %v4038_v44 = vadd.f32 %v3990_v12, %v6777_v23 }
0x1123   : > { %4056 = vst.msk [vmem:[%s7042_s25 + $0x38] sm:$0xff] %vm666_vm0, %v4040_v36 }
0x1124   : > { %4054 = vst.msk [vmem:[%s7042_s25 + $0x28] sm:$0xff] %vm666_vm0, %v4038_v44  ;;  %v4810_v52 = vpop.f32.mrb[104].mxu1 }
0x1125   : > { %v4011_v13 = vadd.f32 %v4810_v52, %v4229_v29  ;;  %v4002_v59 = vpop.f32.mrb[105].mxu1 }
0x1126   : > { %v4003_v58 = vadd.f32 %v4229_v29, %v4002_v59  ;;  %v4811_v27 = vpop.f32.mrb[106].mxu1 }
0x1127   : > { %v4043_v37 = vadd.f32 %v4011_v13, %v6811_v18  ;;  %v4014_v2 = vadd.f32 %v4811_v27, %v4229_v29  ;;  %v4005_v1 = vpop.f32.mrb[107].mxu1 }
0x1128   : > { %v4041_v57 = vadd.f32 %v4003_v58, %v6798_v51  ;;  %v4006_v9 = vadd.f32 %v4229_v29, %v4005_v1 }
0x1129   : > { %4059 = vst.msk [vmem:[%s7042_s25 + $0x50] sm:$0xff] %vm666_vm0, %v4043_v37  ;;  %v4044_v23 = vadd.f32 %v4014_v2, %v6806_v55 }
0x112a   : > { %4057 = vst.msk [vmem:[%s7042_s25 + $0x40] sm:$0xff] %vm666_vm0, %v4041_v57  ;;  %v4042_v17 = vadd.f32 %v4006_v9, %v6801_v24 }
0x112b   : > { %4060 = vst.msk [vmem:[%s7042_s25 + $0x58] sm:$0xff] %vm666_vm0, %v4044_v23 }
0x112c   : > { %4058 = vst.msk [vmem:[%s7042_s25 + $0x48] sm:$0xff] %vm666_vm0, %v4042_v17 }
0x114d   : > { %v4814_v18 = vpop.f32.mrb[108].mxu1 }
0x114e   : > { %v4027_v26 = vadd.f32 %v4814_v18, %v4229_v29  ;;  %v4018_v51 = vpop.f32.mrb[109].mxu1 }
0x114f   : > { %v4019_v14 = vadd.f32 %v4229_v29, %v4018_v51  ;;  %v4815_v38 = vpop.f32.mrb[110].mxu1 }
0x1150   : > { %v4047_v28 = vadd.f32 %v4027_v26, %v6827_v62  ;;  %v4030_v60 = vadd.f32 %v4815_v38, %v4229_v29  ;;  %v4021_v55 = vpop.f32.mrb[111].mxu1 }
0x1151   : > { %v4045_v45 = vadd.f32 %v4019_v14, %v6823_v0  ;;  %v4022_v5 = vadd.f32 %v4229_v29, %v4021_v55 }
0x1152   : > { %4063 = vst.msk [vmem:[%s7042_s25 + $0x70] sm:$0xff] %vm666_vm0, %v4047_v28  ;;  %v4048_v24 = vadd.f32 %v4030_v60, %v6835_v47 }
0x1153   : > { %4061 = vst.msk [vmem:[%s7042_s25 + $0x60] sm:$0xff] %vm666_vm0, %v4045_v45  ;;  %v4046_v39 = vadd.f32 %v4022_v5, %v6830_v43 }
0x1154   : > { %4064 = vst.msk [vmem:[%s7042_s25 + $0x78] sm:$0xff] %vm666_vm0, %v4048_v24 }
0x1155   : > { %4062 = vst.msk [vmem:[%s7042_s25 + $0x68] sm:$0xff] %vm666_vm0, %v4046_v39 }
0x1156 PF: > { %s30_s1 = sadd.s32 1, %s5219_s1  }
0x1157   : > { %p27_p4 = scmp.ge.s32.totalorder %s30_s1, 4  }
0x1159   :  { %29 = sbr.rel (!%p27_p4) target bundleno = 6 (0x6), region = 133 }

// kernel: transformer_attn_forward.4
= control target key start
LH: loop header
LB: loop body
LE: loop exit
PB: predicated region body
PF: predicated region fallthrough
CT: control target
= control target key end

     0   :  { %s7619_s0 = inlined_call_operand.vmem [shape: f32[2,128,32], index: 0, kind: input, shape index: {}]   ;;  %s7620_s1 = inlined_call_operand.vmem [shape: f32[2,1,128], index: 1, kind: input, shape index: {}]   ;;  %s7621_s2 = inlined_call_operand.vmem [shape: f32[1,32], index: 2, kind: input, shape index: {}]   ;;  %s7622_s3 = inlined_call_operand.vmem [shape: f32[1,32], index: 3, kind: input, shape index: {}]   ;;  %s7623_s4 = inlined_call_operand.vmem [shape: bf16[32,32], index: 4, kind: input, shape index: {}]   ;;  %s7624_s5 = inlined_call_operand.vmem [shape: f32[1,32], index: 5, kind: input, shape index: {}]   ;;  %s7625_s6 = inlined_call_operand.vmem [shape: bf16[32,32], index: 6, kind: input, shape index: {}]   ;;  %s7626_s7 = inlined_call_operand.vmem [shape: f32[1,32], index: 7, kind: input, shape index: {}]   ;;  %s7627_s8 = inlined_call_operand.vmem [shape: bf16[32,32], index: 8, kind: input, shape index: {}]   ;;  %s7628_s9 = inlined_call_operand.vmem [shape: f32[1,32], index: 9, kind: input, shape index: {}]   ;;  %s7629_s10 = inlined_call_operand.vmem [shape: bf16[32,32], index: 10, kind: input, shape index: {}]   ;;  %s7630_s11 = inlined_call_operand.vmem [shape: f32[1,32], index: 11, kind: input, shape index: {}]   ;;  %s7631_s12 = inlined_call_operand.vmem [shape: f32[1,32], index: 12, kind: input, shape index: {}]   ;;  %s7632_s13 = inlined_call_operand.vmem [shape: f32[1,32], index: 13, kind: input, shape index: {}]   ;;  %s7633_s14 = inlined_call_operand.vmem [shape: bf16[32,64], index: 14, kind: input, shape index: {}]   ;;  %s7634_s15 = inlined_call_operand.vmem [shape: f32[1,64], index: 15, kind: input, shape index: {}]   ;;  %s7635_s16 = inlined_call_operand.vmem [shape: bf16[64,32], index: 16, kind: input, shape index: {}]   ;;  %s7636_s17 = inlined_call_operand.vmem [shape: f32[1,32], index: 17, kind: input, shape index: {}]   ;;  %s7637_s18 = inlined_call_operand.vmem [shape: f32[1,32], index: 18, kind: input, shape index: {}]   ;;  %s7638_s19 = inlined_call_operand.vmem [shape: f32[1,32], index: 19, kind: input, shape index: {}]   ;;  %s7639_s20 = inlined_call_operand.vmem [shape: f32[2,128,32], index: 20, kind: output, shape index: {}]  }
   0x1   :  { %7648 = sst [smem:[#allocation10_spill]] %s7619_s0 }
   0x2   :  { %7649 = sst [smem:[#allocation11_spill]] %s7620_s1  ;;  %s5621_s1 = smov 0  }
   0x3   :  { %7650 = sst [smem:[#allocation12_spill]] %s7621_s2 }
   0x4   :  { %7651 = sst [smem:[#allocation13_spill]] %s7622_s3 }
   0x5   :  { %7652 = sst [smem:[#allocation14_spill]] %s7623_s4 }
   0x6 LB: > { %s4383_s22 = sadd.s32 4294967295, %s5507_s1   ;;  %p4387_p0 = scmp.ge.s32.totalorder %s5507_s1, 1  ;;  %s5507_s1 = sphi %s5621_s1, %s30_s1  }
   0x7   : > { %p570_p1 = scmp.lt.s32.totalorder %s5507_s1, 3 }
   0x9   : > { %p571_p2 = pnand %p4387_p0, %p570_p1 }
   0xb   : > { %574 = sbr.rel (%p571_p2) target bundleno = 4755 (0x1293), region = 100 }
  0x12   : > { %p631_p3 = scmp.lt.s32.totalorder %s4383_s22, 1  ;;  %vm666_vm0 = vcmask 261120   ;;  %s7653_s25 = sld [smem:[#allocation10_spill]]  ;;  %vm1342_vm1 = vcmask 64512   ;;  %vm2267_vm3 = vcmask 130112   ;;  %vm2766_vm4 = vcmask 195712  }
  0x13   : > { %s7654_s28 = sld [smem:[#allocation14_spill]]  ;;  %s7655_s4 = sld [smem:[#allocation12_spill]]  ;;  %vm3265_vm5 = vcmask 261312   ;;  %vm3911_vm6 = vcmask 523264  }
  0x14   : > { %s7685_s22 = smov (!%p631_p3, %s4383_s22), 1  ;;  %s7656_s0 = sld [smem:[#allocation13_spill]] }
  0x15   : > { %s4500_s23 = sshll.u32 %s7685_s22, 7  ;;  %s7657_s24 = sld [smem:[#allocation11_spill]] }
  0x16   : > { %s5512_s26 = smov 104   ;;  %s5513_s27 = smov 8  }
  0x17   : > { %s7537_s29 = scalar_lea.vmem %s7639_s20, %s4500_s23 }
  0x18   : > { %s5637_s3 = scalar_lea.vmem %s7653_s25, %s4500_s23  ;;  %s5511_s25 = smov 112  }
  0x19   : > { %v645_v0 = vld [vmem:[%s5637_s3] sm:$0xff]  ;;  %v647_v1 = vld [vmem:[%s5637_s3 + $0x10] sm:$0xff]  ;;  %v646_v2 = vld [vmem:[%s5637_s3 + $0x8] sm:$0xff] }
  0x1a   : > { %v667_v3 = vsel %vm666_vm0, %v645_v0, 0.0  ;;  %v673_v4 = vsel %vm666_vm0, %v647_v1, 0.0  ;;  %v648_v5 = vld [vmem:[%s5637_s3 + $0x18] sm:$0xff]  ;;  %v670_v6 = vsel %vm666_vm0, %v646_v2, 0.0  ;;  %v649_v8 = vld [vmem:[%s5637_s3 + $0x20] sm:$0xff]  ;;  %v650_v9 = vld [vmem:[%s5637_s3 + $0x28] sm:$0xff] }
  0x1b   : > { %668 = vadd.xlane.f32.xlu0 %v667_v3  ;;  %674 = vadd.xlane.f32.xlu1 %v673_v4  ;;  %v676_v7 = vsel %vm666_vm0, %v648_v5, 0.0  ;;  %v679_v10 = vsel %vm666_vm0, %v649_v8, 0.0  ;;  %v682_v11 = vsel %vm666_vm0, %v650_v9, 0.0  ;;  %v5652_v12 = vld [vmem:[%s5637_s3 + $0x30] sm:$0xff]  ;;  %v5655_v13 = vld [vmem:[%s5637_s3 + $0x38] sm:$0xff]  ;;  %v5662_v16 = vld [vmem:[%s5637_s3 + $0x40] sm:$0xff]  ;;  %s638_s2 = scalar_lea.vmem %s7657_s24, %s7685_s22 }
  0x1c   : > { %v685_v14 = vsel %vm666_vm0, %v5652_v12, 0.0  ;;  %v688_v15 = vsel %vm666_vm0, %v5655_v13, 0.0  ;;  %v5665_v17 = vld [vmem:[%s5637_s3 + $0x48] sm:$0xff]  ;;  %v691_v18 = vsel %vm666_vm0, %v5662_v16, 0.0  ;;  %v5672_v20 = vld [vmem:[%s5637_s3 + $0x50] sm:$0xff]  ;;  %v5675_v21 = vld [vmem:[%s5637_s3 + $0x58] sm:$0xff] }
  0x1d   : > { %v694_v19 = vsel %vm666_vm0, %v5665_v17, 0.0  ;;  %v697_v22 = vsel %vm666_vm0, %v5672_v20, 0.0  ;;  %v700_v23 = vsel %vm666_vm0, %v5675_v21, 0.0  ;;  %v5682_v24 = vld [vmem:[%s5637_s3 + $0x60] sm:$0xff]  ;;  %v5685_v25 = vld [vmem:[%s5637_s3 + $0x68] sm:$0xff]  ;;  %v5692_v28 = vld [vmem:[%s5637_s3 + $0x70] sm:$0xff] }
  0x1e   : > { %v703_v26 = vsel %vm666_vm0, %v5682_v24, 0.0  ;;  %v706_v27 = vsel %vm666_vm0, %v5685_v25, 0.0  ;;  %v5695_v29 = vld [vmem:[%s5637_s3 + $0x78] sm:$0xff]  ;;  %v709_v30 = vsel %vm666_vm0, %v5692_v28, 0.0  ;;  %s5515_s24 = smov 24  }
  0x1f   : > { %671 = vadd.xlane.f32.xlu0 %v670_v6  ;;  %677 = vadd.xlane.f32.xlu1 %v676_v7  ;;  %v712_v31 = vsel %vm666_vm0, %v5695_v29, 0.0 }
  0x23   : > { %680 = vadd.xlane.f32.xlu0 %v679_v10  ;;  %683 = vadd.xlane.f32.xlu1 %v682_v11 }
  0x27   : > { %686 = vadd.xlane.f32.xlu0 %v685_v14  ;;  %689 = vadd.xlane.f32.xlu1 %v688_v15 }
  0x2b   : > { %692 = vadd.xlane.f32.xlu0 %v691_v18  ;;  %695 = vadd.xlane.f32.xlu1 %v694_v19 }
  0x2f   : > { %698 = vadd.xlane.f32.xlu0 %v697_v22  ;;  %701 = vadd.xlane.f32.xlu1 %v700_v23 }
  0x33   : > { %704 = vadd.xlane.f32.xlu0 %v703_v26  ;;  %707 = vadd.xlane.f32.xlu1 %v706_v27 }
  0x37   : > { %710 = vadd.xlane.f32.xlu0 %v709_v30  ;;  %713 = vadd.xlane.f32.xlu1 %v712_v31 }
  0xa8   : > { %v669_v32 = vpop.xlane.xlu0 %668  ;;  %v675_v33 = vpop.xlane.xlu1 %674 }
  0xa9   : > { %v716_v34 = vmul.f32 0.03125, %v669_v32  ;;  %v718_v35 = vmul.f32 0.03125, %v675_v33 }
  0xab   : > { %v5701_v36 = vsub.f32 %v645_v0, %v716_v34  ;;  %v5703_v37 = vsub.f32 %v647_v1, %v718_v35 }
  0xac   : > { %v672_v38 = vpop.xlane.xlu0 %671  ;;  %v678_v39 = vpop.xlane.xlu1 %677 }
  0xad   : > { %v717_v40 = vmul.f32 0.03125, %v672_v38  ;;  %v719_v41 = vmul.f32 0.03125, %v678_v39  ;;  %v748_v42 = vmul.f32 %v5701_v36, %v5701_v36  ;;  %v750_v43 = vmul.f32 %v5703_v37, %v5703_v37 }
  0xaf   : > { %v5709_v44 = vsub.f32 %v646_v2, %v717_v40  ;;  %v5711_v45 = vsub.f32 %v648_v5, %v719_v41  ;;  %v764_v46 = vsel %vm666_vm0, %v748_v42, 0.0  ;;  %v770_v49 = vsel %vm666_vm0, %v750_v43, 0.0 }
  0xb0   : > { %765 = vadd.xlane.f32.xlu0 %v764_v46  ;;  %v681_v47 = vpop.xlane.xlu0 %680  ;;  %v684_v48 = vpop.xlane.xlu1 %683 }
  0xb1   : > { %v720_v50 = vmul.f32 0.03125, %v681_v47  ;;  %v721_v51 = vmul.f32 0.03125, %v684_v48  ;;  %v749_v52 = vmul.f32 %v5709_v44, %v5709_v44  ;;  %v751_v53 = vmul.f32 %v5711_v45, %v5711_v45 }
  0xb3   : > { %v5719_v54 = vsub.f32 %v649_v8, %v720_v50  ;;  %v5721_v55 = vsub.f32 %v650_v9, %v721_v51  ;;  %v767_v56 = vsel %vm666_vm0, %v749_v52, 0.0  ;;  %v773_v59 = vsel %vm666_vm0, %v751_v53, 0.0  ;;  %v5120_v53 = vld [vmem:[%s7625_s6] sm:$0xff]  }
  0xb4   : > { %771 = vadd.xlane.f32.xlu0 %v770_v49  ;;  %768 = vadd.xlane.f32.xlu1 %v767_v56  ;;  %v687_v57 = vpop.xlane.xlu0 %686  ;;  %v690_v58 = vpop.xlane.xlu1 %689  ;;  %v5121_v56 = vld [vmem:[%s7654_s28 + $0x8] sm:$0xff]  }
  0xb5   : > { %v722_v60 = vmul.f32 0.03125, %v687_v57  ;;  %v723_v61 = vmul.f32 0.03125, %v690_v58  ;;  %v752_v62 = vmul.f32 %v5719_v54, %v5719_v54  ;;  %v753_v63 = vmul.f32 %v5721_v55, %v5721_v55  ;;  %4712 = vmatprep.subr.bf16.mxu1 %v5120_v53  ;;  %v5122_v57 = vld [vmem:[%s7625_s6 + $0x8] sm:$0xff]   ;;  %v5806_v58 = vld [vmem:[%s7627_s8] sm:$0xff]  }
  0xb6   : > { %4713 = vmatpush3.bf16.msra.mxu1 %v5120_v53 }
  0xb7   : > { %v5730_v0 = vsub.f32 %v5652_v12, %v722_v60  ;;  %v5733_v1 = vsub.f32 %v5655_v13, %v723_v61  ;;  %v776_v2 = vsel %vm666_vm0, %v752_v62, 0.0  ;;  %v779_v5 = vsel %vm666_vm0, %v753_v63, 0.0  ;;  %4714 = vmatprep.subr.bf16.mxu1 %v5122_v57 }
  0xb8   : > { %774 = vadd.xlane.f32.xlu1 %v773_v59  ;;  %777 = vadd.xlane.f32.xlu0 %v776_v2  ;;  %v693_v3 = vpop.xlane.xlu0 %692  ;;  %v696_v4 = vpop.xlane.xlu1 %695 }
  0xb9   : > { %v724_v6 = vmul.f32 0.03125, %v693_v3  ;;  %v725_v7 = vmul.f32 0.03125, %v696_v4  ;;  %v754_v8 = vmul.f32 %v5730_v0, %v5730_v0  ;;  %v755_v9 = vmul.f32 %v5733_v1, %v5733_v1 }
  0xba   : > { %4715 = vmatpush3.bf16.msra.mxu1 %v5122_v57 }
  0xbb   : > { %v5742_v10 = vsub.f32 %v5662_v16, %v724_v6  ;;  %v5745_v11 = vsub.f32 %v5665_v17, %v725_v7  ;;  %v782_v12 = vsel %vm666_vm0, %v754_v8, 0.0  ;;  %v785_v15 = vsel %vm666_vm0, %v755_v9, 0.0 }
  0xbc   : > { %780 = vadd.xlane.f32.xlu1 %v779_v5  ;;  %783 = vadd.xlane.f32.xlu0 %v782_v12  ;;  %v699_v13 = vpop.xlane.xlu0 %698  ;;  %v702_v14 = vpop.xlane.xlu1 %701 }
  0xbd   : > { %v726_v18 = vmul.f32 0.03125, %v699_v13  ;;  %v727_v19 = vmul.f32 0.03125, %v702_v14  ;;  %v756_v22 = vmul.f32 %v5742_v10, %v5742_v10  ;;  %v757_v16 = vmul.f32 %v5745_v11, %v5745_v11 }
  0xbf   : > { %v5754_v23 = vsub.f32 %v5672_v20, %v726_v18  ;;  %v5757_v17 = vsub.f32 %v5675_v21, %v727_v19  ;;  %v788_v26 = vsel %vm666_vm0, %v756_v22, 0.0  ;;  %v791_v31 = vsel %vm666_vm0, %v757_v16, 0.0 }
  0xc0   : > { %786 = vadd.xlane.f32.xlu1 %v785_v15  ;;  %789 = vadd.xlane.f32.xlu0 %v788_v26  ;;  %v705_v27 = vpop.xlane.xlu0 %704  ;;  %v708_v30 = vpop.xlane.xlu1 %707 }
  0xc1   : > { %v728_v32 = vmul.f32 0.03125, %v705_v27  ;;  %v729_v33 = vmul.f32 0.03125, %v708_v30  ;;  %v758_v34 = vmul.f32 %v5754_v23, %v5754_v23  ;;  %v759_v20 = vmul.f32 %v5757_v17, %v5757_v17 }
  0xc3   : > { %v5766_v35 = vsub.f32 %v5682_v24, %v728_v32  ;;  %v5769_v21 = vsub.f32 %v5685_v25, %v729_v33  ;;  %v794_v38 = vsel %vm666_vm0, %v758_v34, 0.0  ;;  %v797_v41 = vsel %vm666_vm0, %v759_v20, 0.0  ;;  %v5813_v34 = vld [vmem:[%s7655_s4] ss:$0 sm:$0xff]  ;;  %s5509_s4 = smov 120  }
  0xc4   : > { %792 = vadd.xlane.f32.xlu1 %v791_v31  ;;  %795 = vadd.xlane.f32.xlu0 %v794_v38  ;;  %v711_v39 = vpop.xlane.xlu0 %710  ;;  %v714_v40 = vpop.xlane.xlu1 %713 }
  0xc5   : > { %v730_v42 = vmul.f32 0.03125, %v711_v39  ;;  %v731_v43 = vmul.f32 0.03125, %v714_v40  ;;  %v760_v46 = vmul.f32 %v5766_v35, %v5766_v35  ;;  %v761_v24 = vmul.f32 %v5769_v21, %v5769_v21 }
  0xc7   : > { %v5778_v47 = vsub.f32 %v5692_v28, %v730_v42  ;;  %v5781_v25 = vsub.f32 %v5695_v29, %v731_v43  ;;  %v800_v48 = vsel %vm666_vm0, %v760_v46, 0.0  ;;  %v803_v49 = vsel %vm666_vm0, %v761_v24, 0.0  ;;  %v5119_v29 = vld [vmem:[%s7654_s28] sm:$0xff]  }
  0xc8   : > { %798 = vadd.xlane.f32.xlu1 %v797_v41  ;;  %801 = vadd.xlane.f32.xlu0 %v800_v48  ;;  %v5820_v48 = vld [vmem:[%s7656_s0] ss:$0 sm:$0xff] }
  0xc9   : > { %v762_v50 = vmul.f32 %v5778_v47, %v5778_v47  ;;  %v763_v51 = vmul.f32 %v5781_v25, %v5781_v25  ;;  %4692 = vmatprep.subr.bf16.mxu0 %v5119_v29 }
  0xca   : > { %4693 = vmatpush3.bf16.msra.mxu0 %v5119_v29 }
  0xcb   : > { %v806_v52 = vsel %vm666_vm0, %v762_v50, 0.0  ;;  %v809_v28 = vsel %vm666_vm0, %v763_v51, 0.0  ;;  %4694 = vmatprep.subr.bf16.mxu0 %v5121_v56 }
  0xcc   : > { %804 = vadd.xlane.f32.xlu1 %v803_v49  ;;  %807 = vadd.xlane.f32.xlu0 %v806_v52 }
  0xce   : > { %4695 = vmatpush3.bf16.msra.mxu0 %v5121_v56 }
  0xcf   : > { %4732 = vmatprep.subr.bf16.mxu0 %v5806_v58 }
  0xd0   : > { %810 = vadd.xlane.f32.xlu1 %v809_v28 }
 0x13d   : > { %v766_v59 = vpop.xlane.xlu0 %765 }
 0x13e   : > { %v812_v60 = vmul.f32 0.03125, %v766_v59 }
 0x140   : > { %v828_v61 = vadd.f32 1e-06, %v812_v60 }
 0x141   : > { %v769_v62 = vpop.xlane.xlu1 %768  ;;  %v772_v63 = vpop.xlane.xlu0 %771 }
 0x142   : > { %5133 = vrsqrt.f32 %v828_v61  ;;  %v813_v2 = vmul.f32 0.03125, %v769_v62  ;;  %v814_v3 = vmul.f32 0.03125, %v772_v63 }
 0x144   : > { %v829_v4 = vadd.f32 1e-06, %v813_v2  ;;  %v830_v5 = vadd.f32 1e-06, %v814_v3 }
 0x145   : > { %v775_v6 = vpop.xlane.xlu1 %774  ;;  %v778_v7 = vpop.xlane.xlu0 %777 }
 0x146   : > { %5135 = vrsqrt.f32 %v829_v4  ;;  %v815_v8 = vmul.f32 0.03125, %v775_v6  ;;  %v816_v9 = vmul.f32 0.03125, %v778_v7 }
 0x147   : > { %5137 = vrsqrt.f32 %v830_v5 }
 0x148   : > { %v831_v12 = vadd.f32 1e-06, %v815_v8  ;;  %v832_v13 = vadd.f32 1e-06, %v816_v9 }
 0x149   : > { %v781_v14 = vpop.xlane.xlu1 %780  ;;  %v784_v15 = vpop.xlane.xlu0 %783 }
 0x14a   : > { %5139 = vrsqrt.f32 %v831_v12  ;;  %v817_v18 = vmul.f32 0.03125, %v781_v14  ;;  %v818_v19 = vmul.f32 0.03125, %v784_v15 }
 0x14b   : > { %5141 = vrsqrt.f32 %v832_v13 }
 0x14c   : > { %v5134_v22 = vpop.eup %5133  ;;  %v833_v16 = vadd.f32 1e-06, %v817_v18  ;;  %v834_v26 = vadd.f32 1e-06, %v818_v19 }
 0x14d   : > { %v787_v27 = vpop.xlane.xlu1 %786  ;;  %v790_v30 = vpop.xlane.xlu0 %789  ;;  %v860_v31 = vmul.f32 %v5134_v22, %v5701_v36  ;;  %v5124_v22 = vld [vmem:[%s7627_s8 + $0x8] sm:$0xff]  }
 0x14e   : > { %5143 = vrsqrt.f32 %v833_v16  ;;  %v819_v32 = vmul.f32 0.03125, %v787_v27  ;;  %v820_v33 = vmul.f32 0.03125, %v790_v30 }
 0x14f   : > { %5145 = vrsqrt.f32 %v834_v26  ;;  %v882_v46 = vmul.f32 %v5813_v34, %v860_v31 }
 0x150   : > { %v5136_v20 = vpop.eup %5135  ;;  %v835_v38 = vadd.f32 1e-06, %v819_v32  ;;  %v836_v39 = vadd.f32 1e-06, %v820_v33 }
 0x151   : > { %v5138_v40 = vpop.eup %5137  ;;  %v793_v41 = vpop.xlane.xlu1 %792  ;;  %v861_v43 = vmul.f32 %v5136_v20, %v5709_v44  ;;  %v904_v57 = vadd.f32 %v5820_v48, %v882_v46 }
 0x152   : > { %v796_v42 = vpop.xlane.xlu0 %795  ;;  %5147 = vrsqrt.f32 %v835_v38  ;;  %v821_v36 = vmul.f32 0.03125, %v793_v41  ;;  %v862_v49 = vmul.f32 %v5138_v40, %v5703_v37 }
 0x153   : > { %v822_v24 = vmul.f32 0.03125, %v796_v42  ;;  %5149 = vrsqrt.f32 %v836_v39  ;;  %v883_v50 = vmul.f32 %v5813_v34, %v861_v43 }
 0x154   : > { %v5140_v51 = vpop.eup %5139  ;;  %v837_v52 = vadd.f32 1e-06, %v821_v36  ;;  %v884_v44 = vmul.f32 %v5813_v34, %v862_v49 }
 0x155   : > { %v838_v28 = vadd.f32 1e-06, %v822_v24  ;;  %v5142_v29 = vpop.eup %5141  ;;  %v799_v53 = vpop.xlane.xlu1 %798  ;;  %v905_v59 = vadd.f32 %v5820_v48, %v883_v50  ;;  %v863_v60 = vmul.f32 %v5140_v51, %v5711_v45 }
 0x156   : > { %v802_v56 = vpop.xlane.xlu0 %801  ;;  %5151 = vrsqrt.f32 %v837_v52  ;;  %v823_v61 = vmul.f32 0.03125, %v799_v53  ;;  %v864_v2 = vmul.f32 %v5142_v29, %v5719_v54  ;;  %v906_v6 = vadd.f32 %v5820_v48, %v884_v44 }
 0x157   : > { %v824_v37 = vmul.f32 0.03125, %v802_v56  ;;  %5153 = vrsqrt.f32 %v838_v28  ;;  %v5828_v62 = vpack.c.bf16 %v905_v59, %v904_v57  ;;  %v885_v63 = vmul.f32 %v5813_v34, %v863_v60 }
 0x158   : > { %v5144_v3 = vpop.eup %5143  ;;  %v839_v4 = vadd.f32 1e-06, %v823_v61  ;;  %v886_v54 = vmul.f32 %v5813_v34, %v864_v2 }
 0x159   : > { %v840_v5 = vadd.f32 1e-06, %v824_v37  ;;  %v5146_v7 = vpop.eup %5145  ;;  %v805_v8 = vpop.xlane.xlu1 %804  ;;  %4696 = vmatprep.mubr.msk.bf16.mxu0 %vm666_vm0, %v5828_v62  ;;  %4716 = vmatprep.mubr.msk.bf16.mxu1 %vm666_vm0, %v5828_v62  ;;  %v907_v9 = vadd.f32 %v5820_v48, %v885_v63  ;;  %v865_v12 = vmul.f32 %v5144_v3, %v5721_v55 }
 0x15a   : > { %v808_v45 = vpop.xlane.xlu0 %807  ;;  %5155 = vrsqrt.f32 %v839_v4  ;;  %v825_v13 = vmul.f32 0.03125, %v805_v8  ;;  %v866_v15 = vmul.f32 %v5146_v7, %v5730_v0  ;;  %v908_v55 = vadd.f32 %v5820_v48, %v886_v54 }
 0x15b   : > { %v826_v14 = vmul.f32 0.03125, %v808_v45  ;;  %5157 = vrsqrt.f32 %v840_v5  ;;  %v5841_v18 = vpack.c.bf16 %v907_v9, %v906_v6  ;;  %v887_v19 = vmul.f32 %v5813_v34, %v865_v12 }
 0x15c   : > { %v5148_v16 = vpop.eup %5147  ;;  %v841_v26 = vadd.f32 1e-06, %v825_v13  ;;  %v888_v33 = vmul.f32 %v5813_v34, %v866_v15 }
 0x15d   : > { %v842_v27 = vadd.f32 1e-06, %v826_v14  ;;  %v5150_v30 = vpop.eup %5149  ;;  %v811_v31 = vpop.xlane.xlu1 %810  ;;  %4697 = vmatmul.mubr.msk.bf16.vlgmr.msra.gmra.mrb[0].mxu0 %vm666_vm0, %v5841_v18  ;;  %4717 = vmatmul.mubr.msk.bf16.vlgmr.msra.gmra.mrb[0].mxu1 %vm666_vm0, %v5841_v18  ;;  %v909_v0 = vadd.f32 %v5820_v48, %v887_v19  ;;  %v867_v32 = vmul.f32 %v5148_v16, %v5733_v1 }
 0x15e   : > { %5159 = vrsqrt.f32 %v841_v26  ;;  %v827_v20 = vmul.f32 0.03125, %v811_v31  ;;  %v868_v38 = vmul.f32 %v5150_v30, %v5742_v10  ;;  %4733 = vmatpush3.bf16.msra.mxu0 %v5806_v58  ;;  %v910_v1 = vadd.f32 %v5820_v48, %v888_v33 }
 0x15f   : > { %5161 = vrsqrt.f32 %v842_v27  ;;  %v922_v39 = vpack.c.bf16 %v909_v0, %v908_v55  ;;  %v889_v40 = vmul.f32 %v5813_v34, %v867_v32  ;;  %4734 = vmatprep.subr.bf16.mxu0 %v5124_v22 }
 0x160   : > { %v5152_v41 = vpop.eup %5151  ;;  %v843_v42 = vadd.f32 1e-06, %v827_v20  ;;  %v890_v43 = vmul.f32 %v5813_v34, %v868_v38 }
 0x161   : > { %v5154_v46 = vpop.eup %5153  ;;  %4700 = vmatprep.mubr.msk.bf16.mxu0 %vm666_vm0, %v922_v39  ;;  %4720 = vmatprep.mubr.msk.bf16.mxu1 %vm666_vm0, %v922_v39  ;;  %v911_v10 = vadd.f32 %v5820_v48, %v889_v40  ;;  %v869_v58 = vmul.f32 %v5152_v41, %v5745_v11 }
 0x162   : > { %5163 = vrsqrt.f32 %v843_v42  ;;  %v870_v36 = vmul.f32 %v5154_v46, %v5754_v23  ;;  %4735 = vmatpush3.bf16.msra.mxu0 %v5124_v22  ;;  %v912_v51 = vadd.f32 %v5820_v48, %v890_v43 }
 0x163   : > { %v923_v24 = vpack.c.bf16 %v911_v10, %v910_v1  ;;  %v891_v49 = vmul.f32 %v5813_v34, %v869_v58 }
 0x164   : > { %v5156_v50 = vpop.eup %5155  ;;  %v892_v11 = vmul.f32 %v5813_v34, %v870_v36 }
 0x165   : > { %v5158_v52 = vpop.eup %5157  ;;  %4701 = vmatmul.mubr.msk.bf16.gmra.mrb[4].mxu0 %vm666_vm0, %v923_v24  ;;  %4721 = vmatmul.mubr.msk.bf16.gmra.mrb[4].mxu1 %vm666_vm0, %v923_v24  ;;  %v913_v28 = vadd.f32 %v5820_v48, %v891_v49  ;;  %v871_v44 = vmul.f32 %v5156_v50, %v5757_v17 }
 0x166   : > { %v872_v23 = vmul.f32 %v5158_v52, %v5766_v35  ;;  %v914_v60 = vadd.f32 %v5820_v48, %v892_v11 }
 0x167   : > { %v924_v29 = vpack.c.bf16 %v913_v28, %v912_v51  ;;  %v893_v53 = vmul.f32 %v5813_v34, %v871_v44 }
 0x168   : > { %v5160_v56 = vpop.eup %5159  ;;  %v894_v57 = vmul.f32 %v5813_v34, %v872_v23 }
 0x169   : > { %v5162_v59 = vpop.eup %5161  ;;  %4704 = vmatprep.mubr.msk.bf16.mxu0 %vm666_vm0, %v924_v29  ;;  %4724 = vmatprep.mubr.msk.bf16.mxu1 %vm666_vm0, %v924_v29  ;;  %v915_v61 = vadd.f32 %v5820_v48, %v893_v53  ;;  %v873_v17 = vmul.f32 %v5160_v56, %v5769_v21 }
 0x16a   : > { %v874_v37 = vmul.f32 %v5162_v59, %v5778_v47  ;;  %v916_v3 = vadd.f32 %v5820_v48, %v894_v57 }
 0x16b   : > { %v925_v35 = vpack.c.bf16 %v915_v61, %v914_v60  ;;  %v895_v63 = vmul.f32 %v5813_v34, %v873_v17 }
 0x16c   : > { %v5164_v2 = vpop.eup %5163  ;;  %v896_v6 = vmul.f32 %v5813_v34, %v874_v37 }
 0x16d   : > { %4705 = vmatmul.mubr.msk.bf16.gmra.mrb[8].mxu0 %vm666_vm0, %v925_v35  ;;  %4725 = vmatmul.mubr.msk.bf16.gmra.mrb[8].mxu1 %vm666_vm0, %v925_v35  ;;  %v917_v4 = vadd.f32 %v5820_v48, %v895_v63  ;;  %v875_v5 = vmul.f32 %v5164_v2, %v5781_v25 }
 0x16e   : > { %v918_v47 = vadd.f32 %v5820_v48, %v896_v6 }
 0x16f   : > { %v926_v7 = vpack.c.bf16 %v917_v4, %v916_v3  ;;  %v897_v21 = vmul.f32 %v5813_v34, %v875_v5  ;;  %v5908_v34 = vld [vmem:[%s7624_s5] ss:$0 sm:$0xff] }
 0x171   : > { %4708 = vmatprep.mubr.msk.bf16.mxu0 %vm666_vm0, %v926_v7  ;;  %4728 = vmatprep.mubr.msk.bf16.mxu1 %vm666_vm0, %v926_v7  ;;  %v919_v8 = vadd.f32 %v5820_v48, %v897_v21 }
 0x173   : > { %v927_v45 = vpack.c.bf16 %v919_v8, %v918_v47 }
 0x175   : > { %4709 = vmatmul.mubr.msk.bf16.gmra.mrb[12].mxu0 %vm666_vm0, %v927_v45  ;;  %4729 = vmatmul.mubr.msk.bf16.gmra.mrb[12].mxu1 %vm666_vm0, %v927_v45 }
 0x176   : > { %4736 = vmatprep.mubr.msk.bf16.mxu0 %vm666_vm0, %v5828_v62  ;;  %v5913_v62 = vld [vmem:[%s7626_s7] ss:$0 sm:$0xff] }
 0x17d   : > { %4737 = vmatmul.mubr.msk.bf16.vlgmr.msra.gmra.mrb[16].mxu0 %vm666_vm0, %v5841_v18 }
 0x17e   : > { %4740 = vmatprep.mubr.msk.bf16.mxu0 %vm666_vm0, %v922_v39 }
 0x185   : > { %4741 = vmatmul.mubr.msk.bf16.gmra.mrb[20].mxu0 %vm666_vm0, %v923_v24 }
 0x186   : > { %4744 = vmatprep.mubr.msk.bf16.mxu0 %vm666_vm0, %v924_v29 }
 0x18d   : > { %4745 = vmatmul.mubr.msk.bf16.gmra.mrb[24].mxu0 %vm666_vm0, %v925_v35 }
 0x18e   : > { %4748 = vmatprep.mubr.msk.bf16.mxu0 %vm666_vm0, %v926_v7 }
 0x195   : > { %4749 = vmatmul.mubr.msk.bf16.gmra.mrb[28].mxu0 %vm666_vm0, %v927_v45 }
 0x230   : > { %v4698_v25 = vpop.f32.mrb[0].mxu0  ;;  %v4718_v48 = vpop.f32.mrb[0].mxu1 }
 0x231   : > { %v1009_v9 = vpop.f32.mrb[1].mxu0  ;;  %v1129_v12 = vpop.f32.mrb[1].mxu1  ;;  %v1018_v14 = vadd.f32 %v4698_v25, %v5908_v34  ;;  %v1138_v15 = vadd.f32 %v4718_v48, %v5913_v62 }
 0x232   : > { %v4699_v54 = vpop.f32.mrb[2].mxu0  ;;  %v4719_v13 = vpop.f32.mrb[2].mxu1  ;;  %v1010_v26 = vadd.f32 %v5908_v34, %v1009_v9  ;;  %v1130_v27 = vadd.f32 %v5913_v62, %v1129_v12 }
 0x233   : > { %v1021_v18 = vadd.f32 %v4699_v54, %v5908_v34  ;;  %v1141_v19 = vadd.f32 %v4719_v13, %v5913_v62  ;;  %v1012_v22 = vpop.f32.mrb[3].mxu0  ;;  %v1132_v16 = vpop.f32.mrb[3].mxu1 }
 0x234   : > { %v1013_v55 = vadd.f32 %v5908_v34, %v1012_v22  ;;  %v1133_v30 = vadd.f32 %v5913_v62, %v1132_v16 }
 0x235   : > { %v5923_v31 = vpack.c.bf16 %v1021_v18, %v1018_v14  ;;  %v5925_v0 = vpack.c.bf16 %v1141_v19, %v1138_v15 }
 0x236   : > { %v5927_v32 = vpack.c.bf16 %v1013_v55, %v1010_v26  ;;  %v5929_v33 = vpack.c.bf16 %v1133_v30, %v1130_v27 }
 0x237   : > { %1787 = vrot.lane.b32.xlu1 %v5925_v0, %s5509_s4  ;;  %v1371_v56 = vsel %vm1342_vm1, %v5925_v0, 0 }
 0x238   : > { %1785 = vrot.lane.b32.xlu0 %v5929_v33, %s5509_s4  ;;  %v4702_v20 = vpop.f32.mrb[4].mxu0  ;;  %v4722_v38 = vpop.f32.mrb[4].mxu1  ;;  %5072 = vmatprep.subr.msk.bf16.mxu1 %vm1342_vm1, %v5929_v33  ;;  %v1368_v39 = vsel %vm1342_vm1, %v5929_v33, 0 }
 0x239   : > { %v1034_v40 = vadd.f32 %v4702_v20, %v5908_v34  ;;  %4768 = vmatprep.mubr.msk.bf16.mxu1 %vm1342_vm1, %v5927_v32  ;;  %v1025_v41 = vpop.f32.mrb[5].mxu0  ;;  %v1145_v42 = vpop.f32.mrb[5].mxu1  ;;  %4753 = vmatpush3.bf16.xpose.msra.mxu1 %v1368_v39  ;;  %v1154_v10 = vadd.f32 %v4722_v38, %v5913_v62 }
 0x23a   : > { %v1026_v43 = vadd.f32 %v5908_v34, %v1025_v41  ;;  %v4703_v46 = vpop.f32.mrb[6].mxu0  ;;  %v4723_v1 = vpop.f32.mrb[6].mxu1  ;;  %5073 = vmatprep.subr.msk.bf16.mxu1 %vm1342_vm1, %v5925_v0  ;;  %v1146_v50 = vadd.f32 %v5913_v62, %v1145_v42 }
 0x23b   : > { %v1037_v58 = vadd.f32 %v4703_v46, %v5908_v34  ;;  %v1157_v36 = vadd.f32 %v4723_v1, %v5913_v62  ;;  %v1028_v24 = vpop.f32.mrb[7].mxu0  ;;  %v1148_v49 = vpop.f32.mrb[7].mxu1 }
 0x23c   : > { %v1029_v51 = vadd.f32 %v5908_v34, %v1028_v24  ;;  %v1149_v52 = vadd.f32 %v5913_v62, %v1148_v49 }
 0x23d   : > { %v5951_v28 = vpack.c.bf16 %v1037_v58, %v1034_v40  ;;  %v5953_v44 = vpack.c.bf16 %v1157_v36, %v1154_v10 }
 0x23e   : > { %v5955_v11 = vpack.c.bf16 %v1029_v51, %v1026_v43  ;;  %v5957_v23 = vpack.c.bf16 %v1149_v52, %v1146_v50  ;;  %v4416_v43 = vld [vmem:[%s7628_s9] ss:$0 sm:$0xff] }
 0x23f   : > { %v1377_v46 = vsel %vm1342_vm1, %v5953_v44, 0 }
 0x240   : > { %v4706_v29 = vpop.f32.mrb[8].mxu0  ;;  %v4726_v53 = vpop.f32.mrb[8].mxu1  ;;  %v1374_v9 = vsel %vm1342_vm1, %v5957_v23, 0 }
 0x241   : > { %v1050_v57 = vadd.f32 %v4706_v29, %v5908_v34  ;;  %v1041_v59 = vpop.f32.mrb[9].mxu0  ;;  %v1161_v60 = vpop.f32.mrb[9].mxu1  ;;  %4755 = vmatpush3.bf16.xpose.msra.mxu1 %v1371_v56  ;;  %v1170_v35 = vadd.f32 %v4726_v53, %v5913_v62 }
 0x242   : > { %v1042_v61 = vadd.f32 %v5908_v34, %v1041_v59  ;;  %v4707_v17 = vpop.f32.mrb[10].mxu0  ;;  %v4727_v37 = vpop.f32.mrb[10].mxu1  ;;  %5074 = vmatprep.subr.msk.bf16.mxu1 %vm1342_vm1, %v5957_v23  ;;  %v1162_v5 = vadd.f32 %v5913_v62, %v1161_v60 }
 0x243   : > { %v1053_v63 = vadd.f32 %v4707_v17, %v5908_v34  ;;  %v1173_v2 = vadd.f32 %v4727_v37, %v5913_v62  ;;  %v1044_v3 = vpop.f32.mrb[11].mxu0  ;;  %v1164_v4 = vpop.f32.mrb[11].mxu1 }
 0x244   : > { %v1045_v6 = vadd.f32 %v5908_v34, %v1044_v3  ;;  %v1165_v7 = vadd.f32 %v5913_v62, %v1164_v4 }
 0x245   : > { %v5971_v21 = vpack.c.bf16 %v1053_v63, %v1050_v57  ;;  %v5973_v47 = vpack.c.bf16 %v1173_v2, %v1170_v35 }
 0x246   : > { %v5975_v8 = vpack.c.bf16 %v1045_v6, %v1042_v61  ;;  %v5977_v45 = vpack.c.bf16 %v1165_v7, %v1162_v5 }
 0x247   : > { %v1383_v63 = vsel %vm1342_vm1, %v5973_v47, 0 }
 0x248   : > { %v4710_v25 = vpop.f32.mrb[12].mxu0  ;;  %v4730_v48 = vpop.f32.mrb[12].mxu1  ;;  %v1380_v52 = vsel %vm1342_vm1, %v5977_v45, 0 }
 0x249   : > { %v1066_v12 = vadd.f32 %v4710_v25, %v5908_v34  ;;  %v1057_v54 = vpop.f32.mrb[13].mxu0  ;;  %v1177_v13 = vpop.f32.mrb[13].mxu1  ;;  %4757 = vmatpush3.bf16.xpose.msra.mxu1 %v1374_v9  ;;  %v1186_v19 = vadd.f32 %v4730_v48, %v5913_v62 }
 0x24a   : > { %v1058_v14 = vadd.f32 %v5908_v34, %v1057_v54  ;;  %v4711_v15 = vpop.f32.mrb[14].mxu0  ;;  %v4731_v18 = vpop.f32.mrb[14].mxu1  ;;  %5075 = vmatprep.subr.msk.bf16.mxu1 %vm1342_vm1, %v5953_v44  ;;  %v1178_v55 = vadd.f32 %v5913_v62, %v1177_v13 }
 0x24b   : > { %v1069_v22 = vadd.f32 %v4711_v15, %v5908_v34  ;;  %v1189_v16 = vadd.f32 %v4731_v18, %v5913_v62  ;;  %v1060_v26 = vpop.f32.mrb[15].mxu0  ;;  %v1180_v27 = vpop.f32.mrb[15].mxu1 }
 0x24c   : > { %v1061_v30 = vadd.f32 %v5908_v34, %v1060_v26  ;;  %v1181_v20 = vadd.f32 %v5913_v62, %v1180_v27 }
 0x24d   : > { %v5991_v38 = vpack.c.bf16 %v1069_v22, %v1066_v12  ;;  %v5993_v39 = vpack.c.bf16 %v1189_v16, %v1186_v19 }
 0x24e   : > { %v5995_v40 = vpack.c.bf16 %v1061_v30, %v1058_v14  ;;  %v5997_v41 = vpack.c.bf16 %v1181_v20, %v1178_v55  ;;  %v1337_v20 = vlaneseq }
 0x24f   : > { %v1389_v55 = vsel %vm1342_vm1, %v5993_v39, 0 }
 0x250   : > { %v4738_v42 = vpop.f32.mrb[16].mxu0  ;;  %v1386_v54 = vsel %vm1342_vm1, %v5997_v41, 0 }
 0x251   : > { %v1249_v1 = vpop.f32.mrb[17].mxu0  ;;  %4759 = vmatpush3.bf16.xpose.msra.mxu1 %v1377_v46  ;;  %v1258_v62 = vadd.f32 %v4738_v42, %v4416_v43  ;;  %v661_v42 = vld [vmem:[%s638_s2] sm:$0x1] }
 0x252   : > { %v4739_v34 = vpop.f32.mrb[18].mxu0  ;;  %5076 = vmatprep.subr.msk.bf16.mxu1 %vm1342_vm1, %v5977_v45  ;;  %v1250_v36 = vadd.f32 %v4416_v43, %v1249_v1  ;;  %vm662_vm2 = vcmp.gt.f32.partialorder %v661_v42, 0.5  ;;  %v5510_v1 = vmov 0.0  }
 0x253   : > { %v1261_v10 = vadd.f32 %v4739_v34, %v4416_v43  ;;  %v1252_v58 = vpop.f32.mrb[19].mxu0  ;;  %v663_v34 = vsel %vm662_vm2, -1e+18, %v5510_v1 }
 0x254   : > { %v1253_v24 = vadd.f32 %v4416_v43, %v1252_v58 }
 0x255   : > { %v6006_v49 = vpack.c.bf16 %v1261_v10, %v1258_v62 }
 0x256   : > { %v6008_v50 = vpack.c.bf16 %v1253_v24, %v1250_v36 }
 0x258   : > { %v4742_v51 = vpop.f32.mrb[20].mxu0  ;;  %4784 = vmatprep.subr.bf16.mxu0 %v6008_v50 }
 0x259   : > { %v1265_v29 = vpop.f32.mrb[21].mxu0  ;;  %4761 = vmatpush3.bf16.xpose.msra.mxu1 %v1380_v52  ;;  %4785 = vmatpush3.bf16.msra.mxu0 %v6008_v50  ;;  %v1274_v56 = vadd.f32 %v4742_v51, %v4416_v43 }
 0x25a   : > { %v4743_v53 = vpop.f32.mrb[22].mxu0  ;;  %5077 = vmatprep.subr.msk.bf16.mxu1 %vm1342_vm1, %v5973_v47  ;;  %4786 = vmatprep.subr.bf16.mxu0 %v6006_v49  ;;  %v1266_v60 = vadd.f32 %v4416_v43, %v1265_v29 }
 0x25b   : > { %v1277_v57 = vadd.f32 %v4743_v53, %v4416_v43  ;;  %v1268_v59 = vpop.f32.mrb[23].mxu0 }
 0x25c   : > { %v1269_v61 = vadd.f32 %v4416_v43, %v1268_v59 }
 0x25d   : > { %v6017_v17 = vpack.c.bf16 %v1277_v57, %v1274_v56  ;;  %4787 = vmatpush3.bf16.msra.mxu0 %v6006_v49 }
 0x25e   : > { %v6020_v37 = vpack.c.bf16 %v1269_v61, %v1266_v60 }
 0x260   : > { %v4746_v35 = vpop.f32.mrb[24].mxu0  ;;  %4788 = vmatprep.subr.bf16.mxu0 %v6020_v37 }
 0x261   : > { %v1281_v2 = vpop.f32.mrb[25].mxu0  ;;  %4763 = vmatpush3.bf16.xpose.msra.mxu1 %v1383_v63  ;;  %4789 = vmatpush3.bf16.msra.mxu0 %v6020_v37  ;;  %v1290_v4 = vadd.f32 %v4746_v35, %v4416_v43 }
 0x262   : > { %v4747_v3 = vpop.f32.mrb[26].mxu0  ;;  %5078 = vmatprep.subr.msk.bf16.mxu1 %vm1342_vm1, %v5997_v41  ;;  %4790 = vmatprep.subr.bf16.mxu0 %v6017_v17  ;;  %v1282_v7 = vadd.f32 %v4416_v43, %v1281_v2 }
 0x263   : > { %v1293_v5 = vadd.f32 %v4747_v3, %v4416_v43  ;;  %v1284_v6 = vpop.f32.mrb[27].mxu0 }
 0x264   : > { %v1285_v25 = vadd.f32 %v4416_v43, %v1284_v6 }
 0x265   : > { %v6029_v48 = vpack.c.bf16 %v1293_v5, %v1290_v4  ;;  %4791 = vmatpush3.bf16.msra.mxu0 %v6017_v17 }
 0x266   : > { %v6032_v9 = vpack.c.bf16 %v1285_v25, %v1282_v7 }
 0x268   : > { %v4750_v12 = vpop.f32.mrb[28].mxu0  ;;  %4792 = vmatprep.subr.bf16.mxu0 %v6032_v9 }
 0x269   : > { %v1297_v13 = vpop.f32.mrb[29].mxu0  ;;  %4765 = vmatpush3.bf16.xpose.msra.mxu1 %v1386_v54  ;;  %4793 = vmatpush3.bf16.msra.mxu0 %v6032_v9  ;;  %v1306_v15 = vadd.f32 %v4750_v12, %v4416_v43 }
 0x26a   : > { %v4751_v14 = vpop.f32.mrb[30].mxu0  ;;  %5079 = vmatprep.subr.msk.bf16.mxu1 %vm1342_vm1, %v5993_v39  ;;  %4794 = vmatprep.subr.bf16.mxu0 %v6029_v48  ;;  %v1298_v22 = vadd.f32 %v4416_v43, %v1297_v13 }
 0x26b   : > { %v1309_v18 = vadd.f32 %v4751_v14, %v4416_v43  ;;  %v1300_v19 = vpop.f32.mrb[31].mxu0 }
 0x26c   : > { %v1301_v16 = vadd.f32 %v4416_v43, %v1300_v19  ;;  %v1338_v43 = vshrl.u32 %v1337_v20, 7 }
 0x26d   : > { %v6041_v26 = vpack.c.bf16 %v1309_v18, %v1306_v15  ;;  %4795 = vmatpush3.bf16.msra.mxu0 %v6029_v48 }
 0x26e   : > { %v6044_v27 = vpack.c.bf16 %v1301_v16, %v1298_v22  ;;  %v1339_v46 = vsub.s32 0, %v1338_v43 }
 0x270   : > { %4796 = vmatprep.subr.bf16.mxu0 %v6044_v27  ;;  %v6074_v62 = vrot.slane %v663_v34, %v1339_v46 }
 0x271   : > { %4767 = vmatpush3.bf16.xpose.msra.mxu1 %v1389_v55  ;;  %4797 = vmatpush3.bf16.msra.mxu0 %v6044_v27 }
 0x272   : > { %4798 = vmatprep.subr.bf16.mxu0 %v6041_v26 }
 0x275   : > { %4799 = vmatpush3.bf16.msra.mxu0 %v6041_v26 }
 0x278   : > { %4769 = vmatmul.mubr.msk.bf16.vlgmr.msra.gmra.mrb[16].mxu1 %vm1342_vm1, %v5923_v31 }
 0x279   : > { %4772 = vmatprep.mubr.msk.bf16.mxu1 %vm1342_vm1, %v5955_v11 }
 0x280   : > { %4773 = vmatmul.mubr.msk.bf16.gmra.mrb[20].mxu1 %vm1342_vm1, %v5951_v28 }
 0x281   : > { %4776 = vmatprep.mubr.msk.bf16.mxu1 %vm1342_vm1, %v5975_v8 }
 0x288   : > { %4777 = vmatmul.mubr.msk.bf16.gmra.mrb[24].mxu1 %vm1342_vm1, %v5971_v21 }
 0x289   : > { %4780 = vmatprep.mubr.msk.bf16.mxu1 %vm1342_vm1, %v5995_v40 }
 0x290   : > { %4781 = vmatmul.mubr.msk.bf16.gmra.mrb[28].mxu1 %vm1342_vm1, %v5991_v38 }
 0x2a9   : > { %v6132_v20 = vpop.permute.xlu1 %1787 }
 0x2aa   : > { %v6066_v30 = vpop.permute.xlu0 %1785 }
 0x2ab   : > { %5080 = vmatprep.subr.msk.bf16.mxu0 %vm1342_vm1, %v6066_v30 }
 0x34b   : > { %v4770_v10 = vpop.f32.mrb[16].mxu1 }
 0x34c   : > { %v1434_v58 = vadd.f32 %v4770_v10, %v6074_v62  ;;  %v1425_v36 = vpop.f32.mrb[17].mxu1 }
 0x34d   : > { %v4771_v24 = vpop.f32.mrb[18].mxu1  ;;  %v1426_v29 = vadd.f32 %v1425_v36, %v6074_v62 }
 0x34e   : > { %v1437_v51 = vadd.f32 %v4771_v24, %v6074_v62  ;;  %1492 = vmax.xlane.f32.xlu0 %v1434_v58  ;;  %v1428_v52 = vpop.f32.mrb[19].mxu1 }
 0x34f   : > { %v1429_v53 = vadd.f32 %v1428_v52, %v6074_v62 }
 0x350   : > { %1494 = vmax.xlane.f32.xlu1 %v1437_v51 }
 0x352   : > { %1488 = vmax.xlane.f32.xlu0 %v1426_v29 }
 0x353   : > { %v4774_v56 = vpop.f32.mrb[20].mxu1 }
 0x354   : > { %v6081_v57 = vadd.f32 %v4774_v56, %v6074_v62  ;;  %v1441_v59 = vpop.f32.mrb[21].mxu1  ;;  %1490 = vmax.xlane.f32.xlu1 %v1429_v53 }
 0x355   : > { %v4775_v60 = vpop.f32.mrb[22].mxu1  ;;  %v6088_v63 = vadd.f32 %v1441_v59, %v6074_v62 }
 0x356   : > { %v6084_v61 = vadd.f32 %v4775_v60, %v6074_v62  ;;  %v1444_v35 = vpop.f32.mrb[23].mxu1  ;;  %1500 = vmax.xlane.f32.xlu0 %v6081_v57 }
 0x357   : > { %v6092_v2 = vadd.f32 %v1444_v35, %v6074_v62 }
 0x358   : > { %1502 = vmax.xlane.f32.xlu1 %v6084_v61 }
 0x35a   : > { %1496 = vmax.xlane.f32.xlu0 %v6088_v63 }
 0x35b   : > { %v4778_v3 = vpop.f32.mrb[24].mxu1 }
 0x35c   : > { %v6096_v4 = vadd.f32 %v4778_v3, %v6074_v62  ;;  %v1457_v5 = vpop.f32.mrb[25].mxu1  ;;  %1498 = vmax.xlane.f32.xlu1 %v6092_v2 }
 0x35d   : > { %v4779_v6 = vpop.f32.mrb[26].mxu1  ;;  %v6104_v12 = vadd.f32 %v1457_v5, %v6074_v62 }
 0x35e   : > { %v6100_v7 = vadd.f32 %v4779_v6, %v6074_v62  ;;  %v1460_v25 = vpop.f32.mrb[27].mxu1  ;;  %1508 = vmax.xlane.f32.xlu0 %v6096_v4 }
 0x35f   : > { %v6108_v54 = vadd.f32 %v1460_v25, %v6074_v62 }
 0x360   : > { %1510 = vmax.xlane.f32.xlu1 %v6100_v7 }
 0x362   : > { %1504 = vmax.xlane.f32.xlu0 %v6104_v12 }
 0x363   : > { %v4782_v13 = vpop.f32.mrb[28].mxu1 }
 0x364   : > { %v6112_v14 = vadd.f32 %v4782_v13, %v6074_v62  ;;  %1506 = vmax.xlane.f32.xlu1 %v6108_v54  ;;  %v1473_v15 = vpop.f32.mrb[29].mxu1 }
 0x365   : > { %v4783_v18 = vpop.f32.mrb[30].mxu1  ;;  %v6117_v22 = vadd.f32 %v1473_v15, %v6074_v62 }
 0x366   : > { %1516 = vmax.xlane.f32.xlu0 %v6112_v14  ;;  %v1476_v19 = vpop.f32.mrb[31].mxu1  ;;  %v6125_v16 = vadd.f32 %v4783_v18, %v6074_v62 }
 0x367   : > { %v6129_v55 = vadd.f32 %v1476_v19, %v6074_v62 }
 0x36a   : > { %1512 = vmax.xlane.f32.xlu0 %v6117_v22 }
 0x375   : > { %1791 = vrot.lane.b32.xlu1 %v5953_v44, %s5509_s4 }
 0x380   : > { %1789 = vrot.lane.b32.xlu0 %v5957_v23, %s5509_s4 }
 0x399   : > { %1518 = vmax.xlane.f32.xlu1 %v6125_v16 }
 0x39d   : > { %1514 = vmax.xlane.f32.xlu1 %v6129_v55 }
 0x3db   : > { %v1493_v42 = vpop.xlane.xlu0 %1492 }
 0x3dc   : > { %v1522_v43 = vsub.f32 %v1434_v58, %v1493_v42 }
 0x3dd   : > { %v1495_v46 = vpop.xlane.xlu1 %1494 }
 0x3de   : > { %v1540_v1 = vmul.f32 1.442695, %v1522_v43  ;;  %v1523_v34 = vsub.f32 %v1437_v51, %v1495_v46 }
 0x3df   : > { %v1489_v10 = vpop.xlane.xlu0 %1488 }
 0x3e0   : > { %5165 = vpow2.f32 %v1540_v1  ;;  %v1542_v36 = vmul.f32 1.442695, %v1523_v34  ;;  %v1520_v24 = vsub.f32 %v1426_v29, %v1489_v10 }
 0x3e1   : > { %v1491_v52 = vpop.xlane.xlu1 %1490 }
 0x3e2   : > { %5167 = vpow2.f32 %v1542_v36  ;;  %v1536_v56 = vmul.f32 1.442695, %v1520_v24  ;;  %v1521_v59 = vsub.f32 %v1429_v53, %v1491_v52 }
 0x3e3   : > { %v1501_v29 = vpop.xlane.xlu0 %1500 }
 0x3e4   : > { %5169 = vpow2.f32 %v1536_v56  ;;  %v1538_v60 = vmul.f32 1.442695, %v1521_v59  ;;  %v1526_v15 = vsub.f32 %v6081_v57, %v1501_v29 }
 0x3e5   : > { %v1503_v6 = vpop.xlane.xlu1 %1502 }
 0x3e6   : > { %5171 = vpow2.f32 %v1538_v60  ;;  %v1548_v42 = vmul.f32 1.442695, %v1526_v15  ;;  %v1527_v1 = vsub.f32 %v6084_v61, %v1503_v6 }
 0x3e7   : > { %v1497_v53 = vpop.xlane.xlu0 %1496 }
 0x3e8   : > { %v1524_v18 = vsub.f32 %v6088_v63, %v1497_v53  ;;  %5173 = vpow2.f32 %v1548_v42  ;;  %v1550_v52 = vmul.f32 1.442695, %v1527_v1 }
 0x3e9   : > { %v1499_v13 = vpop.xlane.xlu1 %1498 }
 0x3ea   : > { %v6134_v35 = vpop.eup %5165  ;;  %v1525_v43 = vsub.f32 %v6092_v2, %v1499_v13  ;;  %v1544_v34 = vmul.f32 1.442695, %v1524_v18 }
 0x3eb   : > { %1572 = vadd.xlane.f32.xlu0 %v6134_v35  ;;  %v1509_v5 = vpop.xlane.xlu0 %1508 }
 0x3ec   : > { %v6137_v3 = vpop.eup %5167  ;;  %v1546_v10 = vmul.f32 1.442695, %v1525_v43  ;;  %5175 = vpow2.f32 %v1544_v34  ;;  %v1530_v56 = vsub.f32 %v6096_v4, %v1509_v5 }
 0x3ed   : > { %1574 = vadd.xlane.f32.xlu1 %v6137_v3  ;;  %v1511_v46 = vpop.xlane.xlu1 %1510 }
 0x3ee   : > { %v6140_v58 = vpop.eup %5169  ;;  %5177 = vpow2.f32 %v1546_v10  ;;  %v1556_v2 = vmul.f32 1.442695, %v1530_v56  ;;  %v1531_v29 = vsub.f32 %v6100_v7, %v1511_v46 }
 0x3ef   : > { %1568 = vadd.xlane.f32.xlu0 %v6140_v58  ;;  %v1505_v25 = vpop.xlane.xlu0 %1504  ;;  %5179 = vpow2.f32 %v1550_v52 }
 0x3f0   : > { %v6143_v51 = vpop.eup %5171  ;;  %v1528_v60 = vsub.f32 %v6104_v12, %v1505_v25 }
 0x3f1   : > { %1570 = vadd.xlane.f32.xlu1 %v6143_v51  ;;  %v1507_v57 = vpop.xlane.xlu1 %1506 }
 0x3f2   : > { %v1552_v6 = vmul.f32 1.442695, %v1528_v60  ;;  %v1529_v7 = vsub.f32 %v6108_v54, %v1507_v57 }
 0x3f3   : > { %v1517_v19 = vpop.xlane.xlu0 %1516 }
 0x3f4   : > { %v1534_v36 = vsub.f32 %v6112_v14, %v1517_v19  ;;  %v6161_v14 = vpop.eup %5173  ;;  %v1554_v42 = vmul.f32 1.442695, %v1529_v7 }
 0x3f5   : > { %v6159_v53 = vpop.permute.xlu1 %1791 }
 0x3f6   : > { %v1564_v63 = vmul.f32 1.442695, %v1534_v36  ;;  %v6164_v4 = vpop.eup %5175 }
 0x3f7   : > { %v1513_v24 = vpop.xlane.xlu0 %1512 }
 0x3f8   : > { %v1532_v59 = vsub.f32 %v6117_v22, %v1513_v24  ;;  %5181 = vpow2.f32 %v1564_v63  ;;  %v1558_v22 = vmul.f32 1.442695, %v1531_v29  ;;  %v6167_v12 = vpop.eup %5177 }
 0x3f9   : > { %5183 = vpow2.f32 %v1556_v2  ;;  %v6172_v13 = vpop.eup %5179 }
 0x3fa   : > { %v1560_v61 = vmul.f32 1.442695, %v1532_v59 }
 0x3fb   : > { %v1790_v24 = vpop.permute.xlu0 %1789 }
 0x3fc   : > { %5185 = vpow2.f32 %v1560_v61 }
 0x3fd   : > { %5187 = vpow2.f32 %v1552_v6 }
 0x3fe   : > { %5189 = vpow2.f32 %v1558_v22 }
 0x402   : > { %1795 = vrot.lane.b32.xlu1 %v5973_v47, %s5509_s4  ;;  %v6175_v19 = vpop.eup %5181 }
 0x403   : > { %v6179_v54 = vpop.eup %5183 }
 0x405   : > { %1793 = vrot.lane.b32.xlu0 %v5977_v45, %s5509_s4 }
 0x424   : > { %1580 = vadd.xlane.f32.xlu0 %v6161_v14 }
 0x426   : > { %v1519_v5 = vpop.xlane.xlu1 %1518  ;;  %1576 = vadd.xlane.f32.xlu1 %v6164_v4 }
 0x427   : > { %v1535_v25 = vsub.f32 %v6125_v16, %v1519_v5  ;;  %v6182_v16 = vpop.eup %5185 }
 0x428   : > { %1578 = vadd.xlane.f32.xlu0 %v6167_v12  ;;  %v6185_v1 = vpop.eup %5187 }
 0x429   : > { %v1566_v15 = vmul.f32 1.442695, %v1535_v25  ;;  %v6188_v34 = vpop.eup %5189 }
 0x42a   : > { %v1515_v18 = vpop.xlane.xlu1 %1514  ;;  %1582 = vadd.xlane.f32.xlu1 %v6172_v13 }
 0x42b   : > { %5191 = vpow2.f32 %v1566_v15  ;;  %v1533_v43 = vsub.f32 %v6129_v55, %v1515_v18  ;;  %v1826_v15 = vsel %vm1342_vm1, %v6066_v30, 0 }
 0x42c   : > { %1596 = vadd.xlane.f32.xlu0 %v6175_v19  ;;  %5193 = vpow2.f32 %v1554_v42 }
 0x42d   : > { %v1562_v46 = vmul.f32 1.442695, %v1533_v43 }
 0x42e   : > { %1588 = vadd.xlane.f32.xlu1 %v6179_v54 }
 0x42f   : > { %5195 = vpow2.f32 %v1562_v46 }
 0x430   : > { %1592 = vadd.xlane.f32.xlu0 %v6182_v16 }
 0x432   : > { %1584 = vadd.xlane.f32.xlu1 %v6185_v1 }
 0x435   : > { %v6190_v55 = vpop.eup %5191 }
 0x436   : > { %1590 = vadd.xlane.f32.xlu1 %v6188_v34  ;;  %1598 = vadd.xlane.f32.xlu0 %v6190_v55  ;;  %v6194_v10 = vpop.eup %5193 }
 0x439   : > { %v6197_v36 = vpop.eup %5195 }
 0x43a   : > { %1586 = vadd.xlane.f32.xlu1 %v6194_v10 }
 0x43e   : > { %1594 = vadd.xlane.f32.xlu1 %v6197_v36 }
 0x44c   : > { %1797 = vrot.lane.b32.xlu0 %v5997_v41, %s5509_s4 }
 0x44f   : > { %1799 = vrot.lane.b32.xlu1 %v5993_v39, %s5509_s4 }
 0x450   : > { %1761 = vrot.lane.b32.xlu0 %v5927_v32, %s5509_s4 }
 0x453   : > { %1763 = vrot.lane.b32.xlu1 %v5923_v31, %s5509_s4 }
 0x454   : > { %1765 = vrot.lane.b32.xlu0 %v5955_v11, %s5509_s4 }
 0x457   : > { %1767 = vrot.lane.b32.xlu1 %v5951_v28, %s5509_s4 }
 0x458   : > { %1769 = vrot.lane.b32.xlu0 %v5975_v8, %s5509_s4 }
 0x45b   : > { %1771 = vrot.lane.b32.xlu1 %v5971_v21, %s5509_s4 }
 0x45c   : > { %1773 = vrot.lane.b32.xlu0 %v5995_v40, %s5509_s4 }
 0x45f   : > { %1775 = vrot.lane.b32.xlu1 %v5991_v38, %s5509_s4 }
 0x460   : > { %2106 = vrot.lane.b32.xlu0 %v6008_v50, %s5509_s4 }
 0x463   : > { %2108 = vrot.lane.b32.xlu1 %v6006_v49, %s5509_s4 }
 0x464   : > { %2110 = vrot.lane.b32.xlu0 %v6020_v37, %s5509_s4 }
 0x467   : > { %2112 = vrot.lane.b32.xlu1 %v6017_v17, %s5509_s4 }
 0x468   : > { %2114 = vrot.lane.b32.xlu0 %v6032_v9, %s5509_s4 }
 0x46b   : > { %2116 = vrot.lane.b32.xlu1 %v6029_v48, %s5509_s4 }
 0x46c   : > { %2118 = vrot.lane.b32.xlu0 %v6044_v27, %s5509_s4 }
 0x46f   : > { %2120 = vrot.lane.b32.xlu1 %v6041_v26, %s5509_s4  ;;  %s5514_s4 = smov 16  }
 0x470   : > { %2292 = vrot.lane.b32.xlu0 %v5929_v33, %s5511_s25 }
 0x473   : > { %2294 = vrot.lane.b32.xlu1 %v5925_v0, %s5511_s25 }
 0x478   : > { %v1573_v52 = vpop.xlane.xlu0 %1572 }
 0x47a   : > { %v1575_v56 = vpop.xlane.xlu1 %1574 }
 0x47b   : > { %5197 = vrcp.f32 %v1575_v56 }
 0x47c   : > { %v1569_v57 = vpop.xlane.xlu0 %1568 }
 0x47d   : > { %5199 = vrcp.f32 %v1569_v57 }
 0x47e   : > { %5201 = vrcp.f32 %v1573_v52  ;;  %v1571_v63 = vpop.xlane.xlu1 %1570 }
 0x47f   : > { %5203 = vrcp.f32 %v1571_v63 }
 0x480   : > { %v1794_v30 = vpop.permute.xlu0 %1793 }
 0x481   : > { %v1838_v18 = vsel %vm1342_vm1, %v1794_v30, 0 }
 0x485   : > { %v5198_v59 = vpop.eup %5197 }
 0x486   : > { %v1619_v29 = vmul.f32 %v5198_v59, %v6137_v3  ;;  %v1829_v3 = vsel %vm1342_vm1, %v6132_v20, 0 }
 0x487   : > { %v5200_v2 = vpop.eup %5199 }
 0x488   : > { %v5202_v60 = vpop.eup %5201  ;;  %v1616_v6 = vmul.f32 %v5200_v2, %v6140_v58  ;;  %v1832_v58 = vsel %vm1342_vm1, %v1790_v24, 0 }
 0x489   : > { %v5204_v61 = vpop.eup %5203  ;;  %v1618_v5 = vmul.f32 %v5202_v60, %v6134_v35  ;;  %v1835_v35 = vsel %vm1342_vm1, %v6159_v53, 0 }
 0x48a   : > { %v1617_v22 = vmul.f32 %v5204_v61, %v6143_v51  ;;  %v1796_v51 = vpop.permute.xlu1 %1795 }
 0x48b   : > { %v1633_v25 = vpack.c.bf16 %v1619_v29, %v1618_v5 }
 0x48c   : > { %v1632_v7 = vpack.c.bf16 %v1617_v22, %v1616_v6 }
 0x48e   : > { %4800 = vmatprep.mubr.bf16.mxu0 %v1632_v7 }
 0x48f   : > { %4801 = vmatmul.mubr.bf16.vlgmr.msra.gmra.mrb[32].mxu0 %v1633_v25 }
 0x490   : > { %4817 = vmatpush3.bf16.xpose.msra.mxu0 %v1826_v15 }
 0x491   : > { %5081 = vmatprep.subr.msk.bf16.mxu0 %vm1342_vm1, %v6132_v20 }
 0x498   : > { %4819 = vmatpush3.bf16.xpose.msra.mxu0 %v1829_v3 }
 0x499   : > { %5082 = vmatprep.subr.msk.bf16.mxu0 %vm1342_vm1, %v1790_v24  ;;  %v1841_v24 = vsel %vm1342_vm1, %v1796_v51, 0 }
 0x4a0   : > { %4821 = vmatpush3.bf16.xpose.msra.mxu0 %v1832_v58 }
 0x4a1   : > { %5083 = vmatprep.subr.msk.bf16.mxu0 %vm1342_vm1, %v6159_v53 }
 0x4a8   : > { %4823 = vmatpush3.bf16.xpose.msra.mxu0 %v1835_v35 }
 0x4a9   : > { %5084 = vmatprep.subr.msk.bf16.mxu0 %vm1342_vm1, %v1794_v30 }
 0x4b0   : > { %4825 = vmatpush3.bf16.xpose.msra.mxu0 %v1838_v18 }
 0x4b1   : > { %5085 = vmatprep.subr.msk.bf16.mxu0 %vm1342_vm1, %v1796_v51  ;;  %v1581_v20 = vpop.xlane.xlu0 %1580 }
 0x4b3   : > { %v1577_v42 = vpop.xlane.xlu1 %1576 }
 0x4b4   : > { %5205 = vrcp.f32 %v1577_v42 }
 0x4b5   : > { %5207 = vrcp.f32 %v1581_v20  ;;  %v1579_v43 = vpop.xlane.xlu0 %1578 }
 0x4b6   : > { %5209 = vrcp.f32 %v1579_v43 }
 0x4b7   : > { %v1583_v46 = vpop.xlane.xlu1 %1582 }
 0x4b8   : > { %5211 = vrcp.f32 %v1583_v46  ;;  %4827 = vmatpush3.bf16.xpose.msra.mxu0 %v1841_v24 }
 0x4b9   : > { %v1597_v53 = vpop.xlane.xlu0 %1596 }
 0x4bb   : > { %v1589_v52 = vpop.xlane.xlu1 %1588 }
 0x4bd   : > { %v1593_v63 = vpop.xlane.xlu0 %1592 }
 0x4be   : > { %v5206_v56 = vpop.eup %5205 }
 0x4bf   : > { %v5208_v57 = vpop.eup %5207  ;;  %v1585_v59 = vpop.xlane.xlu1 %1584  ;;  %v1620_v60 = vmul.f32 %v5206_v56, %v6164_v4 }
 0x4c0   : > { %v5210_v2 = vpop.eup %5209  ;;  %v1622_v7 = vmul.f32 %v5208_v57, %v6161_v14 }
 0x4c1   : > { %v1621_v61 = vmul.f32 %v5210_v2, %v6167_v12 }
 0x4c2   : > { %v5212_v29 = vpop.eup %5211 }
 0x4c3   : > { %v1591_v6 = vpop.xlane.xlu1 %1590  ;;  %v1599_v22 = vpop.xlane.xlu0 %1598  ;;  %v1634_v5 = vpack.c.bf16 %v1621_v61, %v1620_v60  ;;  %v1623_v25 = vmul.f32 %v5212_v29, %v6172_v13 }
 0x4c4   : > { %5213 = vrcp.f32 %v1591_v6 }
 0x4c5   : > { %4804 = vmatprep.mubr.bf16.mxu0 %v1634_v5  ;;  %v1635_v15 = vpack.c.bf16 %v1623_v25, %v1622_v7  ;;  %5215 = vrcp.f32 %v1585_v59 }
 0x4c6   : > { %5217 = vrcp.f32 %v1589_v52 }
 0x4c7   : > { %v1587_v3 = vpop.xlane.xlu1 %1586  ;;  %4805 = vmatmul.mubr.bf16.gmra.mrb[36].mxu0 %v1635_v15  ;;  %v1798_v58 = vpop.permute.xlu0 %1797 }
 0x4c8   : > { %5219 = vrcp.f32 %v1587_v3  ;;  %5086 = vmatprep.subr.msk.bf16.mxu0 %vm1342_vm1, %v1798_v58  ;;  %v1844_v4 = vsel %vm1342_vm1, %v1798_v58, 0 }
 0x4c9   : > { %4829 = vmatpush3.bf16.xpose.msra.mxu0 %v1844_v4  ;;  %5221 = vrcp.f32 %v1593_v63 }
 0x4cb   : > { %v1595_v12 = vpop.xlane.xlu1 %1594  ;;  %v1762_v35 = vpop.permute.xlu0 %1761 }
 0x4cc   : > { %5223 = vrcp.f32 %v1595_v12 }
 0x4cd   : > { %5225 = vrcp.f32 %v1599_v22 }
 0x4ce   : > { %v5214_v14 = vpop.eup %5213  ;;  %5227 = vrcp.f32 %v1597_v53 }
 0x4cf   : > { %v1800_v13 = vpop.permute.xlu1 %1799  ;;  %v1766_v30 = vpop.permute.xlu0 %1765  ;;  %v1627_v43 = vmul.f32 %v5214_v14, %v6188_v34 }
 0x4d0   : > { %v5216_v51 = vpop.eup %5215  ;;  %5087 = vmatprep.subr.msk.bf16.mxu0 %vm1342_vm1, %v1800_v13  ;;  %v1847_v18 = vsel %vm1342_vm1, %v1800_v13, 0 }
 0x4d1   : > { %v5218_v20 = vpop.eup %5217  ;;  %4831 = vmatpush3.bf16.xpose.msra.mxu0 %v1847_v18  ;;  %v1624_v52 = vmul.f32 %v5216_v51, %v6185_v1 }
 0x4d2   : > { %v5220_v42 = vpop.eup %5219  ;;  %v1626_v53 = vmul.f32 %v5218_v20, %v6179_v54 }
 0x4d3   : > { %v1764_v46 = vpop.permute.xlu1 %1763  ;;  %v1770_v24 = vpop.permute.xlu0 %1769  ;;  %v1625_v56 = vmul.f32 %v5220_v42, %v6194_v10 }
 0x4d4   : > { %v5222_v57 = vpop.eup %5221  ;;  %v1637_v2 = vpack.c.bf16 %v1627_v43, %v1626_v53 }
 0x4d5   : > { %v1636_v63 = vpack.c.bf16 %v1625_v56, %v1624_v52  ;;  %v1628_v6 = vmul.f32 %v5222_v57, %v6182_v16 }
 0x4d6   : > { %v5224_v59 = vpop.eup %5223 }
 0x4d7   : > { %v5226_v60 = vpop.eup %5225  ;;  %v1768_v61 = vpop.permute.xlu1 %1767  ;;  %4808 = vmatprep.mubr.bf16.mxu0 %v1636_v63  ;;  %v1629_v34 = vmul.f32 %v5224_v59, %v6197_v36 }
 0x4d8   : > { %v1774_v29 = vpop.permute.xlu0 %1773  ;;  %4809 = vmatmul.mubr.bf16.gmra.mrb[40].mxu0 %v1637_v2  ;;  %v5228_v22 = vpop.eup %5227  ;;  %v1631_v1 = vmul.f32 %v5226_v60, %v6190_v55 }
 0x4d9   : > { %v1638_v5 = vpack.c.bf16 %v1629_v34, %v1628_v6  ;;  %v1630_v54 = vmul.f32 %v5228_v22, %v6175_v19 }
 0x4db   : > { %v1772_v10 = vpop.permute.xlu1 %1771  ;;  %4812 = vmatprep.mubr.bf16.mxu0 %v1638_v5  ;;  %v1639_v25 = vpack.c.bf16 %v1631_v1, %v1630_v54 }
 0x4dc   : > { %v2107_v7 = vpop.permute.xlu0 %2106 }
 0x4dd   : > { %4848 = vmatprep.subr.bf16.mxu1 %v2107_v7 }
 0x4de   : > { %4849 = vmatpush3.bf16.msra.mxu1 %v2107_v7 }
 0x4df   : > { %v1776_v15 = vpop.permute.xlu1 %1775 }
 0x4e0   : > { %4813 = vmatmul.mubr.bf16.gmra.mrb[44].mxu0 %v1639_v25  ;;  %v2111_v36 = vpop.permute.xlu0 %2110 }
 0x4e1   : > { %4832 = vmatprep.mubr.msk.bf16.mxu0 %vm1342_vm1, %v1762_v35 }
 0x4e3   : > { %v2109_v16 = vpop.permute.xlu1 %2108 }
 0x4e4   : > { %4850 = vmatprep.subr.bf16.mxu1 %v2109_v16  ;;  %v2115_v3 = vpop.permute.xlu0 %2114 }
 0x4e5   : > { %4851 = vmatpush3.bf16.msra.mxu1 %v2109_v16 }
 0x4e6   : > { %4852 = vmatprep.subr.bf16.mxu1 %v2111_v36 }
 0x4e7   : > { %v2113_v55 = vpop.permute.xlu1 %2112 }
 0x4e8   : > { %4833 = vmatmul.mubr.msk.bf16.vlgmr.msra.gmra.mrb[48].mxu0 %vm1342_vm1, %v1764_v46  ;;  %v2119_v58 = vpop.permute.xlu0 %2118 }
 0x4e9   : > { %4836 = vmatprep.mubr.msk.bf16.mxu0 %vm1342_vm1, %v1766_v30  ;;  %4853 = vmatpush3.bf16.msra.mxu1 %v2111_v36 }
 0x4ea   : > { %4854 = vmatprep.subr.bf16.mxu1 %v2113_v55 }
 0x4eb   : > { %v2117_v19 = vpop.permute.xlu1 %2116 }
 0x4ec   : > { %v6283_v12 = vpop.permute.xlu0 %2292 }
 0x4ed   : > { %4855 = vmatpush3.bf16.msra.mxu1 %v2113_v55 }
 0x4ee   : > { %4856 = vmatprep.subr.bf16.mxu1 %v2115_v3 }
 0x4ef   : > { %v2121_v4 = vpop.permute.xlu1 %2120 }
 0x4f0   : > { %4837 = vmatmul.mubr.msk.bf16.gmra.mrb[52].mxu0 %vm1342_vm1, %v1768_v61 }
 0x4f1   : > { %4840 = vmatprep.mubr.msk.bf16.mxu0 %vm1342_vm1, %v1770_v24  ;;  %4857 = vmatpush3.bf16.msra.mxu1 %v2115_v3 }
 0x4f2   : > { %4858 = vmatprep.subr.bf16.mxu1 %v2117_v19 }
 0x4f5   : > { %4859 = vmatpush3.bf16.msra.mxu1 %v2117_v19 }
 0x4f6   : > { %4860 = vmatprep.subr.bf16.mxu1 %v2119_v58 }
 0x4f8   : > { %4841 = vmatmul.mubr.msk.bf16.gmra.mrb[56].mxu0 %vm1342_vm1, %v1772_v10 }
 0x4f9   : > { %4844 = vmatprep.mubr.msk.bf16.mxu0 %vm1342_vm1, %v1774_v29  ;;  %4861 = vmatpush3.bf16.msra.mxu1 %v2119_v58 }
 0x4fa   : > { %4862 = vmatprep.subr.bf16.mxu1 %v2121_v4 }
 0x4fd   : > { %4863 = vmatpush3.bf16.msra.mxu1 %v2121_v4 }
 0x4fe   : > { %5088 = vmatprep.subr.msk.bf16.mxu1 %vm1342_vm1, %v6283_v12 }
 0x500   : > { %4845 = vmatmul.mubr.msk.bf16.gmra.mrb[60].mxu0 %vm1342_vm1, %v1776_v15 }
 0x562   : > { %v4802_v35 = vpop.f32.mrb[32].mxu0 }
 0x563   : > { %v1674_v14 = vpop.f32.mrb[33].mxu0 }
 0x564   : > { %v4803_v13 = vpop.f32.mrb[34].mxu0 }
 0x565   : > { %v1738_v30 = vpack.c.bf16 %v4803_v13, %v4802_v35  ;;  %v1677_v51 = vpop.f32.mrb[35].mxu0 }
 0x566   : > { %v1737_v18 = vpack.c.bf16 %v1677_v51, %v1674_v14 }
 0x567   : > { %1746 = vst.msk [vmem:[#allocation2 + $0x8] sm:$0xff] %vm1342_vm1, %v1738_v30 }
 0x568   : > { %1745 = vst.msk [vmem:[#allocation2] sm:$0xff] %vm1342_vm1, %v1737_v18 }
 0x59a   : > { %v4806_v20 = vpop.f32.mrb[36].mxu0 }
 0x59b   : > { %v1690_v42 = vpop.f32.mrb[37].mxu0 }
 0x59c   : > { %v4807_v43 = vpop.f32.mrb[38].mxu0 }
 0x59d   : > { %v1740_v46 = vpack.c.bf16 %v4807_v43, %v4806_v20  ;;  %v1693_v24 = vpop.f32.mrb[39].mxu0 }
 0x59e   : > { %v1739_v52 = vpack.c.bf16 %v1693_v24, %v1690_v42 }
 0x59f   : > { %1748 = vst.msk [vmem:[#allocation2 + $0x18] sm:$0xff] %vm1342_vm1, %v1740_v46 }
 0x5a0   : > { %1747 = vst.msk [vmem:[#allocation2 + $0x10] sm:$0xff] %vm1342_vm1, %v1739_v52 }
 0x5ab   : > { %v4810_v56 = vpop.f32.mrb[40].mxu0 }
 0x5ac   : > { %v1706_v57 = vpop.f32.mrb[41].mxu0 }
 0x5ad   : > { %v4811_v53 = vpop.f32.mrb[42].mxu0 }
 0x5ae   : > { %v1742_v63 = vpack.c.bf16 %v4811_v53, %v4810_v56  ;;  %v1709_v59 = vpop.f32.mrb[43].mxu0 }
 0x5af   : > { %v1741_v2 = vpack.c.bf16 %v1709_v59, %v1706_v57 }
 0x5b0   : > { %1750 = vst.msk [vmem:[#allocation2 + $0x28] sm:$0xff] %vm1342_vm1, %v1742_v63 }
 0x5b1   : > { %1749 = vst.msk [vmem:[#allocation2 + $0x20] sm:$0xff] %vm1342_vm1, %v1741_v2 }
 0x5b3   : > { %v4814_v60 = vpop.f32.mrb[44].mxu0 }
 0x5b4   : > { %v1722_v61 = vpop.f32.mrb[45].mxu0 }
 0x5b5   : > { %v4815_v29 = vpop.f32.mrb[46].mxu0 }
 0x5b6   : > { %v1744_v6 = vpack.c.bf16 %v4815_v29, %v4814_v60  ;;  %v1725_v34 = vpop.f32.mrb[47].mxu0  ;;  %v6352_v60 = vpop.permute.xlu1 %2294 }
 0x5b7   : > { %v1743_v22 = vpack.c.bf16 %v1725_v34, %v1722_v61 }
 0x5b8   : > { %1752 = vst.msk [vmem:[#allocation2 + $0x38] sm:$0xff] %vm1342_vm1, %v1744_v6 }
 0x5b9   : > { %1751 = vst.msk [vmem:[#allocation2 + $0x30] sm:$0xff] %vm1342_vm1, %v1743_v22 }
 0x5bb   : > { %v4834_v5 = vpop.f32.mrb[48].mxu0 }
 0x5bc   : > { %v1892_v1 = vadd.f32 %v4834_v5, %v6074_v62  ;;  %v1883_v10 = vpop.f32.mrb[49].mxu0 }
 0x5bd   : > { %v4835_v7 = vpop.f32.mrb[50].mxu0  ;;  %v1884_v15 = vadd.f32 %v1883_v10, %v6074_v62 }
 0x5be   : > { %1950 = vmax.xlane.f32.xlu0 %v1892_v1  ;;  %v1886_v54 = vpop.f32.mrb[51].mxu0  ;;  %v1895_v36 = vadd.f32 %v4835_v7, %v6074_v62 }
 0x5bf   : > { %v1887_v25 = vadd.f32 %v1886_v54, %v6074_v62 }
 0x5c1   : > { %1948 = vmax.xlane.f32.xlu1 %v1887_v25 }
 0x5c2   : > { %1946 = vmax.xlane.f32.xlu0 %v1884_v15 }
 0x5c3   : > { %v4838_v16 = vpop.f32.mrb[52].mxu0 }
 0x5c4   : > { %v1899_v55 = vpop.f32.mrb[53].mxu0  ;;  %v6304_v4 = vadd.f32 %v4838_v16, %v6074_v62 }
 0x5c5   : > { %v4839_v3 = vpop.f32.mrb[54].mxu0  ;;  %v6312_v13 = vadd.f32 %v1899_v55, %v6074_v62 }
 0x5c6   : > { %v6301_v19 = vadd.f32 %v4839_v3, %v6074_v62  ;;  %1952 = vmax.xlane.f32.xlu0 %v1895_v36  ;;  %v1902_v58 = vpop.f32.mrb[55].mxu0 }
 0x5c7   : > { %v6308_v35 = vadd.f32 %v1902_v58, %v6074_v62 }
 0x5c8   : > { %1960 = vmax.xlane.f32.xlu1 %v6301_v19 }
 0x5ca   : > { %1958 = vmax.xlane.f32.xlu0 %v6304_v4 }
 0x5cb   : > { %v4842_v14 = vpop.f32.mrb[56].mxu0 }
 0x5cc   : > { %1956 = vmax.xlane.f32.xlu1 %v6308_v35  ;;  %v1915_v30 = vpop.f32.mrb[57].mxu0  ;;  %v6320_v42 = vadd.f32 %v4842_v14, %v6074_v62 }
 0x5cd   : > { %v4843_v51 = vpop.f32.mrb[58].mxu0  ;;  %v6328_v24 = vadd.f32 %v1915_v30, %v6074_v62 }
 0x5ce   : > { %v6316_v18 = vadd.f32 %v4843_v51, %v6074_v62  ;;  %1954 = vmax.xlane.f32.xlu0 %v6312_v13  ;;  %v1918_v20 = vpop.f32.mrb[59].mxu0 }
 0x5cf   : > { %v6324_v43 = vadd.f32 %v1918_v20, %v6074_v62 }
 0x5d0   : > { %1968 = vmax.xlane.f32.xlu1 %v6316_v18 }
 0x5d2   : > { %1966 = vmax.xlane.f32.xlu0 %v6320_v42 }
 0x5d3   : > { %v4846_v46 = vpop.f32.mrb[60].mxu0 }
 0x5d4   : > { %1964 = vmax.xlane.f32.xlu1 %v6324_v43  ;;  %v1931_v52 = vpop.f32.mrb[61].mxu0  ;;  %v6333_v53 = vadd.f32 %v4846_v46, %v6074_v62 }
 0x5d5   : > { %v4847_v56 = vpop.f32.mrb[62].mxu0  ;;  %v6337_v63 = vadd.f32 %v1931_v52, %v6074_v62 }
 0x5d6   : > { %1962 = vmax.xlane.f32.xlu0 %v6328_v24  ;;  %v1934_v57 = vpop.f32.mrb[63].mxu0  ;;  %v6345_v59 = vadd.f32 %v4847_v56, %v6074_v62 }
 0x5d7   : > { %v6349_v2 = vadd.f32 %v1934_v57, %v6074_v62 }
 0x5da   : > { %1974 = vmax.xlane.f32.xlu0 %v6333_v53 }
 0x5de   : > { %1970 = vmax.xlane.f32.xlu0 %v6337_v63 }
 0x5e5   : > { %2298 = vrot.lane.b32.xlu1 %v5953_v44, %s5511_s25 }
 0x5f4   : > { %2296 = vrot.lane.b32.xlu0 %v5957_v23, %s5511_s25 }
 0x609   : > { %1976 = vmax.xlane.f32.xlu1 %v6345_v59 }
 0x60d   : > { %1972 = vmax.xlane.f32.xlu1 %v6349_v2 }
 0x64b   : > { %v1951_v61 = vpop.xlane.xlu0 %1950 }
 0x64c   : > { %v1980_v29 = vsub.f32 %v1892_v1, %v1951_v61 }
 0x64e   : > { %v1998_v6 = vmul.f32 1.442695, %v1980_v29  ;;  %v1949_v34 = vpop.xlane.xlu1 %1948 }
 0x64f   : > { %v1979_v22 = vsub.f32 %v1887_v25, %v1949_v34  ;;  %v1947_v5 = vpop.xlane.xlu0 %1946 }
 0x650   : > { %5229 = vpow2.f32 %v1998_v6  ;;  %v1978_v10 = vsub.f32 %v1884_v15, %v1947_v5 }
 0x651   : > { %v1996_v7 = vmul.f32 1.442695, %v1979_v22 }
 0x652   : > { %v1994_v54 = vmul.f32 1.442695, %v1978_v10 }
 0x653   : > { %5231 = vpow2.f32 %v1996_v7  ;;  %v1953_v16 = vpop.xlane.xlu0 %1952 }
 0x654   : > { %5233 = vpow2.f32 %v1994_v54  ;;  %v1981_v55 = vsub.f32 %v1895_v36, %v1953_v16 }
 0x655   : > { %v1961_v30 = vpop.xlane.xlu1 %1960 }
 0x656   : > { %v2000_v3 = vmul.f32 1.442695, %v1981_v55  ;;  %v1985_v34 = vsub.f32 %v6301_v19, %v1961_v30 }
 0x657   : > { %v1959_v15 = vpop.xlane.xlu0 %1958 }
 0x658   : > { %5235 = vpow2.f32 %v2000_v3  ;;  %v1984_v20 = vsub.f32 %v6304_v4, %v1959_v15  ;;  %v2008_v7 = vmul.f32 1.442695, %v1985_v34 }
 0x659   : > { %v1957_v46 = vpop.xlane.xlu1 %1956 }
 0x65a   : > { %v6354_v58 = vpop.eup %5229  ;;  %v2006_v56 = vmul.f32 1.442695, %v1984_v20  ;;  %v1983_v61 = vsub.f32 %v6308_v35, %v1957_v46 }
 0x65b   : > { %2030 = vadd.xlane.f32.xlu1 %v6354_v58  ;;  %v1955_v36 = vpop.xlane.xlu0 %1954 }
 0x65c   : > { %v1982_v57 = vsub.f32 %v6312_v13, %v1955_v36  ;;  %5237 = vpow2.f32 %v2006_v56  ;;  %v2004_v5 = vmul.f32 1.442695, %v1983_v61 }
 0x65d   : > { %v6357_v14 = vpop.eup %5231  ;;  %v1969_v29 = vpop.xlane.xlu1 %1968 }
 0x65e   : > { %v6359_v1 = vpop.eup %5233  ;;  %2028 = vadd.xlane.f32.xlu0 %v6357_v14  ;;  %v2002_v22 = vmul.f32 1.442695, %v1982_v57  ;;  %v1989_v19 = vsub.f32 %v6316_v18, %v1969_v29 }
 0x65f   : > { %2026 = vadd.xlane.f32.xlu1 %v6359_v1  ;;  %v1967_v51 = vpop.xlane.xlu0 %1966 }
 0x660   : > { %v1988_v10 = vsub.f32 %v6320_v42, %v1967_v51  ;;  %5239 = vpow2.f32 %v2002_v22  ;;  %v2016_v30 = vmul.f32 1.442695, %v1989_v19 }
 0x661   : > { %v1965_v54 = vpop.xlane.xlu1 %1964  ;;  %5241 = vpow2.f32 %v2004_v5 }
 0x662   : > { %v6363_v25 = vpop.eup %5235  ;;  %v2014_v16 = vmul.f32 1.442695, %v1988_v10  ;;  %5243 = vpow2.f32 %v2008_v7 }
 0x663   : > { %2032 = vadd.xlane.f32.xlu1 %v6363_v25  ;;  %v1963_v52 = vpop.xlane.xlu0 %1962 }
 0x664   : > { %v1986_v13 = vsub.f32 %v6328_v24, %v1963_v52  ;;  %5245 = vpow2.f32 %v2014_v16  ;;  %v1987_v24 = vsub.f32 %v6324_v43, %v1965_v54 }
 0x665   : > { %v6381_v42 = vpop.permute.xlu1 %2298 }
 0x666   : > { %v2010_v15 = vmul.f32 1.442695, %v1986_v13  ;;  %v6379_v36 = vpop.eup %5237  ;;  %v2012_v46 = vmul.f32 1.442695, %v1987_v24 }
 0x667   : > { %v1975_v6 = vpop.xlane.xlu0 %1974 }
 0x668   : > { %v1992_v4 = vsub.f32 %v6333_v53, %v1975_v6 }
 0x66a   : > { %v2022_v35 = vmul.f32 1.442695, %v1992_v4  ;;  %v6385_v51 = vpop.eup %5239 }
 0x66b   : > { %v1971_v55 = vpop.xlane.xlu0 %1970 }
 0x66c   : > { %v1990_v3 = vsub.f32 %v6337_v63, %v1971_v55  ;;  %5247 = vpow2.f32 %v2022_v35  ;;  %v6387_v63 = vpop.eup %5241 }
 0x66d   : > { %5249 = vpow2.f32 %v2010_v15  ;;  %v6392_v56 = vpop.eup %5243 }
 0x66e   : > { %v2018_v53 = vmul.f32 1.442695, %v1990_v3  ;;  %v6394_v43 = vpop.eup %5245 }
 0x66f   : > { %v2297_v7 = vpop.permute.xlu0 %2296 }
 0x670   : > { %5251 = vpow2.f32 %v2018_v53 }
 0x671   : > { %5253 = vpow2.f32 %v2016_v30 }
 0x674   : > { %2300 = vrot.lane.b32.xlu0 %v5977_v45, %s5511_s25  ;;  %2302 = vrot.lane.b32.xlu1 %v5973_v47, %s5511_s25 }
 0x676   : > { %v6399_v29 = vpop.eup %5247 }
 0x677   : > { %v6401_v6 = vpop.eup %5249 }
 0x67a   : > { %v6405_v34 = vpop.eup %5251 }
 0x67b   : > { %v6407_v22 = vpop.eup %5253 }
 0x693   : > { %2038 = vadd.xlane.f32.xlu0 %v6379_v36 }
 0x696   : > { %v1977_v20 = vpop.xlane.xlu1 %1976 }
 0x697   : > { %v1993_v18 = vsub.f32 %v6345_v59, %v1977_v20  ;;  %2034 = vadd.xlane.f32.xlu0 %v6385_v51  ;;  %v2333_v20 = vsel %vm1342_vm1, %v6283_v12, 0 }
 0x698   : > { %2036 = vadd.xlane.f32.xlu1 %v6387_v63 }
 0x699   : > { %v2024_v52 = vmul.f32 1.442695, %v1993_v18 }
 0x69a   : > { %v1973_v57 = vpop.xlane.xlu1 %1972 }
 0x69b   : > { %5255 = vpow2.f32 %v2024_v52  ;;  %v1991_v61 = vsub.f32 %v6349_v2, %v1973_v57  ;;  %2040 = vadd.xlane.f32.xlu0 %v6392_v56 }
 0x69c   : > { %2046 = vadd.xlane.f32.xlu1 %v6394_v43  ;;  %5257 = vpow2.f32 %v2012_v46 }
 0x69d   : > { %v2020_v59 = vmul.f32 1.442695, %v1991_v61 }
 0x69f   : > { %2054 = vadd.xlane.f32.xlu0 %v6399_v29  ;;  %5259 = vpow2.f32 %v2020_v59 }
 0x6a0   : > { %2042 = vadd.xlane.f32.xlu1 %v6401_v6 }
 0x6a3   : > { %2050 = vadd.xlane.f32.xlu0 %v6405_v34 }
 0x6a4   : > { %2048 = vadd.xlane.f32.xlu1 %v6407_v22 }
 0x6a5   : > { %v6411_v2 = vpop.eup %5255 }
 0x6a6   : > { %v6413_v5 = vpop.eup %5257 }
 0x6a7   : > { %2056 = vadd.xlane.f32.xlu0 %v6411_v2 }
 0x6a8   : > { %2044 = vadd.xlane.f32.xlu1 %v6413_v5 }
 0x6a9   : > { %v6417_v10 = vpop.eup %5259 }
 0x6ac   : > { %2052 = vadd.xlane.f32.xlu1 %v6417_v10 }
 0x6bd   : > { %2306 = vrot.lane.b32.xlu1 %v5993_v39, %s5511_s25  ;;  %2304 = vrot.lane.b32.xlu0 %v5997_v41, %s5511_s25 }
 0x6c1   : > { %2278 = vrot.lane.b32.xlu1 %v5923_v31, %s5511_s25  ;;  %2276 = vrot.lane.b32.xlu0 %v5927_v32, %s5511_s25 }
 0x6c5   : > { %2282 = vrot.lane.b32.xlu1 %v5951_v28, %s5511_s25  ;;  %2280 = vrot.lane.b32.xlu0 %v5955_v11, %s5511_s25 }
 0x6c9   : > { %2286 = vrot.lane.b32.xlu1 %v5971_v21, %s5511_s25  ;;  %2284 = vrot.lane.b32.xlu0 %v5975_v8, %s5511_s25 }
 0x6cd   : > { %2290 = vrot.lane.b32.xlu1 %v5991_v38, %s5511_s25  ;;  %2288 = vrot.lane.b32.xlu0 %v5995_v40, %s5511_s25 }
 0x6d1   : > { %2607 = vrot.lane.b32.xlu1 %v6006_v49, %s5511_s25  ;;  %2605 = vrot.lane.b32.xlu0 %v6008_v50, %s5511_s25 }
 0x6d5   : > { %2611 = vrot.lane.b32.xlu1 %v6017_v17, %s5511_s25  ;;  %2609 = vrot.lane.b32.xlu0 %v6020_v37, %s5511_s25 }
 0x6d9   : > { %2615 = vrot.lane.b32.xlu1 %v6029_v48, %s5511_s25  ;;  %2613 = vrot.lane.b32.xlu0 %v6032_v9, %s5511_s25 }
 0x6dd   : > { %2619 = vrot.lane.b32.xlu1 %v6041_v26, %s5511_s25  ;;  %2617 = vrot.lane.b32.xlu0 %v6044_v27, %s5511_s25 }
 0x6e1   : > { %2793 = vrot.lane.b32.xlu1 %v5925_v0, %s5512_s26  ;;  %2791 = vrot.lane.b32.xlu0 %v5929_v33, %s5512_s26 }
 0x6e8   : > { %v2031_v54 = vpop.xlane.xlu1 %2030 }
 0x6eb   : > { %v2029_v4 = vpop.xlane.xlu0 %2028 }
 0x6ec   : > { %5261 = vrcp.f32 %v2029_v4  ;;  %v2027_v16 = vpop.xlane.xlu1 %2026 }
 0x6ed   : > { %5263 = vrcp.f32 %v2027_v16 }
 0x6ee   : > { %5265 = vrcp.f32 %v2031_v54 }
 0x6ef   : > { %v2301_v12 = vpop.permute.xlu0 %2300 }
 0x6f0   : > { %v2033_v13 = vpop.xlane.xlu1 %2032 }
 0x6f1   : > { %5267 = vrcp.f32 %v2033_v13 }
 0x6f6   : > { %v5262_v55 = vpop.eup %5261 }
 0x6f7   : > { %v5264_v35 = vpop.eup %5263  ;;  %v2075_v3 = vmul.f32 %v5262_v55, %v6357_v14  ;;  %v2336_v14 = vsel %vm1342_vm1, %v6352_v60, 0 }
 0x6f8   : > { %v2074_v19 = vmul.f32 %v5264_v35, %v6359_v1  ;;  %v5266_v15 = vpop.eup %5265  ;;  %v2342_v1 = vsel %vm1342_vm1, %v6381_v42, 0 }
 0x6f9   : > { %v2076_v33 = vmul.f32 %v5266_v15, %v6354_v58  ;;  %v2339_v58 = vsel %vm1342_vm1, %v2297_v7, 0 }
 0x6fa   : > { %v2090_v0 = vpack.c.bf16 %v2075_v3, %v2074_v19 }
 0x6fb   : > { %v5268_v53 = vpop.eup %5267 }
 0x6fc   : > { %v2077_v30 = vmul.f32 %v5268_v53, %v6363_v25  ;;  %4864 = vmatprep.mubr.bf16.mxu1 %v2090_v0  ;;  %v2345_v25 = vsel %vm1342_vm1, %v2301_v12, 0 }
 0x6fe   : > { %v2091_v24 = vpack.c.bf16 %v2077_v30, %v2076_v33 }
 0x700   : > { %4865 = vmatmul.mubr.bf16.vlgmr.msra.gmra.mrb[32].mxu1 %v2091_v24 }
 0x701   : > { %4881 = vmatpush3.bf16.xpose.msra.mxu1 %v2333_v20 }
 0x702   : > { %5089 = vmatprep.subr.msk.bf16.mxu1 %vm1342_vm1, %v6352_v60  ;;  %v2303_v60 = vpop.permute.xlu1 %2302 }
 0x703   : > { %v2348_v57 = vsel %vm1342_vm1, %v2303_v60, 0 }
 0x709   : > { %4883 = vmatpush3.bf16.xpose.msra.mxu1 %v2336_v14 }
 0x70a   : > { %5090 = vmatprep.subr.msk.bf16.mxu1 %vm1342_vm1, %v2297_v7 }
 0x711   : > { %4885 = vmatpush3.bf16.xpose.msra.mxu1 %v2339_v58 }
 0x712   : > { %5091 = vmatprep.subr.msk.bf16.mxu1 %vm1342_vm1, %v6381_v42 }
 0x719   : > { %4887 = vmatpush3.bf16.xpose.msra.mxu1 %v2342_v1 }
 0x71a   : > { %5092 = vmatprep.subr.msk.bf16.mxu1 %vm1342_vm1, %v2301_v12 }
 0x720   : > { %v2039_v18 = vpop.xlane.xlu0 %2038 }
 0x721   : > { %4889 = vmatpush3.bf16.xpose.msra.mxu1 %v2345_v25 }
 0x722   : > { %5093 = vmatprep.subr.msk.bf16.mxu1 %vm1342_vm1, %v2303_v60 }
 0x724   : > { %v2035_v46 = vpop.xlane.xlu0 %2034 }
 0x725   : > { %5269 = vrcp.f32 %v2035_v46  ;;  %v2037_v52 = vpop.xlane.xlu1 %2036 }
 0x726   : > { %5271 = vrcp.f32 %v2037_v52 }
 0x727   : > { %5273 = vrcp.f32 %v2039_v18 }
 0x728   : > { %v2041_v61 = vpop.xlane.xlu0 %2040 }
 0x729   : > { %4891 = vmatpush3.bf16.xpose.msra.mxu1 %v2348_v57  ;;  %5275 = vrcp.f32 %v2041_v61  ;;  %v2047_v42 = vpop.xlane.xlu1 %2046 }
 0x72c   : > { %v2055_v59 = vpop.xlane.xlu0 %2054 }
 0x72d   : > { %v2043_v7 = vpop.xlane.xlu1 %2042 }
 0x72f   : > { %v5270_v54 = vpop.eup %5269 }
 0x730   : > { %v5272_v4 = vpop.eup %5271  ;;  %v2051_v16 = vpop.xlane.xlu0 %2050  ;;  %v2078_v13 = vmul.f32 %v5270_v54, %v6385_v51 }
 0x731   : > { %v5274_v55 = vpop.eup %5273  ;;  %v2049_v35 = vpop.xlane.xlu1 %2048  ;;  %v2079_v3 = vmul.f32 %v5272_v4, %v6387_v63 }
 0x732   : > { %5277 = vrcp.f32 %v2049_v35  ;;  %v2080_v53 = vmul.f32 %v5274_v55, %v6379_v36 }
 0x733   : > { %v5276_v19 = vpop.eup %5275  ;;  %v2092_v15 = vpack.c.bf16 %v2079_v3, %v2078_v13  ;;  %5279 = vrcp.f32 %v2043_v7 }
 0x734   : > { %v2057_v0 = vpop.xlane.xlu0 %2056  ;;  %v2081_v33 = vmul.f32 %v5276_v19, %v6392_v56  ;;  %5281 = vrcp.f32 %v2047_v42 }
 0x735   : > { %v2045_v30 = vpop.xlane.xlu1 %2044  ;;  %4868 = vmatprep.mubr.bf16.mxu1 %v2092_v15 }
 0x736   : > { %5283 = vrcp.f32 %v2045_v30  ;;  %v2093_v24 = vpack.c.bf16 %v2081_v33, %v2080_v53 }
 0x737   : > { %5285 = vrcp.f32 %v2051_v16 }
 0x738   : > { %4869 = vmatmul.mubr.bf16.gmra.mrb[36].mxu1 %v2093_v24  ;;  %v2305_v51 = vpop.permute.xlu0 %2304 }
 0x739   : > { %v2053_v20 = vpop.xlane.xlu1 %2052  ;;  %5094 = vmatprep.subr.msk.bf16.mxu1 %vm1342_vm1, %v2305_v51  ;;  %v2351_v63 = vsel %vm1342_vm1, %v2305_v51, 0 }
 0x73a   : > { %5287 = vrcp.f32 %v2053_v20  ;;  %4893 = vmatpush3.bf16.xpose.msra.mxu1 %v2351_v63 }
 0x73b   : > { %5289 = vrcp.f32 %v2057_v0 }
 0x73c   : > { %v2277_v14 = vpop.permute.xlu0 %2276  ;;  %v5278_v36 = vpop.eup %5277  ;;  %5291 = vrcp.f32 %v2055_v59 }
 0x73d   : > { %v2307_v56 = vpop.permute.xlu1 %2306  ;;  %v5280_v58 = vpop.eup %5279  ;;  %v2085_v18 = vmul.f32 %v5278_v36, %v6407_v22 }
 0x73e   : > { %5095 = vmatprep.subr.msk.bf16.mxu1 %vm1342_vm1, %v2307_v56  ;;  %v5282_v1 = vpop.eup %5281  ;;  %v2354_v46 = vsel %vm1342_vm1, %v2307_v56, 0  ;;  %v2082_v52 = vmul.f32 %v5280_v58, %v6401_v6 }
 0x73f   : > { %v2084_v42 = vmul.f32 %v5282_v1, %v6394_v43 }
 0x740   : > { %v5284_v12 = vpop.eup %5283  ;;  %v2281_v25 = vpop.permute.xlu0 %2280 }
 0x741   : > { %v2279_v60 = vpop.permute.xlu1 %2278  ;;  %v2083_v57 = vmul.f32 %v5284_v12, %v6413_v5  ;;  %v5286_v61 = vpop.eup %5285  ;;  %v2095_v4 = vpack.c.bf16 %v2085_v18, %v2084_v42 }
 0x742   : > { %4895 = vmatpush3.bf16.xpose.msra.mxu1 %v2354_v46  ;;  %v2086_v22 = vmul.f32 %v5286_v61, %v6405_v34 }
 0x743   : > { %v2094_v59 = vpack.c.bf16 %v2083_v57, %v2082_v52 }
 0x744   : > { %v5288_v7 = vpop.eup %5287  ;;  %v2285_v54 = vpop.permute.xlu0 %2284 }
 0x745   : > { %v5290_v16 = vpop.eup %5289  ;;  %v2283_v13 = vpop.permute.xlu1 %2282  ;;  %4872 = vmatprep.mubr.bf16.mxu1 %v2094_v59  ;;  %v2087_v55 = vmul.f32 %v5288_v7, %v6417_v10 }
 0x746   : > { %4873 = vmatmul.mubr.bf16.gmra.mrb[40].mxu1 %v2095_v4  ;;  %v5292_v35 = vpop.eup %5291  ;;  %v2089_v5 = vmul.f32 %v5290_v16, %v6411_v2 }
 0x747   : > { %v2096_v6 = vpack.c.bf16 %v2087_v55, %v2086_v22  ;;  %v2088_v43 = vmul.f32 %v5292_v35, %v6399_v29 }
 0x748   : > { %v2289_v3 = vpop.permute.xlu0 %2288 }
 0x749   : > { %v2287_v19 = vpop.permute.xlu1 %2286  ;;  %4876 = vmatprep.mubr.bf16.mxu1 %v2096_v6  ;;  %v2097_v0 = vpack.c.bf16 %v2089_v5, %v2088_v43 }
 0x74c   : > { %v2606_v15 = vpop.permute.xlu0 %2605 }
 0x74d   : > { %v2291_v53 = vpop.permute.xlu1 %2290  ;;  %4912 = vmatprep.subr.bf16.mxu0 %v2606_v15 }
 0x74e   : > { %4877 = vmatmul.mubr.bf16.gmra.mrb[44].mxu1 %v2097_v0  ;;  %4913 = vmatpush3.bf16.msra.mxu0 %v2606_v15 }
 0x74f   : > { %4896 = vmatprep.mubr.msk.bf16.mxu1 %vm1342_vm1, %v2277_v14 }
 0x750   : > { %v2610_v10 = vpop.permute.xlu0 %2609 }
 0x751   : > { %v2608_v34 = vpop.permute.xlu1 %2607 }
 0x752   : > { %4914 = vmatprep.subr.bf16.mxu0 %v2608_v34 }
 0x753   : > { %4915 = vmatpush3.bf16.msra.mxu0 %v2608_v34 }
 0x754   : > { %4916 = vmatprep.subr.bf16.mxu0 %v2610_v10  ;;  %v2614_v29 = vpop.permute.xlu0 %2613 }
 0x755   : > { %v2612_v2 = vpop.permute.xlu1 %2611 }
 0x756   : > { %4897 = vmatmul.mubr.msk.bf16.vlgmr.msra.gmra.mrb[48].mxu1 %vm1342_vm1, %v2279_v60 }
 0x757   : > { %4900 = vmatprep.mubr.msk.bf16.mxu1 %vm1342_vm1, %v2281_v25  ;;  %4917 = vmatpush3.bf16.msra.mxu0 %v2610_v10 }
 0x758   : > { %4918 = vmatprep.subr.bf16.mxu0 %v2612_v2  ;;  %v2618_v30 = vpop.permute.xlu0 %2617 }
 0x759   : > { %v2616_v33 = vpop.permute.xlu1 %2615 }
 0x75b   : > { %4919 = vmatpush3.bf16.msra.mxu0 %v2612_v2 }
 0x75c   : > { %4920 = vmatprep.subr.bf16.mxu0 %v2614_v29  ;;  %v6503_v51 = vpop.permute.xlu0 %2791 }
 0x75d   : > { %v2620_v24 = vpop.permute.xlu1 %2619 }
 0x75e   : > { %4901 = vmatmul.mubr.msk.bf16.gmra.mrb[52].mxu1 %vm1342_vm1, %v2283_v13 }
 0x75f   : > { %4904 = vmatprep.mubr.msk.bf16.mxu1 %vm1342_vm1, %v2285_v54  ;;  %4921 = vmatpush3.bf16.msra.mxu0 %v2614_v29 }
 0x760   : > { %4922 = vmatprep.subr.bf16.mxu0 %v2616_v33 }
 0x763   : > { %4923 = vmatpush3.bf16.msra.mxu0 %v2616_v33 }
 0x764   : > { %4924 = vmatprep.subr.bf16.mxu0 %v2618_v30 }
 0x766   : > { %4905 = vmatmul.mubr.msk.bf16.gmra.mrb[56].mxu1 %vm1342_vm1, %v2287_v19 }
 0x767   : > { %4908 = vmatprep.mubr.msk.bf16.mxu1 %vm1342_vm1, %v2289_v3  ;;  %4925 = vmatpush3.bf16.msra.mxu0 %v2618_v30 }
 0x768   : > { %4926 = vmatprep.subr.bf16.mxu0 %v2620_v24 }
 0x76b   : > { %4927 = vmatpush3.bf16.msra.mxu0 %v2620_v24 }
 0x76c   : > { %5096 = vmatprep.subr.msk.bf16.mxu0 %vm1342_vm1, %v6503_v51 }
 0x76e   : > { %4909 = vmatmul.mubr.msk.bf16.gmra.mrb[60].mxu1 %vm1342_vm1, %v2291_v53 }
 0x7d3   : > { %v6508_v20 = vpop.f32.mrb[32].mxu1 }
 0x7d4   : > { %v6510_v63 = vpop.f32.mrb[33].mxu1 }
 0x7d5   : > { %v6512_v14 = vpop.f32.mrb[34].mxu1 }
 0x7d6   : > { %v6516_v56 = vpop.f32.mrb[35].mxu1 }
 0x80b   : > { %v6520_v1 = vpop.f32.mrb[36].mxu1 }
 0x80c   : > { %v6522_v12 = vpop.f32.mrb[37].mxu1 }
 0x80d   : > { %7658 = vst [vmem:[#allocation3_spill] sm:$0xff] %v6522_v12  ;;  %v6524_v25 = vpop.f32.mrb[38].mxu1 }
 0x80e   : > { %v6528_v60 = vpop.f32.mrb[39].mxu1 }
 0x819   : > { %v6532_v52 = vpop.f32.mrb[40].mxu1 }
 0x81a   : > { %v6534_v57 = vpop.f32.mrb[41].mxu1 }
 0x81b   : > { %7659 = vst [vmem:[#allocation4_spill] sm:$0xff] %v6534_v57  ;;  %v6536_v61 = vpop.f32.mrb[42].mxu1 }
 0x81c   : > { %v6540_v59 = vpop.f32.mrb[43].mxu1 }
 0x81d   : > { %7660 = vst [vmem:[#allocation5_spill] sm:$0xff] %v6540_v59 }
 0x821   : > { %v6544_v54 = vpop.f32.mrb[44].mxu1 }
 0x822   : > { %7661 = vst [vmem:[#allocation6_spill] sm:$0xff] %v6544_v54  ;;  %v6546_v4 = vpop.f32.mrb[45].mxu1 }
 0x823   : > { %7662 = vst [vmem:[#allocation7_spill] sm:$0xff] %v6546_v4  ;;  %v6548_v16 = vpop.f32.mrb[46].mxu1 }
 0x824   : > { %7663 = vst [vmem:[#allocation8_spill] sm:$0xff] %v6548_v16  ;;  %v6552_v22 = vpop.f32.mrb[47].mxu1 }
 0x825   : > { %7664 = vst [vmem:[#allocation9_spill] sm:$0xff] %v6552_v22 }
 0x829   : > { %v4898_v35 = vpop.f32.mrb[48].mxu1 }
 0x82a   : > { %v2399_v6 = vadd.f32 %v4898_v35, %v6074_v62  ;;  %v2390_v3 = vpop.f32.mrb[49].mxu1 }
 0x82b   : > { %v4899_v5 = vpop.f32.mrb[50].mxu1  ;;  %v2391_v15 = vadd.f32 %v2390_v3, %v6074_v62 }
 0x82c   : > { %2457 = vmax.xlane.f32.xlu0 %v2399_v6  ;;  %v2393_v19 = vpop.f32.mrb[51].mxu1  ;;  %v2402_v53 = vadd.f32 %v4899_v5, %v6074_v62 }
 0x82d   : > { %v2394_v43 = vadd.f32 %v2393_v19, %v6074_v62 }
 0x82f   : > { %2455 = vmax.xlane.f32.xlu1 %v2394_v43 }
 0x830   : > { %2453 = vmax.xlane.f32.xlu0 %v2391_v15 }
 0x831   : > { %v4902_v0 = vpop.f32.mrb[52].mxu1 }
 0x832   : > { %v2406_v34 = vpop.f32.mrb[53].mxu1  ;;  %v6564_v33 = vadd.f32 %v4902_v0, %v6074_v62 }
 0x833   : > { %v4903_v10 = vpop.f32.mrb[54].mxu1  ;;  %v6572_v35 = vadd.f32 %v2406_v34, %v6074_v62 }
 0x834   : > { %v6561_v2 = vadd.f32 %v4903_v10, %v6074_v62  ;;  %2459 = vmax.xlane.f32.xlu0 %v2402_v53  ;;  %v2409_v29 = vpop.f32.mrb[55].mxu1 }
 0x835   : > { %v6568_v30 = vadd.f32 %v2409_v29, %v6074_v62 }
 0x836   : > { %2467 = vmax.xlane.f32.xlu1 %v6561_v2 }
 0x838   : > { %2465 = vmax.xlane.f32.xlu0 %v6564_v33 }
 0x839   : > { %v4906_v24 = vpop.f32.mrb[56].mxu1 }
 0x83a   : > { %2463 = vmax.xlane.f32.xlu1 %v6568_v30  ;;  %v2422_v3 = vpop.f32.mrb[57].mxu1  ;;  %v6580_v10 = vadd.f32 %v4906_v24, %v6074_v62 }
 0x83b   : > { %v4907_v5 = vpop.f32.mrb[58].mxu1  ;;  %v6588_v55 = vadd.f32 %v2422_v3, %v6074_v62 }
 0x83c   : > { %v6576_v19 = vadd.f32 %v4907_v5, %v6074_v62  ;;  %2461 = vmax.xlane.f32.xlu0 %v6572_v35  ;;  %v2425_v0 = vpop.f32.mrb[59].mxu1 }
 0x83d   : > { %v6584_v29 = vadd.f32 %v2425_v0, %v6074_v62 }
 0x83e   : > { %2475 = vmax.xlane.f32.xlu1 %v6576_v19 }
 0x840   : > { %2473 = vmax.xlane.f32.xlu0 %v6580_v10 }
 0x841   : > { %v4910_v34 = vpop.f32.mrb[60].mxu1 }
 0x842   : > { %2471 = vmax.xlane.f32.xlu1 %v6584_v29  ;;  %v2438_v5 = vpop.f32.mrb[61].mxu1  ;;  %v6593_v24 = vadd.f32 %v4910_v34, %v6074_v62 }
 0x843   : > { %v4911_v13 = vpop.f32.mrb[62].mxu1  ;;  %v6597_v0 = vadd.f32 %v2438_v5, %v6074_v62  ;;  %v6612_v5 = vpop.permute.xlu1 %2793 }
 0x844   : > { %2469 = vmax.xlane.f32.xlu0 %v6588_v55  ;;  %v2441_v7 = vpop.f32.mrb[63].mxu1  ;;  %v6605_v3 = vadd.f32 %v4911_v13, %v6074_v62 }
 0x845   : > { %v6609_v34 = vadd.f32 %v2441_v7, %v6074_v62 }
 0x848   : > { %2481 = vmax.xlane.f32.xlu0 %v6593_v24 }
 0x84c   : > { %2477 = vmax.xlane.f32.xlu0 %v6597_v0 }
 0x853   : > { %2797 = vrot.lane.b32.xlu1 %v5953_v44, %s5512_s26 }
 0x862   : > { %2795 = vrot.lane.b32.xlu0 %v5957_v23, %s5512_s26 }
 0x877   : > { %2483 = vmax.xlane.f32.xlu1 %v6605_v3 }
 0x87b   : > { %2479 = vmax.xlane.f32.xlu1 %v6609_v34 }
 0x8b9   : > { %v2458_v46 = vpop.xlane.xlu0 %2457 }
 0x8ba   : > { %v2487_v58 = vsub.f32 %v2399_v6, %v2458_v46 }
 0x8bc   : > { %v2505_v42 = vmul.f32 1.442695, %v2487_v58  ;;  %v2456_v18 = vpop.xlane.xlu1 %2455 }
 0x8bd   : > { %v2486_v44 = vsub.f32 %v2394_v43, %v2456_v18  ;;  %v2454_v36 = vpop.xlane.xlu0 %2453 }
 0x8be   : > { %5293 = vpow2.f32 %v2505_v42  ;;  %v2485_v23 = vsub.f32 %v2391_v15, %v2454_v36 }
 0x8bf   : > { %v2503_v4 = vmul.f32 1.442695, %v2486_v44 }
 0x8c0   : > { %v2501_v13 = vmul.f32 1.442695, %v2485_v23 }
 0x8c1   : > { %5295 = vpow2.f32 %v2503_v4  ;;  %v2460_v22 = vpop.xlane.xlu0 %2459 }
 0x8c2   : > { %5297 = vpow2.f32 %v2501_v13  ;;  %v2488_v54 = vsub.f32 %v2402_v53, %v2460_v22 }
 0x8c3   : > { %v2468_v42 = vpop.xlane.xlu1 %2467 }
 0x8c4   : > { %v2507_v7 = vmul.f32 1.442695, %v2488_v54  ;;  %v2492_v13 = vsub.f32 %v6561_v2, %v2468_v42 }
 0x8c5   : > { %v2466_v18 = vpop.xlane.xlu0 %2465 }
 0x8c6   : > { %5299 = vpow2.f32 %v2507_v7  ;;  %v2491_v4 = vsub.f32 %v6564_v33, %v2466_v18  ;;  %v2515_v59 = vmul.f32 1.442695, %v2492_v13 }
 0x8c7   : > { %v2464_v22 = vpop.xlane.xlu1 %2463 }
 0x8c8   : > { %v6614_v16 = vpop.eup %5293  ;;  %v2513_v43 = vmul.f32 1.442695, %v2491_v4  ;;  %v2490_v53 = vsub.f32 %v6568_v30, %v2464_v22 }
 0x8c9   : > { %2537 = vadd.xlane.f32.xlu1 %v6614_v16  ;;  %v2462_v46 = vpop.xlane.xlu0 %2461 }
 0x8ca   : > { %v2489_v15 = vsub.f32 %v6572_v35, %v2462_v46  ;;  %5301 = vpow2.f32 %v2513_v43  ;;  %v2511_v7 = vmul.f32 1.442695, %v2490_v53 }
 0x8cb   : > { %v6617_v57 = vpop.eup %5295  ;;  %v2476_v44 = vpop.xlane.xlu1 %2475 }
 0x8cc   : > { %v6619_v58 = vpop.eup %5297  ;;  %2535 = vadd.xlane.f32.xlu0 %v6617_v57  ;;  %v2496_v2 = vsub.f32 %v6576_v19, %v2476_v44 }
 0x8cd   : > { %2533 = vadd.xlane.f32.xlu1 %v6619_v58  ;;  %v2474_v54 = vpop.xlane.xlu0 %2473 }
 0x8cf   : > { %v2472_v12 = vpop.xlane.xlu1 %2471 }
 0x8d0   : > { %v6623_v36 = vpop.eup %5299 }
 0x8d1   : > { %2539 = vadd.xlane.f32.xlu1 %v6623_v36  ;;  %v2470_v6 = vpop.xlane.xlu0 %2469 }
 0x8d2   : > { %v2493_v35 = vsub.f32 %v6588_v55, %v2470_v6  ;;  %v2494_v55 = vsub.f32 %v6584_v29, %v2472_v12 }
 0x8d4   : > { %v2517_v42 = vmul.f32 1.442695, %v2493_v35  ;;  %v6639_v22 = vpop.eup %5301  ;;  %v2519_v43 = vmul.f32 1.442695, %v2494_v55 }
 0x8d5   : > { %v2482_v23 = vpop.xlane.xlu0 %2481 }
 0x8d6   : > { %v2499_v33 = vsub.f32 %v6593_v24, %v2482_v23 }
 0x8d8   : > { %v2529_v30 = vmul.f32 1.442695, %v2499_v33 }
 0x8d9   : > { %v2478_v46 = vpop.xlane.xlu0 %2477 }
 0x8da   : > { %v2497_v4 = vsub.f32 %v6597_v0, %v2478_v46  ;;  %v2832_v46 = vsel %vm1342_vm1, %v6503_v51, 0 }
 0x8dc   : > { %v2525_v24 = vmul.f32 1.442695, %v2497_v4 }
 0x8e2   : > { %2799 = vrot.lane.b32.xlu0 %v5977_v45, %s5512_s26  ;;  %2801 = vrot.lane.b32.xlu1 %v5973_v47, %s5512_s26  ;;  %v2509_v45 = vmul.f32 1.442695, %v2489_v15  ;;  %v2495_v47 = vsub.f32 %v6580_v10, %v2474_v54  ;;  %v6641_v10 = vpop.permute.xlu1 %2797  ;;  %v2523_v54 = vmul.f32 1.442695, %v2496_v2 }
 0x8e4   : > { %5303 = vpow2.f32 %v2509_v45  ;;  %v2521_v18 = vmul.f32 1.442695, %v2495_v47 }
 0x8e5   : > { %5305 = vpow2.f32 %v2511_v7 }
 0x8e6   : > { %5307 = vpow2.f32 %v2515_v59 }
 0x8e7   : > { %5309 = vpow2.f32 %v2521_v18 }
 0x8e8   : > { %5311 = vpow2.f32 %v2529_v30 }
 0x8e9   : > { %5313 = vpow2.f32 %v2517_v42 }
 0x8ea   : > { %5315 = vpow2.f32 %v2525_v24 }
 0x8eb   : > { %5317 = vpow2.f32 %v2523_v54 }
 0x8ee   : > { %v6645_v59 = vpop.eup %5303 }
 0x8ef   : > { %v6647_v0 = vpop.eup %5305 }
 0x8f0   : > { %v6652_v53 = vpop.eup %5307 }
 0x8f1   : > { %v6654_v12 = vpop.eup %5309 }
 0x8f2   : > { %v6659_v23 = vpop.eup %5311 }
 0x8f3   : > { %v6661_v13 = vpop.eup %5313 }
 0x8f4   : > { %v6665_v45 = vpop.eup %5315 }
 0x8f5   : > { %v6667_v7 = vpop.eup %5317 }
 0x901   : > { %2545 = vadd.xlane.f32.xlu0 %v6639_v22 }
 0x904   : > { %v2484_v6 = vpop.xlane.xlu1 %2483 }
 0x905   : > { %v2500_v19 = vsub.f32 %v6605_v3, %v2484_v6  ;;  %2541 = vadd.xlane.f32.xlu0 %v6645_v59 }
 0x906   : > { %2543 = vadd.xlane.f32.xlu1 %v6647_v0 }
 0x907   : > { %v2531_v15 = vmul.f32 1.442695, %v2500_v19 }
 0x908   : > { %v2480_v44 = vpop.xlane.xlu1 %2479 }
 0x909   : > { %5319 = vpow2.f32 %v2531_v15  ;;  %v2498_v29 = vsub.f32 %v6609_v34, %v2480_v44  ;;  %2547 = vadd.xlane.f32.xlu0 %v6652_v53 }
 0x90a   : > { %2553 = vadd.xlane.f32.xlu1 %v6654_v12  ;;  %5321 = vpow2.f32 %v2519_v43 }
 0x90b   : > { %v2527_v3 = vmul.f32 1.442695, %v2498_v29 }
 0x90d   : > { %2561 = vadd.xlane.f32.xlu0 %v6659_v23  ;;  %5323 = vpow2.f32 %v2527_v3 }
 0x90e   : > { %2549 = vadd.xlane.f32.xlu1 %v6661_v13 }
 0x911   : > { %2557 = vadd.xlane.f32.xlu0 %v6665_v45 }
 0x912   : > { %2555 = vadd.xlane.f32.xlu1 %v6667_v7 }
 0x913   : > { %v6671_v34 = vpop.eup %5319 }
 0x914   : > { %v6673_v47 = vpop.eup %5321 }
 0x915   : > { %2563 = vadd.xlane.f32.xlu0 %v6671_v34 }
 0x916   : > { %2551 = vadd.xlane.f32.xlu1 %v6673_v47 }
 0x917   : > { %v6677_v33 = vpop.eup %5323 }
 0x91a   : > { %2559 = vadd.xlane.f32.xlu1 %v6677_v33 }
 0x92b   : > { %2805 = vrot.lane.b32.xlu1 %v5993_v39, %s5512_s26  ;;  %2803 = vrot.lane.b32.xlu0 %v5997_v41, %s5512_s26 }
 0x92f   : > { %2777 = vrot.lane.b32.xlu1 %v5923_v31, %s5512_s26  ;;  %2775 = vrot.lane.b32.xlu0 %v5927_v32, %s5512_s26  ;;  %v2796_v31 = vpop.permute.xlu0 %2795 }
 0x933   : > { %2781 = vrot.lane.b32.xlu1 %v5951_v28, %s5512_s26  ;;  %2779 = vrot.lane.b32.xlu0 %v5955_v11, %s5512_s26 }
 0x937   : > { %2785 = vrot.lane.b32.xlu1 %v5971_v21, %s5512_s26  ;;  %2783 = vrot.lane.b32.xlu0 %v5975_v8, %s5512_s26 }
 0x93b   : > { %2789 = vrot.lane.b32.xlu1 %v5991_v38, %s5512_s26  ;;  %2787 = vrot.lane.b32.xlu0 %v5995_v40, %s5512_s26 }
 0x93f   : > { %3106 = vrot.lane.b32.xlu1 %v6006_v49, %s5512_s26  ;;  %3104 = vrot.lane.b32.xlu0 %v6008_v50, %s5512_s26 }
 0x943   : > { %3108 = vrot.lane.b32.xlu0 %v6020_v37, %s5512_s26 }
 0x956   : > { %v2538_v32 = vpop.xlane.xlu1 %2537 }
 0x959   : > { %v2536_v28 = vpop.xlane.xlu0 %2535 }
 0x95a   : > { %5325 = vrcp.f32 %v2536_v28  ;;  %v2534_v11 = vpop.xlane.xlu1 %2533 }
 0x95b   : > { %5327 = vrcp.f32 %v2534_v11 }
 0x95c   : > { %5329 = vrcp.f32 %v2538_v32 }
 0x95d   : > { %v2800_v51 = vpop.permute.xlu0 %2799 }
 0x95e   : > { %v2540_v21 = vpop.xlane.xlu1 %2539 }
 0x95f   : > { %5331 = vrcp.f32 %v2540_v21 }
 0x964   : > { %v5326_v8 = vpop.eup %5325 }
 0x965   : > { %v5328_v38 = vpop.eup %5327  ;;  %v2582_v39 = vmul.f32 %v5326_v8, %v6617_v57  ;;  %v2835_v57 = vsel %vm1342_vm1, %v6612_v5, 0 }
 0x966   : > { %v2581_v40 = vmul.f32 %v5328_v38, %v6619_v58  ;;  %v5330_v41 = vpop.eup %5329  ;;  %v2841_v58 = vsel %vm1342_vm1, %v6641_v10, 0 }
 0x967   : > { %v2583_v37 = vmul.f32 %v5330_v41, %v6614_v16  ;;  %v2838_v16 = vsel %vm1342_vm1, %v2796_v31, 0 }
 0x968   : > { %v2597_v49 = vpack.c.bf16 %v2582_v39, %v2581_v40 }
 0x969   : > { %v5332_v50 = vpop.eup %5331 }
 0x96a   : > { %v2584_v18 = vmul.f32 %v5332_v50, %v6623_v36  ;;  %4928 = vmatprep.mubr.bf16.mxu0 %v2597_v49  ;;  %v2844_v36 = vsel %vm1342_vm1, %v2800_v51, 0 }
 0x96c   : > { %v2598_v35 = vpack.c.bf16 %v2584_v18, %v2583_v37 }
 0x96e   : > { %4929 = vmatmul.mubr.bf16.vlgmr.msra.gmra.mrb[64].mxu0 %v2598_v35 }
 0x96f   : > { %4945 = vmatpush3.bf16.xpose.msra.mxu0 %v2832_v46 }
 0x970   : > { %5097 = vmatprep.subr.msk.bf16.mxu0 %vm1342_vm1, %v6612_v5  ;;  %v2802_v5 = vpop.permute.xlu1 %2801 }
 0x971   : > { %v2847_v42 = vsel %vm1342_vm1, %v2802_v5, 0 }
 0x977   : > { %4947 = vmatpush3.bf16.xpose.msra.mxu0 %v2835_v57 }
 0x978   : > { %5098 = vmatprep.subr.msk.bf16.mxu0 %vm1342_vm1, %v2796_v31 }
 0x97f   : > { %4949 = vmatpush3.bf16.xpose.msra.mxu0 %v2838_v16 }
 0x980   : > { %5099 = vmatprep.subr.msk.bf16.mxu0 %vm1342_vm1, %v6641_v10 }
 0x987   : > { %4951 = vmatpush3.bf16.xpose.msra.mxu0 %v2841_v58 }
 0x988   : > { %5100 = vmatprep.subr.msk.bf16.mxu0 %vm1342_vm1, %v2800_v51 }
 0x98e   : > { %v2546_v30 = vpop.xlane.xlu0 %2545 }
 0x98f   : > { %4953 = vmatpush3.bf16.xpose.msra.mxu0 %v2844_v36 }
 0x990   : > { %5101 = vmatprep.subr.msk.bf16.mxu0 %vm1342_vm1, %v2802_v5 }
 0x992   : > { %v2542_v4 = vpop.xlane.xlu0 %2541 }
 0x993   : > { %5333 = vrcp.f32 %v2542_v4  ;;  %v2544_v2 = vpop.xlane.xlu1 %2543 }
 0x994   : > { %5335 = vrcp.f32 %v2544_v2 }
 0x995   : > { %5337 = vrcp.f32 %v2546_v30 }
 0x996   : > { %v2548_v24 = vpop.xlane.xlu0 %2547 }
 0x997   : > { %4955 = vmatpush3.bf16.xpose.msra.mxu0 %v2847_v42  ;;  %5339 = vrcp.f32 %v2548_v24  ;;  %v2554_v10 = vpop.xlane.xlu1 %2553 }
 0x99a   : > { %v2562_v54 = vpop.xlane.xlu0 %2561 }
 0x99b   : > { %v2550_v55 = vpop.xlane.xlu1 %2549 }
 0x99d   : > { %v5334_v6 = vpop.eup %5333 }
 0x99e   : > { %v5336_v19 = vpop.eup %5335  ;;  %v2558_v43 = vpop.xlane.xlu0 %2557  ;;  %v2585_v15 = vmul.f32 %v5334_v6, %v6645_v59 }
 0x99f   : > { %v5338_v44 = vpop.eup %5337  ;;  %v2556_v29 = vpop.xlane.xlu1 %2555  ;;  %v2586_v3 = vmul.f32 %v5336_v19, %v6647_v0 }
 0x9a0   : > { %5341 = vrcp.f32 %v2556_v29  ;;  %v2587_v11 = vmul.f32 %v5338_v44, %v6639_v22 }
 0x9a1   : > { %v5340_v31 = vpop.eup %5339  ;;  %v2599_v32 = vpack.c.bf16 %v2586_v3, %v2585_v15  ;;  %5343 = vrcp.f32 %v2550_v55 }
 0x9a2   : > { %v2564_v28 = vpop.xlane.xlu0 %2563  ;;  %v2588_v21 = vmul.f32 %v5340_v31, %v6652_v53  ;;  %5345 = vrcp.f32 %v2554_v10 }
 0x9a3   : > { %v2552_v8 = vpop.xlane.xlu1 %2551  ;;  %4932 = vmatprep.mubr.bf16.mxu0 %v2599_v32 }
 0x9a4   : > { %5347 = vrcp.f32 %v2552_v8  ;;  %v2600_v38 = vpack.c.bf16 %v2588_v21, %v2587_v11 }
 0x9a5   : > { %5349 = vrcp.f32 %v2558_v43 }
 0x9a6   : > { %4933 = vmatmul.mubr.bf16.gmra.mrb[68].mxu0 %v2600_v38  ;;  %v2804_v59 = vpop.permute.xlu0 %2803 }
 0x9a7   : > { %v2560_v39 = vpop.xlane.xlu1 %2559  ;;  %5102 = vmatprep.subr.msk.bf16.mxu0 %vm1342_vm1, %v2804_v59  ;;  %v2850_v0 = vsel %vm1342_vm1, %v2804_v59, 0 }
 0x9a8   : > { %5351 = vrcp.f32 %v2560_v39  ;;  %4957 = vmatpush3.bf16.xpose.msra.mxu0 %v2850_v0 }
 0x9a9   : > { %5353 = vrcp.f32 %v2564_v28 }
 0x9aa   : > { %v2776_v40 = vpop.permute.xlu0 %2775  ;;  %v5342_v22 = vpop.eup %5341  ;;  %5355 = vrcp.f32 %v2562_v54 }
 0x9ab   : > { %v2806_v53 = vpop.permute.xlu1 %2805  ;;  %v5344_v41 = vpop.eup %5343  ;;  %v2592_v18 = vmul.f32 %v5342_v22, %v6667_v7 }
 0x9ac   : > { %5103 = vmatprep.subr.msk.bf16.mxu0 %vm1342_vm1, %v2806_v53  ;;  %v5346_v49 = vpop.eup %5345  ;;  %v2853_v46 = vsel %vm1342_vm1, %v2806_v53, 0  ;;  %v2589_v57 = vmul.f32 %v5344_v41, %v6661_v13 }
 0x9ad   : > { %v2591_v51 = vmul.f32 %v5346_v49, %v6654_v12 }
 0x9ae   : > { %v5348_v50 = vpop.eup %5347  ;;  %v2780_v37 = vpop.permute.xlu0 %2779 }
 0x9af   : > { %v2778_v35 = vpop.permute.xlu1 %2777  ;;  %v2590_v16 = vmul.f32 %v5348_v50, %v6673_v47  ;;  %v5350_v58 = vpop.eup %5349  ;;  %v2602_v4 = vpack.c.bf16 %v2592_v18, %v2591_v51 }
 0x9b0   : > { %4959 = vmatpush3.bf16.xpose.msra.mxu0 %v2853_v46  ;;  %v2593_v7 = vmul.f32 %v5350_v58, %v6665_v45 }
 0x9b1   : > { %v2601_v36 = vpack.c.bf16 %v2590_v16, %v2589_v57 }
 0x9b2   : > { %v5352_v30 = vpop.eup %5351  ;;  %v2784_v5 = vpop.permute.xlu0 %2783 }
 0x9b3   : > { %v5354_v2 = vpop.eup %5353  ;;  %v2782_v42 = vpop.permute.xlu1 %2781  ;;  %4936 = vmatprep.mubr.bf16.mxu0 %v2601_v36  ;;  %v2594_v24 = vmul.f32 %v5352_v30, %v6677_v33 }
 0x9b4   : > { %4937 = vmatmul.mubr.bf16.gmra.mrb[72].mxu0 %v2602_v4  ;;  %v5356_v10 = vpop.eup %5355  ;;  %v2596_v47 = vmul.f32 %v5354_v2, %v6671_v34 }
 0x9b5   : > { %v2603_v13 = vpack.c.bf16 %v2594_v24, %v2593_v7  ;;  %v2595_v12 = vmul.f32 %v5356_v10, %v6659_v23 }
 0x9b6   : > { %v2788_v54 = vpop.permute.xlu0 %2787 }
 0x9b7   : > { %v2786_v55 = vpop.permute.xlu1 %2785  ;;  %4940 = vmatprep.mubr.bf16.mxu0 %v2603_v13  ;;  %v2604_v19 = vpack.c.bf16 %v2596_v47, %v2595_v12 }
 0x9ba   : > { %v3105_v6 = vpop.permute.xlu0 %3104 }
 0x9bb   : > { %v2790_v43 = vpop.permute.xlu1 %2789  ;;  %4976 = vmatprep.subr.bf16.mxu1 %v3105_v6 }
 0x9bc   : > { %4941 = vmatmul.mubr.bf16.gmra.mrb[76].mxu0 %v2604_v19  ;;  %4977 = vmatpush3.bf16.msra.mxu1 %v3105_v6 }
 0x9bd   : > { %4960 = vmatprep.mubr.msk.bf16.mxu0 %vm1342_vm1, %v2776_v40 }
 0x9be   : > { %v3109_v33 = vpop.permute.xlu0 %3108 }
 0x9bf   : > { %v3107_v45 = vpop.permute.xlu1 %3106 }
 0x9c0   : > { %4978 = vmatprep.subr.bf16.mxu1 %v3107_v45 }
 0x9c1   : > { %4979 = vmatpush3.bf16.msra.mxu1 %v3107_v45 }
 0x9c2   : > { %4980 = vmatprep.subr.bf16.mxu1 %v3109_v33 }
 0x9c4   : > { %4961 = vmatmul.mubr.msk.bf16.vlgmr.msra.gmra.mrb[80].mxu0 %vm1342_vm1, %v2778_v35 }
 0x9c5   : > { %4964 = vmatprep.mubr.msk.bf16.mxu0 %vm1342_vm1, %v2780_v37  ;;  %4981 = vmatpush3.bf16.msra.mxu1 %v3109_v33 }
 0x9cc   : > { %4965 = vmatmul.mubr.msk.bf16.gmra.mrb[84].mxu0 %vm1342_vm1, %v2782_v42 }
 0x9cd   : > { %4968 = vmatprep.mubr.msk.bf16.mxu0 %vm1342_vm1, %v2784_v5 }
 0x9d4   : > { %4969 = vmatmul.mubr.msk.bf16.gmra.mrb[88].mxu0 %vm1342_vm1, %v2786_v55 }
 0x9d5   : > { %4972 = vmatprep.mubr.msk.bf16.mxu0 %vm1342_vm1, %v2788_v54 }
 0x9dc   : > { %4973 = vmatmul.mubr.msk.bf16.gmra.mrb[92].mxu0 %vm1342_vm1, %v2790_v43 }
 0xa41   : > { %v6750_v23 = vpop.f32.mrb[64].mxu0 }
 0xa42   : > { %v6752_v34 = vpop.f32.mrb[65].mxu0 }
 0xa43   : > { %v6754_v15 = vpop.f32.mrb[66].mxu0 }
 0xa44   : > { %v2727_v44 = vpack.c.bf16 %v6754_v15, %v6750_v23  ;;  %v6758_v29 = vpop.f32.mrb[67].mxu0  ;;  %v7667_v15 = vpack.c.bf16 %v6536_v61, %v6532_v52  ;;  %v7669_v52 = vld [vmem:[#allocation3_spill] sm:$0xff] }
 0xa45   : > { %v2726_v3 = vpack.c.bf16 %v6758_v29, %v6752_v34  ;;  %v7668_v29 = vpack.c.bf16 %v6516_v56, %v6510_v63  ;;  %v7670_v61 = vpack.c.bf16 %v6528_v60, %v7669_v52 }
 0xa79   : > { %v6762_v31 = vpop.f32.mrb[68].mxu0 }
 0xa7a   : > { %v6764_v32 = vpop.f32.mrb[69].mxu0 }
 0xa7b   : > { %v6766_v28 = vpop.f32.mrb[70].mxu0 }
 0xa7c   : > { %v2729_v11 = vpack.c.bf16 %v6766_v28, %v6762_v31  ;;  %v6770_v21 = vpop.f32.mrb[71].mxu0  ;;  %v7672_v31 = vld [vmem:[#allocation4_spill] sm:$0xff] }
 0xa7d   : > { %v2728_v8 = vpack.c.bf16 %v6770_v21, %v6764_v32 }
 0xa87   : > { %v6774_v38 = vpop.f32.mrb[72].mxu0 }
 0xa88   : > { %v6776_v59 = vpop.f32.mrb[73].mxu0 }
 0xa89   : > { %v6778_v39 = vpop.f32.mrb[74].mxu0 }
 0xa8a   : > { %v6782_v40 = vpop.f32.mrb[75].mxu0 }
 0xa8f   : > { %v6786_v53 = vpop.f32.mrb[76].mxu0 }
 0xa90   : > { %v6788_v41 = vpop.f32.mrb[77].mxu0 }
 0xa91   : > { %v6790_v49 = vpop.f32.mrb[78].mxu0 }
 0xa92   : > { %v6794_v37 = vpop.f32.mrb[79].mxu0 }
 0xa97   : > { %v4962_v35 = vpop.f32.mrb[80].mxu0 }
 0xa98   : > { %v2898_v46 = vadd.f32 %v4962_v35, %v6074_v62  ;;  %v2889_v57 = vpop.f32.mrb[81].mxu0 }
 0xa99   : > { %v4963_v16 = vpop.f32.mrb[82].mxu0  ;;  %v2890_v36 = vadd.f32 %v2889_v57, %v6074_v62 }
 0xa9a   : > { %2956 = vmax.xlane.f32.xlu0 %v2898_v46  ;;  %v2892_v58 = vpop.f32.mrb[83].mxu0  ;;  %v2901_v5 = vadd.f32 %v4963_v16, %v6074_v62 }
 0xa9b   : > { %v2893_v51 = vadd.f32 %v2892_v58, %v6074_v62 }
 0xa9d   : > { %2954 = vmax.xlane.f32.xlu1 %v2893_v51 }
 0xa9e   : > { %2952 = vmax.xlane.f32.xlu0 %v2890_v36 }
 0xa9f   : > { %v4966_v30 = vpop.f32.mrb[84].mxu0 }
 0xaa0   : > { %v2905_v4 = vpop.f32.mrb[85].mxu0  ;;  %v2914_v24 = vadd.f32 %v4966_v30, %v6074_v62 }
 0xaa1   : > { %v4967_v2 = vpop.f32.mrb[86].mxu0  ;;  %v2906_v54 = vadd.f32 %v2905_v4, %v6074_v62 }
 0xaa2   : > { %v6803_v42 = vadd.f32 %v4967_v2, %v6074_v62  ;;  %2958 = vmax.xlane.f32.xlu0 %v2901_v5  ;;  %v2908_v7 = vpop.f32.mrb[87].mxu0 }
 0xaa3   : > { %v2909_v10 = vadd.f32 %v2908_v7, %v6074_v62 }
 0xaa4   : > { %2966 = vmax.xlane.f32.xlu1 %v6803_v42 }
 0xaa6   : > { %2964 = vmax.xlane.f32.xlu0 %v2914_v24 }
 0xaa7   : > { %v4970_v13 = vpop.f32.mrb[88].mxu0 }
 0xaa8   : > { %2962 = vmax.xlane.f32.xlu1 %v2909_v10  ;;  %v2921_v47 = vpop.f32.mrb[89].mxu0  ;;  %v2930_v19 = vadd.f32 %v4970_v13, %v6074_v62 }
 0xaa9   : > { %v4971_v55 = vpop.f32.mrb[90].mxu0  ;;  %v6818_v33 = vadd.f32 %v2921_v47, %v6074_v62 }
 0xaaa   : > { %v6810_v12 = vadd.f32 %v4971_v55, %v6074_v62  ;;  %2960 = vmax.xlane.f32.xlu0 %v2906_v54  ;;  %v2924_v6 = vpop.f32.mrb[91].mxu0 }
 0xaab   : > { %v6815_v43 = vadd.f32 %v2924_v6, %v6074_v62 }
 0xaac   : > { %2974 = vmax.xlane.f32.xlu1 %v6810_v12 }
 0xaae   : > { %2972 = vmax.xlane.f32.xlu0 %v2930_v19 }
 0xaaf   : > { %v4974_v45 = vpop.f32.mrb[92].mxu0 }
 0xab0   : > { %2970 = vmax.xlane.f32.xlu1 %v6815_v43  ;;  %v2937_v35 = vpop.f32.mrb[93].mxu0  ;;  %v6823_v58 = vadd.f32 %v4974_v45, %v6074_v62 }
 0xab1   : > { %v4975_v57 = vpop.f32.mrb[94].mxu0  ;;  %v6827_v30 = vadd.f32 %v2937_v35, %v6074_v62 }
 0xab2   : > { %2968 = vmax.xlane.f32.xlu0 %v6818_v33  ;;  %v2940_v16 = vpop.f32.mrb[95].mxu0  ;;  %v6835_v4 = vadd.f32 %v4975_v57, %v6074_v62 }
 0xab3   : > { %v6839_v2 = vadd.f32 %v2940_v16, %v6074_v62 }
 0xab6   : > { %2980 = vmax.xlane.f32.xlu0 %v6823_v58 }
 0xaba   : > { %2976 = vmax.xlane.f32.xlu0 %v6827_v30 }
 0xac1   : > { %3112 = vrot.lane.b32.xlu1 %v6032_v9, %s5512_s26 }
 0xad0   : > { %3110 = vrot.lane.b32.xlu0 %v6017_v17, %s5512_s26 }
 0xae5   : > { %2982 = vmax.xlane.f32.xlu1 %v6835_v4 }
 0xae9   : > { %2978 = vmax.xlane.f32.xlu1 %v6839_v2 }
 0xafa   : > { %3114 = vrot.lane.b32.xlu1 %v6029_v48, %s5512_s26 }
 0xb27   : > { %v2957_v7 = vpop.xlane.xlu0 %2956 }
 0xb28   : > { %v2986_v13 = vsub.f32 %v2898_v46, %v2957_v7 }
 0xb2a   : > { %v3004_v47 = vmul.f32 1.442695, %v2986_v13  ;;  %v2955_v55 = vpop.xlane.xlu1 %2954 }
 0xb2b   : > { %v2953_v9 = vpop.xlane.xlu0 %2952  ;;  %v2985_v45 = vsub.f32 %v2893_v51, %v2955_v55 }
 0xb2c   : > { %5357 = vpow2.f32 %v3004_v47  ;;  %v2984_v17 = vsub.f32 %v2890_v36, %v2953_v9 }
 0xb2d   : > { %v3002_v16 = vmul.f32 1.442695, %v2985_v45 }
 0xb2e   : > { %v3000_v6 = vmul.f32 1.442695, %v2984_v17 }
 0xb2f   : > { %v2959_v35 = vpop.xlane.xlu0 %2958 }
 0xb30   : > { %5359 = vpow2.f32 %v3000_v6  ;;  %v2987_v57 = vsub.f32 %v2901_v5, %v2959_v35 }
 0xb31   : > { %v2967_v18 = vpop.xlane.xlu1 %2966 }
 0xb32   : > { %v3006_v62 = vmul.f32 1.442695, %v2987_v57  ;;  %v2991_v51 = vsub.f32 %v6803_v42, %v2967_v18 }
 0xb33   : > { %v2965_v50 = vpop.xlane.xlu0 %2964 }
 0xb34   : > { %5361 = vpow2.f32 %v3006_v62  ;;  %v2990_v22 = vsub.f32 %v2914_v24, %v2965_v50  ;;  %v3014_v24 = vmul.f32 1.442695, %v2991_v51 }
 0xb35   : > { %v2963_v0 = vpop.xlane.xlu1 %2962  ;;  %5363 = vpow2.f32 %v3002_v16 }
 0xb36   : > { %v6844_v48 = vpop.eup %5357  ;;  %v3012_v46 = vmul.f32 1.442695, %v2990_v22  ;;  %v2989_v7 = vsub.f32 %v2909_v10, %v2963_v0 }
 0xb37   : > { %3036 = vadd.xlane.f32.xlu1 %v6844_v48  ;;  %v2961_v36 = vpop.xlane.xlu0 %2960 }
 0xb38   : > { %5365 = vpow2.f32 %v3012_v46  ;;  %v3010_v13 = vmul.f32 1.442695, %v2989_v7  ;;  %v2988_v5 = vsub.f32 %v2906_v54, %v2961_v36 }
 0xb39   : > { %v2975_v55 = vpop.xlane.xlu1 %2974 }
 0xb3a   : > { %v6848_v47 = vpop.eup %5359  ;;  %v3008_v9 = vmul.f32 1.442695, %v2988_v5  ;;  %5367 = vpow2.f32 %v3010_v13  ;;  %v2995_v10 = vsub.f32 %v6810_v12, %v2975_v55 }
 0xb3b   : > { %3032 = vadd.xlane.f32.xlu1 %v6848_v47  ;;  %v2973_v50 = vpop.xlane.xlu0 %2972 }
 0xb3c   : > { %5369 = vpow2.f32 %v3008_v9  ;;  %v2994_v0 = vsub.f32 %v2930_v19, %v2973_v50  ;;  %v3022_v57 = vmul.f32 1.442695, %v2995_v10  ;;  %v7665_v10 = vpack.c.bf16 %v6512_v14, %v6508_v20 }
 0xb3d   : > { %5371 = vpow2.f32 %v3014_v24  ;;  %v2971_v42 = vpop.xlane.xlu1 %2970  ;;  %v7666_v20 = vpack.c.bf16 %v6524_v25, %v6520_v1 }
 0xb3e   : > { %v6851_v22 = vpop.eup %5361  ;;  %v3020_v17 = vmul.f32 1.442695, %v2994_v0  ;;  %v2993_v19 = vsub.f32 %v6815_v43, %v2971_v42 }
 0xb3f   : > { %3038 = vadd.xlane.f32.xlu1 %v6851_v22  ;;  %v2969_v18 = vpop.xlane.xlu0 %2968  ;;  %v6856_v6 = vpop.eup %5363 }
 0xb40   : > { %v2992_v54 = vsub.f32 %v6818_v33, %v2969_v18  ;;  %5373 = vpow2.f32 %v3020_v17  ;;  %v3018_v7 = vmul.f32 1.442695, %v2993_v19 }
 0xb41   : > { %v3113_v9 = vpop.permute.xlu1 %3112 }
 0xb42   : > { %v6858_v45 = vpop.eup %5365  ;;  %v3016_v35 = vmul.f32 1.442695, %v2992_v54 }
 0xb43   : > { %3034 = vadd.xlane.f32.xlu1 %v6856_v6  ;;  %3044 = vadd.xlane.f32.xlu0 %v6858_v45  ;;  %v2981_v12 = vpop.xlane.xlu0 %2980 }
 0xb44   : > { %5375 = vpow2.f32 %v3016_v35  ;;  %v2998_v62 = vsub.f32 %v6823_v58, %v2981_v12  ;;  %v6864_v16 = vpop.eup %5367 }
 0xb45   : > { %5377 = vpow2.f32 %v3022_v57 }
 0xb46   : > { %v6866_v33 = vpop.eup %5369  ;;  %v3028_v46 = vmul.f32 1.442695, %v2998_v62 }
 0xb47   : > { %3042 = vadd.xlane.f32.xlu1 %v6864_v16  ;;  %3040 = vadd.xlane.f32.xlu0 %v6866_v33  ;;  %v2977_v43 = vpop.xlane.xlu0 %2976  ;;  %v6871_v51 = vpop.eup %5371 }
 0xb48   : > { %5379 = vpow2.f32 %v3028_v46  ;;  %v2996_v36 = vsub.f32 %v6827_v30, %v2977_v43 }
 0xb49   : > { %5381 = vpow2.f32 %v3018_v7 }
 0xb4a   : > { %v3024_v13 = vmul.f32 1.442695, %v2996_v36  ;;  %v6874_v5 = vpop.eup %5373 }
 0xb4b   : > { %3046 = vadd.xlane.f32.xlu0 %v6871_v51  ;;  %v3111_v58 = vpop.permute.xlu0 %3110 }
 0xb4c   : > { %5383 = vpow2.f32 %v3024_v13  ;;  %4982 = vmatprep.subr.bf16.mxu1 %v3111_v58 }
 0xb4d   : > { %4983 = vmatpush3.bf16.msra.mxu1 %v3111_v58 }
 0xb4e   : > { %v6876_v55 = vpop.eup %5375  ;;  %4984 = vmatprep.subr.bf16.mxu1 %v3113_v9 }
 0xb4f   : > { %3052 = vadd.xlane.f32.xlu0 %v6874_v5  ;;  %3048 = vadd.xlane.f32.xlu1 %v6876_v55  ;;  %v6880_v30 = vpop.eup %5377 }
 0xb51   : > { %4985 = vmatpush3.bf16.msra.mxu1 %v3113_v9 }
 0xb52   : > { %v6882_v50 = vpop.eup %5379 }
 0xb53   : > { %3054 = vadd.xlane.f32.xlu0 %v6880_v30  ;;  %3060 = vadd.xlane.f32.xlu1 %v6882_v50  ;;  %v6886_v24 = vpop.eup %5381 }
 0xb56   : > { %v6888_v0 = vpop.eup %5383 }
 0xb57   : > { %3050 = vadd.xlane.f32.xlu0 %v6886_v24  ;;  %3056 = vadd.xlane.f32.xlu1 %v6888_v0 }
 0xb68   : > { %3118 = vrot.lane.b32.xlu1 %v6041_v26, %s5512_s26 }
 0xb6c   : > { %2245 = vrot.lane.b32.xlu1 %v7665_v10, %s5513_s27 }
 0xb6d   : > { %3116 = vrot.lane.b32.xlu0 %v6044_v27, %s5512_s26 }
 0xb70   : > { %2742 = vrot.lane.b32.xlu1 %v2726_v3, %s5514_s4  ;;  %v7671_v3 = vld [vmem:[#allocation5_spill] sm:$0xff] }
 0xb71   : > { %v7673_v28 = vpack.c.bf16 %v7671_v3, %v7672_v31 }
 0xb72   : > { %v2983_v17 = vpop.xlane.xlu1 %2982 }
 0xb73   : > { %v2999_v34 = vsub.f32 %v6835_v4, %v2983_v17 }
 0xb74   : > { %2744 = vrot.lane.b32.xlu1 %v2727_v44, %s5514_s4 }
 0xb75   : > { %v3030_v1 = vmul.f32 1.442695, %v2999_v34 }
 0xb76   : > { %v2979_v26 = vpop.xlane.xlu1 %2978 }
 0xb77   : > { %v2997_v27 = vsub.f32 %v6839_v2, %v2979_v26 }
 0xb78   : > { %2249 = vrot.lane.b32.xlu1 %v7666_v20, %s5513_s27 }
 0xb79   : > { %v3026_v23 = vmul.f32 1.442695, %v2997_v27 }
 0xb7a   : > { %v3115_v14 = vpop.permute.xlu1 %3114 }
 0xb7b   : > { %4986 = vmatprep.subr.bf16.mxu1 %v3115_v14  ;;  %5385 = vpow2.f32 %v3026_v23 }
 0xb7c   : > { %2748 = vrot.lane.b32.xlu1 %v2729_v11, %s5514_s4  ;;  %4987 = vmatpush3.bf16.msra.mxu1 %v3115_v14  ;;  %5387 = vpow2.f32 %v3030_v1 }
 0xb80   : > { %2253 = vrot.lane.b32.xlu1 %v7667_v15, %s5513_s27 }
 0xb85   : > { %v6922_v25 = vpop.eup %5385 }
 0xb86   : > { %v6925_v44 = vpop.eup %5387 }
 0xb8c   : > { %3058 = vadd.xlane.f32.xlu0 %v6922_v25 }
 0xb90   : > { %3062 = vadd.xlane.f32.xlu0 %v6925_v44 }
 0xba6   : > { %2243 = vrot.lane.b32.xlu0 %v7668_v29, %s5513_s27 }
 0xbaa   : > { %2247 = vrot.lane.b32.xlu0 %v7670_v61, %s5513_s27 }
 0xbae   : > { %2746 = vrot.lane.b32.xlu0 %v2728_v8, %s5514_s4 }
 0xbb2   : > { %2251 = vrot.lane.b32.xlu0 %v7673_v28, %s5513_s27 }
 0xbc4   : > { %v3037_v11 = vpop.xlane.xlu1 %3036 }
 0xbc8   : > { %v3033_v4 = vpop.xlane.xlu1 %3032 }
 0xbc9   : > { %5389 = vrcp.f32 %v3033_v4 }
 0xbcc   : > { %v3039_v2 = vpop.xlane.xlu1 %3038 }
 0xbd0   : > { %v3035_v63 = vpop.xlane.xlu1 %3034  ;;  %v3045_v56 = vpop.xlane.xlu0 %3044 }
 0xbd1   : > { %5391 = vrcp.f32 %v3035_v63 }
 0xbd2   : > { %5393 = vrcp.f32 %v3039_v2 }
 0xbd3   : > { %v5390_v54 = vpop.eup %5389 }
 0xbd4   : > { %v3041_v18 = vpop.xlane.xlu0 %3040  ;;  %v3043_v60 = vpop.xlane.xlu1 %3042  ;;  %v3080_v21 = vmul.f32 %v5390_v54, %v6848_v47 }
 0xbd5   : > { %5395 = vrcp.f32 %v3043_v60 }
 0xbd6   : > { %5397 = vrcp.f32 %v3041_v18 }
 0xbd7   : > { %5399 = vrcp.f32 %v3037_v11 }
 0xbd8   : > { %v3047_v42 = vpop.xlane.xlu0 %3046 }
 0xbd9   : > { %5401 = vrcp.f32 %v3047_v42 }
 0xbdb   : > { %v5392_v35 = vpop.eup %5391 }
 0xbdc   : > { %v3049_v57 = vpop.xlane.xlu1 %3048  ;;  %v3053_v32 = vpop.xlane.xlu0 %3052  ;;  %v3081_v8 = vmul.f32 %v5392_v35, %v6856_v6 }
 0xbdd   : > { %v5394_v43 = vpop.eup %5393 }
 0xbde   : > { %v3096_v19 = vpack.c.bf16 %v3081_v8, %v3080_v21  ;;  %v3083_v9 = vmul.f32 %v5394_v43, %v6851_v22 }
 0xbdf   : > { %v5396_v36 = vpop.eup %5395 }
 0xbe0   : > { %4992 = vmatprep.mubr.bf16.mxu1 %v3096_v19  ;;  %v3061_v12 = vpop.xlane.xlu1 %3060  ;;  %v3055_v62 = vpop.xlane.xlu0 %3054  ;;  %v3085_v26 = vmul.f32 %v5396_v36, %v6864_v16 }
 0xbe1   : > { %v5398_v47 = vpop.eup %5397 }
 0xbe2   : > { %v5400_v6 = vpop.eup %5399  ;;  %v3084_v17 = vmul.f32 %v5398_v47, %v6866_v33  ;;  %v7675_v47 = vpack.c.bf16 %v6782_v40, %v6776_v59 }
 0xbe3   : > { %v3082_v20 = vmul.f32 %v5400_v6, %v6844_v48  ;;  %v5402_v14 = vpop.eup %5401 }
 0xbe4   : > { %v3057_v46 = vpop.xlane.xlu1 %3056  ;;  %v3051_v7 = vpop.xlane.xlu0 %3050  ;;  %v3098_v23 = vpack.c.bf16 %v3085_v26, %v3084_v17  ;;  %v3087_v33 = vmul.f32 %v5402_v14, %v6871_v51  ;;  %v7679_v14 = vld [vmem:[#allocation9_spill] sm:$0xff] }
 0xbe5   : > { %5403 = vrcp.f32 %v3051_v7  ;;  %v3097_v27 = vpack.c.bf16 %v3083_v9, %v3082_v20  ;;  %v7676_v20 = vld [vmem:[#allocation8_spill] sm:$0xff] }
 0xbe6   : > { %5405 = vrcp.f32 %v3045_v56 }
 0xbe7   : > { %5407 = vrcp.f32 %v3049_v57 }
 0xbe8   : > { %v3119_v13 = vpop.permute.xlu1 %3118  ;;  %v3117_v58 = vpop.permute.xlu0 %3116  ;;  %5409 = vrcp.f32 %v3055_v62 }
 0xbe9   : > { %4988 = vmatprep.subr.bf16.mxu1 %v3117_v58  ;;  %5411 = vrcp.f32 %v3053_v32 }
 0xbea   : > { %4989 = vmatpush3.bf16.msra.mxu1 %v3117_v58  ;;  %5413 = vrcp.f32 %v3057_v46 }
 0xbeb   : > { %4990 = vmatprep.subr.bf16.mxu1 %v3119_v13 }
 0xbec   : > { %v2246_v10 = vpop.permute.xlu1 %2245 }
 0xbed   : > { %2269 = vst.msk [vmem:[#allocation2 + $0x8] sm:$0xff] %vm2267_vm3, %v2246_v10 }
 0xbee   : > { %4991 = vmatpush3.bf16.msra.mxu1 %v3119_v13  ;;  %v7674_v13 = vpack.c.bf16 %v6778_v39, %v6774_v38 }
 0xbef   : > { %v5404_v15 = vpop.eup %5403 }
 0xbf0   : > { %v2743_v34 = vpop.permute.xlu1 %2742  ;;  %v5406_v22 = vpop.eup %5405  ;;  %v3089_v48 = vmul.f32 %v5404_v15, %v6886_v24 }
 0xbf1   : > { %4993 = vmatmul.mubr.bf16.vlgmr.msra.gmra.mrb[64].mxu1 %v3097_v27  ;;  %v5408_v1 = vpop.eup %5407  ;;  %v3086_v29 = vmul.f32 %v5406_v22, %v6858_v45  ;;  %v7677_v27 = vld [vmem:[#allocation6_spill] sm:$0xff] }
 0xbf2   : > { %4996 = vmatprep.mubr.bf16.mxu1 %v3098_v23  ;;  %v3088_v52 = vmul.f32 %v5408_v1, %v6876_v55  ;;  %v5410_v3 = vpop.eup %5409  ;;  %v7678_v38 = vpack.c.bf16 %v7676_v20, %v7677_v27  ;;  %v7682_v1 = vpack.c.bf16 %v6790_v49, %v6786_v53 }
 0xbf3   : > { %v3099_v61 = vpack.c.bf16 %v3087_v33, %v3086_v29  ;;  %v5412_v11 = vpop.eup %5411  ;;  %v3091_v51 = vmul.f32 %v5410_v3, %v6880_v30  ;;  %v7683_v33 = vpack.c.bf16 %v6794_v37, %v6788_v41 }
 0xbf4   : > { %v2745_v16 = vpop.permute.xlu1 %2744  ;;  %v3100_v28 = vpack.c.bf16 %v3089_v48, %v3088_v52  ;;  %v3090_v24 = vmul.f32 %v5412_v11, %v6874_v5  ;;  %v5414_v18 = vpop.eup %5413 }
 0xbf5   : > { %2768 = vst.msk [vmem:[#allocation2 + $0x8] sm:$0xff] %vm2766_vm4, %v2745_v16  ;;  %v3092_v5 = vmul.f32 %v5414_v18, %v6888_v0  ;;  %v5125_v0 = vld [vmem:[%s7629_s10] sm:$0xff]  }
 0xbf6   : > { %v3101_v2 = vpack.c.bf16 %v3091_v51, %v3090_v24  ;;  %5008 = vmatprep.subr.bf16.mxu1 %v5125_v0 }
 0xbf7   : > { %5009 = vmatpush3.bf16.msra.mxu1 %v5125_v0 }
 0xbf8   : > { %v2250_v31 = vpop.permute.xlu1 %2249 }
 0xbf9   : > { %2271 = vst.msk [vmem:[#allocation2 + $0x18] sm:$0xff] %vm2267_vm3, %v2250_v31  ;;  %4997 = vmatmul.mubr.bf16.gmra.mrb[68].mxu1 %v3099_v61 }
 0xbfa   : > { %5000 = vmatprep.mubr.bf16.mxu1 %v3100_v28 }
 0xbfc   : > { %v2749_v4 = vpop.permute.xlu1 %2748 }
 0xbfd   : > { %2770 = vst.msk [vmem:[#allocation2 + $0x18] sm:$0xff] %vm2766_vm4, %v2749_v4 }
 0xc00   : > { %v2254_v45 = vpop.permute.xlu1 %2253 }
 0xc01   : > { %2273 = vst.msk [vmem:[#allocation2 + $0x28] sm:$0xff] %vm2267_vm3, %v2254_v45  ;;  %5001 = vmatmul.mubr.bf16.gmra.mrb[72].mxu1 %v3101_v2 }
 0xc19   : > { %v3059_v55 = vpop.xlane.xlu0 %3058 }
 0xc1a   : > { %5415 = vrcp.f32 %v3059_v55 }
 0xc1b   : > { %5417 = vrcp.f32 %v3061_v12 }
 0xc1d   : > { %v3063_v63 = vpop.xlane.xlu0 %3062 }
 0xc1e   : > { %5419 = vrcp.f32 %v3063_v63 }
 0xc21   : > { %v2244_v56 = vpop.permute.xlu0 %2243 }
 0xc22   : > { %2268 = vst.msk [vmem:[#allocation2] sm:$0xff] %vm2267_vm3, %v2244_v56 }
 0xc23   : > { %2767 = vst.msk [vmem:[#allocation2] sm:$0xff] %vm2766_vm4, %v2743_v34  ;;  %v7680_v34 = vld [vmem:[#allocation7_spill] sm:$0xff] }
 0xc24   : > { %v5416_v30 = vpop.eup %5415  ;;  %v7681_v59 = vpack.c.bf16 %v7679_v14, %v7680_v34  ;;  %v5489_v34 = vld [vmem:[%s5637_s3 + $0x20] sm:$0xff] }
 0xc25   : > { %v2248_v60 = vpop.permute.xlu0 %2247  ;;  %v3093_v42 = vmul.f32 %v5416_v30, %v6922_v25  ;;  %v5418_v54 = vpop.eup %5417  ;;  %v5126_v25 = vld [vmem:[%s7629_s10 + $0x8] sm:$0xff]  }
 0xc26   : > { %2270 = vst.msk [vmem:[#allocation2 + $0x10] sm:$0xff] %vm2267_vm3, %v2248_v60  ;;  %v3094_v21 = vmul.f32 %v5418_v54, %v6882_v50  ;;  %5010 = vmatprep.subr.bf16.mxu1 %v5126_v25 }
 0xc27   : > { %v3102_v35 = vpack.c.bf16 %v3093_v42, %v3092_v5  ;;  %5011 = vmatpush3.bf16.msra.mxu1 %v5126_v25  ;;  %v5485_v25 = vld [vmem:[%s5637_s3] sm:$0xff] }
 0xc28   : > { %v5420_v57 = vpop.eup %5419 }
 0xc29   : > { %5004 = vmatprep.mubr.bf16.mxu1 %v3102_v35  ;;  %v2747_v32 = vpop.permute.xlu0 %2746  ;;  %v3095_v8 = vmul.f32 %v5420_v57, %v6925_v44  ;;  %v7033_v57 = vld [vmem:[%s7630_s11] ss:$0 sm:$0xff] }
 0xc2a   : > { %2769 = vst.msk [vmem:[#allocation2 + $0x10] sm:$0xff] %vm2766_vm4, %v2747_v32 }
 0xc2b   : > { %v3103_v19 = vpack.c.bf16 %v3095_v8, %v3094_v21 }
 0xc2d   : > { %5005 = vmatmul.mubr.bf16.gmra.mrb[76].mxu1 %v3103_v19  ;;  %v2252_v12 = vpop.permute.xlu0 %2251 }
 0xc2e   : > { %2272 = vst.msk [vmem:[#allocation2 + $0x20] sm:$0xff] %vm2267_vm3, %v2252_v12 }
 0xcc4   : > { %v4994_v50 = vpop.f32.mrb[64].mxu1 }
 0xcc5   : > { %v3162_v44 = vpop.f32.mrb[65].mxu1 }
 0xcc6   : > { %v4995_v62 = vpop.f32.mrb[66].mxu1 }
 0xcc7   : > { %v3226_v46 = vpack.c.bf16 %v4995_v62, %v4994_v50  ;;  %v3165_v7 = vpop.f32.mrb[67].mxu1  ;;  %v5486_v62 = vld [vmem:[%s5637_s3 + $0x10] sm:$0xff] }
 0xcc8   : > { %v3225_v43 = vpack.c.bf16 %v3165_v7, %v3162_v44 }
 0xcc9   : > { %3243 = vrot.lane.b32.xlu1 %v3226_v46, %s5515_s24 }
 0xcca   : > { %3241 = vrot.lane.b32.xlu0 %v3225_v43, %s5515_s24  ;;  %v5487_v43 = vld [vmem:[%s5637_s3 + $0x8] sm:$0xff] }
 0xccc   : > { %v4998_v36 = vpop.f32.mrb[68].mxu1 }
 0xccd   : > { %2752 = vrot.lane.b32.xlu1 %v7674_v13, %s5514_s4  ;;  %v3178_v58 = vpop.f32.mrb[69].mxu1 }
 0xcce   : > { %2750 = vrot.lane.b32.xlu0 %v7675_v47, %s5514_s4  ;;  %v4999_v6 = vpop.f32.mrb[70].mxu1 }
 0xccf   : > { %v3228_v9 = vpack.c.bf16 %v4999_v6, %v4998_v36  ;;  %v3181_v10 = vpop.f32.mrb[71].mxu1 }
 0xcd0   : > { %v3227_v17 = vpack.c.bf16 %v3181_v10, %v3178_v58 }
 0xcd1   : > { %3247 = vrot.lane.b32.xlu1 %v3228_v9, %s5515_s24  ;;  %v5488_v9 = vld [vmem:[%s5637_s3 + $0x18] sm:$0xff] }
 0xcd2   : > { %3245 = vrot.lane.b32.xlu0 %v3227_v17, %s5515_s24 }
 0xcd4   : > { %v5002_v26 = vpop.f32.mrb[72].mxu1 }
 0xcd5   : > { %2257 = vrot.lane.b32.xlu1 %v7678_v38, %s5513_s27  ;;  %v3194_v39 = vpop.f32.mrb[73].mxu1 }
 0xcd6   : > { %2255 = vrot.lane.b32.xlu0 %v7681_v59, %s5513_s27  ;;  %v5003_v40 = vpop.f32.mrb[74].mxu1 }
 0xcd7   : > { %v3230_v23 = vpack.c.bf16 %v5003_v40, %v5002_v26  ;;  %v3197_v15 = vpop.f32.mrb[75].mxu1  ;;  %v5490_v40 = vld [vmem:[%s5637_s3 + $0x28] sm:$0xff] }
 0xcd8   : > { %v3229_v22 = vpack.c.bf16 %v3197_v15, %v3194_v39 }
 0xcd9   : > { %3251 = vrot.lane.b32.xlu1 %v3230_v23, %s5515_s24 }
 0xcda   : > { %3249 = vrot.lane.b32.xlu0 %v3229_v22, %s5515_s24  ;;  %v5491_v22 = vld [vmem:[%s5637_s3 + $0x38] sm:$0xff] }
 0xcdd   : > { %2756 = vrot.lane.b32.xlu1 %v7682_v1, %s5514_s4 }
 0xcde   : > { %2754 = vrot.lane.b32.xlu0 %v7683_v33, %s5514_s4 }
 0xd00   : > { %v5006_v16 = vpop.f32.mrb[76].mxu1 }
 0xd01   : > { %v3210_v48 = vpop.f32.mrb[77].mxu1 }
 0xd02   : > { %v5007_v29 = vpop.f32.mrb[78].mxu1 }
 0xd03   : > { %v3232_v52 = vpack.c.bf16 %v5007_v29, %v5006_v16  ;;  %v3213_v61 = vpop.f32.mrb[79].mxu1  ;;  %v5492_v29 = vld [vmem:[%s5637_s3 + $0x30] sm:$0xff] }
 0xd04   : > { %v3231_v3 = vpack.c.bf16 %v3213_v61, %v3210_v48 }
 0xd05   : > { %3255 = vrot.lane.b32.xlu1 %v3232_v52, %s5515_s24 }
 0xd06   : > { %3253 = vrot.lane.b32.xlu0 %v3231_v3, %s5515_s24 }
 0xd3b   : > { %v3244_v31 = vpop.permute.xlu1 %3243 }
 0xd3c   : > { %3267 = vst.msk [vmem:[#allocation2 + $0x8] sm:$0xff] %vm3265_vm5, %v3244_v31  ;;  %v3242_v53 = vpop.permute.xlu0 %3241 }
 0xd3d   : > { %3266 = vst.msk [vmem:[#allocation2] sm:$0xff] %vm3265_vm5, %v3242_v53 }
 0xd3f   : > { %v2753_v49 = vpop.permute.xlu1 %2752 }
 0xd40   : > { %2772 = vst.msk [vmem:[#allocation2 + $0x28] sm:$0xff] %vm2766_vm4, %v2753_v49  ;;  %v2751_v41 = vpop.permute.xlu0 %2750 }
 0xd41   : > { %2771 = vst.msk [vmem:[#allocation2 + $0x20] sm:$0xff] %vm2766_vm4, %v2751_v41 }
 0xd43   : > { %v3248_v37 = vpop.permute.xlu1 %3247  ;;  %v3275_v51 = vld [vmem:[#allocation2 + $0x8] sm:$0xff] }
 0xd44   : > { %3269 = vst.msk [vmem:[#allocation2 + $0x18] sm:$0xff] %vm3265_vm5, %v3248_v37  ;;  %v3246_v28 = vpop.permute.xlu0 %3245  ;;  %v3274_v11 = vld [vmem:[#allocation2] sm:$0xff] }
 0xd45   : > { %3268 = vst.msk [vmem:[#allocation2 + $0x10] sm:$0xff] %vm3265_vm5, %v3246_v28  ;;  %5012 = vmatprep.mubr.msk.bf16.mxu1 %vm666_vm0, %v3274_v11  ;;  %v5493_v11 = vld [vmem:[%s5637_s3 + $0x40] sm:$0xff] }
 0xd46   : > { %5013 = vmatmul.mubr.msk.bf16.vlgmr.msra.gmra.mrb[80].mxu1 %vm666_vm0, %v3275_v51 }
 0xd47   : > { %v2258_v4 = vpop.permute.xlu1 %2257 }
 0xd48   : > { %2275 = vst.msk [vmem:[#allocation2 + $0x38] sm:$0xff] %vm2267_vm3, %v2258_v4  ;;  %v2256_v24 = vpop.permute.xlu0 %2255  ;;  %v5494_v4 = vld [vmem:[%s5637_s3 + $0x48] sm:$0xff] }
 0xd49   : > { %2274 = vst.msk [vmem:[#allocation2 + $0x30] sm:$0xff] %vm2267_vm3, %v2256_v24 }
 0xd4b   : > { %v3252_v2 = vpop.permute.xlu1 %3251  ;;  %v3277_v63 = vld [vmem:[#allocation2 + $0x18] sm:$0xff] }
 0xd4c   : > { %3271 = vst.msk [vmem:[#allocation2 + $0x28] sm:$0xff] %vm3265_vm5, %v3252_v2  ;;  %v3250_v45 = vpop.permute.xlu0 %3249  ;;  %v3276_v55 = vld [vmem:[#allocation2 + $0x10] sm:$0xff] }
 0xd4d   : > { %3270 = vst.msk [vmem:[#allocation2 + $0x20] sm:$0xff] %vm3265_vm5, %v3250_v45  ;;  %5016 = vmatprep.mubr.msk.bf16.mxu1 %vm666_vm0, %v3276_v55  ;;  %v5495_v45 = vld [vmem:[%s5637_s3 + $0x58] sm:$0xff] }
 0xd4e   : > { %5017 = vmatmul.mubr.msk.bf16.gmra.mrb[84].mxu1 %vm666_vm0, %v3277_v63 }
 0xd4f   : > { %v2757_v56 = vpop.permute.xlu1 %2756 }
 0xd50   : > { %2774 = vst.msk [vmem:[#allocation2 + $0x38] sm:$0xff] %vm2766_vm4, %v2757_v56  ;;  %v2755_v18 = vpop.permute.xlu0 %2754  ;;  %v5496_v56 = vld [vmem:[%s5637_s3 + $0x50] sm:$0xff] }
 0xd51   : > { %2773 = vst.msk [vmem:[#allocation2 + $0x30] sm:$0xff] %vm2766_vm4, %v2755_v18 }
 0xd53   : > { %v3279_v60 = vld [vmem:[#allocation2 + $0x28] sm:$0xff] }
 0xd54   : > { %v3278_v30 = vld [vmem:[#allocation2 + $0x20] sm:$0xff] }
 0xd55   : > { %5020 = vmatprep.mubr.msk.bf16.mxu1 %vm666_vm0, %v3278_v30 }
 0xd56   : > { %5021 = vmatmul.mubr.msk.bf16.gmra.mrb[88].mxu1 %vm666_vm0, %v3279_v60 }
 0xd77   : > { %v3256_v5 = vpop.permute.xlu1 %3255 }
 0xd78   : > { %3273 = vst.msk [vmem:[#allocation2 + $0x38] sm:$0xff] %vm3265_vm5, %v3256_v5  ;;  %v3254_v42 = vpop.permute.xlu0 %3253 }
 0xd79   : > { %3272 = vst.msk [vmem:[#allocation2 + $0x30] sm:$0xff] %vm3265_vm5, %v3254_v42 }
 0xd7f   : > { %v3281_v35 = vld [vmem:[#allocation2 + $0x38] sm:$0xff] }
 0xd80   : > { %v3280_v54 = vld [vmem:[#allocation2 + $0x30] sm:$0xff] }
 0xd81   : > { %5024 = vmatprep.mubr.msk.bf16.mxu1 %vm666_vm0, %v3280_v54 }
 0xd82   : > { %5025 = vmatmul.mubr.msk.bf16.gmra.mrb[92].mxu1 %vm666_vm0, %v3281_v35 }
 0xe19   : > { %v5014_v32 = vpop.f32.mrb[80].mxu1 }
 0xe1a   : > { %v3363_v21 = vpop.f32.mrb[81].mxu1  ;;  %v3372_v8 = vadd.f32 %v5014_v32, %v7033_v57 }
 0xe1b   : > { %v3364_v19 = vadd.f32 %v7033_v57, %v3363_v21  ;;  %v5015_v12 = vpop.f32.mrb[82].mxu1 }
 0xe1c   : > { %v3366_v0 = vpop.f32.mrb[83].mxu1  ;;  %v7042_v46 = vadd.f32 %v5486_v62, %v3372_v8  ;;  %v3375_v7 = vadd.f32 %v5015_v12, %v7033_v57  ;;  %v5497_v12 = vld [vmem:[%s5637_s3 + $0x60] sm:$0xff] }
 0xe1d   : > { %v7038_v50 = vadd.f32 %v5485_v25, %v3364_v19  ;;  %v3367_v44 = vadd.f32 %v7033_v57, %v3366_v0 }
 0xe1e   : > { %v7053_v10 = vadd.f32 %v5488_v9, %v3375_v7  ;;  %v3450_v20 = vsel %vm666_vm0, %v7042_v46, 0.0  ;;  %v5499_v7 = vld [vmem:[%s5637_s3 + $0x68] sm:$0xff] }
 0xe1f   : > { %v7046_v36 = vadd.f32 %v5487_v43, %v3367_v44  ;;  %v3444_v13 = vsel %vm666_vm0, %v7038_v50, 0.0  ;;  %v5498_v44 = vld [vmem:[%s5637_s3 + $0x70] sm:$0xff] }
 0xe20   : > { %3445 = vadd.xlane.f32.xlu0 %v3444_v13  ;;  %v3453_v15 = vsel %vm666_vm0, %v7053_v10, 0.0 }
 0xe21   : > { %v5018_v58 = vpop.f32.mrb[84].mxu1  ;;  %v3447_v47 = vsel %vm666_vm0, %v7046_v36, 0.0 }
 0xe22   : > { %3448 = vadd.xlane.f32.xlu1 %v3447_v47  ;;  %v3379_v6 = vpop.f32.mrb[85].mxu1  ;;  %v3388_v14 = vadd.f32 %v5018_v58, %v7033_v57  ;;  %v5500_v58 = vld [vmem:[%s5637_s3 + $0x78] sm:$0xff] }
 0xe23   : > { %v3380_v17 = vadd.f32 %v7033_v57, %v3379_v6  ;;  %v5019_v26 = vpop.f32.mrb[86].mxu1 }
 0xe24   : > { %3451 = vadd.xlane.f32.xlu0 %v3450_v20  ;;  %v3382_v27 = vpop.f32.mrb[87].mxu1  ;;  %v3391_v38 = vadd.f32 %v5019_v26, %v7033_v57  ;;  %v7075_v52 = vadd.f32 %v5492_v29, %v3388_v14 }
 0xe25   : > { %v3383_v39 = vadd.f32 %v7033_v57, %v3382_v27  ;;  %v7062_v59 = vadd.f32 %v5489_v34, %v3380_v17 }
 0xe26   : > { %v7070_v1 = vadd.f32 %v5491_v22, %v3391_v38  ;;  %v3462_v2 = vsel %vm666_vm0, %v7075_v52, 0.0 }
 0xe27   : > { %v7065_v23 = vadd.f32 %v5490_v40, %v3383_v39  ;;  %v3456_v31 = vsel %vm666_vm0, %v7062_v59, 0.0 }
 0xe28   : > { %3454 = vadd.xlane.f32.xlu0 %v3453_v15  ;;  %v3465_v37 = vsel %vm666_vm0, %v7070_v1, 0.0 }
 0xe29   : > { %v5022_v33 = vpop.f32.mrb[88].mxu1  ;;  %v3459_v16 = vsel %vm666_vm0, %v7065_v23, 0.0 }
 0xe2a   : > { %3460 = vadd.xlane.f32.xlu1 %v3459_v16  ;;  %v3395_v48 = vpop.f32.mrb[89].mxu1  ;;  %v3404_v28 = vadd.f32 %v5022_v33, %v7033_v57 }
 0xe2b   : > { %v3396_v61 = vadd.f32 %v7033_v57, %v3395_v48  ;;  %v5023_v3 = vpop.f32.mrb[90].mxu1 }
 0xe2c   : > { %3457 = vadd.xlane.f32.xlu0 %v3456_v31  ;;  %v3398_v53 = vpop.f32.mrb[91].mxu1  ;;  %v3407_v49 = vadd.f32 %v5023_v3, %v7033_v57  ;;  %v7099_v18 = vadd.f32 %v5496_v56, %v3404_v28 }
 0xe2d   : > { %v3399_v41 = vadd.f32 %v7033_v57, %v3398_v53  ;;  %v7086_v51 = vadd.f32 %v5493_v11, %v3396_v61 }
 0xe2e   : > { %3466 = vadd.xlane.f32.xlu1 %v3465_v37  ;;  %v7094_v55 = vadd.f32 %v5495_v45, %v3407_v49  ;;  %v3474_v5 = vsel %vm666_vm0, %v7099_v18, 0.0 }
 0xe2f   : > { %v7089_v24 = vadd.f32 %v5494_v4, %v3399_v41  ;;  %v3468_v30 = vsel %vm666_vm0, %v7086_v51, 0.0 }
 0xe30   : > { %3463 = vadd.xlane.f32.xlu0 %v3462_v2  ;;  %v3477_v60 = vsel %vm666_vm0, %v7094_v55, 0.0 }
 0xe31   : > { %v3471_v63 = vsel %vm666_vm0, %v7089_v24, 0.0 }
 0xe32   : > { %3472 = vadd.xlane.f32.xlu1 %v3471_v63 }
 0xe34   : > { %3469 = vadd.xlane.f32.xlu0 %v3468_v30 }
 0xe36   : > { %3478 = vadd.xlane.f32.xlu1 %v3477_v60 }
 0xe38   : > { %3475 = vadd.xlane.f32.xlu0 %v3474_v5 }
 0xe55   : > { %v5026_v42 = vpop.f32.mrb[92].mxu1 }
 0xe56   : > { %v3420_v54 = vadd.f32 %v5026_v42, %v7033_v57  ;;  %v3411_v35 = vpop.f32.mrb[93].mxu1 }
 0xe57   : > { %v3412_v32 = vadd.f32 %v7033_v57, %v3411_v35  ;;  %v5027_v21 = vpop.f32.mrb[94].mxu1 }
 0xe58   : > { %v3423_v8 = vadd.f32 %v5027_v21, %v7033_v57  ;;  %v3414_v19 = vpop.f32.mrb[95].mxu1  ;;  %v7115_v62 = vadd.f32 %v5498_v44, %v3420_v54 }
 0xe59   : > { %v7111_v0 = vadd.f32 %v5497_v12, %v3412_v32  ;;  %v3415_v25 = vadd.f32 %v7033_v57, %v3414_v19 }
 0xe5a   : > { %v7123_v47 = vadd.f32 %v5500_v58, %v3423_v8  ;;  %v3486_v57 = vsel %vm666_vm0, %v7115_v62, 0.0 }
 0xe5b   : > { %v7118_v43 = vadd.f32 %v5499_v7, %v3415_v25  ;;  %v3480_v13 = vsel %vm666_vm0, %v7111_v0, 0.0 }
 0xe5c   : > { %3481 = vadd.xlane.f32.xlu0 %v3480_v13  ;;  %v3489_v9 = vsel %vm666_vm0, %v7123_v47, 0.0 }
 0xe5d   : > { %v3483_v6 = vsel %vm666_vm0, %v7118_v43, 0.0 }
 0xe5e   : > { %3484 = vadd.xlane.f32.xlu1 %v3483_v6 }
 0xe60   : > { %3487 = vadd.xlane.f32.xlu0 %v3486_v57 }
 0xe62   : > { %3490 = vadd.xlane.f32.xlu1 %v3489_v9 }
 0xead   : > { %v3446_v17 = vpop.xlane.xlu0 %3445 }
 0xeae   : > { %v3492_v26 = vmul.f32 0.03125, %v3446_v17 }
 0xeaf   : > { %v3449_v20 = vpop.xlane.xlu1 %3448 }
 0xeb0   : > { %v7132_v27 = vsub.f32 %v7038_v50, %v3492_v26  ;;  %v3493_v38 = vmul.f32 0.03125, %v3449_v20 }
 0xeb1   : > { %v3452_v39 = vpop.xlane.xlu0 %3451 }
 0xeb2   : > { %v7135_v14 = vsub.f32 %v7046_v36, %v3493_v38  ;;  %v3494_v34 = vmul.f32 0.03125, %v3452_v39  ;;  %v3524_v40 = vmul.f32 %v7132_v27, %v7132_v27 }
 0xeb4   : > { %v7140_v15 = vsub.f32 %v7042_v46, %v3494_v34  ;;  %v3540_v22 = vsel %vm666_vm0, %v3524_v40, 0.0  ;;  %v3525_v33 = vmul.f32 %v7135_v14, %v7135_v14 }
 0xeb5   : > { %3541 = vadd.xlane.f32.xlu0 %v3540_v22  ;;  %v3455_v16 = vpop.xlane.xlu0 %3454 }
 0xeb6   : > { %v3495_v48 = vmul.f32 0.03125, %v3455_v16  ;;  %v3543_v29 = vsel %vm666_vm0, %v3525_v33, 0.0  ;;  %v3526_v61 = vmul.f32 %v7140_v15, %v7140_v15 }
 0xeb7   : > { %v3461_v3 = vpop.xlane.xlu1 %3460  ;;  %3544 = vadd.xlane.f32.xlu1 %v3543_v29 }
 0xeb8   : > { %v7149_v31 = vsub.f32 %v7053_v10, %v3495_v48  ;;  %v3497_v53 = vmul.f32 0.03125, %v3461_v3  ;;  %v3546_v49 = vsel %vm666_vm0, %v3526_v61, 0.0  ;;  %v5127_v61 = vld [vmem:[%s7633_s14] sm:$0xff]   ;;  %v5128_v3 = vld [vmem:[%s7633_s14 + $0x8] sm:$0xff]  }
 0xeb9   : > { %3547 = vadd.xlane.f32.xlu0 %v3546_v49  ;;  %v3458_v41 = vpop.xlane.xlu0 %3457  ;;  %5028 = vmatprep.subr.bf16.mxu0 %v5127_v61 }
 0xeba   : > { %v7153_v37 = vsub.f32 %v7065_v23, %v3497_v53  ;;  %v3496_v28 = vmul.f32 0.03125, %v3458_v41  ;;  %v3527_v11 = vmul.f32 %v7149_v31, %v7149_v31  ;;  %5029 = vmatpush3.bf16.msra.mxu0 %v5127_v61 }
 0xebb   : > { %v3467_v4 = vpop.xlane.xlu1 %3466  ;;  %5030 = vmatprep.subr.bf16.mxu0 %v5128_v3 }
 0xebc   : > { %v7158_v2 = vsub.f32 %v7062_v59, %v3496_v28  ;;  %v3499_v45 = vmul.f32 0.03125, %v3467_v4  ;;  %v3549_v63 = vsel %vm666_vm0, %v3527_v11, 0.0  ;;  %v3529_v56 = vmul.f32 %v7153_v37, %v7153_v37 }
 0xebd   : > { %3550 = vadd.xlane.f32.xlu1 %v3549_v63  ;;  %v3464_v30 = vpop.xlane.xlu0 %3463 }
 0xebe   : > { %v7164_v60 = vsub.f32 %v7070_v1, %v3499_v45  ;;  %v3498_v5 = vmul.f32 0.03125, %v3464_v30  ;;  %v3528_v42 = vmul.f32 %v7158_v2, %v7158_v2  ;;  %v3555_v35 = vsel %vm666_vm0, %v3529_v56, 0.0  ;;  %5031 = vmatpush3.bf16.msra.mxu0 %v5128_v3 }
 0xebf   : > { %v3473_v54 = vpop.xlane.xlu1 %3472 }
 0xec0   : > { %v7170_v32 = vsub.f32 %v7075_v52, %v3498_v5  ;;  %v3501_v21 = vmul.f32 0.03125, %v3473_v54  ;;  %v3552_v8 = vsel %vm666_vm0, %v3528_v42, 0.0  ;;  %v3531_v19 = vmul.f32 %v7164_v60, %v7164_v60 }
 0xec1   : > { %3556 = vadd.xlane.f32.xlu1 %v3555_v35  ;;  %3553 = vadd.xlane.f32.xlu0 %v3552_v8  ;;  %v3470_v12 = vpop.xlane.xlu0 %3469 }
 0xec2   : > { %v7176_v25 = vsub.f32 %v7089_v24, %v3501_v21  ;;  %v3500_v44 = vmul.f32 0.03125, %v3470_v12  ;;  %v3530_v7 = vmul.f32 %v7170_v32, %v7170_v32  ;;  %v3561_v58 = vsel %vm666_vm0, %v3531_v19, 0.0 }
 0xec3   : > { %v3479_v13 = vpop.xlane.xlu1 %3478 }
 0xec4   : > { %v7182_v6 = vsub.f32 %v7086_v51, %v3500_v44  ;;  %v3503_v57 = vmul.f32 0.03125, %v3479_v13  ;;  %v3558_v9 = vsel %vm666_vm0, %v3530_v7, 0.0  ;;  %v3533_v17 = vmul.f32 %v7176_v25, %v7176_v25  ;;  %v5129_v13 = vld [vmem:[%s7635_s16] sm:$0xff]  }
 0xec5   : > { %3562 = vadd.xlane.f32.xlu1 %v3561_v58  ;;  %3559 = vadd.xlane.f32.xlu0 %v3558_v9  ;;  %v3476_v26 = vpop.xlane.xlu0 %3475  ;;  %v5130_v58 = vld [vmem:[%s7635_s16 + $0x8] sm:$0xff]  }
 0xec6   : > { %v7188_v20 = vsub.f32 %v7094_v55, %v3503_v57  ;;  %v3502_v38 = vmul.f32 0.03125, %v3476_v26  ;;  %v3532_v39 = vmul.f32 %v7182_v6, %v7182_v6  ;;  %v3567_v40 = vsel %vm666_vm0, %v3533_v17, 0.0  ;;  %5048 = vmatprep.subr.bf16.mxu1 %v5129_v13 }
 0xec7   : > { %5049 = vmatpush3.bf16.msra.mxu1 %v5129_v13 }
 0xec8   : > { %v7193_v34 = vsub.f32 %v7099_v18, %v3502_v38  ;;  %v3564_v22 = vsel %vm666_vm0, %v3532_v39, 0.0  ;;  %v3535_v33 = vmul.f32 %v7188_v20, %v7188_v20  ;;  %5050 = vmatprep.subr.bf16.mxu1 %v5130_v58 }
 0xec9   : > { %3568 = vadd.xlane.f32.xlu1 %v3567_v40  ;;  %3565 = vadd.xlane.f32.xlu0 %v3564_v22 }
 0xeca   : > { %v3534_v16 = vmul.f32 %v7193_v34, %v7193_v34  ;;  %v3573_v48 = vsel %vm666_vm0, %v3535_v33, 0.0 }
 0xecb   : > { %5051 = vmatpush3.bf16.msra.mxu1 %v5130_v58 }
 0xecc   : > { %v3570_v29 = vsel %vm666_vm0, %v3534_v16, 0.0 }
 0xecd   : > { %3574 = vadd.xlane.f32.xlu1 %v3573_v48  ;;  %3571 = vadd.xlane.f32.xlu0 %v3570_v29 }
 0xee9   : > { %v3482_v53 = vpop.xlane.xlu0 %3481 }
 0xeea   : > { %v3504_v49 = vmul.f32 0.03125, %v3482_v53 }
 0xeeb   : > { %v3485_v41 = vpop.xlane.xlu1 %3484 }
 0xeec   : > { %v7210_v28 = vsub.f32 %v7111_v0, %v3504_v49  ;;  %v3505_v11 = vmul.f32 0.03125, %v3485_v41 }
 0xeed   : > { %v3488_v4 = vpop.xlane.xlu0 %3487 }
 0xeee   : > { %v7213_v45 = vsub.f32 %v7118_v43, %v3505_v11  ;;  %v3506_v63 = vmul.f32 0.03125, %v3488_v4  ;;  %v3536_v56 = vmul.f32 %v7210_v28, %v7210_v28  ;;  %v7242_v11 = vld [vmem:[%s7631_s12] ss:$0 sm:$0xff] }
 0xeef   : > { %v3491_v30 = vpop.xlane.xlu1 %3490 }
 0xef0   : > { %v7218_v5 = vsub.f32 %v7115_v62, %v3506_v63  ;;  %v3507_v42 = vmul.f32 0.03125, %v3491_v30  ;;  %v3576_v54 = vsel %vm666_vm0, %v3536_v56, 0.0  ;;  %v3537_v35 = vmul.f32 %v7213_v45, %v7213_v45 }
 0xef1   : > { %3577 = vadd.xlane.f32.xlu0 %v3576_v54 }
 0xef2   : > { %v7224_v21 = vsub.f32 %v7123_v47, %v3507_v42  ;;  %v3579_v8 = vsel %vm666_vm0, %v3537_v35, 0.0  ;;  %v3538_v19 = vmul.f32 %v7218_v5, %v7218_v5 }
 0xef3   : > { %3580 = vadd.xlane.f32.xlu1 %v3579_v8 }
 0xef4   : > { %v3582_v12 = vsel %vm666_vm0, %v3538_v19, 0.0  ;;  %v3539_v44 = vmul.f32 %v7224_v21, %v7224_v21 }
 0xef5   : > { %3583 = vadd.xlane.f32.xlu0 %v3582_v12 }
 0xef6   : > { %v3585_v7 = vsel %vm666_vm0, %v3539_v44, 0.0 }
 0xef7   : > { %3586 = vadd.xlane.f32.xlu1 %v3585_v7  ;;  %v7250_v7 = vld [vmem:[%s7632_s13] ss:$0 sm:$0xff] }
 0xf42   : > { %v3542_v57 = vpop.xlane.xlu0 %3541 }
 0xf43   : > { %v3588_v9 = vmul.f32 0.03125, %v3542_v57 }
 0xf44   : > { %v3545_v17 = vpop.xlane.xlu1 %3544 }
 0xf45   : > { %v3604_v26 = vadd.f32 1e-06, %v3588_v9  ;;  %v3589_v38 = vmul.f32 0.03125, %v3545_v17 }
 0xf46   : > { %v3548_v39 = vpop.xlane.xlu0 %3547 }
 0xf47   : > { %5421 = vrsqrt.f32 %v3604_v26  ;;  %v3605_v40 = vadd.f32 1e-06, %v3589_v38  ;;  %v3590_v22 = vmul.f32 0.03125, %v3548_v39 }
 0xf49   : > { %5423 = vrsqrt.f32 %v3605_v40  ;;  %v3606_v33 = vadd.f32 1e-06, %v3590_v22 }
 0xf4a   : > { %v3551_v16 = vpop.xlane.xlu1 %3550 }
 0xf4b   : > { %5425 = vrsqrt.f32 %v3606_v33  ;;  %v3591_v48 = vmul.f32 0.03125, %v3551_v16 }
 0xf4d   : > { %v3607_v29 = vadd.f32 1e-06, %v3591_v48 }
 0xf4e   : > { %v3557_v61 = vpop.xlane.xlu1 %3556  ;;  %v3554_v3 = vpop.xlane.xlu0 %3553 }
 0xf4f   : > { %5427 = vrsqrt.f32 %v3607_v29  ;;  %v3593_v53 = vmul.f32 0.03125, %v3557_v61  ;;  %v3592_v49 = vmul.f32 0.03125, %v3554_v3 }
 0xf51   : > { %v5422_v41 = vpop.eup %5421  ;;  %v3609_v4 = vadd.f32 1e-06, %v3593_v53  ;;  %v3608_v63 = vadd.f32 1e-06, %v3592_v49 }
 0xf52   : > { %v3636_v56 = vmul.f32 %v5422_v41, %v7132_v27  ;;  %v3563_v30 = vpop.xlane.xlu1 %3562  ;;  %v3560_v42 = vpop.xlane.xlu0 %3559 }
 0xf53   : > { %v5424_v54 = vpop.eup %5423  ;;  %5429 = vrsqrt.f32 %v3609_v4  ;;  %v3595_v35 = vmul.f32 0.03125, %v3563_v30  ;;  %v3594_v8 = vmul.f32 0.03125, %v3560_v42 }
 0xf54   : > { %v3637_v19 = vmul.f32 %v5424_v54, %v7135_v14  ;;  %5431 = vrsqrt.f32 %v3608_v63  ;;  %v3658_v12 = vmul.f32 %v7242_v11, %v3636_v56 }
 0xf55   : > { %v5426_v44 = vpop.eup %5425  ;;  %v3611_v13 = vadd.f32 1e-06, %v3595_v35  ;;  %v3610_v58 = vadd.f32 1e-06, %v3594_v8 }
 0xf56   : > { %v3638_v27 = vmul.f32 %v5426_v44, %v7140_v15  ;;  %v3569_v57 = vpop.xlane.xlu1 %3568  ;;  %v3566_v9 = vpop.xlane.xlu0 %3565  ;;  %v3659_v17 = vmul.f32 %v7242_v11, %v3637_v19  ;;  %v3680_v38 = vadd.f32 %v7250_v7, %v3658_v12 }
 0xf57   : > { %5433 = vrsqrt.f32 %v3611_v13  ;;  %v3597_v26 = vmul.f32 0.03125, %v3569_v57  ;;  %v3596_v14 = vmul.f32 0.03125, %v3566_v9 }
 0xf58   : > { %5435 = vrsqrt.f32 %v3610_v58  ;;  %v3681_v39 = vadd.f32 %v7250_v7, %v3659_v17  ;;  %v3660_v16 = vmul.f32 %v7242_v11, %v3638_v27 }
 0xf59   : > { %v5428_v40 = vpop.eup %5427  ;;  %v3613_v22 = vadd.f32 1e-06, %v3597_v26  ;;  %v3612_v33 = vadd.f32 1e-06, %v3596_v14 }
 0xf5a   : > { %v3639_v48 = vmul.f32 %v5428_v40, %v7149_v31  ;;  %v3575_v15 = vpop.xlane.xlu1 %3574  ;;  %v3572_v29 = vpop.xlane.xlu0 %3571  ;;  %v3696_v61 = vpack.c.bf16 %v3681_v39, %v3680_v38  ;;  %v3682_v30 = vadd.f32 %v7250_v7, %v3660_v16 }
 0xf5b   : > { %5437 = vrsqrt.f32 %v3613_v22  ;;  %v3599_v3 = vmul.f32 0.03125, %v3575_v15  ;;  %v3598_v53 = vmul.f32 0.03125, %v3572_v29 }
 0xf5c   : > { %v3661_v49 = vmul.f32 %v7242_v11, %v3639_v48  ;;  %5439 = vrsqrt.f32 %v3612_v33  ;;  %5032 = vmatprep.mubr.msk.bf16.mxu0 %vm666_vm0, %v3696_v61 }
 0xf5d   : > { %v5430_v41 = vpop.eup %5429  ;;  %v3615_v4 = vadd.f32 1e-06, %v3599_v3  ;;  %v3614_v63 = vadd.f32 1e-06, %v3598_v53 }
 0xf5e   : > { %v5432_v56 = vpop.eup %5431  ;;  %v3683_v42 = vadd.f32 %v7250_v7, %v3661_v49  ;;  %v3641_v31 = vmul.f32 %v5430_v41, %v7153_v37 }
 0xf5f   : > { %v3640_v54 = vmul.f32 %v5432_v56, %v7158_v2  ;;  %5441 = vrsqrt.f32 %v3615_v4 }
 0xf60   : > { %5443 = vrsqrt.f32 %v3614_v63  ;;  %v3697_v35 = vpack.c.bf16 %v3683_v42, %v3682_v30  ;;  %v3663_v8 = vmul.f32 %v7242_v11, %v3641_v31 }
 0xf61   : > { %v5434_v19 = vpop.eup %5433  ;;  %v3662_v12 = vmul.f32 %v7242_v11, %v3640_v54 }
 0xf62   : > { %v5436_v44 = vpop.eup %5435  ;;  %v3643_v13 = vmul.f32 %v5434_v19, %v7164_v60  ;;  %5033 = vmatmul.mubr.msk.bf16.vlgmr.msra.gmra.mrb[96].mxu0 %vm666_vm0, %v3697_v35  ;;  %v3685_v58 = vadd.f32 %v7250_v7, %v3663_v8 }
 0xf63   : > { %v3642_v27 = vmul.f32 %v5436_v44, %v7170_v32  ;;  %v3684_v37 = vadd.f32 %v7250_v7, %v3662_v12 }
 0xf64   : > { %v3665_v2 = vmul.f32 %v7242_v11, %v3643_v13 }
 0xf65   : > { %v5438_v57 = vpop.eup %5437  ;;  %v3698_v9 = vpack.c.bf16 %v3685_v58, %v3684_v37  ;;  %v3664_v17 = vmul.f32 %v7242_v11, %v3642_v27 }
 0xf66   : > { %v5440_v26 = vpop.eup %5439  ;;  %v3645_v14 = vmul.f32 %v5438_v57, %v7176_v25  ;;  %v3687_v38 = vadd.f32 %v7250_v7, %v3665_v2 }
 0xf67   : > { %v3644_v60 = vmul.f32 %v5440_v26, %v7182_v6  ;;  %5036 = vmatprep.mubr.msk.bf16.mxu0 %vm666_vm0, %v3698_v9  ;;  %v3686_v39 = vadd.f32 %v7250_v7, %v3664_v17 }
 0xf68   : > { %v3667_v32 = vmul.f32 %v7242_v11, %v3645_v14 }
 0xf69   : > { %v5442_v40 = vpop.eup %5441  ;;  %v3699_v22 = vpack.c.bf16 %v3687_v38, %v3686_v39  ;;  %v3666_v33 = vmul.f32 %v7242_v11, %v3644_v60 }
 0xf6a   : > { %v5444_v16 = vpop.eup %5443  ;;  %v3647_v48 = vmul.f32 %v5442_v40, %v7188_v20  ;;  %v3689_v15 = vadd.f32 %v7250_v7, %v3667_v32  ;;  %v5132_v32 = vld [vmem:[%s7635_s16 + $0x18] sm:$0xff]  }
 0xf6b   : > { %v3646_v25 = vmul.f32 %v5444_v16, %v7193_v34  ;;  %5037 = vmatmul.mubr.msk.bf16.gmra.mrb[100].mxu0 %vm666_vm0, %v3699_v22  ;;  %v3688_v6 = vadd.f32 %v7250_v7, %v3666_v33 }
 0xf6c   : > { %v3669_v29 = vmul.f32 %v7242_v11, %v3647_v48 }
 0xf6d   : > { %v3700_v61 = vpack.c.bf16 %v3689_v15, %v3688_v6  ;;  %v3668_v3 = vmul.f32 %v7242_v11, %v3646_v25 }
 0xf6e   : > { %v3691_v53 = vadd.f32 %v7250_v7, %v3669_v29 }
 0xf6f   : > { %5040 = vmatprep.mubr.msk.bf16.mxu0 %vm666_vm0, %v3700_v61  ;;  %v3690_v49 = vadd.f32 %v7250_v7, %v3668_v3 }
 0xf71   : > { %v3701_v20 = vpack.c.bf16 %v3691_v53, %v3690_v49 }
 0xf73   : > { %5041 = vmatmul.mubr.msk.bf16.gmra.mrb[104].mxu0 %vm666_vm0, %v3701_v20 }
 0xf7e   : > { %v3578_v41 = vpop.xlane.xlu0 %3577 }
 0xf7f   : > { %v3600_v34 = vmul.f32 0.03125, %v3578_v41 }
 0xf80   : > { %v3581_v4 = vpop.xlane.xlu1 %3580 }
 0xf81   : > { %v3616_v63 = vadd.f32 1e-06, %v3600_v34  ;;  %v3601_v56 = vmul.f32 0.03125, %v3581_v4 }
 0xf82   : > { %v3584_v30 = vpop.xlane.xlu0 %3583 }
 0xf83   : > { %5445 = vrsqrt.f32 %v3616_v63  ;;  %v3617_v42 = vadd.f32 1e-06, %v3601_v56  ;;  %v3602_v31 = vmul.f32 0.03125, %v3584_v30 }
 0xf84   : > { %v3587_v54 = vpop.xlane.xlu1 %3586 }
 0xf85   : > { %5447 = vrsqrt.f32 %v3617_v42  ;;  %v3618_v35 = vadd.f32 1e-06, %v3602_v31  ;;  %v3603_v8 = vmul.f32 0.03125, %v3587_v54 }
 0xf87   : > { %5449 = vrsqrt.f32 %v3618_v35  ;;  %v3619_v19 = vadd.f32 1e-06, %v3603_v8 }
 0xf89   : > { %5451 = vrsqrt.f32 %v3619_v19 }
 0xf8d   : > { %v5446_v12 = vpop.eup %5445 }
 0xf8e   : > { %v3648_v44 = vmul.f32 %v5446_v12, %v7210_v28 }
 0xf8f   : > { %v5448_v13 = vpop.eup %5447 }
 0xf90   : > { %v3649_v58 = vmul.f32 %v5448_v13, %v7213_v45  ;;  %v3670_v27 = vmul.f32 %v7242_v11, %v3648_v44 }
 0xf91   : > { %v5450_v37 = vpop.eup %5449 }
 0xf92   : > { %v3650_v2 = vmul.f32 %v5450_v37, %v7218_v5  ;;  %v3671_v57 = vmul.f32 %v7242_v11, %v3649_v58  ;;  %v3692_v26 = vadd.f32 %v7250_v7, %v3670_v27 }
 0xf93   : > { %v5452_v9 = vpop.eup %5451 }
 0xf94   : > { %v3651_v17 = vmul.f32 %v5452_v9, %v7224_v21  ;;  %v3693_v14 = vadd.f32 %v7250_v7, %v3671_v57  ;;  %v3672_v38 = vmul.f32 %v7242_v11, %v3650_v2  ;;  %v5131_v21 = vld [vmem:[%s7635_s16 + $0x10] sm:$0xff]  }
 0xf95   : > { %5052 = vmatprep.subr.bf16.mxu1 %v5131_v21 }
 0xf96   : > { %v3702_v28 = vpack.c.bf16 %v3693_v14, %v3692_v26  ;;  %v3673_v60 = vmul.f32 %v7242_v11, %v3651_v17  ;;  %v3694_v45 = vadd.f32 %v7250_v7, %v3672_v38  ;;  %5053 = vmatpush3.bf16.msra.mxu1 %v5131_v21  ;;  %v4472_v11 = vld [vmem:[%s7634_s15] ss:$0 sm:$0xff] }
 0xf97   : > { %5054 = vmatprep.subr.bf16.mxu1 %v5132_v32 }
 0xf98   : > { %5044 = vmatprep.mubr.msk.bf16.mxu0 %vm666_vm0, %v3702_v28  ;;  %v3695_v5 = vadd.f32 %v7250_v7, %v3673_v60 }
 0xf9a   : > { %v3703_v39 = vpack.c.bf16 %v3695_v5, %v3694_v45  ;;  %5055 = vmatpush3.bf16.msra.mxu1 %v5132_v32 }
 0xf9c   : > { %5045 = vmatmul.mubr.msk.bf16.gmra.mrb[108].mxu0 %vm666_vm0, %v3703_v39 }
0x1035   : > { %v5034_v7 = vpop.f32.mrb[96].mxu0 }
0x1036   : > { %v3794_v40 = vadd.f32 %v5034_v7, %v4472_v11  ;;  %v3785_v22 = vpop.f32.mrb[97].mxu0 }
0x1037   : > { %v3786_v33 = vadd.f32 %v4472_v11, %v3785_v22  ;;  %v5035_v16 = vpop.f32.mrb[98].mxu0 }
0x1038   : > { %v3797_v48 = vadd.f32 %v5035_v16, %v4472_v11  ;;  %v3788_v15 = vpop.f32.mrb[99].mxu0  ;;  %v3850_v6 = vmax.f32 %v3794_v40, 0.0 }
0x1039   : > { %v3789_v25 = vadd.f32 %v4472_v11, %v3788_v15  ;;  %v3848_v61 = vmax.f32 %v3786_v33, 0.0 }
0x103a   : > { %v3851_v29 = vmax.f32 %v3797_v48, 0.0 }
0x103b   : > { %v3849_v3 = vmax.f32 %v3789_v25, 0.0 }
0x103c   : > { %v3865_v53 = vpack.c.bf16 %v3851_v29, %v3850_v6  ;;  %v7325_v29 = vld [vmem:[%s7636_s17] ss:$0 sm:$0xff] }
0x103d   : > { %v3864_v49 = vpack.c.bf16 %v3849_v3, %v3848_v61 }
0x103e   : > { %v5038_v20 = vpop.f32.mrb[100].mxu0 }
0x103f   : > { %v3810_v41 = vadd.f32 %v5038_v20, %v4472_v11  ;;  %v3801_v34 = vpop.f32.mrb[101].mxu0  ;;  %5056 = vmatprep.mubr.msk.bf16.mxu1 %vm3911_vm6, %v3864_v49 }
0x1040   : > { %v3802_v4 = vadd.f32 %v4472_v11, %v3801_v34  ;;  %v5039_v63 = vpop.f32.mrb[102].mxu0  ;;  %5057 = vmatmul.mubr.msk.bf16.vlgmr.msra.gmra.mrb[96].mxu1 %vm3911_vm6, %v3865_v53 }
0x1041   : > { %v3813_v56 = vadd.f32 %v5039_v63, %v4472_v11  ;;  %v3804_v30 = vpop.f32.mrb[103].mxu0  ;;  %v3854_v31 = vmax.f32 %v3810_v41, 0.0 }
0x1042   : > { %v3805_v42 = vadd.f32 %v4472_v11, %v3804_v30  ;;  %v3852_v35 = vmax.f32 %v3802_v4, 0.0 }
0x1043   : > { %v3855_v54 = vmax.f32 %v3813_v56, 0.0 }
0x1044   : > { %v3853_v8 = vmax.f32 %v3805_v42, 0.0 }
0x1045   : > { %v3867_v19 = vpack.c.bf16 %v3855_v54, %v3854_v31 }
0x1046   : > { %v3866_v12 = vpack.c.bf16 %v3853_v8, %v3852_v35  ;;  %v5042_v44 = vpop.f32.mrb[104].mxu0 }
0x1047   : > { %v3826_v13 = vadd.f32 %v5042_v44, %v4472_v11  ;;  %v3817_v58 = vpop.f32.mrb[105].mxu0 }
0x1048   : > { %v3818_v27 = vadd.f32 %v4472_v11, %v3817_v58  ;;  %v5043_v37 = vpop.f32.mrb[106].mxu0  ;;  %5060 = vmatprep.mubr.msk.bf16.mxu1 %vm3911_vm6, %v3866_v12 }
0x1049   : > { %v3829_v2 = vadd.f32 %v5043_v37, %v4472_v11  ;;  %v3820_v57 = vpop.f32.mrb[107].mxu0  ;;  %5061 = vmatmul.mubr.msk.bf16.gmra.mrb[100].mxu1 %vm3911_vm6, %v3867_v19  ;;  %v3858_v17 = vmax.f32 %v3826_v13, 0.0 }
0x104a   : > { %v3821_v9 = vadd.f32 %v4472_v11, %v3820_v57  ;;  %v3856_v14 = vmax.f32 %v3818_v27, 0.0 }
0x104b   : > { %v3859_v26 = vmax.f32 %v3829_v2, 0.0 }
0x104c   : > { %v3857_v38 = vmax.f32 %v3821_v9, 0.0 }
0x104d   : > { %v3869_v28 = vpack.c.bf16 %v3859_v26, %v3858_v17 }
0x104e   : > { %v3868_v60 = vpack.c.bf16 %v3857_v38, %v3856_v14 }
0x1050   : > { %5064 = vmatprep.mubr.msk.bf16.mxu1 %vm3911_vm6, %v3868_v60 }
0x1051   : > { %5065 = vmatmul.mubr.msk.bf16.gmra.mrb[104].mxu1 %vm3911_vm6, %v3869_v28 }
0x106f   : > { %v5046_v45 = vpop.f32.mrb[108].mxu0 }
0x1070   : > { %v3842_v5 = vadd.f32 %v5046_v45, %v4472_v11  ;;  %v3833_v39 = vpop.f32.mrb[109].mxu0 }
0x1071   : > { %v3834_v21 = vadd.f32 %v4472_v11, %v3833_v39  ;;  %v5047_v32 = vpop.f32.mrb[110].mxu0 }
0x1072   : > { %v3845_v7 = vadd.f32 %v5047_v32, %v4472_v11  ;;  %v3836_v40 = vpop.f32.mrb[111].mxu0  ;;  %v3862_v33 = vmax.f32 %v3842_v5, 0.0 }
0x1073   : > { %v3837_v22 = vadd.f32 %v4472_v11, %v3836_v40  ;;  %v3860_v48 = vmax.f32 %v3834_v21, 0.0 }
0x1074   : > { %v3863_v16 = vmax.f32 %v3845_v7, 0.0 }
0x1075   : > { %v3861_v15 = vmax.f32 %v3837_v22, 0.0 }
0x1076   : > { %v3871_v25 = vpack.c.bf16 %v3863_v16, %v3862_v33 }
0x1077   : > { %v3870_v6 = vpack.c.bf16 %v3861_v15, %v3860_v48 }
0x1079   : > { %5068 = vmatprep.mubr.msk.bf16.mxu1 %vm3911_vm6, %v3870_v6 }
0x107a   : > { %5069 = vmatmul.mubr.msk.bf16.gmra.mrb[108].mxu1 %vm3911_vm6, %v3871_v25 }
0x1113   : > { %v5058_v61 = vpop.f32.mrb[96].mxu1 }
0x1114   : > { %v3979_v3 = vadd.f32 %v5058_v61, %v7325_v29  ;;  %v3970_v53 = vpop.f32.mrb[97].mxu1 }
0x1115   : > { %v3971_v11 = vadd.f32 %v7325_v29, %v3970_v53  ;;  %v5059_v49 = vpop.f32.mrb[98].mxu1 }
0x1116   : > { %v7330_v20 = vadd.f32 %v3979_v3, %v7042_v46  ;;  %v3982_v41 = vadd.f32 %v5059_v49, %v7325_v29  ;;  %v3973_v34 = vpop.f32.mrb[99].mxu1 }
0x1117   : > { %v3974_v4 = vadd.f32 %v7325_v29, %v3973_v34  ;;  %v7335_v63 = vadd.f32 %v3971_v11, %v7038_v50 }
0x1118   : > { %v7338_v56 = vadd.f32 %v3982_v41, %v7053_v10  ;;  %v4057_v30 = vsel %vm666_vm0, %v7330_v20, 0.0 }
0x1119   : > { %4058 = vadd.xlane.f32.xlu0 %v4057_v30  ;;  %v7343_v42 = vadd.f32 %v3974_v4, %v7046_v36  ;;  %v4051_v54 = vsel %vm666_vm0, %v7335_v63, 0.0 }
0x111a   : > { %v4060_v46 = vsel %vm666_vm0, %v7338_v56, 0.0 }
0x111b   : > { %4061 = vadd.xlane.f32.xlu1 %v4060_v46  ;;  %v4054_v19 = vsel %vm666_vm0, %v7343_v42, 0.0 }
0x111c   : > { %v5062_v31 = vpop.f32.mrb[100].mxu1 }
0x111d   : > { %v3995_v50 = vadd.f32 %v5062_v31, %v7325_v29  ;;  %v3986_v35 = vpop.f32.mrb[101].mxu1  ;;  %4052 = vadd.xlane.f32.xlu0 %v4051_v54 }
0x111e   : > { %v3987_v10 = vadd.f32 %v7325_v29, %v3986_v35  ;;  %v5063_v8 = vpop.f32.mrb[102].mxu1 }
0x111f   : > { %v7354_v36 = vadd.f32 %v3995_v50, %v7075_v52  ;;  %v3998_v12 = vadd.f32 %v5063_v8, %v7325_v29  ;;  %v3989_v44 = vpop.f32.mrb[103].mxu1  ;;  %4055 = vadd.xlane.f32.xlu1 %v4054_v19 }
0x1120   : > { %v3990_v13 = vadd.f32 %v7325_v29, %v3989_v44  ;;  %v7359_v58 = vadd.f32 %v3987_v10, %v7062_v59 }
0x1121   : > { %v7362_v27 = vadd.f32 %v3998_v12, %v7070_v1  ;;  %v4069_v37 = vsel %vm666_vm0, %v7354_v36, 0.0 }
0x1122   : > { %4070 = vadd.xlane.f32.xlu0 %v4069_v37  ;;  %v7367_v2 = vadd.f32 %v3990_v13, %v7065_v23  ;;  %v4063_v59 = vsel %vm666_vm0, %v7359_v58, 0.0 }
0x1123   : > { %v4072_v52 = vsel %vm666_vm0, %v7362_v27, 0.0 }
0x1124   : > { %4073 = vadd.xlane.f32.xlu1 %v4072_v52  ;;  %v5066_v57 = vpop.f32.mrb[104].mxu1  ;;  %v4066_v28 = vsel %vm666_vm0, %v7367_v2, 0.0 }
0x1125   : > { %v4011_v9 = vadd.f32 %v5066_v57, %v7325_v29  ;;  %v4002_v17 = vpop.f32.mrb[105].mxu1 }
0x1126   : > { %v4003_v1 = vadd.f32 %v7325_v29, %v4002_v17  ;;  %4064 = vadd.xlane.f32.xlu0 %v4063_v59  ;;  %v5067_v26 = vpop.f32.mrb[106].mxu1 }
0x1127   : > { %v7376_v14 = vadd.f32 %v4011_v9, %v7099_v18  ;;  %v4014_v23 = vadd.f32 %v5067_v26, %v7325_v29  ;;  %v4005_v38 = vpop.f32.mrb[107].mxu1 }
0x1128   : > { %v4006_v60 = vadd.f32 %v7325_v29, %v4005_v38  ;;  %4067 = vadd.xlane.f32.xlu1 %v4066_v28  ;;  %v7383_v45 = vadd.f32 %v4003_v1, %v7086_v51 }
0x1129   : > { %v7386_v5 = vadd.f32 %v4014_v23, %v7094_v55  ;;  %v4081_v39 = vsel %vm666_vm0, %v7376_v14, 0.0 }
0x112a   : > { %4082 = vadd.xlane.f32.xlu0 %v4081_v39  ;;  %v7391_v18 = vadd.f32 %v4006_v60, %v7089_v24  ;;  %v4075_v32 = vsel %vm666_vm0, %v7383_v45, 0.0 }
0x112b   : > { %v4084_v21 = vsel %vm666_vm0, %v7386_v5, 0.0 }
0x112c   : > { %4085 = vadd.xlane.f32.xlu1 %v4084_v21  ;;  %v4078_v51 = vsel %vm666_vm0, %v7391_v18, 0.0 }
0x112e   : > { %4076 = vadd.xlane.f32.xlu0 %v4075_v32 }
0x1130   : > { %4079 = vadd.xlane.f32.xlu1 %v4078_v51 }
0x114d   : > { %v5070_v55 = vpop.f32.mrb[108].mxu1 }
0x114e   : > { %v4018_v7 = vpop.f32.mrb[109].mxu1  ;;  %v4027_v40 = vadd.f32 %v5070_v55, %v7325_v29 }
0x114f   : > { %v4019_v22 = vadd.f32 %v7325_v29, %v4018_v7  ;;  %v5071_v24 = vpop.f32.mrb[110].mxu1 }
0x1150   : > { %v4030_v33 = vadd.f32 %v5071_v24, %v7325_v29  ;;  %v4021_v16 = vpop.f32.mrb[111].mxu1  ;;  %v7407_v25 = vadd.f32 %v4027_v40, %v7115_v62 }
0x1151   : > { %v7403_v48 = vadd.f32 %v4019_v22, %v7111_v0  ;;  %v4022_v15 = vadd.f32 %v7325_v29, %v4021_v16 }
0x1152   : > { %v7415_v3 = vadd.f32 %v4030_v33, %v7123_v47  ;;  %v4093_v0 = vsel %vm666_vm0, %v7407_v25, 0.0 }
0x1153   : > { %v7410_v6 = vadd.f32 %v4022_v15, %v7118_v43  ;;  %v4087_v61 = vsel %vm666_vm0, %v7403_v48, 0.0 }
0x1154   : > { %4088 = vadd.xlane.f32.xlu0 %v4087_v61  ;;  %v4096_v62 = vsel %vm666_vm0, %v7415_v3, 0.0 }
0x1155   : > { %v4090_v53 = vsel %vm666_vm0, %v7410_v6, 0.0 }
0x1156   : > { %4091 = vadd.xlane.f32.xlu1 %v4090_v53 }
0x1158   : > { %4094 = vadd.xlane.f32.xlu0 %v4093_v0 }
0x115a   : > { %4097 = vadd.xlane.f32.xlu1 %v4096_v62 }
0x11a6   : > { %v4059_v43 = vpop.xlane.xlu0 %4058 }
0x11a7   : > { %v4101_v29 = vmul.f32 0.03125, %v4059_v43 }
0x11a8   : > { %v4062_v11 = vpop.xlane.xlu1 %4061 }
0x11a9   : > { %v7424_v49 = vsub.f32 %v7330_v20, %v4101_v29  ;;  %v4102_v47 = vmul.f32 0.03125, %v4062_v11 }
0x11aa   : > { %v4053_v41 = vpop.xlane.xlu0 %4052 }
0x11ab   : > { %v7427_v34 = vsub.f32 %v7338_v56, %v4102_v47  ;;  %v4099_v4 = vmul.f32 0.03125, %v4053_v41  ;;  %v4133_v30 = vmul.f32 %v7424_v49, %v7424_v49 }
0x11ac   : > { %v4056_v46 = vpop.xlane.xlu1 %4055 }
0x11ad   : > { %v7432_v31 = vsub.f32 %v7335_v63, %v4099_v4  ;;  %v4100_v54 = vmul.f32 0.03125, %v4056_v46  ;;  %v4153_v50 = vsel %vm666_vm0, %v4133_v30, 0.0  ;;  %v4134_v20 = vmul.f32 %v7427_v34, %v7427_v34 }
0x11ae   : > { %4154 = vadd.xlane.f32.xlu0 %v4153_v50 }
0x11af   : > { %v7438_v35 = vsub.f32 %v7343_v42, %v4100_v54  ;;  %v4071_v56 = vpop.xlane.xlu0 %4070  ;;  %v4156_v10 = vsel %vm666_vm0, %v4134_v20, 0.0  ;;  %v4131_v8 = vmul.f32 %v7432_v31, %v7432_v31 }
0x11b0   : > { %v4105_v19 = vmul.f32 0.03125, %v4071_v56  ;;  %4157 = vadd.xlane.f32.xlu1 %v4156_v10 }
0x11b1   : > { %v4074_v63 = vpop.xlane.xlu1 %4073  ;;  %v4147_v12 = vsel %vm666_vm0, %v4131_v8, 0.0  ;;  %v4132_v44 = vmul.f32 %v7438_v35, %v7438_v35 }
0x11b2   : > { %v7447_v13 = vsub.f32 %v7354_v36, %v4105_v19  ;;  %v4106_v37 = vmul.f32 0.03125, %v4074_v63  ;;  %4148 = vadd.xlane.f32.xlu0 %v4147_v12 }
0x11b3   : > { %v4065_v42 = vpop.xlane.xlu0 %4064  ;;  %v4150_v52 = vsel %vm666_vm0, %v4132_v44, 0.0 }
0x11b4   : > { %v7451_v57 = vsub.f32 %v7362_v27, %v4106_v37  ;;  %v4103_v9 = vmul.f32 0.03125, %v4065_v42  ;;  %4151 = vadd.xlane.f32.xlu1 %v4150_v52  ;;  %v4137_v17 = vmul.f32 %v7447_v13, %v7447_v13 }
0x11b5   : > { %v4068_v59 = vpop.xlane.xlu1 %4067 }
0x11b6   : > { %v7456_v1 = vsub.f32 %v7359_v58, %v4103_v9  ;;  %v4104_v26 = vmul.f32 0.03125, %v4068_v59  ;;  %v4165_v36 = vsel %vm666_vm0, %v4137_v17, 0.0  ;;  %v4138_v23 = vmul.f32 %v7451_v57, %v7451_v57 }
0x11b7   : > { %4166 = vadd.xlane.f32.xlu0 %v4165_v36  ;;  %v4083_v38 = vpop.xlane.xlu0 %4082 }
0x11b8   : > { %v7462_v27 = vsub.f32 %v7367_v2, %v4104_v26  ;;  %v4109_v28 = vmul.f32 0.03125, %v4083_v38  ;;  %v4168_v60 = vsel %vm666_vm0, %v4138_v23, 0.0  ;;  %v4135_v39 = vmul.f32 %v7456_v1, %v7456_v1 }
0x11b9   : > { %v4086_v21 = vpop.xlane.xlu1 %4085  ;;  %4169 = vadd.xlane.f32.xlu1 %v4168_v60 }
0x11ba   : > { %v7468_v58 = vsub.f32 %v7376_v14, %v4109_v28  ;;  %v4110_v32 = vmul.f32 0.03125, %v4086_v21  ;;  %v4159_v51 = vsel %vm666_vm0, %v4135_v39, 0.0  ;;  %v4136_v55 = vmul.f32 %v7462_v27, %v7462_v27 }
0x11bb   : > { %4160 = vadd.xlane.f32.xlu0 %v4159_v51  ;;  %v4077_v2 = vpop.xlane.xlu0 %4076 }
0x11bc   : > { %v7474_v7 = vsub.f32 %v7386_v5, %v4110_v32  ;;  %v4107_v40 = vmul.f32 0.03125, %v4077_v2  ;;  %v4162_v22 = vsel %vm666_vm0, %v4136_v55, 0.0  ;;  %v4141_v24 = vmul.f32 %v7468_v58, %v7468_v58 }
0x11bd   : > { %v4080_v33 = vpop.xlane.xlu1 %4079  ;;  %4163 = vadd.xlane.f32.xlu1 %v4162_v22  ;;  %v7522_v22 = vld [vmem:[%s7637_s18] ss:$0 sm:$0xff] }
0x11be   : > { %v7480_v14 = vsub.f32 %v7383_v45, %v4107_v40  ;;  %v4108_v16 = vmul.f32 0.03125, %v4080_v33  ;;  %v4177_v15 = vsel %vm666_vm0, %v4141_v24, 0.0  ;;  %v4142_v61 = vmul.f32 %v7474_v7, %v7474_v7 }
0x11bf   : > { %4178 = vadd.xlane.f32.xlu0 %v4177_v15 }
0x11c0   : > { %v7486_v5 = vsub.f32 %v7391_v18, %v4108_v16  ;;  %v4180_v53 = vsel %vm666_vm0, %v4142_v61, 0.0  ;;  %v4139_v0 = vmul.f32 %v7480_v14, %v7480_v14 }
0x11c1   : > { %4181 = vadd.xlane.f32.xlu1 %v4180_v53  ;;  %v7528_v53 = vld [vmem:[%s7638_s19] ss:$0 sm:$0xff] }
0x11c2   : > { %v4171_v62 = vsel %vm666_vm0, %v4139_v0, 0.0  ;;  %v4140_v45 = vmul.f32 %v7486_v5, %v7486_v5 }
0x11c3   : > { %4172 = vadd.xlane.f32.xlu0 %v4171_v62 }
0x11c4   : > { %v4174_v43 = vsel %vm666_vm0, %v4140_v45, 0.0 }
0x11c5   : > { %4175 = vadd.xlane.f32.xlu1 %v4174_v43 }
0x11e1   : > { %v4089_v29 = vpop.xlane.xlu0 %4088 }
0x11e2   : > { %v4111_v11 = vmul.f32 0.03125, %v4089_v29 }
0x11e3   : > { %v4092_v47 = vpop.xlane.xlu1 %4091 }
0x11e4   : > { %v7496_v18 = vsub.f32 %v7403_v48, %v4111_v11  ;;  %v4112_v41 = vmul.f32 0.03125, %v4092_v47 }
0x11e5   : > { %v4095_v4 = vpop.xlane.xlu0 %4094 }
0x11e6   : > { %v7499_v30 = vsub.f32 %v7410_v6, %v4112_v41  ;;  %v4113_v46 = vmul.f32 0.03125, %v4095_v4  ;;  %v4143_v54 = vmul.f32 %v7496_v18, %v7496_v18 }
0x11e7   : > { %v4098_v50 = vpop.xlane.xlu1 %4097 }
0x11e8   : > { %v7504_v20 = vsub.f32 %v7407_v25, %v4113_v46  ;;  %v4114_v56 = vmul.f32 0.03125, %v4098_v50  ;;  %v4183_v10 = vsel %vm666_vm0, %v4143_v54, 0.0  ;;  %v4144_v48 = vmul.f32 %v7499_v30, %v7499_v30 }
0x11e9   : > { %4184 = vadd.xlane.f32.xlu0 %v4183_v10 }
0x11ea   : > { %v7510_v8 = vsub.f32 %v7415_v3, %v4114_v56  ;;  %v4186_v6 = vsel %vm666_vm0, %v4144_v48, 0.0  ;;  %v4145_v19 = vmul.f32 %v7504_v20, %v7504_v20 }
0x11eb   : > { %4187 = vadd.xlane.f32.xlu1 %v4186_v6 }
0x11ec   : > { %v4189_v63 = vsel %vm666_vm0, %v4145_v19, 0.0  ;;  %v4146_v25 = vmul.f32 %v7510_v8, %v7510_v8 }
0x11ed   : > { %4190 = vadd.xlane.f32.xlu0 %v4189_v63 }
0x11ee   : > { %v4192_v12 = vsel %vm666_vm0, %v4146_v25, 0.0 }
0x11ef   : > { %4193 = vadd.xlane.f32.xlu1 %v4192_v12 }
0x123b   : > { %v4155_v44 = vpop.xlane.xlu0 %4154 }
0x123c   : > { %v4197_v37 = vmul.f32 0.03125, %v4155_v44 }
0x123d   : > { %v4158_v42 = vpop.xlane.xlu1 %4157 }
0x123e   : > { %v4213_v3 = vadd.f32 1e-06, %v4197_v37  ;;  %v4198_v52 = vmul.f32 0.03125, %v4158_v42 }
0x123f   : > { %v4149_v9 = vpop.xlane.xlu0 %4148 }
0x1240   : > { %5453 = vrsqrt.f32 %v4213_v3  ;;  %v4214_v17 = vadd.f32 1e-06, %v4198_v52  ;;  %v4195_v59 = vmul.f32 0.03125, %v4149_v9 }
0x1241   : > { %v4152_v26 = vpop.xlane.xlu1 %4151 }
0x1242   : > { %5455 = vrsqrt.f32 %v4214_v17  ;;  %v4211_v36 = vadd.f32 1e-06, %v4195_v59  ;;  %v4196_v23 = vmul.f32 0.03125, %v4152_v26 }
0x1244   : > { %5457 = vrsqrt.f32 %v4211_v36  ;;  %v4212_v38 = vadd.f32 1e-06, %v4196_v23  ;;  %v4167_v28 = vpop.xlane.xlu0 %4166 }
0x1245   : > { %v4201_v60 = vmul.f32 0.03125, %v4167_v28 }
0x1246   : > { %5459 = vrsqrt.f32 %v4212_v38  ;;  %v4170_v39 = vpop.xlane.xlu1 %4169 }
0x1247   : > { %v4217_v21 = vadd.f32 1e-06, %v4201_v60  ;;  %v4202_v32 = vmul.f32 0.03125, %v4170_v39 }
0x1248   : > { %v4161_v51 = vpop.xlane.xlu0 %4160 }
0x1249   : > { %5461 = vrsqrt.f32 %v4217_v21  ;;  %v4218_v55 = vadd.f32 1e-06, %v4202_v32  ;;  %v4199_v2 = vmul.f32 0.03125, %v4161_v51 }
0x124a   : > { %v5454_v40 = vpop.eup %5453  ;;  %v4164_v24 = vpop.xlane.xlu1 %4163 }
0x124b   : > { %v4245_v33 = vmul.f32 %v5454_v40, %v7424_v49  ;;  %5463 = vrsqrt.f32 %v4218_v55  ;;  %v4215_v16 = vadd.f32 1e-06, %v4199_v2  ;;  %v4200_v15 = vmul.f32 0.03125, %v4164_v24 }
0x124c   : > { %v5456_v61 = vpop.eup %5455  ;;  %v4179_v0 = vpop.xlane.xlu0 %4178 }
0x124d   : > { %v4267_v62 = vmul.f32 %v7522_v22, %v4245_v33  ;;  %v4246_v45 = vmul.f32 %v5456_v61, %v7427_v34  ;;  %5465 = vrsqrt.f32 %v4215_v16  ;;  %v4216_v43 = vadd.f32 1e-06, %v4200_v15 }
0x124e   : > { %v5458_v29 = vpop.eup %5457  ;;  %v4205_v49 = vmul.f32 0.03125, %v4179_v0  ;;  %v4182_v11 = vpop.xlane.xlu1 %4181 }
0x124f   : > { %v4289_v47 = vadd.f32 %v7528_v53, %v4267_v62  ;;  %v4268_v41 = vmul.f32 %v7522_v22, %v4246_v45  ;;  %v4243_v4 = vmul.f32 %v5458_v29, %v7432_v31  ;;  %5467 = vrsqrt.f32 %v4216_v43 }
0x1250   : > { %v5460_v34 = vpop.eup %5459  ;;  %v4221_v46 = vadd.f32 1e-06, %v4205_v49  ;;  %v4206_v54 = vmul.f32 0.03125, %v4182_v11  ;;  %v4173_v50 = vpop.xlane.xlu0 %4172 }
0x1251   : > { %4305 = vst.msk [vmem:[%s7537_s29 + $0x10] sm:$0xff] %vm666_vm0, %v4289_v47  ;;  %v4290_v56 = vadd.f32 %v7528_v53, %v4268_v41  ;;  %v4265_v10 = vmul.f32 %v7522_v22, %v4243_v4  ;;  %v4244_v48 = vmul.f32 %v5460_v34, %v7438_v35  ;;  %v4203_v6 = vmul.f32 0.03125, %v4173_v50 }
0x1252   : > { %5469 = vrsqrt.f32 %v4221_v46  ;;  %v4222_v19 = vadd.f32 1e-06, %v4206_v54  ;;  %v4176_v63 = vpop.xlane.xlu1 %4175 }
0x1253   : > { %v5462_v25 = vpop.eup %5461  ;;  %4306 = vst.msk [vmem:[%s7537_s29 + $0x18] sm:$0xff] %vm666_vm0, %v4290_v56  ;;  %v4287_v31 = vadd.f32 %v7528_v53, %v4265_v10  ;;  %v4266_v12 = vmul.f32 %v7522_v22, %v4244_v48  ;;  %v4219_v44 = vadd.f32 1e-06, %v4203_v6  ;;  %v4204_v37 = vmul.f32 0.03125, %v4176_v63 }
0x1254   : > { %v4249_v42 = vmul.f32 %v5462_v25, %v7447_v13  ;;  %5471 = vrsqrt.f32 %v4222_v19 }
0x1255   : > { %v5464_v3 = vpop.eup %5463  ;;  %4303 = vst.msk [vmem:[%s7537_s29] sm:$0xff] %vm666_vm0, %v4287_v31  ;;  %v4288_v35 = vadd.f32 %v7528_v53, %v4266_v12  ;;  %5473 = vrsqrt.f32 %v4219_v44  ;;  %v4220_v52 = vadd.f32 1e-06, %v4204_v37 }
0x1256   : > { %v4271_v9 = vmul.f32 %v7522_v22, %v4249_v42  ;;  %v4250_v17 = vmul.f32 %v5464_v3, %v7451_v57 }
0x1257   : > { %v5466_v59 = vpop.eup %5465  ;;  %4304 = vst.msk [vmem:[%s7537_s29 + $0x8] sm:$0xff] %vm666_vm0, %v4288_v35  ;;  %5475 = vrsqrt.f32 %v4220_v52 }
0x1258   : > { %v4293_v13 = vadd.f32 %v7528_v53, %v4271_v9  ;;  %v4272_v26 = vmul.f32 %v7522_v22, %v4250_v17  ;;  %v4247_v36 = vmul.f32 %v5466_v59, %v7456_v1 }
0x1259   : > { %v5468_v23 = vpop.eup %5467 }
0x125a   : > { %4309 = vst.msk [vmem:[%s7537_s29 + $0x30] sm:$0xff] %vm666_vm0, %v4293_v13  ;;  %v4294_v38 = vadd.f32 %v7528_v53, %v4272_v26  ;;  %v4269_v28 = vmul.f32 %v7522_v22, %v4247_v36  ;;  %v4248_v57 = vmul.f32 %v5468_v23, %v7462_v27 }
0x125c   : > { %v5470_v60 = vpop.eup %5469  ;;  %4310 = vst.msk [vmem:[%s7537_s29 + $0x38] sm:$0xff] %vm666_vm0, %v4294_v38  ;;  %v4291_v39 = vadd.f32 %v7528_v53, %v4269_v28  ;;  %v4270_v21 = vmul.f32 %v7522_v22, %v4248_v57 }
0x125d   : > { %v4253_v1 = vmul.f32 %v5470_v60, %v7468_v58 }
0x125e   : > { %v5472_v32 = vpop.eup %5471  ;;  %4307 = vst.msk [vmem:[%s7537_s29 + $0x20] sm:$0xff] %vm666_vm0, %v4291_v39  ;;  %v4292_v51 = vadd.f32 %v7528_v53, %v4270_v21 }
0x125f   : > { %v5474_v55 = vpop.eup %5473  ;;  %v4275_v27 = vmul.f32 %v7522_v22, %v4253_v1  ;;  %v4254_v2 = vmul.f32 %v5472_v32, %v7474_v7 }
0x1260   : > { %4308 = vst.msk [vmem:[%s7537_s29 + $0x28] sm:$0xff] %vm666_vm0, %v4292_v51  ;;  %v4251_v40 = vmul.f32 %v5474_v55, %v7480_v14 }
0x1261   : > { %v5476_v24 = vpop.eup %5475  ;;  %v4297_v58 = vadd.f32 %v7528_v53, %v4275_v27  ;;  %v4276_v33 = vmul.f32 %v7522_v22, %v4254_v2 }
0x1262   : > { %v4273_v16 = vmul.f32 %v7522_v22, %v4251_v40  ;;  %v4252_v15 = vmul.f32 %v5476_v24, %v7486_v5 }
0x1263   : > { %4313 = vst.msk [vmem:[%s7537_s29 + $0x50] sm:$0xff] %vm666_vm0, %v4297_v58  ;;  %v4298_v61 = vadd.f32 %v7528_v53, %v4276_v33 }
0x1264   : > { %v4295_v0 = vadd.f32 %v7528_v53, %v4273_v16  ;;  %v4274_v7 = vmul.f32 %v7522_v22, %v4252_v15 }
0x1265   : > { %4314 = vst.msk [vmem:[%s7537_s29 + $0x58] sm:$0xff] %vm666_vm0, %v4298_v61 }
0x1266   : > { %4311 = vst.msk [vmem:[%s7537_s29 + $0x40] sm:$0xff] %vm666_vm0, %v4295_v0  ;;  %v4296_v14 = vadd.f32 %v7528_v53, %v4274_v7 }
0x1268   : > { %4312 = vst.msk [vmem:[%s7537_s29 + $0x48] sm:$0xff] %vm666_vm0, %v4296_v14 }
0x1276   : > { %v4185_v62 = vpop.xlane.xlu0 %4184 }
0x1277   : > { %v4207_v45 = vmul.f32 0.03125, %v4185_v62 }
0x1278   : > { %v4188_v43 = vpop.xlane.xlu1 %4187 }
0x1279   : > { %v4223_v5 = vadd.f32 1e-06, %v4207_v45  ;;  %v4208_v29 = vmul.f32 0.03125, %v4188_v43 }
0x127a   : > { %v4191_v49 = vpop.xlane.xlu0 %4190 }
0x127b   : > { %5477 = vrsqrt.f32 %v4223_v5  ;;  %v4224_v11 = vadd.f32 1e-06, %v4208_v29  ;;  %v4209_v47 = vmul.f32 0.03125, %v4191_v49 }
0x127c   : > { %v4194_v41 = vpop.xlane.xlu1 %4193 }
0x127d   : > { %5479 = vrsqrt.f32 %v4224_v11  ;;  %v4225_v4 = vadd.f32 1e-06, %v4209_v47  ;;  %v4210_v34 = vmul.f32 0.03125, %v4194_v41 }
0x127f   : > { %5481 = vrsqrt.f32 %v4225_v4  ;;  %v4226_v46 = vadd.f32 1e-06, %v4210_v34 }
0x1281   : > { %5483 = vrsqrt.f32 %v4226_v46 }
0x1285   : > { %v5478_v54 = vpop.eup %5477 }
0x1286   : > { %v4255_v50 = vmul.f32 %v5478_v54, %v7496_v18 }
0x1287   : > { %v5480_v56 = vpop.eup %5479 }
0x1288   : > { %v4277_v10 = vmul.f32 %v7522_v22, %v4255_v50  ;;  %v4256_v48 = vmul.f32 %v5480_v56, %v7499_v30 }
0x1289   : > { %v5482_v6 = vpop.eup %5481 }
0x128a   : > { %v4299_v19 = vadd.f32 %v7528_v53, %v4277_v10  ;;  %v4278_v63 = vmul.f32 %v7522_v22, %v4256_v48  ;;  %v4257_v25 = vmul.f32 %v5482_v6, %v7504_v20 }
0x128b   : > { %v5484_v31 = vpop.eup %5483 }
0x128c   : > { %4315 = vst.msk [vmem:[%s7537_s29 + $0x60] sm:$0xff] %vm666_vm0, %v4299_v19  ;;  %v4300_v12 = vadd.f32 %v7528_v53, %v4278_v63  ;;  %v4279_v18 = vmul.f32 %v7522_v22, %v4257_v25  ;;  %v4258_v44 = vmul.f32 %v5484_v31, %v7510_v8 }
0x128e   : > { %4316 = vst.msk [vmem:[%s7537_s29 + $0x68] sm:$0xff] %vm666_vm0, %v4300_v12  ;;  %v4301_v30 = vadd.f32 %v7528_v53, %v4279_v18  ;;  %v4280_v37 = vmul.f32 %v7522_v22, %v4258_v44 }
0x1290   : > { %4317 = vst.msk [vmem:[%s7537_s29 + $0x70] sm:$0xff] %vm666_vm0, %v4301_v30  ;;  %v4302_v42 = vadd.f32 %v7528_v53, %v4280_v37 }
0x1292   : > { %4318 = vst.msk [vmem:[%s7537_s29 + $0x78] sm:$0xff] %vm666_vm0, %v4302_v42 }
0x1293 PF: > { %s30_s1 = sadd.s32 1, %s5507_s1  }
0x1294   : > { %p27_p4 = scmp.ge.s32.totalorder %s30_s1, 4  }
0x1296   :  { %29 = sbr.rel (!%p27_p4) target bundleno = 6 (0x6), region = 133 }

</bundles_post_ra>
